<compile_context>
chip_gen: v7x
topology: tpu7x:2x2x1
jax: 0.10.0
libtpu: 0.0.40
codegen_flags: <defaults>
</compile_context>

<pallas_src>
import jax
import jax.numpy as jnp
from jax.experimental import pallas as pl
from jax.experimental.pallas import tpu as pltpu

SEASONS = 2
IN_FEATURES = 6 + 11 * SEASONS   # 28
H1, H2, H3, OUT = 1024, 1024, 512, 11
OUT_PAD = 128                    # lane-dense padded logits width


def mlp_kernel(x_ref,
               w1_ref, b1_ref,
               w2_ref, b2_ref,
               w3_ref, b3_ref,
               w4_ref, b4_ref,
               o_ref):
    # Fused 4-layer MLP for one batch tile; bf16 MXU inputs, f32 accumulation, f32 bias/ReLU.
    x = x_ref[...]                                   # already bf16 (cast in wrapper)

    h = jnp.dot(x, w1_ref[...], preferred_element_type=jnp.float32) + b1_ref[...]
    h = jnp.maximum(h, 0.0)

    h = jnp.dot(h.astype(jnp.bfloat16), w2_ref[...],
                preferred_element_type=jnp.float32) + b2_ref[...]
    h = jnp.maximum(h, 0.0)

    h = jnp.dot(h.astype(jnp.bfloat16), w3_ref[...],
                preferred_element_type=jnp.float32) + b3_ref[...]
    h = jnp.maximum(h, 0.0)

    logits = jnp.dot(h.astype(jnp.bfloat16), w4_ref[...],
                     preferred_element_type=jnp.float32) + b4_ref[...]
    o_ref[...] = logits.astype(o_ref.dtype)


def _build_call(tb, n_tiles, b_pad, flops, bytes_accessed, single_buffer_weights):
    const = lambda i: (0, 0)   # weights/biases: same block every grid step -> no re-DMA

    if single_buffer_weights:
        wspec = lambda shape: pl.BlockSpec(shape, const, pipeline_mode=pl.Buffered(1))
    else:
        wspec = lambda shape: pl.BlockSpec(shape, const)

    return pl.pallas_call(
        mlp_kernel,
        out_shape=jax.ShapeDtypeStruct((b_pad, OUT_PAD), jnp.float32),
        grid_spec=pltpu.PrefetchScalarGridSpec(
            num_scalar_prefetch=0,
            grid=(n_tiles,),
            in_specs=[
                pl.BlockSpec((tb, IN_FEATURES), lambda i: (i, 0)),   # x batch tile
                wspec((IN_FEATURES, H1)),
                wspec((1, H1)),
                wspec((H1, H2)),
                wspec((1, H2)),
                wspec((H2, H3)),
                wspec((1, H3)),
                wspec((H3, OUT_PAD)),
                wspec((1, OUT_PAD)),
            ],
            out_specs=pl.BlockSpec((tb, OUT_PAD), lambda i: (i, 0)),
        ),
        compiler_params=pltpu.CompilerParams(
            dimension_semantics=("parallel",),      # megacore sharding on v7x
            vmem_limit_bytes=48 << 20),             # tb=1024 working set ~25 MiB; v7x safe
        cost_estimate=pl.CostEstimate(
            flops=flops, transcendentals=0, bytes_accessed=bytes_accessed),
    )


def neural_network_big(x, params, *, tb_max=1024):
    """x: (B, ...) -> flattened to (B, IN_FEATURES). params: (in,out) weights, (1,out) biases."""
    x = x.reshape(x.shape[0], -1)          # nn.Flatten
    B = x.shape[0]

    # Balanced batch tiling (multiple of 8 rows); even #tiles (>=2) when B>=16 for v7x megacore.
    n_tiles = pl.cdiv(B, tb_max)
    if B >= 16:
        n_tiles = max(n_tiles, 2)
        if n_tiles % 2:
            n_tiles += 1
    tb = ((pl.cdiv(B, n_tiles) + 7) // 8) * 8
    b_pad = n_tiles * tb

    # bf16 activations into the MXU: cast x in the wrapper (halves x HBM read / VMEM tile).
    x = x.astype(jnp.bfloat16)
    if b_pad != B:
        x = jnp.pad(x, ((0, b_pad - B), (0, 0)))

    # bf16 weights; zero-pad the final layer to 128 lanes (padded columns are exactly zero).
    w1 = params["w1"].astype(jnp.bfloat16)
    w2 = params["w2"].astype(jnp.bfloat16)
    w3 = params["w3"].astype(jnp.bfloat16)
    w4 = jnp.zeros((H3, OUT_PAD), jnp.bfloat16).at[:, :OUT].set(
        params["w4"].astype(jnp.bfloat16))
    b1, b2, b3 = params["b1"], params["b2"], params["b3"]
    b4 = jnp.zeros((1, OUT_PAD), jnp.float32).at[:, :OUT].set(params["b4"])

    flops = 2 * b_pad * (IN_FEATURES * H1 + H1 * H2 + H2 * H3 + H3 * OUT_PAD)
    bytes_accessed = (x.size * 2 + b_pad * OUT_PAD * 4
                      + (w1.size + w2.size + w3.size + w4.size) * 2
                      + (b1.size + b2.size + b3.size + b4.size) * 4)

    args = (x, w1, b1, w2, b2, w3, b3, w4, b4)
    try:
        out = _build_call(tb, n_tiles, b_pad, flops, bytes_accessed, True)(*args)
    except Exception:
        # Fallback for jax builds without pipeline_mode=pl.Buffered(1) support on pallas_call.
        out = _build_call(tb, n_tiles, b_pad, flops, bytes_accessed, False)(*args)

    return out[:B, :OUT]


def init_params(key):
    """Deterministic init matching PyTorch nn.Linear's U(-1/sqrt(fan_in), 1/sqrt(fan_in))."""
    dims = [(IN_FEATURES, H1), (H1, H2), (H2, H3), (H3, OUT)]
    params = {}
    keys = jax.random.split(key, 2 * len(dims))
    for i, (fan_in, fan_out) in enumerate(dims):
        bound = 1.0 / jnp.sqrt(jnp.float32(fan_in))
        params[f"w{i+1}"] = jax.random.uniform(
            keys[2 * i], (fan_in, fan_out), jnp.float32, -bound, bound)
        params[f"b{i+1}"] = jax.random.uniform(
            keys[2 * i + 1], (1, fan_out), jnp.float32, -bound, bound)
    return params


def reference_forward(x, params):
    """Pure-JAX reference with the same bf16 MXU-input rounding as the kernel (f32 accumulate)."""
    x = x.reshape(x.shape[0], -1)

    def bf(a):
        return a.astype(jnp.bfloat16).astype(jnp.float32)
    h = jnp.maximum(jnp.dot(bf(x), bf(params["w1"])) + params["b1"], 0.0)
    h = jnp.maximum(jnp.dot(bf(h), bf(params["w2"])) + params["b2"], 0.0)
    h = jnp.maximum(jnp.dot(bf(h), bf(params["w3"])) + params["b3"], 0.0)
    return jnp.dot(bf(h), bf(params["w4"])) + params["b4"]


if __name__ == "__main__":
    key = jax.random.PRNGKey(0)
    k_params, k_x = jax.random.split(key)

    params = init_params(k_params)
    batch = 16                                        # exercises the 2-tile (megacore) path
    x = jax.random.normal(k_x, (batch, IN_FEATURES), jnp.float32)

    logits = neural_network_big(x, params)
    jax.block_until_ready(logits)

    ref = reference_forward(x, params)
    assert logits.shape == (batch, OUT)
    assert jnp.allclose(logits, ref, atol=1e-3, rtol=1e-3), "mismatch vs reference"

    print("KERNEL_OK")
</pallas_src>

<mosaic_0001>
module attributes {stable_mosaic.version = 11 : i64} {
  func.func @mlp_kernel(%arg0: i32, %arg1: memref<8x28xbf16, #tpu.memory_space<vmem>>, %arg2: memref<28x1024xbf16, #tpu.memory_space<vmem>>, %arg3: memref<1x1024xf32, #tpu.memory_space<vmem>>, %arg4: memref<1024x1024xbf16, #tpu.memory_space<vmem>>, %arg5: memref<1x1024xf32, #tpu.memory_space<vmem>>, %arg6: memref<1024x512xbf16, #tpu.memory_space<vmem>>, %arg7: memref<1x512xf32, #tpu.memory_space<vmem>>, %arg8: memref<512x128xbf16, #tpu.memory_space<vmem>>, %arg9: memref<1x128xf32, #tpu.memory_space<vmem>>, %arg10: memref<8x128xf32, #tpu.memory_space<vmem>>) attributes {dimension_semantics = [#tpu.dimension_semantics<parallel>], iteration_bounds = array<i64: 2>, scalar_prefetch = 0 : i64, scratch_operands = 0 : i64, tpu.core_type = #tpu.core_type<tc>, window_params = [{transform_indices = @transform_0, window_bounds = array<i64: 8, 28>}, {pipeline_mode = #tpu.pipeline_mode<synchronous>, transform_indices = @transform_1, window_bounds = array<i64: 28, 1024>}, {pipeline_mode = #tpu.pipeline_mode<synchronous>, transform_indices = @transform_2, window_bounds = array<i64: 1, 1024>}, {pipeline_mode = #tpu.pipeline_mode<synchronous>, transform_indices = @transform_3, window_bounds = array<i64: 1024, 1024>}, {pipeline_mode = #tpu.pipeline_mode<synchronous>, transform_indices = @transform_4, window_bounds = array<i64: 1, 1024>}, {pipeline_mode = #tpu.pipeline_mode<synchronous>, transform_indices = @transform_5, window_bounds = array<i64: 1024, 512>}, {pipeline_mode = #tpu.pipeline_mode<synchronous>, transform_indices = @transform_6, window_bounds = array<i64: 1, 512>}, {pipeline_mode = #tpu.pipeline_mode<synchronous>, transform_indices = @transform_7, window_bounds = array<i64: 512, 128>}, {pipeline_mode = #tpu.pipeline_mode<synchronous>, transform_indices = @transform_8, window_bounds = array<i64: 1, 128>}, {transform_indices = @transform_9, window_bounds = array<i64: 8, 128>}]} {
    %c0 = arith.constant 0 : index
    %c0_0 = arith.constant 0 : index
    %0 = vector.load %arg1[%c0, %c0_0] : memref<8x28xbf16, #tpu.memory_space<vmem>>, vector<8x28xbf16>
    %c0_1 = arith.constant 0 : index
    %c0_2 = arith.constant 0 : index
    %1 = vector.load %arg2[%c0_1, %c0_2] : memref<28x1024xbf16, #tpu.memory_space<vmem>>, vector<28x1024xbf16>
    %cst = arith.constant dense<0.000000e+00> : vector<8x1024xf32>
    %2 = tpu.matmul %0, %1, %cst {dimension_numbers = #tpu.dot_dimension_numbers<[1], [0], [0], [1], [0, 0, 1, 1], [], []>} : vector<8x28xbf16>, vector<28x1024xbf16>, vector<8x1024xf32> -> vector<8x1024xf32>
    %c0_3 = arith.constant 0 : index
    %c0_4 = arith.constant 0 : index
    %3 = vector.load %arg3[%c0_3, %c0_4] : memref<1x1024xf32, #tpu.memory_space<vmem>>, vector<1x1024xf32>
    %4 = vector.broadcast %3 : vector<1x1024xf32> to vector<8x1024xf32>
    %5 = arith.addf %2, %4 : vector<8x1024xf32>
    %cst_5 = arith.constant 0.000000e+00 : f32
    %6 = vector.broadcast %cst_5 : f32 to vector<8x1024xf32>
    %7 = arith.maximumf %5, %6 : vector<8x1024xf32>
    %8 = arith.truncf %7 : vector<8x1024xf32> to vector<8x1024xbf16>
    %c0_6 = arith.constant 0 : index
    %c0_7 = arith.constant 0 : index
    %9 = vector.load %arg4[%c0_6, %c0_7] : memref<1024x1024xbf16, #tpu.memory_space<vmem>>, vector<1024x1024xbf16>
    %cst_8 = arith.constant dense<0.000000e+00> : vector<8x1024xf32>
    %10 = tpu.matmul %8, %9, %cst_8 {dimension_numbers = #tpu.dot_dimension_numbers<[1], [0], [0], [1], [0, 0, 1, 1], [], []>} : vector<8x1024xbf16>, vector<1024x1024xbf16>, vector<8x1024xf32> -> vector<8x1024xf32>
    %c0_9 = arith.constant 0 : index
    %c0_10 = arith.constant 0 : index
    %11 = vector.load %arg5[%c0_9, %c0_10] : memref<1x1024xf32, #tpu.memory_space<vmem>>, vector<1x1024xf32>
    %12 = vector.broadcast %11 : vector<1x1024xf32> to vector<8x1024xf32>
    %13 = arith.addf %10, %12 : vector<8x1024xf32>
    %cst_11 = arith.constant 0.000000e+00 : f32
    %14 = vector.broadcast %cst_11 : f32 to vector<8x1024xf32>
    %15 = arith.maximumf %13, %14 : vector<8x1024xf32>
    %16 = arith.truncf %15 : vector<8x1024xf32> to vector<8x1024xbf16>
    %c0_12 = arith.constant 0 : index
    %c0_13 = arith.constant 0 : index
    %17 = vector.load %arg6[%c0_12, %c0_13] : memref<1024x512xbf16, #tpu.memory_space<vmem>>, vector<1024x512xbf16>
    %cst_14 = arith.constant dense<0.000000e+00> : vector<8x512xf32>
    %18 = tpu.matmul %16, %17, %cst_14 {dimension_numbers = #tpu.dot_dimension_numbers<[1], [0], [0], [1], [0, 0, 1, 1], [], []>} : vector<8x1024xbf16>, vector<1024x512xbf16>, vector<8x512xf32> -> vector<8x512xf32>
    %c0_15 = arith.constant 0 : index
    %c0_16 = arith.constant 0 : index
    %19 = vector.load %arg7[%c0_15, %c0_16] : memref<1x512xf32, #tpu.memory_space<vmem>>, vector<1x512xf32>
    %20 = vector.broadcast %19 : vector<1x512xf32> to vector<8x512xf32>
    %21 = arith.addf %18, %20 : vector<8x512xf32>
    %cst_17 = arith.constant 0.000000e+00 : f32
    %22 = vector.broadcast %cst_17 : f32 to vector<8x512xf32>
    %23 = arith.maximumf %21, %22 : vector<8x512xf32>
    %24 = arith.truncf %23 : vector<8x512xf32> to vector<8x512xbf16>
    %c0_18 = arith.constant 0 : index
    %c0_19 = arith.constant 0 : index
    %25 = vector.load %arg8[%c0_18, %c0_19] : memref<512x128xbf16, #tpu.memory_space<vmem>>, vector<512x128xbf16>
    %cst_20 = arith.constant dense<0.000000e+00> : vector<8x128xf32>
    %26 = tpu.matmul %24, %25, %cst_20 {dimension_numbers = #tpu.dot_dimension_numbers<[1], [0], [0], [1], [0, 0, 1, 1], [], []>} : vector<8x512xbf16>, vector<512x128xbf16>, vector<8x128xf32> -> vector<8x128xf32>
    %c0_21 = arith.constant 0 : index
    %c0_22 = arith.constant 0 : index
    %27 = vector.load %arg9[%c0_21, %c0_22] : memref<1x128xf32, #tpu.memory_space<vmem>>, vector<1x128xf32>
    %28 = vector.broadcast %27 : vector<1x128xf32> to vector<8x128xf32>
    %29 = arith.addf %26, %28 : vector<8x128xf32>
    %c0_23 = arith.constant 0 : index
    %c0_24 = arith.constant 0 : index
    %30 = vector.load %arg10[%c0_23, %c0_24] : memref<8x128xf32, #tpu.memory_space<vmem>>, vector<8x128xf32>
    tpu.vector_store %arg10[%c0_23, %c0_24], %29 {strides = array<i32>} : memref<8x128xf32, #tpu.memory_space<vmem>>, vector<8x128xf32>,
    return
  }
  func.func @transform_0(%arg0: i32) -> (i32, i32) {
    %c0_i32 = arith.constant 0 : i32
    %c0_i32_0 = arith.constant 0 : i32
    return %arg0, %c0_i32 : i32, i32
  }
  func.func @transform_1(%arg0: i32) -> (i32, i32) {
    %c0_i32 = arith.constant 0 : i32
    %c0_i32_0 = arith.constant 0 : i32
    %c0_i32_1 = arith.constant 0 : i32
    return %c0_i32, %c0_i32_0 : i32, i32
  }
  func.func @transform_2(%arg0: i32) -> (i32, i32) {
    %c0_i32 = arith.constant 0 : i32
    %c0_i32_0 = arith.constant 0 : i32
    %c0_i32_1 = arith.constant 0 : i32
    return %c0_i32, %c0_i32_0 : i32, i32
  }
  func.func @transform_3(%arg0: i32) -> (i32, i32) {
    %c0_i32 = arith.constant 0 : i32
    %c0_i32_0 = arith.constant 0 : i32
    %c0_i32_1 = arith.constant 0 : i32
    return %c0_i32, %c0_i32_0 : i32, i32
  }
  func.func @transform_4(%arg0: i32) -> (i32, i32) {
    %c0_i32 = arith.constant 0 : i32
    %c0_i32_0 = arith.constant 0 : i32
    %c0_i32_1 = arith.constant 0 : i32
    return %c0_i32, %c0_i32_0 : i32, i32
  }
  func.func @transform_5(%arg0: i32) -> (i32, i32) {
    %c0_i32 = arith.constant 0 : i32
    %c0_i32_0 = arith.constant 0 : i32
    %c0_i32_1 = arith.constant 0 : i32
    return %c0_i32, %c0_i32_0 : i32, i32
  }
  func.func @transform_6(%arg0: i32) -> (i32, i32) {
    %c0_i32 = arith.constant 0 : i32
    %c0_i32_0 = arith.constant 0 : i32
    %c0_i32_1 = arith.constant 0 : i32
    return %c0_i32, %c0_i32_0 : i32, i32
  }
  func.func @transform_7(%arg0: i32) -> (i32, i32) {
    %c0_i32 = arith.constant 0 : i32
    %c0_i32_0 = arith.constant 0 : i32
    %c0_i32_1 = arith.constant 0 : i32
    return %c0_i32, %c0_i32_0 : i32, i32
  }
  func.func @transform_8(%arg0: i32) -> (i32, i32) {
    %c0_i32 = arith.constant 0 : i32
    %c0_i32_0 = arith.constant 0 : i32
    %c0_i32_1 = arith.constant 0 : i32
    return %c0_i32, %c0_i32_0 : i32, i32
  }
  func.func @transform_9(%arg0: i32) -> (i32, i32) {
    %c0_i32 = arith.constant 0 : i32
    %c0_i32_0 = arith.constant 0 : i32
    return %arg0, %c0_i32 : i32, i32
  }
}

module attributes {stable_mosaic.version = 11 : i64} {
  func.func @mlp_kernel(%arg0: i32, %arg1: memref<8x28xbf16, #tpu.memory_space<vmem>>, %arg2: memref<28x1024xbf16, #tpu.memory_space<vmem>>, %arg3: memref<1x1024xf32, #tpu.memory_space<vmem>>, %arg4: memref<1024x1024xbf16, #tpu.memory_space<vmem>>, %arg5: memref<1x1024xf32, #tpu.memory_space<vmem>>, %arg6: memref<1024x512xbf16, #tpu.memory_space<vmem>>, %arg7: memref<1x512xf32, #tpu.memory_space<vmem>>, %arg8: memref<512x128xbf16, #tpu.memory_space<vmem>>, %arg9: memref<1x128xf32, #tpu.memory_space<vmem>>, %arg10: memref<8x128xf32, #tpu.memory_space<vmem>>) attributes {dimension_semantics = [#tpu.dimension_semantics<parallel>], iteration_bounds = array<i64: 2>, scalar_prefetch = 0 : i64, scratch_operands = 0 : i64, tpu.core_type = #tpu.core_type<tc>, window_params = [{transform_indices = @transform_0, window_bounds = array<i64: 8, 28>}, {pipeline_mode = #tpu.pipeline_mode<synchronous>, transform_indices = @transform_1, window_bounds = array<i64: 28, 1024>}, {pipeline_mode = #tpu.pipeline_mode<synchronous>, transform_indices = @transform_2, window_bounds = array<i64: 1, 1024>}, {pipeline_mode = #tpu.pipeline_mode<synchronous>, transform_indices = @transform_3, window_bounds = array<i64: 1024, 1024>}, {pipeline_mode = #tpu.pipeline_mode<synchronous>, transform_indices = @transform_4, window_bounds = array<i64: 1, 1024>}, {pipeline_mode = #tpu.pipeline_mode<synchronous>, transform_indices = @transform_5, window_bounds = array<i64: 1024, 512>}, {pipeline_mode = #tpu.pipeline_mode<synchronous>, transform_indices = @transform_6, window_bounds = array<i64: 1, 512>}, {pipeline_mode = #tpu.pipeline_mode<synchronous>, transform_indices = @transform_7, window_bounds = array<i64: 512, 128>}, {pipeline_mode = #tpu.pipeline_mode<synchronous>, transform_indices = @transform_8, window_bounds = array<i64: 1, 128>}, {transform_indices = @transform_9, window_bounds = array<i64: 8, 128>}]} {
    %c0 = arith.constant 0 : index
    %c0_0 = arith.constant 0 : index
    %0 = vector.load %arg1[%c0, %c0_0] : memref<8x28xbf16, #tpu.memory_space<vmem>>, vector<8x28xbf16>
    %c0_1 = arith.constant 0 : index
    %c0_2 = arith.constant 0 : index
    %1 = vector.load %arg2[%c0_1, %c0_2] : memref<28x1024xbf16, #tpu.memory_space<vmem>>, vector<28x1024xbf16>
    %cst = arith.constant dense<0.000000e+00> : vector<8x1024xf32>
    %2 = tpu.matmul %0, %1, %cst {dimension_numbers = #tpu.dot_dimension_numbers<[1], [0], [0], [1], [0, 0, 1, 1], [], []>} : vector<8x28xbf16>, vector<28x1024xbf16>, vector<8x1024xf32> -> vector<8x1024xf32>
    %c0_3 = arith.constant 0 : index
    %c0_4 = arith.constant 0 : index
    %3 = vector.load %arg3[%c0_3, %c0_4] : memref<1x1024xf32, #tpu.memory_space<vmem>>, vector<1x1024xf32>
    %4 = vector.broadcast %3 : vector<1x1024xf32> to vector<8x1024xf32>
    %5 = arith.addf %2, %4 : vector<8x1024xf32>
    %cst_5 = arith.constant 0.000000e+00 : f32
    %6 = vector.broadcast %cst_5 : f32 to vector<8x1024xf32>
    %7 = arith.maximumf %5, %6 : vector<8x1024xf32>
    %8 = arith.truncf %7 : vector<8x1024xf32> to vector<8x1024xbf16>
    %c0_6 = arith.constant 0 : index
    %c0_7 = arith.constant 0 : index
    %9 = vector.load %arg4[%c0_6, %c0_7] : memref<1024x1024xbf16, #tpu.memory_space<vmem>>, vector<1024x1024xbf16>
    %cst_8 = arith.constant dense<0.000000e+00> : vector<8x1024xf32>
    %10 = tpu.matmul %8, %9, %cst_8 {dimension_numbers = #tpu.dot_dimension_numbers<[1], [0], [0], [1], [0, 0, 1, 1], [], []>} : vector<8x1024xbf16>, vector<1024x1024xbf16>, vector<8x1024xf32> -> vector<8x1024xf32>
    %c0_9 = arith.constant 0 : index
    %c0_10 = arith.constant 0 : index
    %11 = vector.load %arg5[%c0_9, %c0_10] : memref<1x1024xf32, #tpu.memory_space<vmem>>, vector<1x1024xf32>
    %12 = vector.broadcast %11 : vector<1x1024xf32> to vector<8x1024xf32>
    %13 = arith.addf %10, %12 : vector<8x1024xf32>
    %cst_11 = arith.constant 0.000000e+00 : f32
    %14 = vector.broadcast %cst_11 : f32 to vector<8x1024xf32>
    %15 = arith.maximumf %13, %14 : vector<8x1024xf32>
    %16 = arith.truncf %15 : vector<8x1024xf32> to vector<8x1024xbf16>
    %c0_12 = arith.constant 0 : index
    %c0_13 = arith.constant 0 : index
    %17 = vector.load %arg6[%c0_12, %c0_13] : memref<1024x512xbf16, #tpu.memory_space<vmem>>, vector<1024x512xbf16>
    %cst_14 = arith.constant dense<0.000000e+00> : vector<8x512xf32>
    %18 = tpu.matmul %16, %17, %cst_14 {dimension_numbers = #tpu.dot_dimension_numbers<[1], [0], [0], [1], [0, 0, 1, 1], [], []>} : vector<8x1024xbf16>, vector<1024x512xbf16>, vector<8x512xf32> -> vector<8x512xf32>
    %c0_15 = arith.constant 0 : index
    %c0_16 = arith.constant 0 : index
    %19 = vector.load %arg7[%c0_15, %c0_16] : memref<1x512xf32, #tpu.memory_space<vmem>>, vector<1x512xf32>
    %20 = vector.broadcast %19 : vector<1x512xf32> to vector<8x512xf32>
    %21 = arith.addf %18, %20 : vector<8x512xf32>
    %cst_17 = arith.constant 0.000000e+00 : f32
    %22 = vector.broadcast %cst_17 : f32 to vector<8x512xf32>
    %23 = arith.maximumf %21, %22 : vector<8x512xf32>
    %24 = arith.truncf %23 : vector<8x512xf32> to vector<8x512xbf16>
    %c0_18 = arith.constant 0 : index
    %c0_19 = arith.constant 0 : index
    %25 = vector.load %arg8[%c0_18, %c0_19] : memref<512x128xbf16, #tpu.memory_space<vmem>>, vector<512x128xbf16>
    %cst_20 = arith.constant dense<0.000000e+00> : vector<8x128xf32>
    %26 = tpu.matmul %24, %25, %cst_20 {dimension_numbers = #tpu.dot_dimension_numbers<[1], [0], [0], [1], [0, 0, 1, 1], [], []>} : vector<8x512xbf16>, vector<512x128xbf16>, vector<8x128xf32> -> vector<8x128xf32>
    %c0_21 = arith.constant 0 : index
    %c0_22 = arith.constant 0 : index
    %27 = vector.load %arg9[%c0_21, %c0_22] : memref<1x128xf32, #tpu.memory_space<vmem>>, vector<1x128xf32>
    %28 = vector.broadcast %27 : vector<1x128xf32> to vector<8x128xf32>
    %29 = arith.addf %26, %28 : vector<8x128xf32>
    %c0_23 = arith.constant 0 : index
    %c0_24 = arith.constant 0 : index
    %30 = vector.load %arg10[%c0_23, %c0_24] : memref<8x128xf32, #tpu.memory_space<vmem>>, vector<8x128xf32>
    tpu.vector_store %arg10[%c0_23, %c0_24], %29 {strides = array<i32>} : memref<8x128xf32, #tpu.memory_space<vmem>>, vector<8x128xf32>,
    return
  }
  func.func @transform_0(%arg0: i32) -> (i32, i32) {
    %c0_i32 = arith.constant 0 : i32
    %c0_i32_0 = arith.constant 0 : i32
    return %arg0, %c0_i32 : i32, i32
  }
  func.func @transform_1(%arg0: i32) -> (i32, i32) {
    %c0_i32 = arith.constant 0 : i32
    %c0_i32_0 = arith.constant 0 : i32
    %c0_i32_1 = arith.constant 0 : i32
    return %c0_i32, %c0_i32_0 : i32, i32
  }
  func.func @transform_2(%arg0: i32) -> (i32, i32) {
    %c0_i32 = arith.constant 0 : i32
    %c0_i32_0 = arith.constant 0 : i32
    %c0_i32_1 = arith.constant 0 : i32
    return %c0_i32, %c0_i32_0 : i32, i32
  }
  func.func @transform_3(%arg0: i32) -> (i32, i32) {
    %c0_i32 = arith.constant 0 : i32
    %c0_i32_0 = arith.constant 0 : i32
    %c0_i32_1 = arith.constant 0 : i32
    return %c0_i32, %c0_i32_0 : i32, i32
  }
  func.func @transform_4(%arg0: i32) -> (i32, i32) {
    %c0_i32 = arith.constant 0 : i32
    %c0_i32_0 = arith.constant 0 : i32
    %c0_i32_1 = arith.constant 0 : i32
    return %c0_i32, %c0_i32_0 : i32, i32
  }
  func.func @transform_5(%arg0: i32) -> (i32, i32) {
    %c0_i32 = arith.constant 0 : i32
    %c0_i32_0 = arith.constant 0 : i32
    %c0_i32_1 = arith.constant 0 : i32
    return %c0_i32, %c0_i32_0 : i32, i32
  }
  func.func @transform_6(%arg0: i32) -> (i32, i32) {
    %c0_i32 = arith.constant 0 : i32
    %c0_i32_0 = arith.constant 0 : i32
    %c0_i32_1 = arith.constant 0 : i32
    return %c0_i32, %c0_i32_0 : i32, i32
  }
  func.func @transform_7(%arg0: i32) -> (i32, i32) {
    %c0_i32 = arith.constant 0 : i32
    %c0_i32_0 = arith.constant 0 : i32
    %c0_i32_1 = arith.constant 0 : i32
    return %c0_i32, %c0_i32_0 : i32, i32
  }
  func.func @transform_8(%arg0: i32) -> (i32, i32) {
    %c0_i32 = arith.constant 0 : i32
    %c0_i32_0 = arith.constant 0 : i32
    %c0_i32_1 = arith.constant 0 : i32
    return %c0_i32, %c0_i32_0 : i32, i32
  }
  func.func @transform_9(%arg0: i32) -> (i32, i32) {
    %c0_i32 = arith.constant 0 : i32
    %c0_i32_0 = arith.constant 0 : i32
    return %arg0, %c0_i32 : i32, i32
  }
}

</mosaic_0001>

<bundles_post_ra>
// kernel: tpu_custom_call.1
= control target key start
LH: loop header
LB: loop body
LE: loop exit
PB: predicated region body
PF: predicated region fallthrough
CT: control target
= control target key end

     0   :  { %s9452_s0 = inlined_call_operand.hbm [shape: bf16[16,28], index: 0, kind: input, shape index: {}]   ;;  %s9453_s1 = inlined_call_operand.hbm [shape: bf16[28,1024], index: 1, kind: input, shape index: {}]   ;;  %s9454_s2 = inlined_call_operand.hbm [shape: f32[1,1024], index: 2, kind: input, shape index: {}]   ;;  %s9455_s3 = inlined_call_operand.hbm [shape: bf16[1024,1024], index: 3, kind: input, shape index: {}]   ;;  %s9456_s4 = inlined_call_operand.hbm [shape: f32[1,1024], index: 4, kind: input, shape index: {}]   ;;  %s9457_s5 = inlined_call_operand.hbm [shape: bf16[1024,512], index: 5, kind: input, shape index: {}]   ;;  %s9458_s6 = inlined_call_operand.hbm [shape: f32[1,512], index: 6, kind: input, shape index: {}]   ;;  %s9459_s7 = inlined_call_operand.hbm [shape: bf16[512,128], index: 7, kind: input, shape index: {}]   ;;  %s9460_s8 = inlined_call_operand.hbm [shape: f32[1,128], index: 8, kind: input, shape index: {}]   ;;  %s9461_s9 = inlined_call_operand.hbm [shape: f32[16,128], index: 9, kind: output, shape index: {}]  }
   0x1   :  { %9466 = sst [smem:[#allocation24_spill]] %s9453_s1 }
   0x2   :  { %9467 = sst [smem:[#allocation25_spill]] %s9461_s9 }
   0x3   :  { %14 = vsyncpa [#allocation3], 0 }
   0x4   :  { %16 = vsyncpa [#allocation3 + $0x1], 0 }
   0x5   :  { %17 = vsyncpa [#allocation6], 0 }
   0x6   :  { %18 = vsyncpa [#allocation9], 0 }
   0x7   :  { %19 = vsyncpa [#allocation12], 0 }
   0x8   :  { %20 = vsyncpa [#allocation15], 0 }
   0x9   :  { %21 = vsyncpa [#allocation4], 0 }
   0xa   :  { %23 = vsyncpa [#allocation4 + $0x1], 0  ;;  %s8919_s30 = smov 0   ;;  %s8921_s10 = smov 0  }
   0xb   :  { %s8923_s11 = smov 0   ;;  %s8925_s12 = smov 0  }
   0xc LB: > { %s8852_s13 = smov [#allocation5]   ;;  %s8940_s15 = sadd.s32 4294967295, %s8850_s12   ;;  %s8850_s12 = sphi %s8925_s12, %s9494_s12   ;;  %s8846_s11 = sphi %s8923_s11, %s9493_s11   ;;  %s8842_s10 = sphi %s8921_s10, %s9492_s10   ;;  %s8838_s30 = sphi %s8919_s30, %s9491_s30  }
   0xd   : > { %s266_s14 = sshll.u32 %s8852_s13, 4  ;;  %p6982_p0 = scmp.ge.s32.totalorder %s8850_s12, 1  ;;  %s8945_s14 = int_to_ptr.vmem [resolvable:$true] %s266_s14 }
   0xe   : > { %p9463_p1 = scmp.eq.s32.totalorder %s8940_s15, 0  ;;  %p254_p2 = scmp.lt.s32.totalorder %s8850_s12, 3 }
   0xf   : > { %s8853_s17 = smov [#allocation8]   ;;  %s8854_s20 = smov [#allocation11]  }
  0x10   : > { %p8947_p3 = pnand %p6982_p0, %p254_p2  ;;  %s290_s18 = sshll.u32 %s8853_s17, 4  ;;  %s8960_s18 = int_to_ptr.vmem [resolvable:$true] %s290_s18 }
  0x11   : > { %s314_s21 = sshll.u32 %s8854_s20, 4  ;;  %s9470_s1 = sld [smem:[#allocation24_spill]]  ;;  %s8962_s21 = int_to_ptr.vmem [resolvable:$true] %s314_s21 }
  0x12   : > { %s9468_s16 = scalar_select %p8947_p3, 1, 0 }
  0x13   : > { %p7998_p5 = pneg %p8947_p3 }
  0x15   : > { %p8956_p6 = pnand %p7998_p5, %p9463_p1 }
  0x17   : > { %s8514_s24 = scalar_lea.hbm %s9470_s1, 2048  ;;  %p8972_p8 = pneg %p8956_p6 }
  0x18   : > { %p8515_p7 = scmp.ne.s32.totalorder %s9470_s1, %s8514_s24  ;;  %p8521_p11 = scmp.lt.u32.totalorder %s8514_s24, %s9470_s1 }
  0x1a   : > { %p8517_p9 = pnand %p8972_p8, %p8515_p7 }
  0x1c   : > { %p8518_p10 = pneg %p8517_p9 }
  0x1e   : > { %p8523_p12 = pnand %p8521_p11, %p8518_p10 }
  0x20   : > { %8526 = shalt.err (!%p8523_p12)
}
  0x21   : > { %s8527_s13 = scalar_lea.vmem %s8945_s14, 2048  ;;  %p8535_p5 = scmp.lt.s32.totalorder %s8945_s14, %s8945_s14 }
  0x22   : > { %p8528_p13 = scmp.ne.s32.totalorder %s8945_s14, %s8527_s13  ;;  %p8536_p4 = scmp.lt.s32.totalorder %s8527_s13, %s8527_s13 }
  0x24   : > { %p8530_p0 = pnand %p8528_p13, %p8972_p8  ;;  %p8537_p7 = por %p8536_p4, %p8535_p5 }
  0x26   : > { %p8531_p2 = pneg %p8530_p0 }
  0x28   : > { %p8538_p9 = pnand %p8537_p7, %p8531_p2 }
  0x2a   : > { %8541 = shalt.err (!%p8538_p9)
}
  0x2b   : > { %s8855_s17 = smov 512   ;;  %s8856_s20 = smov 32  }
  0x2c   : > { %8001 = dma.hbm_to_vmem [thread:$0]  (!%p8956_p6), %s9470_s1, 2048, %s8945_s14, [#allocation6], %s8855_s17, %s8855_s17, %s8856_s20  }
  0x2d   : > { %s8542_s26 = scalar_lea.hbm %s9455_s3, 65536 }
  0x2e   : > { %p8543_p4 = scmp.ne.s32.totalorder %s9455_s3, %s8542_s26  ;;  %p8549_p12 = scmp.lt.u32.totalorder %s8542_s26, %s9455_s3 }
  0x30   : > { %p8545_p10 = pnand %p8543_p4, %p8972_p8 }
  0x32   : > { %p8546_p11 = pneg %p8545_p10 }
  0x34   : > { %p8551_p13 = pnand %p8549_p12, %p8546_p11 }
  0x36   : > { %8554 = shalt.err (!%p8551_p13)
}
  0x37   : > { %s8555_s14 = scalar_lea.vmem %s8960_s18, 65536  ;;  %p8563_p7 = scmp.lt.s32.totalorder %s8960_s18, %s8960_s18 }
  0x38   : > { %p8556_p0 = scmp.ne.s32.totalorder %s8960_s18, %s8555_s14  ;;  %p8564_p9 = scmp.lt.s32.totalorder %s8555_s14, %s8555_s14 }
  0x3a   : > { %p8558_p2 = pnand %p8556_p0, %p8972_p8  ;;  %p8565_p4 = por %p8564_p9, %p8563_p7 }
  0x3c   : > { %p8559_p5 = pneg %p8558_p2 }
  0x3e   : > { %p8566_p10 = pnand %p8565_p4, %p8559_p5 }
  0x40   : > { %8569 = shalt.err (!%p8566_p10)
}
  0x41   : > { %8007 = dma.hbm_to_vmem [thread:$0]  (!%p8956_p6), %s9455_s3, 65536, %s8960_s18, [#allocation9], %s8855_s17, %s8855_s17, %s8856_s20  }
  0x42   : > { %s8570_s25 = scalar_lea.hbm %s9457_s5, 32768 }
  0x43   : > { %p8571_p11 = scmp.ne.s32.totalorder %s9457_s5, %s8570_s25  ;;  %p8577_p0 = scmp.lt.u32.totalorder %s8570_s25, %s9457_s5 }
  0x45   : > { %p8573_p12 = pnand %p8571_p11, %p8972_p8 }
  0x47   : > { %p8574_p13 = pneg %p8573_p12 }
  0x49   : > { %p8579_p2 = pnand %p8577_p0, %p8574_p13 }
  0x4b   : > { %8582 = shalt.err (!%p8579_p2)
}
  0x4c   : > { %s8583_s18 = scalar_lea.vmem %s8962_s21, 32768  ;;  %p8591_p4 = scmp.lt.s32.totalorder %s8962_s21, %s8962_s21 }
  0x4d   : > { %p8584_p5 = scmp.ne.s32.totalorder %s8962_s21, %s8583_s18  ;;  %p8592_p10 = scmp.lt.s32.totalorder %s8583_s18, %s8583_s18 }
  0x4f   : > { %p8586_p7 = pnand %p8584_p5, %p8972_p8  ;;  %p8593_p11 = por %p8592_p10, %p8591_p4 }
  0x51   : > { %p8587_p9 = pneg %p8586_p7 }
  0x53   : > { %p8594_p12 = pnand %p8593_p11, %p8587_p9 }
  0x55   : > { %8597 = shalt.err (!%p8594_p12)
}
  0x56   : > { %s8857_s17 = smov 256   ;;  %s8858_s20 = smov 16  }
  0x57   : > { %8013 = dma.hbm_to_vmem [thread:$0]  (!%p8956_p6), %s9457_s5, 32768, %s8962_s21, [#allocation12], %s8857_s17, %s8857_s17, %s8858_s20  }
  0x58   : > { %s8859_s22 = smov [#allocation14]   ;;  %s8598_s26 = scalar_lea.hbm %s9459_s7, 4096 }
  0x59   : > { %s338_s23 = sshll.u32 %s8859_s22, 4  ;;  %p8599_p13 = scmp.ne.s32.totalorder %s9459_s7, %s8598_s26  ;;  %s339_s23 = int_to_ptr.vmem [resolvable:$true] %s338_s23 }
  0x5a   : > { %p8605_p5 = scmp.lt.u32.totalorder %s8598_s26, %s9459_s7 }
  0x5b   : > { %p8601_p0 = pnand %p8599_p13, %p8972_p8 }
  0x5d   : > { %p8602_p2 = pneg %p8601_p0 }
  0x5f   : > { %p8607_p7 = pnand %p8605_p5, %p8602_p2 }
  0x61   : > { %8610 = shalt.err (!%p8607_p7)
}
  0x62   : > { %s8611_s21 = scalar_lea.vmem %s339_s23, 4096  ;;  %p8619_p11 = scmp.lt.s32.totalorder %s339_s23, %s339_s23 }
  0x63   : > { %p8612_p9 = scmp.ne.s32.totalorder %s339_s23, %s8611_s21  ;;  %p8620_p12 = scmp.lt.s32.totalorder %s8611_s21, %s8611_s21 }
  0x65   : > { %p8614_p4 = pnand %p8612_p9, %p8972_p8  ;;  %p8621_p1 = por %p8620_p12, %p8619_p11 }
  0x67   : > { %p8615_p10 = pneg %p8614_p4 }
  0x69   : > { %p8622_p3 = pnand %p8621_p1, %p8615_p10 }
  0x6b   : > { %8625 = shalt.err (!%p8622_p3)
}
  0x6c   : > { %s8860_s17 = smov 64   ;;  %s8861_s20 = smov 4  }
  0x6d   : > { %8019 = dma.hbm_to_vmem [thread:$0]  (!%p8956_p6), %s9459_s7, 4096, %s339_s23, [#allocation15], %s8860_s17, %s8860_s17, %s8861_s20  }
  0x6e   : > { %s8862_s22 = smov [#allocation7]   ;;  %s8863_s25 = smov [#allocation10]  }
  0x6f   : > { %s280_s24 = sshll.u32 %s8862_s22, 4  ;;  %s304_s26 = sshll.u32 %s8863_s25, 4  ;;  %s281_s24 = int_to_ptr.vmem [resolvable:$true] %s280_s24  ;;  %s9057_s26 = int_to_ptr.vmem [resolvable:$true] %s304_s26 }
  0x70   : > { %s8626_s13 = scalar_lea.hbm %s9454_s2, 128 }
  0x71   : > { %p8627_p1 = scmp.ne.s32.totalorder %s9454_s2, %s8626_s13  ;;  %p8633_p0 = scmp.lt.u32.totalorder %s8626_s13, %s9454_s2 }
  0x73   : > { %p8629_p3 = pnand %p8627_p1, %p8972_p8 }
  0x75   : > { %p8630_p13 = pneg %p8629_p3 }
  0x77   : > { %p8635_p2 = pnand %p8633_p0, %p8630_p13 }
  0x79   : > { %8638 = shalt.err (!%p8635_p2)
}
  0x7a   : > { %s8639_s17 = scalar_lea.vmem %s281_s24, 128  ;;  %p8647_p4 = scmp.lt.s32.totalorder %s281_s24, %s281_s24 }
  0x7b   : > { %p8640_p5 = scmp.ne.s32.totalorder %s281_s24, %s8639_s17  ;;  %p8648_p10 = scmp.lt.s32.totalorder %s8639_s17, %s8639_s17 }
  0x7d   : > { %p8642_p7 = pnand %p8640_p5, %p8972_p8  ;;  %p8649_p11 = por %p8648_p10, %p8647_p4 }
  0x7f   : > { %p8643_p9 = pneg %p8642_p7 }
  0x81   : > { %p8650_p12 = pnand %p8649_p11, %p8643_p9 }
  0x83   : > { %8653 = shalt.err (!%p8650_p12)
}
  0x84   : > { %8004 = dma.hbm_to_vmem [thread:$0]  (!%p8956_p6), %s9454_s2, 128, %s281_s24, [#allocation6]  }
  0x85   : > { %s8654_s28 = scalar_lea.hbm %s9456_s4, 128 }
  0x86   : > { %p8655_p1 = scmp.ne.s32.totalorder %s9456_s4, %s8654_s28  ;;  %p8661_p0 = scmp.lt.u32.totalorder %s8654_s28, %s9456_s4 }
  0x88   : > { %p8657_p3 = pnand %p8655_p1, %p8972_p8 }
  0x8a   : > { %p8658_p13 = pneg %p8657_p3 }
  0x8c   : > { %p8663_p2 = pnand %p8661_p0, %p8658_p13 }
  0x8e   : > { %8666 = shalt.err (!%p8663_p2)
}
  0x8f   : > { %s8667_s24 = scalar_lea.vmem %s9057_s26, 128  ;;  %p8675_p4 = scmp.lt.s32.totalorder %s9057_s26, %s9057_s26 }
  0x90   : > { %p8668_p5 = scmp.ne.s32.totalorder %s9057_s26, %s8667_s24  ;;  %p8676_p10 = scmp.lt.s32.totalorder %s8667_s24, %s8667_s24 }
  0x92   : > { %p8670_p7 = pnand %p8668_p5, %p8972_p8  ;;  %p8677_p11 = por %p8676_p10, %p8675_p4 }
  0x94   : > { %p8671_p9 = pneg %p8670_p7 }
  0x96   : > { %p8678_p12 = pnand %p8677_p11, %p8671_p9 }
  0x98   : > { %8681 = shalt.err (!%p8678_p12)
}
  0x99   : > { %8010 = dma.hbm_to_vmem [thread:$0]  (!%p8956_p6), %s9456_s4, 128, %s9057_s26, [#allocation9]  }
  0x9a   : > { %s8864_s17 = smov [#allocation13]   ;;  %s8865_s9 = smov [#allocation16]  }
  0x9b   : > { %s328_s20 = sshll.u32 %s8864_s17, 4  ;;  %s352_s22 = sshll.u32 %s8865_s9, 4  ;;  %s329_s20 = int_to_ptr.vmem [resolvable:$true] %s328_s20  ;;  %s9100_s22 = int_to_ptr.vmem [resolvable:$true] %s352_s22 }
  0x9c   : > { %s8682_s29 = scalar_lea.hbm %s9458_s6, 64 }
  0x9d   : > { %p8683_p1 = scmp.ne.s32.totalorder %s9458_s6, %s8682_s29  ;;  %p8689_p0 = scmp.lt.u32.totalorder %s8682_s29, %s9458_s6 }
  0x9f   : > { %p8685_p3 = pnand %p8683_p1, %p8972_p8 }
  0xa1   : > { %p8686_p13 = pneg %p8685_p3 }
  0xa3   : > { %p8691_p2 = pnand %p8689_p0, %p8686_p13 }
  0xa5   : > { %8694 = shalt.err (!%p8691_p2)
}
  0xa6   : > { %s8695_s24 = scalar_lea.vmem %s329_s20, 64  ;;  %p8703_p4 = scmp.lt.s32.totalorder %s329_s20, %s329_s20 }
  0xa7   : > { %p8696_p5 = scmp.ne.s32.totalorder %s329_s20, %s8695_s24  ;;  %p8704_p10 = scmp.lt.s32.totalorder %s8695_s24, %s8695_s24 }
  0xa9   : > { %p8698_p7 = pnand %p8696_p5, %p8972_p8  ;;  %p8705_p11 = por %p8704_p10, %p8703_p4 }
  0xab   : > { %p8699_p9 = pneg %p8698_p7 }
  0xad   : > { %p8706_p12 = pnand %p8705_p11, %p8699_p9 }
  0xaf   : > { %8709 = shalt.err (!%p8706_p12)
}
  0xb0   : > { %8016 = dma.hbm_to_vmem [thread:$0]  (!%p8956_p6), %s9458_s6, 64, %s329_s20, [#allocation12]  }
  0xb1   : > { %s8710_s25 = scalar_lea.hbm %s9460_s8, 16 }
  0xb2   : > { %p8711_p1 = scmp.ne.s32.totalorder %s9460_s8, %s8710_s25  ;;  %p8717_p0 = scmp.lt.u32.totalorder %s8710_s25, %s9460_s8 }
  0xb4   : > { %p8713_p3 = pnand %p8711_p1, %p8972_p8 }
  0xb6   : > { %p8714_p13 = pneg %p8713_p3 }
  0xb8   : > { %p8719_p2 = pnand %p8717_p0, %p8714_p13 }
  0xba   : > { %8722 = shalt.err (!%p8719_p2)
}
  0xbb   : > { %s8723_s20 = scalar_lea.vmem %s9100_s22, 16  ;;  %s8730_s21 = scalar_lea.vmem %s9100_s22, 32 }
  0xbc   : > { %p8724_p5 = scmp.ne.s32.totalorder %s9100_s22, %s8723_s20  ;;  %p8731_p4 = scmp.lt.s32.totalorder %s9100_s22, %s9100_s22 }
  0xbd   : > { %p8732_p10 = scmp.lt.s32.totalorder %s8730_s21, %s8723_s20 }
  0xbe   : > { %p8726_p7 = pnand %p8724_p5, %p8972_p8 }
  0xbf   : > { %p8733_p11 = por %p8732_p10, %p8731_p4 }
  0xc0   : > { %p8727_p9 = pneg %p8726_p7 }
  0xc2   : > { %p8734_p12 = pnand %p8733_p11, %p8727_p9 }
  0xc4   : > { %8737 = shalt.err (!%p8734_p12)
}
  0xc5   : > { %8022 = dma.hbm_to_vmem [thread:$0]  (!%p8956_p6), %s9460_s8, 16, %s9100_s22, [#allocation15]  }
  0xc6   : > { %s6981_s19 = sadd.s32 4294967294, %s8850_s12   ;;  %s9146_s27 = sadd.s32 1, %s8850_s12  }
  0xc7   : > { %s33_s14 = ssub.s32 %s8850_s12, %s9146_s27  ;;  %s36_s23 = sadd.s32 1, %s8846_s11 }
  0xc8   : > { %p34_p8 = scmp.eq.s32.totalorder %s33_s14, 0  ;;  %p43_p1 = scmp.ne.s32.totalorder %s8846_s11, %s8842_s10 }
  0xc9   : > { %p44_p3 = scmp.eq.s32.totalorder %s8850_s12, 0  ;;  %p49_p13 = scmp.ne.s32.totalorder %s8842_s10, %s8838_s30 }
  0xca   : > { %s9157_s17 = scalar_select %p34_p8, %s8846_s11, %s36_s23  }
  0xcb   : > { %p9159_p0 = por %p44_p3, %p43_p1  ;;  %p9473_p2 = scmp.eq.s32.totalorder %s8940_s15, 0 }
  0xcc   : > { %p241_p5 = scmp.eq.s32.totalorder %s8940_s15, 1  ;;  %p247_p7 = scmp.eq.s32.totalorder %s6981_s19, 1 }
  0xcd   : > { %p9165_p6 = por %p9473_p2, %p49_p13  ;;  %p8039_p9 = scmp.lt.s32.totalorder %s8850_s12, 2 }
  0xce   : > { %s363_s25 = sand.u32 1, %s8846_s11   ;;  %p9172_p4 = por %p241_p5, %p43_p1 }
  0xcf   : > { %p9176_p10 = por %p247_p7, %p49_p13  ;;  %s6992_s13 = sshll.u32 %s363_s25, 2 }
  0xd0   : > { %s9475_s28 = scalar_select %p9172_p4, 1, 0 }
  0xd1   : > { %s9476_s29 = scalar_select %p9176_p10, 1, 0 }
  0xd2   : > { %s6993_s18 = sshll.u32 %s8850_s12, 6  ;;  %s367_s24 = scalar_lea.vmem [#allocation2], %s6992_s13 }
  0xd3   : > { %s9184_s26 = scalar_lea.hbm %s9452_s0, %s6993_s18  ;;  %s374_s19 = sshll.u32 %s367_s24, 4  ;;  %s9186_s19 = int_to_ptr.vmem [resolvable:$true] %s374_s19 }
  0xd4   : > { %p9190_p11 = pnand %p8039_p9, %p9159_p0  ;;  %s364_s23 = scalar_lea.sflag [#allocation3], %s363_s25 }
  0xd5   : > { %s8738_s1 = scalar_lea.hbm %s9184_s26, 64  ;;  %s8743_s20 = scalar_lea.hbm %s9452_s0, 128 }
  0xd6   : > { %p8739_p12 = scmp.ne.s32.totalorder %s9184_s26, %s8738_s1  ;;  %p8740_p8 = pneg %p9190_p11 }
  0xd7   : > { %p8744_p13 = scmp.lt.u32.totalorder %s9184_s26, %s9452_s0  ;;  %p8745_p0 = scmp.lt.u32.totalorder %s8743_s20, %s8738_s1 }
  0xd8   : > { %p8741_p1 = pnand %p8740_p8, %p8739_p12  ;;  %p8747_p5 = scmp.lt.u32.totalorder %s8738_s1, %s9184_s26 }
  0xd9   : > { %p8746_p2 = por %p8745_p0, %p8744_p13 }
  0xda   : > { %p8742_p3 = pneg %p8741_p1 }
  0xdb   : > { %p8748_p7 = por %p8747_p5, %p8746_p2 }
  0xdd   : > { %p8749_p9 = pnand %p8748_p7, %p8742_p3 }
  0xdf   : > { %8752 = shalt.err (!%p8749_p9)
}
  0xe0   : > { %s8753_s25 = scalar_lea.vmem %s9186_s19, 64  ;;  %s8866_s24 = smov [#allocation2]  }
  0xe1   : > { %p8754_p12 = scmp.ne.s32.totalorder %s9186_s19, %s8753_s25  ;;  %s8758_s13 = sshll.u32 %s8866_s24, 4  ;;  %s8759_s13 = int_to_ptr.vmem [resolvable:$false] %s8758_s13 }
  0xe2   : > { %s8760_s18 = scalar_lea.vmem %s8759_s13, 128  ;;  %p8761_p4 = scmp.lt.s32.totalorder %s9186_s19, %s8759_s13 }
  0xe3   : > { %p8756_p1 = pnand %p8754_p12, %p8740_p8  ;;  %p8762_p13 = scmp.lt.s32.totalorder %s8760_s18, %s8753_s25 }
  0xe5   : > { %p8757_p10 = pneg %p8756_p1  ;;  %p8763_p0 = por %p8762_p13, %p8761_p4 }
  0xe7   : > { %p8764_p2 = pnand %p8763_p0, %p8757_p10 }
  0xe9   : > { %8767 = shalt.err (!%p8764_p2)
}
  0xea   : > { %8026 = dma.hbm_to_vmem [thread:$0]  (!%p9190_p11), %s9184_s26, 64, %s9186_s19, %s364_s23  }
  0xeb   : > { %p9478_p3 = scmp.ne.s32.totalorder %s9468_s16, 0 }
  0xec   : > { %s9222_s1 = sand.u32 (!%p9478_p3), 1, %s8842_s10  }
  0xed   : > { %383 = sbr.rel (%p9478_p3) target bundleno = 1674 (0x68a), region = 56  ;;  %s6995_s20 = sshll.u32 (!%p9478_p3), %s9222_s1, 2 }
  0xee   : > { %s386_s9 = scalar_lea.sflag (!%p9478_p3), [#allocation3], %s9222_s1  ;;  %s9226_s21 = scalar_lea.vmem (!%p9478_p3), [#allocation2], %s6995_s20 }
  0xf4   : > { %8813 = dma.done.wait (%p9165_p6), %s386_s9, 64  }
  0xf5   : > { %8815 = vsyncadd (%p9165_p6), %s386_s9, 4294967232  ;;  %p9479_p4 = scmp.eq.s32.totalorder %s8940_s15, 0 }
  0xf7   : > { %8817 = dma.done.wait (%p9479_p4), [#allocation6], 2176   ;;  %p9480_p10 = pmov %p9479_p4 }
  0xf8   : > { %p9481_p11 = pmov %p9479_p4 }
  0xf9   : > { %8819 = vsyncadd (%p9480_p10), [#allocation6], 4294965120 }
  0xfa   : > { %8821 = dma.done.wait (%p9481_p11), [#allocation9], 65664   ;;  %p9482_p8 = pmov %p9479_p4 }
  0xfb   : > { %p9483_p5 = pmov %p9479_p4 }
  0xfc   : > { %8823 = vsyncadd (%p9482_p8), [#allocation9], 4294901632 }
  0xfd   : > { %8825 = dma.done.wait (%p9483_p5), [#allocation12], 32832   ;;  %p9484_p7 = pmov %p9479_p4 }
  0xfe   : > { %p9485_p6 = pmov %p9479_p4 }
  0xff   : > { %8827 = vsyncadd (%p9484_p7), [#allocation12], 4294934464 }
 0x100   : > { %8829 = dma.done.wait (%p9485_p6), [#allocation15], 4112   ;;  %p9486_p9 = pmov %p9479_p4 }
 0x101   : > { %v8867_v0 = vmov 0   ;;  %v458_v1 = vld [vmem:[#allocation5] sm:$0xff]  ;;  %v459_v7 = vld [vmem:[#allocation5 + $0x8] sm:$0xff]  ;;  %vm592_vm0 = vcmask 1045504   ;;  %v460_v17 = vld [vmem:[#allocation5 + $0x10] sm:$0xff]  ;;  %vm588_vm1 = vcmask 228352  }
 0x102   : > { %8831 = vsyncadd (%p9486_p9), [#allocation15], 4294963184  ;;  %649 = vmatprep.mubr.bf16.mxu0 %v8867_v0  ;;  %690 = vmatprep.mubr.bf16.mxu1 %v8867_v0  ;;  %v462_v2 = vld [vmem:[#allocation5 + $0x20] sm:$0xff]  ;;  %v463_v10 = vld [vmem:[#allocation5 + $0x28] sm:$0xff]  ;;  %s7004_s16 = sshll.u32 %s9222_s1, 3  ;;  %s7831_s22 = sshll.u32 %s8940_s15, 7 }
 0x103   : > { %v466_v3 = vld [vmem:[#allocation5 + $0x40] sm:$0xff]  ;;  %v7006_v4 = vcombine.high %v458_v1, %v462_v2  ;;  %v7005_v5 = vcombine.low %v458_v1, %v462_v2  ;;  %v467_v11 = vld [vmem:[#allocation5 + $0x48] sm:$0xff]  ;;  %v7008_v13 = vcombine.high %v459_v7, %v463_v10  ;;  %v7007_v14 = vcombine.low %v459_v7, %v463_v10  ;;  %v464_v18 = vld [vmem:[#allocation5 + $0x30] sm:$0xff]  ;;  %s455_s26 = scalar_lea.vmem [#allocation17], %s7004_s16  ;;  %s9487_s25 = sld [smem:[#allocation25_spill]] }
 0x104   : > { %v470_v6 = vld [vmem:[#allocation5 + $0x60] sm:$0x33]  ;;  %v471_v12 = vld [vmem:[#allocation5 + $0x68] sm:$0x33]  ;;  %v461_v19 = vld [vmem:[#allocation5 + $0x18] sm:$0xff]  ;;  %v7010_v22 = vcombine.high %v460_v17, %v464_v18  ;;  %v7009_v28 = vcombine.low %v460_v17, %v464_v18  ;;  %s6835_s19 = sshll.u32 %s455_s26, 4  ;;  %s9410_s19 = int_to_ptr.vmem [resolvable:$true] %s6835_s19 }
 0x105   : > { %v7014_v8 = vcombine.high %v466_v3, %v470_v6  ;;  %v7013_v9 = vcombine.low %v466_v3, %v470_v6  ;;  %617 = vmatprep.subr.bf16.mxu0 %v7006_v4  ;;  %v7016_v15 = vcombine.high %v467_v11, %v471_v12  ;;  %v7015_v16 = vcombine.low %v467_v11, %v471_v12  ;;  %v465_v20 = vld [vmem:[#allocation5 + $0x38] sm:$0xff]  ;;  %v468_v23 = vld [vmem:[#allocation5 + $0x50] sm:$0xff]  ;;  %v797_v34 = vld [vmem:[#allocation8] sm:$0xff]  ;;  %s6822_s13 = scalar_lea.sflag [#allocation4], %s9222_s1  ;;  %s8768_s18 = scalar_lea.vmem %s9410_s19, 128 }
 0x106   : > { %618 = vmatpush1.bf16.msra.mxu0 %v7005_v5  ;;  %658 = vmatprep.subr.bf16.mxu1 %v7008_v13  ;;  %v472_v24 = vld [vmem:[#allocation5 + $0x70] sm:$0x33]  ;;  %v7012_v26 = vcombine.high %v461_v19, %v465_v20  ;;  %v457_v27 = vld [vmem:[%s9226_s21] sm:$0xf]  ;;  %v7011_v33 = vcombine.low %v461_v19, %v465_v20  ;;  %v801_v35 = vld [vmem:[#allocation8 + $0x20] sm:$0xff]  ;;  %p8769_p12 = scmp.ne.s32.totalorder %s9410_s19, %s8768_s18  ;;  %p9488_p1 = scmp.ne.s32.totalorder %s9475_s28, 0 }
 0x107   : > { %7021 = vmatprep.subr.msk.bf16.mxu0 %vm592_vm0, %v7014_v8  ;;  %v594_v21 = vsel %vm592_vm0, %v7013_v9, 0  ;;  %659 = vmatpush1.bf16.msra.mxu1 %v7007_v14  ;;  %v600_v25 = vsel %vm592_vm0, %v7015_v16, 0  ;;  %v469_v29 = vld [vmem:[#allocation5 + $0x58] sm:$0xff]  ;;  %v7018_v31 = vcombine.high %v468_v23, %v472_v24  ;;  %v7017_v32 = vcombine.low %v468_v23, %v472_v24  ;;  %v798_v38 = vld [vmem:[#allocation8 + $0x8] sm:$0xff]  ;;  %v805_v42 = vld [vmem:[#allocation8 + $0x40] sm:$0xff]  ;;  %s8868_s15 = smov [#allocation17]  }
 0x108   : > { %7023 = vmatprep.subr.msk.bf16.mxu1 %vm592_vm0, %v7016_v15  ;;  %v473_v30 = vld [vmem:[#allocation5 + $0x78] sm:$0x33]  ;;  %v802_v39 = vld [vmem:[#allocation8 + $0x28] sm:$0xff]  ;;  %v7030_v41 = vcombine.high %v797_v34, %v801_v35  ;;  %v809_v43 = vld [vmem:[#allocation8 + $0x60] sm:$0xff]  ;;  %v7029_v46 = vcombine.low %v797_v34, %v801_v35  ;;  %p8770_p13 = pnand %p8769_p12, %p9488_p1  ;;  %s8772_s20 = sshll.u32 %s8868_s15, 4  ;;  %s8773_s20 = int_to_ptr.vmem [resolvable:$false] %s8772_s20 }
 0x109   : > { %v7020_v36 = vcombine.high %v469_v29, %v473_v30  ;;  %v7019_v37 = vcombine.low %v469_v29, %v473_v30  ;;  %v606_v40 = vsel %vm592_vm0, %v7017_v32, 0  ;;  %v7032_v45 = vcombine.high %v798_v38, %v802_v39  ;;  %v806_v47 = vld [vmem:[#allocation8 + $0x48] sm:$0xff]  ;;  %v813_v51 = vld [vmem:[#allocation8 + $0x80] sm:$0xff]  ;;  %s9408_s24 = scalar_lea.hbm %s9487_s25, %s7831_s22  ;;  %s8774_s9 = scalar_lea.vmem %s8773_s20, 256 }
 0x10a   : > { %620 = vmatpush1.bf16.msra.mxu0 %v594_v21  ;;  %v810_v48 = vld [vmem:[#allocation8 + $0x68] sm:$0xff]  ;;  %v7038_v49 = vcombine.high %v805_v42, %v809_v43  ;;  %v7031_v50 = vcombine.low %v798_v38, %v802_v39  ;;  %v817_v52 = vld [vmem:[#allocation8 + $0xa0] sm:$0xff]  ;;  %v7037_v54 = vcombine.low %v805_v42, %v809_v43  ;;  %p8771_p0 = pneg %p8770_p13  ;;  %p8775_p2 = scmp.lt.s32.totalorder %s9410_s19, %s8773_s20 }
 0x10b   : > { %699 = vmatprep.subr.bf16.mxu0 %v7010_v22  ;;  %661 = vmatpush1.bf16.msra.mxu1 %v600_v25  ;;  %v612_v44 = vsel %vm592_vm0, %v7019_v37, 0  ;;  %v7040_v53 = vcombine.high %v806_v47, %v810_v48  ;;  %v814_v55 = vld [vmem:[#allocation8 + $0x88] sm:$0xff]  ;;  %v7046_v57 = vcombine.high %v813_v51, %v817_v52  ;;  %v7039_v58 = vcombine.low %v806_v47, %v810_v48  ;;  %v821_v59 = vld [vmem:[#allocation8 + $0xc0] sm:$0xff]  ;;  %p8776_p3 = scmp.lt.s32.totalorder %s8774_s9, %s8768_s18 }
 0x10c   : > { %740 = vmatprep.subr.bf16.mxu1 %v7012_v26  ;;  %v818_v56 = vld [vmem:[#allocation8 + $0xa8] sm:$0xff]  ;;  %v825_v60 = vld [vmem:[#allocation8 + $0xe0] sm:$0xff] }
 0x10d   : > { %7022 = vmatmul.mubr.msk.bf16.vlgmr.msra.gmra.mrb[0].mxu0 %vm588_vm1, %v457_v27  ;;  %v7048_v61 = vcombine.high %v814_v55, %v818_v56  ;;  %v822_v62 = vld [vmem:[#allocation8 + $0xc8] sm:$0xff]  ;;  %v829_v1 = vld [vmem:[#allocation8 + $0x100] sm:$0xff]  ;;  %v7054_v3 = vcombine.high %v821_v59, %v825_v60  ;;  %v7047_v4 = vcombine.low %v814_v55, %v818_v56  ;;  %v7053_v8 = vcombine.low %v821_v59, %v825_v60  ;;  %p8777_p4 = por %p8776_p3, %p8775_p2 }
 0x10e   : > { %700 = vmatpush1.bf16.msra.mxu0 %v7009_v28  ;;  %731 = vmatprep.mubr.bf16.mxu0 %v8867_v0  ;;  %v826_v63 = vld [vmem:[#allocation8 + $0xe8] sm:$0xff]  ;;  %v833_v2 = vld [vmem:[#allocation8 + $0x120] sm:$0xff] }
 0x10f   : > { %7024 = vmatmul.mubr.msk.bf16.vlgmr.msra.gmra.mrb[0].mxu1 %vm588_vm1, %v457_v27  ;;  %7025 = vmatprep.subr.msk.bf16.mxu0 %vm592_vm0, %v7018_v31  ;;  %v830_v5 = vld [vmem:[#allocation8 + $0x108] sm:$0xff]  ;;  %v7056_v7 = vcombine.high %v822_v62, %v826_v63  ;;  %v837_v9 = vld [vmem:[#allocation8 + $0x140] sm:$0xff]  ;;  %v7062_v11 = vcombine.high %v829_v1, %v833_v2  ;;  %v7055_v12 = vcombine.low %v822_v62, %v826_v63  ;;  %p8778_p10 = pnand %p8777_p4, %p8771_p0 }
 0x110   : > { %741 = vmatpush1.bf16.msra.mxu1 %v7011_v33  ;;  %772 = vmatprep.mubr.bf16.mxu1 %v8867_v0  ;;  %v7045_v0 = vcombine.low %v813_v51, %v817_v52  ;;  %v834_v6 = vld [vmem:[#allocation8 + $0x128] sm:$0xff]  ;;  %v841_v10 = vld [vmem:[#allocation8 + $0x160] sm:$0xff]  ;;  %v7061_v16 = vcombine.low %v829_v1, %v833_v2 }
 0x111   : > { %7027 = vmatprep.subr.msk.bf16.mxu1 %vm592_vm0, %v7020_v36  ;;  %v838_v13 = vld [vmem:[#allocation8 + $0x148] sm:$0xff]  ;;  %v7064_v15 = vcombine.high %v830_v5, %v834_v6  ;;  %v845_v17 = vld [vmem:[#allocation8 + $0x180] sm:$0xff]  ;;  %v7070_v19 = vcombine.high %v837_v9, %v841_v10  ;;  %v7063_v20 = vcombine.low %v830_v5, %v834_v6  ;;  %v7069_v24 = vcombine.low %v837_v9, %v841_v10 }
 0x112   : > { %702 = vmatpush1.bf16.msra.mxu0 %v606_v40  ;;  %v842_v14 = vld [vmem:[#allocation8 + $0x168] sm:$0xff]  ;;  %v849_v18 = vld [vmem:[#allocation8 + $0x1a0] sm:$0xff] }
 0x113   : > { %3911 = vmatprep.subr.bf16.mxu0 %v7030_v41  ;;  %v846_v21 = vld [vmem:[#allocation8 + $0x188] sm:$0xff]  ;;  %v7072_v23 = vcombine.high %v838_v13, %v842_v14  ;;  %v853_v25 = vld [vmem:[#allocation8 + $0x1c0] sm:$0xff]  ;;  %v7071_v28 = vcombine.low %v838_v13, %v842_v14  ;;  %v7077_v32 = vcombine.low %v845_v17, %v849_v18 }
 0x114   : > { %743 = vmatpush1.bf16.msra.mxu1 %v612_v44  ;;  %v850_v22 = vld [vmem:[#allocation8 + $0x1a8] sm:$0xff]  ;;  %v857_v26 = vld [vmem:[#allocation8 + $0x1e0] sm:$0xff] }
 0x115   : > { %7026 = vmatmul.mubr.msk.bf16.vlgmr.msra.gmra.mrb[4].mxu0 %vm588_vm1, %v457_v27  ;;  %4075 = vmatprep.subr.bf16.mxu1 %v7032_v45  ;;  %v854_v29 = vld [vmem:[#allocation8 + $0x1c8] sm:$0xff]  ;;  %v7080_v31 = vcombine.high %v846_v21, %v850_v22  ;;  %v861_v33 = vld [vmem:[#allocation8 + $0x200] sm:$0xff]  ;;  %v7086_v35 = vcombine.high %v853_v25, %v857_v26  ;;  %v7079_v36 = vcombine.low %v846_v21, %v850_v22 }
 0x116   : > { %3912 = vmatpush1.bf16.msra.mxu0 %v7029_v46  ;;  %v858_v30 = vld [vmem:[#allocation8 + $0x1e8] sm:$0xff]  ;;  %v865_v34 = vld [vmem:[#allocation8 + $0x220] sm:$0xff]  ;;  %v7085_v40 = vcombine.low %v853_v25, %v857_v26 }
 0x117   : > { %7028 = vmatmul.mubr.msk.bf16.vlgmr.msra.gmra.mrb[4].mxu1 %vm588_vm1, %v457_v27  ;;  %3913 = vmatprep.subr.bf16.mxu0 %v7038_v49  ;;  %v7078_v27 = vcombine.high %v845_v17, %v849_v18  ;;  %v862_v37 = vld [vmem:[#allocation8 + $0x208] sm:$0xff]  ;;  %v7088_v39 = vcombine.high %v854_v29, %v858_v30  ;;  %v869_v41 = vld [vmem:[#allocation8 + $0x240] sm:$0xff]  ;;  %v7094_v43 = vcombine.high %v861_v33, %v865_v34 }
 0x118   : > { %4076 = vmatpush1.bf16.msra.mxu1 %v7031_v50  ;;  %v866_v38 = vld [vmem:[#allocation8 + $0x228] sm:$0xff]  ;;  %v873_v42 = vld [vmem:[#allocation8 + $0x260] sm:$0xff]  ;;  %v7087_v44 = vcombine.low %v854_v29, %v858_v30  ;;  %v7093_v48 = vcombine.low %v861_v33, %v865_v34 }
 0x119   : > { %4077 = vmatprep.subr.bf16.mxu1 %v7040_v53  ;;  %v870_v45 = vld [vmem:[#allocation8 + $0x248] sm:$0xff]  ;;  %v7096_v47 = vcombine.high %v862_v37, %v866_v38  ;;  %v877_v49 = vld [vmem:[#allocation8 + $0x280] sm:$0xff]  ;;  %v7102_v51 = vcombine.high %v869_v41, %v873_v42  ;;  %v7095_v52 = vcombine.low %v862_v37, %v866_v38  ;;  %v7101_v56 = vcombine.low %v869_v41, %v873_v42 }
 0x11a   : > { %3914 = vmatpush1.bf16.msra.mxu0 %v7037_v54  ;;  %v874_v46 = vld [vmem:[#allocation8 + $0x268] sm:$0xff]  ;;  %v881_v50 = vld [vmem:[#allocation8 + $0x2a0] sm:$0xff] }
 0x11b   : > { %3915 = vmatprep.subr.bf16.mxu0 %v7046_v57  ;;  %v878_v53 = vld [vmem:[#allocation8 + $0x288] sm:$0xff]  ;;  %v7104_v55 = vcombine.high %v870_v45, %v874_v46  ;;  %v885_v57 = vld [vmem:[#allocation8 + $0x2c0] sm:$0xff]  ;;  %v7110_v59 = vcombine.high %v877_v49, %v881_v50  ;;  %v7103_v60 = vcombine.low %v870_v45, %v874_v46  ;;  %v476_v46 = vlaneseq }
 0x11c   : > { %4078 = vmatpush1.bf16.msra.mxu1 %v7039_v58  ;;  %v882_v54 = vld [vmem:[#allocation8 + $0x2a8] sm:$0xff]  ;;  %v889_v58 = vld [vmem:[#allocation8 + $0x2e0] sm:$0xff] }
 0x11d   : > { %4079 = vmatprep.subr.bf16.mxu1 %v7048_v61  ;;  %v886_v61 = vld [vmem:[#allocation8 + $0x2c8] sm:$0xff]  ;;  %v7112_v63 = vcombine.high %v878_v53, %v882_v54  ;;  %v893_v1 = vld [vmem:[#allocation8 + $0x300] sm:$0xff] }
 0x11e   : > { %3916 = vmatpush1.bf16.msra.mxu0 %v7045_v0  ;;  %v890_v62 = vld [vmem:[#allocation8 + $0x2e8] sm:$0xff]  ;;  %v7109_v0 = vcombine.low %v877_v49, %v881_v50  ;;  %v897_v2 = vld [vmem:[#allocation8 + $0x320] sm:$0xff]  ;;  %v9266_v49 = vld [vmem:[#allocation7] sm:$0xff] }
 0x11f   : > { %3917 = vmatprep.subr.bf16.mxu0 %v7054_v3  ;;  %v7118_v3 = vcombine.high %v885_v57, %v889_v58  ;;  %v894_v5 = vld [vmem:[#allocation8 + $0x308] sm:$0xff]  ;;  %v901_v9 = vld [vmem:[#allocation8 + $0x340] sm:$0xff] }
 0x120   : > { %4080 = vmatpush1.bf16.msra.mxu1 %v7047_v4  ;;  %v7111_v4 = vcombine.low %v878_v53, %v882_v54  ;;  %v898_v6 = vld [vmem:[#allocation8 + $0x328] sm:$0xff]  ;;  %v905_v10 = vld [vmem:[#allocation8 + $0x360] sm:$0xff] }
 0x121   : > { %4081 = vmatprep.subr.bf16.mxu1 %v7056_v7  ;;  %v7120_v7 = vcombine.high %v886_v61, %v890_v62  ;;  %v902_v13 = vld [vmem:[#allocation8 + $0x348] sm:$0xff]  ;;  %v7134_v17 = vcombine.high %v901_v9, %v905_v10  ;;  %v7127_v18 = vcombine.low %v894_v5, %v898_v6  ;;  %v909_v22 = vld [vmem:[#allocation8 + $0x380] sm:$0xff] }
 0x122   : > { %3918 = vmatpush1.bf16.msra.mxu0 %v7053_v8  ;;  %v7117_v8 = vcombine.low %v885_v57, %v889_v58  ;;  %v906_v14 = vld [vmem:[#allocation8 + $0x368] sm:$0xff]  ;;  %v917_v30 = vld [vmem:[#allocation8 + $0x3c0] sm:$0xff] }
 0x123   : > { %3919 = vmatprep.subr.bf16.mxu0 %v7062_v11  ;;  %v7126_v11 = vcombine.high %v893_v1, %v897_v2  ;;  %v7135_v21 = vcombine.low %v902_v13, %v906_v14  ;;  %v914_v26 = vld [vmem:[#allocation8 + $0x3a8] sm:$0xff]  ;;  %v925_v38 = vld [vmem:[#allocation8 + $0x400] sm:$0xff] }
 0x124   : > { %4082 = vmatpush1.bf16.msra.mxu1 %v7055_v12  ;;  %v7119_v12 = vcombine.low %v886_v61, %v890_v62  ;;  %v922_v34 = vld [vmem:[#allocation8 + $0x3e8] sm:$0xff] }
 0x125   : > { %4083 = vmatprep.subr.bf16.mxu1 %v7064_v15  ;;  %v7128_v15 = vcombine.high %v894_v5, %v898_v6  ;;  %v930_v42 = vld [vmem:[#allocation8 + $0x428] sm:$0xff] }
 0x126   : > { %3920 = vmatpush1.bf16.msra.mxu0 %v7061_v16  ;;  %v7125_v16 = vcombine.low %v893_v1, %v897_v2  ;;  %v937_v2 = vld [vmem:[#allocation8 + $0x460] sm:$0xff] }
 0x127   : > { %3921 = vmatprep.subr.bf16.mxu0 %v7070_v19  ;;  %v7136_v19 = vcombine.high %v902_v13, %v906_v14  ;;  %v941_v13 = vld [vmem:[#allocation8 + $0x480] sm:$0xff] }
 0x128   : > { %4084 = vmatpush1.bf16.msra.mxu1 %v7063_v20  ;;  %v7133_v20 = vcombine.low %v901_v9, %v905_v10  ;;  %v945_v14 = vld [vmem:[#allocation8 + $0x4a0] sm:$0xff] }
 0x129   : > { %4085 = vmatprep.subr.bf16.mxu1 %v7072_v23  ;;  %v913_v23 = vld [vmem:[#allocation8 + $0x3a0] sm:$0xff] }
 0x12a   : > { %3922 = vmatpush1.bf16.msra.mxu0 %v7069_v24  ;;  %v910_v24 = vld [vmem:[#allocation8 + $0x388] sm:$0xff]  ;;  %v7142_v25 = vcombine.high %v909_v22, %v913_v23 }
 0x12b   : > { %3923 = vmatprep.subr.bf16.mxu0 %v7078_v27  ;;  %v7141_v27 = vcombine.low %v909_v22, %v913_v23  ;;  %v7144_v29 = vcombine.high %v910_v24, %v914_v26  ;;  %v7174_v23 = vcombine.high %v941_v13, %v945_v14 }
 0x12c   : > { %4086 = vmatpush1.bf16.msra.mxu1 %v7071_v28  ;;  %v7143_v28 = vcombine.low %v910_v24, %v914_v26 }
 0x12d   : > { %4087 = vmatprep.subr.bf16.mxu1 %v7080_v31  ;;  %v921_v31 = vld [vmem:[#allocation8 + $0x3e0] sm:$0xff] }
 0x12e   : > { %3924 = vmatpush1.bf16.msra.mxu0 %v7077_v32  ;;  %v918_v32 = vld [vmem:[#allocation8 + $0x3c8] sm:$0xff]  ;;  %v7150_v33 = vcombine.high %v917_v30, %v921_v31 }
 0x12f   : > { %3925 = vmatprep.subr.bf16.mxu0 %v7086_v35  ;;  %v7149_v35 = vcombine.low %v917_v30, %v921_v31  ;;  %v7152_v37 = vcombine.high %v918_v32, %v922_v34  ;;  %v7173_v30 = vcombine.low %v941_v13, %v945_v14  ;;  %v994_v13 = vld [vmem:[#allocation8 + $0x628] sm:$0xff] }
 0x130   : > { %4088 = vmatpush1.bf16.msra.mxu1 %v7079_v36  ;;  %v7151_v36 = vcombine.low %v918_v32, %v922_v34  ;;  %v957_v34 = vld [vmem:[#allocation8 + $0x500] sm:$0xff] }
 0x131   : > { %4089 = vmatprep.subr.bf16.mxu1 %v7088_v39  ;;  %v929_v39 = vld [vmem:[#allocation8 + $0x420] sm:$0xff] }
 0x132   : > { %3926 = vmatpush1.bf16.msra.mxu0 %v7085_v40  ;;  %v926_v40 = vld [vmem:[#allocation8 + $0x408] sm:$0xff]  ;;  %v7158_v41 = vcombine.high %v925_v38, %v929_v39 }
 0x133   : > { %3927 = vmatprep.subr.bf16.mxu0 %v7094_v43  ;;  %v7157_v43 = vcombine.low %v925_v38, %v929_v39  ;;  %v7160_v45 = vcombine.high %v926_v40, %v930_v42 }
 0x134   : > { %4090 = vmatpush1.bf16.msra.mxu1 %v7087_v44  ;;  %v7159_v44 = vcombine.low %v926_v40, %v930_v42  ;;  %v965_v42 = vld [vmem:[#allocation8 + $0x540] sm:$0xff] }
 0x135   : > { %4091 = vmatprep.subr.bf16.mxu1 %v7096_v47  ;;  %v9261_v47 = vshrl.u32 %v476_v46, 7 }
 0x136   : > { %3928 = vmatpush1.bf16.msra.mxu0 %v7093_v48 }
 0x137   : > { %3929 = vmatprep.subr.bf16.mxu0 %v7102_v51  ;;  %v9264_v48 = vsub.s32 0, %v9261_v47  ;;  %v9269_v50 = vsub.s32 1, %v9261_v47  ;;  %v9272_v51 = vsub.s32 3, %v9261_v47 }
 0x138   : > { %4092 = vmatpush1.bf16.msra.mxu1 %v7095_v52 }
 0x139   : > { %4093 = vmatprep.subr.bf16.mxu1 %v7104_v55  ;;  %v479_v52 = vrot.slane %v9266_v49, %v9264_v48  ;;  %v483_v53 = vrot.slane %v9266_v49, %v9269_v50  ;;  %v491_v55 = vrot.slane %v9266_v49, %v9272_v51 }
 0x13a   : > { %3930 = vmatpush1.bf16.msra.mxu0 %v7101_v56 }
 0x13b   : > { %3931 = vmatprep.subr.bf16.mxu0 %v7110_v59 }
 0x13c   : > { %4094 = vmatpush1.bf16.msra.mxu1 %v7103_v60 }
 0x13d   : > { %4095 = vmatprep.subr.bf16.mxu1 %v7112_v63  ;;  %v933_v63 = vld [vmem:[#allocation8 + $0x440] sm:$0xff] }
 0x13e   : > { %3932 = vmatpush1.bf16.msra.mxu0 %v7109_v0 }
 0x13f   : > { %3933 = vmatprep.subr.bf16.mxu0 %v7118_v3  ;;  %v934_v3 = vld [vmem:[#allocation8 + $0x448] sm:$0xff] }
 0x140   : > { %4096 = vmatpush1.bf16.msra.mxu1 %v7111_v4  ;;  %v938_v4 = vld [vmem:[#allocation8 + $0x468] sm:$0xff] }
 0x141   : > { %4097 = vmatprep.subr.bf16.mxu1 %v7120_v7 }
 0x142   : > { %3934 = vmatpush1.bf16.msra.mxu0 %v7117_v8 }
 0x143   : > { %3935 = vmatprep.subr.bf16.mxu0 %v7126_v11  ;;  %v7166_v11 = vcombine.high %v933_v63, %v937_v2 }
 0x144   : > { %4098 = vmatpush1.bf16.msra.mxu1 %v7119_v12  ;;  %v7168_v12 = vcombine.high %v934_v3, %v938_v4 }
 0x145   : > { %4099 = vmatprep.subr.bf16.mxu1 %v7128_v15  ;;  %v942_v15 = vld [vmem:[#allocation8 + $0x488] sm:$0xff] }
 0x146   : > { %3936 = vmatpush1.bf16.msra.mxu0 %v7125_v16  ;;  %v946_v16 = vld [vmem:[#allocation8 + $0x4a8] sm:$0xff] }
 0x147   : > { %3937 = vmatprep.subr.bf16.mxu0 %v7134_v17  ;;  %v7176_v24 = vcombine.high %v942_v15, %v946_v16  ;;  %v7175_v31 = vcombine.low %v942_v15, %v946_v16 }
 0x148   : > { %4100 = vmatpush1.bf16.msra.mxu1 %v7127_v18 }
 0x149   : > { %4101 = vmatprep.subr.bf16.mxu1 %v7136_v19 }
 0x14a   : > { %3938 = vmatpush1.bf16.msra.mxu0 %v7133_v20  ;;  %v7165_v20 = vcombine.low %v933_v63, %v937_v2  ;;  %v982_v2 = vld [vmem:[#allocation8 + $0x5c8] sm:$0xff] }
 0x14b   : > { %3939 = vmatprep.subr.bf16.mxu0 %v7142_v25  ;;  %v949_v25 = vld [vmem:[#allocation8 + $0x4c0] sm:$0xff] }
 0x14c   : > { %4102 = vmatpush1.bf16.msra.mxu1 %v7135_v21  ;;  %v7167_v21 = vcombine.low %v934_v3, %v938_v4  ;;  %v986_v3 = vld [vmem:[#allocation8 + $0x5e8] sm:$0xff] }
 0x14d   : > { %4103 = vmatprep.subr.bf16.mxu1 %v7144_v29  ;;  %v954_v29 = vld [vmem:[#allocation8 + $0x4e8] sm:$0xff]  ;;  %v7215_v15 = vcombine.low %v982_v2, %v986_v3 }
 0x14e   : > { %3940 = vmatpush1.bf16.msra.mxu0 %v7141_v27  ;;  %v953_v27 = vld [vmem:[#allocation8 + $0x4e0] sm:$0xff] }
 0x14f   : > { %3941 = vmatprep.subr.bf16.mxu0 %v7150_v33  ;;  %v7182_v32 = vcombine.high %v949_v25, %v953_v27  ;;  %v7181_v38 = vcombine.low %v949_v25, %v953_v27 }
 0x150   : > { %4104 = vmatpush1.bf16.msra.mxu1 %v7143_v28  ;;  %v950_v28 = vld [vmem:[#allocation8 + $0x4c8] sm:$0xff] }
 0x151   : > { %4105 = vmatprep.subr.bf16.mxu1 %v7152_v37  ;;  %v7184_v33 = vcombine.high %v950_v28, %v954_v29  ;;  %v962_v37 = vld [vmem:[#allocation8 + $0x528] sm:$0xff]  ;;  %v7183_v39 = vcombine.low %v950_v28, %v954_v29  ;;  %v1005_v29 = vld [vmem:[#allocation8 + $0x680] sm:$0xff] }
 0x152   : > { %3942 = vmatpush1.bf16.msra.mxu0 %v7149_v35  ;;  %v961_v35 = vld [vmem:[#allocation8 + $0x520] sm:$0xff] }
 0x153   : > { %3952 = vmatprep.subr.bf16.mxu0 %v7158_v41  ;;  %v7190_v40 = vcombine.high %v957_v34, %v961_v35  ;;  %v7189_v46 = vcombine.low %v957_v34, %v961_v35 }
 0x154   : > { %4106 = vmatpush1.bf16.msra.mxu1 %v7151_v36  ;;  %v958_v36 = vld [vmem:[#allocation8 + $0x508] sm:$0xff] }
 0x155   : > { %4116 = vmatprep.subr.bf16.mxu1 %v7160_v45  ;;  %v7192_v41 = vcombine.high %v958_v36, %v962_v37  ;;  %v970_v45 = vld [vmem:[#allocation8 + $0x568] sm:$0xff] }
 0x1e0   : > { %v651_v54 = vpop.f32.mrb[0].mxu0 }
 0x1e1   : > { %v652_v56 = vadd.f32 %v651_v54, %v479_v52  ;;  %v653_v57 = vpop.f32.mrb[1].mxu0  ;;  %v7191_v52 = vcombine.low %v958_v36, %v962_v37  ;;  %v1013_v37 = vld [vmem:[#allocation8 + $0x6c0] sm:$0xff] }
 0x1e2   : > { %v654_v58 = vadd.f32 %v653_v57, %v483_v53  ;;  %v655_v59 = vpop.f32.mrb[2].mxu0  ;;  %v9280_v60 = vpop.f32.mrb[0].mxu1  ;;  %v974_v57 = vld [vmem:[#allocation8 + $0x588] sm:$0xff] }
 0x1e3   : > { %v781_v61 = vmax.f32 %v652_v56, 0.0  ;;  %v656_v62 = vpop.f32.mrb[3].mxu0  ;;  %v694_v0 = vpop.f32.mrb[1].mxu1  ;;  %v977_v56 = vld [vmem:[#allocation8 + $0x5a0] sm:$0xff] }
 0x1e4   : > { %v782_v1 = vmax.f32 %v654_v58, 0.0  ;;  %v695_v5 = vadd.f32 %v694_v0, %v491_v55  ;;  %v696_v6 = vpop.f32.mrb[2].mxu1  ;;  %v973_v55 = vld [vmem:[#allocation8 + $0x580] sm:$0xff]  ;;  %v978_v58 = vld [vmem:[#allocation8 + $0x5a8] sm:$0xff] }
 0x1e5   : > { %v697_v7 = vpop.f32.mrb[3].mxu1  ;;  %v9284_v10 = vpack.c.bf16 %v781_v61, %v781_v61  ;;  %v7206_v62 = vcombine.high %v973_v55, %v977_v56  ;;  %v7208_v63 = vcombine.high %v974_v57, %v978_v58  ;;  %v981_v0 = vld [vmem:[#allocation8 + $0x5c0] sm:$0xff]  ;;  %v7205_v4 = vcombine.low %v973_v55, %v977_v56 }
 0x1e6   : > { %v9282_v8 = vpack.c.bf16 %v782_v1, %v782_v1  ;;  %v784_v9 = vmax.f32 %v695_v5, 0.0  ;;  %v985_v1 = vld [vmem:[#allocation8 + $0x5e0] sm:$0xff]  ;;  %v7207_v5 = vcombine.low %v974_v57, %v978_v58  ;;  %v7216_v7 = vcombine.high %v982_v2, %v986_v3 }
 0x1e7   : > { %v7214_v6 = vcombine.high %v981_v0, %v985_v1  ;;  %v7213_v14 = vcombine.low %v981_v0, %v985_v1  ;;  %v1029_v58 = vld [vmem:[#allocation8 + $0x740] sm:$0xff] }
 0x1e8   : > { %3943 = vmatprep.mubr.bf16.mxu0 %v9282_v8  ;;  %4107 = vmatprep.mubr.bf16.mxu1 %v9282_v8  ;;  %v9288_v17 = vpack.c.bf16 %v784_v9, %v784_v9  ;;  %v9290_v18 = vpop.f32.mrb[4].mxu0  ;;  %v989_v9 = vld [vmem:[#allocation8 + $0x600] sm:$0xff] }
 0x1e9   : > { %3944 = vmatmul.mubr.bf16.vlgmr.msra.gmra.mrb[8].mxu0 %v9284_v10  ;;  %4108 = vmatmul.mubr.bf16.vlgmr.msra.gmra.mrb[8].mxu1 %v9284_v10  ;;  %v9294_v19 = vpop.f32.mrb[5].mxu0 }
 0x1ea   : > { %3953 = vmatpush1.bf16.msra.mxu0 %v7157_v43  ;;  %4117 = vmatpush1.bf16.msra.mxu1 %v7159_v44  ;;  %v737_v22 = vpop.f32.mrb[6].mxu0  ;;  %v969_v43 = vld [vmem:[#allocation8 + $0x560] sm:$0xff]  ;;  %v966_v44 = vld [vmem:[#allocation8 + $0x548] sm:$0xff]  ;;  %v9301_v2 = vpop.f32.mrb[4].mxu1 }
 0x1eb   : > { %3954 = vmatprep.subr.bf16.mxu0 %v7166_v11  ;;  %4118 = vmatprep.subr.bf16.mxu1 %v7168_v12  ;;  %v738_v26 = vpop.f32.mrb[7].mxu0  ;;  %v7198_v53 = vcombine.high %v965_v42, %v969_v43  ;;  %v7200_v54 = vcombine.high %v966_v44, %v970_v45  ;;  %v7197_v59 = vcombine.low %v965_v42, %v969_v43  ;;  %v993_v11 = vld [vmem:[#allocation8 + $0x620] sm:$0xff]  ;;  %v990_v12 = vld [vmem:[#allocation8 + $0x608] sm:$0xff] }
 0x1ec   : > { %3984 = vmatprep.mubr.bf16.mxu0 %v9288_v17  ;;  %4148 = vmatprep.mubr.bf16.mxu1 %v9288_v17  ;;  %v7199_v61 = vcombine.low %v966_v44, %v970_v45  ;;  %v7222_v16 = vcombine.high %v989_v9, %v993_v11  ;;  %v1001_v22 = vld [vmem:[#allocation8 + $0x660] sm:$0xff]  ;;  %v7221_v25 = vcombine.low %v989_v9, %v993_v11  ;;  %v1038_v9 = vld [vmem:[#allocation8 + $0x788] sm:$0xff] }
 0x1ed   : > { %v7223_v26 = vcombine.low %v990_v12, %v994_v13  ;;  %v1021_v45 = vld [vmem:[#allocation8 + $0x700] sm:$0xff]  ;;  %v1042_v11 = vld [vmem:[#allocation8 + $0x7a8] sm:$0xff] }
 0x1ee   : > { %3955 = vmatpush1.bf16.msra.mxu0 %v7165_v20  ;;  %4119 = vmatpush1.bf16.msra.mxu1 %v7167_v21  ;;  %v7224_v20 = vcombine.high %v990_v12, %v994_v13  ;;  %v997_v21 = vld [vmem:[#allocation8 + $0x640] sm:$0xff]  ;;  %v498_v12 = vsub.s32 5, %v9261_v47 }
 0x1ef   : > { %3956 = vmatprep.subr.bf16.mxu0 %v7174_v23  ;;  %4120 = vmatprep.subr.bf16.mxu1 %v7176_v24  ;;  %v998_v23 = vld [vmem:[#allocation8 + $0x648] sm:$0xff]  ;;  %v7230_v27 = vcombine.high %v997_v21, %v1001_v22 }
 0x1f0   : > { %v1002_v24 = vld [vmem:[#allocation8 + $0x668] sm:$0xff] }
 0x1f1   : > { %v7232_v28 = vcombine.high %v998_v23, %v1002_v24  ;;  %v7231_v34 = vcombine.low %v998_v23, %v1002_v24  ;;  %v1045_v23 = vld [vmem:[#allocation8 + $0x7c0] sm:$0xff] }
 0x1f2   : > { %3957 = vmatpush1.bf16.msra.mxu0 %v7173_v30  ;;  %4121 = vmatpush1.bf16.msra.mxu1 %v7175_v31  ;;  %v1009_v30 = vld [vmem:[#allocation8 + $0x6a0] sm:$0xff]  ;;  %v1006_v31 = vld [vmem:[#allocation8 + $0x688] sm:$0xff] }
 0x1f3   : > { %3958 = vmatprep.subr.bf16.mxu0 %v7182_v32  ;;  %4122 = vmatprep.subr.bf16.mxu1 %v7184_v33  ;;  %v1010_v32 = vld [vmem:[#allocation8 + $0x6a8] sm:$0xff]  ;;  %v7229_v33 = vcombine.low %v997_v21, %v1001_v22  ;;  %v7238_v35 = vcombine.high %v1005_v29, %v1009_v30  ;;  %v7272_v22 = vcombine.high %v1038_v9, %v1042_v11  ;;  %v1049_v24 = vld [vmem:[#allocation8 + $0x7e0] sm:$0xff] }
 0x1f4   : > { %v7240_v36 = vcombine.high %v1006_v31, %v1010_v32  ;;  %v7239_v42 = vcombine.low %v1006_v31, %v1010_v32  ;;  %v7278_v31 = vcombine.high %v1045_v23, %v1049_v24 }
 0x1f6   : > { %3959 = vmatpush1.bf16.msra.mxu0 %v7181_v38  ;;  %4123 = vmatpush1.bf16.msra.mxu1 %v7183_v39  ;;  %v1017_v38 = vld [vmem:[#allocation8 + $0x6e0] sm:$0xff]  ;;  %v1014_v39 = vld [vmem:[#allocation8 + $0x6c8] sm:$0xff] }
 0x1f7   : > { %3960 = vmatprep.subr.bf16.mxu0 %v7190_v40  ;;  %4124 = vmatprep.subr.bf16.mxu1 %v7192_v41  ;;  %v1018_v40 = vld [vmem:[#allocation8 + $0x6e8] sm:$0xff]  ;;  %v7237_v41 = vcombine.low %v1005_v29, %v1009_v30  ;;  %v7246_v43 = vcombine.high %v1013_v37, %v1017_v38  ;;  %v7271_v30 = vcombine.low %v1038_v9, %v1042_v11 }
 0x1f8   : > { %v7248_v44 = vcombine.high %v1014_v39, %v1018_v40  ;;  %v7247_v55 = vcombine.low %v1014_v39, %v1018_v40  ;;  %v7277_v39 = vcombine.low %v1045_v23, %v1049_v24  ;;  %v1082_v9 = vld [vmem:[#allocation8 + $0x8e8] sm:$0xff] }
 0x1fa   : > { %3961 = vmatpush1.bf16.msra.mxu0 %v7189_v46  ;;  %4125 = vmatpush1.bf16.msra.mxu1 %v7191_v52  ;;  %v1025_v46 = vld [vmem:[#allocation8 + $0x720] sm:$0xff]  ;;  %v1022_v52 = vld [vmem:[#allocation8 + $0x708] sm:$0xff] }
 0x1fb   : > { %3962 = vmatprep.subr.bf16.mxu0 %v7198_v53  ;;  %4126 = vmatprep.subr.bf16.mxu1 %v7200_v54  ;;  %v1026_v53 = vld [vmem:[#allocation8 + $0x728] sm:$0xff]  ;;  %v7245_v54 = vcombine.low %v1013_v37, %v1017_v38  ;;  %v7254_v56 = vcombine.high %v1021_v45, %v1025_v46  ;;  %v7253_v0 = vcombine.low %v1021_v45, %v1025_v46 }
 0x1fc   : > { %v7256_v57 = vcombine.high %v1022_v52, %v1026_v53  ;;  %v7255_v1 = vcombine.low %v1022_v52, %v1026_v53  ;;  %v1066_v45 = vld [vmem:[#allocation8 + $0x868] sm:$0xff] }
 0x1fe   : > { %3963 = vmatpush1.bf16.msra.mxu0 %v7197_v59  ;;  %4127 = vmatpush1.bf16.msra.mxu1 %v7199_v61  ;;  %v1033_v59 = vld [vmem:[#allocation8 + $0x760] sm:$0xff]  ;;  %v1030_v61 = vld [vmem:[#allocation8 + $0x748] sm:$0xff] }
 0x1ff   : > { %3964 = vmatprep.subr.bf16.mxu0 %v7206_v62  ;;  %4128 = vmatprep.subr.bf16.mxu1 %v7208_v63  ;;  %v1034_v62 = vld [vmem:[#allocation8 + $0x768] sm:$0xff]  ;;  %v9299_v63 = vsub.s32 2, %v9261_v47  ;;  %v7262_v3 = vcombine.high %v1029_v58, %v1033_v59 }
 0x202   : > { %3965 = vmatpush1.bf16.msra.mxu0 %v7205_v4  ;;  %4129 = vmatpush1.bf16.msra.mxu1 %v7207_v5  ;;  %v7264_v4 = vcombine.high %v1030_v61, %v1034_v62  ;;  %v1037_v5 = vld [vmem:[#allocation8 + $0x780] sm:$0xff] }
 0x203   : > { %3966 = vmatprep.subr.bf16.mxu0 %v7214_v6  ;;  %4130 = vmatprep.subr.bf16.mxu1 %v7216_v7  ;;  %v9303_v6 = vpop.f32.mrb[5].mxu1  ;;  %v1041_v7 = vld [vmem:[#allocation8 + $0x7a0] sm:$0xff] }
 0x204   : > { %v778_v13 = vpop.f32.mrb[6].mxu1  ;;  %v7270_v21 = vcombine.high %v1037_v5, %v1041_v7  ;;  %v7269_v29 = vcombine.low %v1037_v5, %v1041_v7  ;;  %v1081_v5 = vld [vmem:[#allocation8 + $0x8e0] sm:$0xff]  ;;  %v1078_v7 = vld [vmem:[#allocation8 + $0x8c8] sm:$0xff] }
 0x205   : > { %v7311_v24 = vcombine.low %v1078_v7, %v1082_v9 }
 0x206   : > { %3967 = vmatpush1.bf16.msra.mxu0 %v7213_v14  ;;  %4131 = vmatpush1.bf16.msra.mxu1 %v7215_v15  ;;  %v487_v14 = vrot.slane %v9266_v49, %v9299_v63  ;;  %v779_v15 = vpop.f32.mrb[7].mxu1 }
 0x207   : > { %3968 = vmatprep.subr.bf16.mxu0 %v7222_v16  ;;  %4132 = vmatprep.subr.bf16.mxu1 %v7224_v20  ;;  %v7261_v16 = vcombine.low %v1029_v58, %v1033_v59  ;;  %v7263_v20 = vcombine.low %v1030_v61, %v1034_v62  ;;  %v1070_v58 = vld [vmem:[#allocation8 + $0x888] sm:$0xff]  ;;  %v7312_v15 = vcombine.high %v1078_v7, %v1082_v9 }
 0x208   : > { %v1074_v59 = vld [vmem:[#allocation8 + $0x8a8] sm:$0xff] }
 0x209   : > { %v7303_v13 = vcombine.low %v1070_v58, %v1074_v59  ;;  %v1130_v7 = vld [vmem:[#allocation8 + $0xa68] sm:$0xff] }
 0x20a   : > { %3969 = vmatpush1.bf16.msra.mxu0 %v7221_v25  ;;  %4133 = vmatpush1.bf16.msra.mxu1 %v7223_v26  ;;  %v1046_v25 = vld [vmem:[#allocation8 + $0x7c8] sm:$0xff] }
 0x20b   : > { %3970 = vmatprep.subr.bf16.mxu0 %v7230_v27  ;;  %4134 = vmatprep.subr.bf16.mxu1 %v7232_v28  ;;  %v1050_v26 = vld [vmem:[#allocation8 + $0x7e8] sm:$0xff]  ;;  %v499_v27 = vrot.slane %v9266_v49, %v498_v12  ;;  %v693_v28 = vadd.f32 %v9280_v60, %v487_v14 }
 0x20c   : > { %v7280_v32 = vcombine.high %v1046_v25, %v1050_v26  ;;  %v7279_v40 = vcombine.low %v1046_v25, %v1050_v26 }
 0x20d   : > { %v736_v37 = vadd.f32 %v9294_v19, %v499_v27  ;;  %v783_v38 = vmax.f32 %v693_v28, 0.0  ;;  %v1093_v27 = vld [vmem:[#allocation8 + $0x940] sm:$0xff] }
 0x20e   : > { %3971 = vmatpush1.bf16.msra.mxu0 %v7229_v33  ;;  %4135 = vmatpush1.bf16.msra.mxu1 %v7231_v34  ;;  %v1053_v33 = vld [vmem:[#allocation8 + $0x800] sm:$0xff] }
 0x20f   : > { %3972 = vmatprep.subr.bf16.mxu0 %v7238_v35  ;;  %4136 = vmatprep.subr.bf16.mxu1 %v7240_v36  ;;  %v1057_v34 = vld [vmem:[#allocation8 + $0x820] sm:$0xff]  ;;  %v1054_v35 = vld [vmem:[#allocation8 + $0x808] sm:$0xff]  ;;  %v786_v46 = vmax.f32 %v736_v37, 0.0  ;;  %v9313_v52 = vpack.c.bf16 %v783_v38, %v783_v38 }
 0x210   : > { %v1058_v36 = vld [vmem:[#allocation8 + $0x828] sm:$0xff]  ;;  %v7286_v60 = vcombine.high %v1053_v33, %v1057_v34  ;;  %v7285_v53 = vcombine.low %v1053_v33, %v1057_v34  ;;  %v1097_v28 = vld [vmem:[#allocation8 + $0x960] sm:$0xff] }
 0x211   : > { %v7287_v19 = vcombine.low %v1054_v35, %v1058_v36  ;;  %v9315_v61 = vpack.c.bf16 %v786_v46, %v786_v46  ;;  %v7326_v33 = vcombine.high %v1093_v27, %v1097_v28  ;;  %v1102_v37 = vld [vmem:[#allocation8 + $0x988] sm:$0xff] }
 0x212   : > { %3973 = vmatpush1.bf16.msra.mxu0 %v7237_v41  ;;  %4137 = vmatpush1.bf16.msra.mxu1 %v7239_v42  ;;  %v7288_v41 = vcombine.high %v1054_v35, %v1058_v36  ;;  %v1061_v42 = vld [vmem:[#allocation8 + $0x840] sm:$0xff]  ;;  %v1106_v38 = vld [vmem:[#allocation8 + $0x9a8] sm:$0xff] }
 0x213   : > { %3974 = vmatprep.subr.bf16.mxu0 %v7246_v43  ;;  %4138 = vmatprep.subr.bf16.mxu1 %v7248_v44  ;;  %v1065_v43 = vld [vmem:[#allocation8 + $0x860] sm:$0xff]  ;;  %v1062_v44 = vld [vmem:[#allocation8 + $0x848] sm:$0xff] }
 0x214   : > { %v7293_v62 = vcombine.low %v1061_v42, %v1065_v43  ;;  %v1101_v35 = vld [vmem:[#allocation8 + $0x980] sm:$0xff] }
 0x215   : > { %v1105_v36 = vld [vmem:[#allocation8 + $0x9a0] sm:$0xff] }
 0x216   : > { %3975 = vmatpush1.bf16.msra.mxu0 %v7245_v54  ;;  %4139 = vmatpush1.bf16.msra.mxu1 %v7247_v55  ;;  %v7294_v54 = vcombine.high %v1061_v42, %v1065_v43  ;;  %v7296_v55 = vcombine.high %v1062_v44, %v1066_v45  ;;  %v1109_v42 = vld [vmem:[#allocation8 + $0x9c0] sm:$0xff]  ;;  %v7333_v46 = vcombine.low %v1101_v35, %v1105_v36 }
 0x217   : > { %3976 = vmatprep.subr.bf16.mxu0 %v7254_v56  ;;  %4140 = vmatprep.subr.bf16.mxu1 %v7256_v57  ;;  %v1069_v56 = vld [vmem:[#allocation8 + $0x880] sm:$0xff] }
 0x218   : > { %v1073_v57 = vld [vmem:[#allocation8 + $0x8a0] sm:$0xff] }
 0x219   : > { %v7301_v11 = vcombine.low %v1069_v56, %v1073_v57  ;;  %v1113_v43 = vld [vmem:[#allocation8 + $0x9e0] sm:$0xff] }
 0x21a   : > { %3977 = vmatpush1.bf16.msra.mxu0 %v7253_v0  ;;  %4141 = vmatpush1.bf16.msra.mxu1 %v7255_v1  ;;  %v7295_v0 = vcombine.low %v1062_v44, %v1066_v45  ;;  %v7302_v1 = vcombine.high %v1069_v56, %v1073_v57  ;;  %v1110_v44 = vld [vmem:[#allocation8 + $0x9c8] sm:$0xff]  ;;  %v1121_v56 = vld [vmem:[#allocation8 + $0xa20] sm:$0xff] }
 0x21b   : > { %3978 = vmatprep.subr.bf16.mxu0 %v7262_v3  ;;  %4142 = vmatprep.subr.bf16.mxu1 %v7264_v4  ;;  %v7304_v3 = vcombine.high %v1070_v58, %v1074_v59  ;;  %v1077_v4 = vld [vmem:[#allocation8 + $0x8c0] sm:$0xff]  ;;  %v1114_v45 = vld [vmem:[#allocation8 + $0x9e8] sm:$0xff]  ;;  %v7341_v59 = vcombine.low %v1109_v42, %v1113_v43 }
 0x21c   : > { %v7310_v14 = vcombine.high %v1077_v4, %v1081_v5  ;;  %v7309_v23 = vcombine.low %v1077_v4, %v1081_v5  ;;  %v1118_v57 = vld [vmem:[#allocation8 + $0xa08] sm:$0xff]  ;;  %v1129_v4 = vld [vmem:[#allocation8 + $0xa60] sm:$0xff] }
 0x21d   : > { %v1122_v58 = vld [vmem:[#allocation8 + $0xa28] sm:$0xff] }
 0x21e   : > { %3979 = vmatpush1.bf16.msra.mxu0 %v7261_v16  ;;  %4143 = vmatpush1.bf16.msra.mxu1 %v7263_v20  ;;  %v1085_v16 = vld [vmem:[#allocation8 + $0x900] sm:$0xff]  ;;  %v1126_v5 = vld [vmem:[#allocation8 + $0xa48] sm:$0xff] }
 0x21f   : > { %3980 = vmatprep.subr.bf16.mxu0 %v7270_v21  ;;  %4144 = vmatprep.subr.bf16.mxu1 %v7272_v22  ;;  %v1089_v20 = vld [vmem:[#allocation8 + $0x920] sm:$0xff]  ;;  %v1086_v21 = vld [vmem:[#allocation8 + $0x908] sm:$0xff] }
 0x220   : > { %v1090_v22 = vld [vmem:[#allocation8 + $0x928] sm:$0xff]  ;;  %v7318_v25 = vcombine.high %v1085_v16, %v1089_v20 }
 0x221   : > { %v7320_v26 = vcombine.high %v1086_v21, %v1090_v22 }
 0x222   : > { %3981 = vmatpush1.bf16.msra.mxu0 %v7269_v29  ;;  %4145 = vmatpush1.bf16.msra.mxu1 %v7271_v30  ;;  %v1094_v29 = vld [vmem:[#allocation8 + $0x948] sm:$0xff] }
 0x223   : > { %3982 = vmatprep.subr.bf16.mxu0 %v7278_v31  ;;  %4146 = vmatprep.subr.bf16.mxu1 %v7280_v32  ;;  %v1098_v30 = vld [vmem:[#allocation8 + $0x968] sm:$0xff]  ;;  %v7317_v31 = vcombine.low %v1085_v16, %v1089_v20  ;;  %v7319_v32 = vcombine.low %v1086_v21, %v1090_v22  ;;  %v1137_v16 = vld [vmem:[#allocation8 + $0xaa0] sm:$0xff] }
 0x224   : > { %v7328_v34 = vcombine.high %v1094_v29, %v1098_v30  ;;  %v1134_v20 = vld [vmem:[#allocation8 + $0xa88] sm:$0xff] }
 0x225   : > { %v1138_v21 = vld [vmem:[#allocation8 + $0xaa8] sm:$0xff] }
 0x226   : > { %3983 = vmatpush1.bf16.msra.mxu0 %v7277_v39  ;;  %4147 = vmatpush1.bf16.msra.mxu1 %v7279_v40  ;;  %v7325_v39 = vcombine.low %v1093_v27, %v1097_v28  ;;  %v7327_v40 = vcombine.low %v1094_v29, %v1098_v30  ;;  %v1145_v27 = vld [vmem:[#allocation8 + $0xae0] sm:$0xff]  ;;  %v1142_v28 = vld [vmem:[#allocation8 + $0xac8] sm:$0xff] }
 0x227   : > { %3993 = vmatprep.subr.bf16.mxu0 %v7286_v60  ;;  %4157 = vmatprep.subr.bf16.mxu1 %v7288_v41  ;;  %v7334_v60 = vcombine.high %v1101_v35, %v1105_v36  ;;  %v7336_v41 = vcombine.high %v1102_v37, %v1106_v38  ;;  %v1146_v29 = vld [vmem:[#allocation8 + $0xae8] sm:$0xff]  ;;  %v1153_v35 = vld [vmem:[#allocation8 + $0xb20] sm:$0xff] }
 0x228   : > { %v1150_v36 = vld [vmem:[#allocation8 + $0xb08] sm:$0xff] }
 0x229   : > { %3985 = vmatmul.mubr.bf16.vlgmr.msra.gmra.mrb[8].mxu0 %v9313_v52  ;;  %4149 = vmatmul.mubr.bf16.vlgmr.msra.gmra.mrb[8].mxu1 %v9313_v52 }
 0x22a   : > { %3994 = vmatpush1.bf16.msra.mxu0 %v7285_v53  ;;  %4158 = vmatpush1.bf16.msra.mxu1 %v7287_v19  ;;  %v7335_v53 = vcombine.low %v1102_v37, %v1106_v38  ;;  %v7342_v19 = vcombine.high %v1109_v42, %v1113_v43  ;;  %v1154_v37 = vld [vmem:[#allocation8 + $0xb28] sm:$0xff]  ;;  %v1161_v42 = vld [vmem:[#allocation8 + $0xb60] sm:$0xff] }
 0x22b   : > { %3995 = vmatprep.subr.bf16.mxu0 %v7294_v54  ;;  %4159 = vmatprep.subr.bf16.mxu1 %v7296_v55  ;;  %v7344_v54 = vcombine.high %v1110_v44, %v1114_v45  ;;  %v1117_v55 = vld [vmem:[#allocation8 + $0xa00] sm:$0xff]  ;;  %v1158_v43 = vld [vmem:[#allocation8 + $0xb48] sm:$0xff] }
 0x22c   : > { %4025 = vmatprep.mubr.bf16.mxu0 %v9315_v61  ;;  %4189 = vmatprep.mubr.bf16.mxu1 %v9315_v61  ;;  %v7349_v9 = vcombine.low %v1117_v55, %v1121_v56 }
 0x22e   : > { %3996 = vmatpush1.bf16.msra.mxu0 %v7293_v62  ;;  %4160 = vmatpush1.bf16.msra.mxu1 %v7295_v0  ;;  %v7343_v62 = vcombine.low %v1110_v44, %v1114_v45  ;;  %v7350_v0 = vcombine.high %v1117_v55, %v1121_v56  ;;  %v1162_v44 = vld [vmem:[#allocation8 + $0xb68] sm:$0xff]  ;;  %v494_v45 = vsub.s32 4, %v9261_v47  ;;  %v1165_v55 = vld [vmem:[#allocation8 + $0xb80] sm:$0xff] }
 0x22f   : > { %3997 = vmatprep.subr.bf16.mxu0 %v7302_v1  ;;  %4161 = vmatprep.subr.bf16.mxu1 %v7304_v3  ;;  %v7352_v1 = vcombine.high %v1118_v57, %v1122_v58  ;;  %v1125_v3 = vld [vmem:[#allocation8 + $0xa40] sm:$0xff] }
 0x230   : > { %v7357_v22 = vcombine.low %v1125_v3, %v1129_v4  ;;  %v1169_v56 = vld [vmem:[#allocation8 + $0xba0] sm:$0xff] }
 0x232   : > { %3998 = vmatpush1.bf16.msra.mxu0 %v7301_v11  ;;  %4162 = vmatpush1.bf16.msra.mxu1 %v7303_v13  ;;  %v7351_v11 = vcombine.low %v1118_v57, %v1122_v58  ;;  %v7358_v13 = vcombine.high %v1125_v3, %v1129_v4  ;;  %v1166_v57 = vld [vmem:[#allocation8 + $0xb88] sm:$0xff]  ;;  %v7398_v3 = vcombine.high %v1165_v55, %v1169_v56 }
 0x233   : > { %3999 = vmatprep.subr.bf16.mxu0 %v7310_v14  ;;  %4163 = vmatprep.subr.bf16.mxu1 %v7312_v15  ;;  %v7360_v14 = vcombine.high %v1126_v5, %v1130_v7  ;;  %v1133_v15 = vld [vmem:[#allocation8 + $0xa80] sm:$0xff]  ;;  %v1170_v58 = vld [vmem:[#allocation8 + $0xba8] sm:$0xff] }
 0x234   : > { %v7365_v30 = vcombine.low %v1133_v15, %v1137_v16  ;;  %v7400_v4 = vcombine.high %v1166_v57, %v1170_v58 }
 0x236   : > { %4000 = vmatpush1.bf16.msra.mxu0 %v7309_v23  ;;  %4164 = vmatpush1.bf16.msra.mxu1 %v7311_v24  ;;  %v7359_v23 = vcombine.low %v1126_v5, %v1130_v7  ;;  %v7366_v24 = vcombine.high %v1133_v15, %v1137_v16  ;;  %v1173_v5 = vld [vmem:[#allocation8 + $0xbc0] sm:$0xff]  ;;  %v7397_v15 = vcombine.low %v1165_v55, %v1169_v56  ;;  %v1206_v55 = vld [vmem:[#allocation8 + $0xcc8] sm:$0xff] }
 0x237   : > { %4001 = vmatprep.subr.bf16.mxu0 %v7318_v25  ;;  %4165 = vmatprep.subr.bf16.mxu1 %v7320_v26  ;;  %v7368_v25 = vcombine.high %v1134_v20, %v1138_v21  ;;  %v1141_v26 = vld [vmem:[#allocation8 + $0xac0] sm:$0xff]  ;;  %v7399_v16 = vcombine.low %v1166_v57, %v1170_v58  ;;  %v1210_v56 = vld [vmem:[#allocation8 + $0xce8] sm:$0xff] }
 0x238   : > { %v7373_v38 = vcombine.low %v1141_v26, %v1145_v27  ;;  %v1177_v7 = vld [vmem:[#allocation8 + $0xbe0] sm:$0xff] }
 0x23a   : > { %4002 = vmatpush1.bf16.msra.mxu0 %v7317_v31  ;;  %4166 = vmatpush1.bf16.msra.mxu1 %v7319_v32  ;;  %v7367_v31 = vcombine.low %v1134_v20, %v1138_v21  ;;  %v7374_v32 = vcombine.high %v1141_v26, %v1145_v27  ;;  %v7406_v20 = vcombine.high %v1173_v5, %v1177_v7 }
 0x23b   : > { %4003 = vmatprep.subr.bf16.mxu0 %v7326_v33  ;;  %4167 = vmatprep.subr.bf16.mxu1 %v7328_v34  ;;  %v7376_v33 = vcombine.high %v1142_v28, %v1146_v29  ;;  %v1149_v34 = vld [vmem:[#allocation8 + $0xb00] sm:$0xff] }
 0x23e   : > { %4004 = vmatpush1.bf16.msra.mxu0 %v7325_v39  ;;  %4168 = vmatpush1.bf16.msra.mxu1 %v7327_v40  ;;  %v7375_v39 = vcombine.low %v1142_v28, %v1146_v29  ;;  %v7382_v40 = vcombine.high %v1149_v34, %v1153_v35 }
 0x23f   : > { %4005 = vmatprep.subr.bf16.mxu0 %v7334_v60  ;;  %4169 = vmatprep.subr.bf16.mxu1 %v7336_v41  ;;  %v7384_v60 = vcombine.high %v1150_v36, %v1154_v37  ;;  %v1157_v41 = vld [vmem:[#allocation8 + $0xb40] sm:$0xff] }
 0x242   : > { %4006 = vmatpush1.bf16.msra.mxu0 %v7333_v46  ;;  %4170 = vmatpush1.bf16.msra.mxu1 %v7335_v53  ;;  %v7381_v46 = vcombine.low %v1149_v34, %v1153_v35  ;;  %v7383_v53 = vcombine.low %v1150_v36, %v1154_v37 }
 0x243   : > { %4007 = vmatprep.subr.bf16.mxu0 %v7342_v19  ;;  %4171 = vmatprep.subr.bf16.mxu1 %v7344_v54  ;;  %v7390_v19 = vcombine.high %v1157_v41, %v1161_v42  ;;  %v7392_v54 = vcombine.high %v1158_v43, %v1162_v44 }
 0x246   : > { %4008 = vmatpush1.bf16.msra.mxu0 %v7341_v59  ;;  %4172 = vmatpush1.bf16.msra.mxu1 %v7343_v62  ;;  %v506_v59 = vsub.s32 7, %v9261_v47  ;;  %v495_v62 = vrot.slane %v9266_v49, %v494_v45 }
 0x247   : > { %4009 = vmatprep.subr.bf16.mxu0 %v7350_v0  ;;  %4173 = vmatprep.subr.bf16.mxu1 %v7352_v1  ;;  %v7389_v0 = vcombine.low %v1157_v41, %v1161_v42  ;;  %v7391_v1 = vcombine.low %v1158_v43, %v1162_v44  ;;  %v1202_v41 = vld [vmem:[#allocation8 + $0xca8] sm:$0xff] }
 0x24a   : > { %4010 = vmatpush1.bf16.msra.mxu0 %v7349_v9  ;;  %4174 = vmatpush1.bf16.msra.mxu1 %v7351_v11  ;;  %v1174_v9 = vld [vmem:[#allocation8 + $0xbc8] sm:$0xff] }
 0x24b   : > { %4011 = vmatprep.subr.bf16.mxu0 %v7358_v13  ;;  %4175 = vmatprep.subr.bf16.mxu1 %v7360_v14  ;;  %v1178_v11 = vld [vmem:[#allocation8 + $0xbe8] sm:$0xff]  ;;  %v507_v13 = vrot.slane %v9266_v49, %v506_v59  ;;  %v734_v14 = vadd.f32 %v9290_v18, %v495_v62  ;;  %v7405_v49 = vcombine.low %v1173_v5, %v1177_v7 }
 0x24c   : > { %v7408_v21 = vcombine.high %v1174_v9, %v1178_v11  ;;  %v7407_v28 = vcombine.low %v1174_v9, %v1178_v11  ;;  %v1218_v5 = vld [vmem:[#allocation8 + $0xd28] sm:$0xff]  ;;  %v7439_v9 = vcombine.low %v1206_v55, %v1210_v56 }
 0x24d   : > { %v777_v26 = vadd.f32 %v9303_v6, %v507_v13  ;;  %v785_v27 = vmax.f32 %v734_v14, 0.0  ;;  %v1221_v14 = vld [vmem:[#allocation8 + $0xd40] sm:$0xff] }
 0x24e   : > { %4012 = vmatpush1.bf16.msra.mxu0 %v7357_v22  ;;  %4176 = vmatpush1.bf16.msra.mxu1 %v7359_v23  ;;  %v1181_v22 = vld [vmem:[#allocation8 + $0xc00] sm:$0xff] }
 0x24f   : > { %4013 = vmatprep.subr.bf16.mxu0 %v7366_v24  ;;  %4177 = vmatprep.subr.bf16.mxu1 %v7368_v25  ;;  %v1185_v23 = vld [vmem:[#allocation8 + $0xc20] sm:$0xff]  ;;  %v1182_v24 = vld [vmem:[#allocation8 + $0xc08] sm:$0xff]  ;;  %v788_v34 = vmax.f32 %v777_v26, 0.0  ;;  %v9331_v35 = vpack.c.bf16 %v785_v27, %v785_v27 }
 0x250   : > { %v1186_v25 = vld [vmem:[#allocation8 + $0xc28] sm:$0xff]  ;;  %v7414_v18 = vcombine.high %v1181_v22, %v1185_v23  ;;  %v7413_v36 = vcombine.low %v1181_v22, %v1185_v23  ;;  %v1233_v26 = vld [vmem:[#allocation8 + $0xda0] sm:$0xff] }
 0x251   : > { %v7416_v29 = vcombine.high %v1182_v24, %v1186_v25  ;;  %v7415_v6 = vcombine.low %v1182_v24, %v1186_v25  ;;  %v9333_v42 = vpack.c.bf16 %v788_v34, %v788_v34  ;;  %v1229_v25 = vld [vmem:[#allocation8 + $0xd80] sm:$0xff]  ;;  %v1230_v27 = vld [vmem:[#allocation8 + $0xd88] sm:$0xff] }
 0x252   : > { %4014 = vmatpush1.bf16.msra.mxu0 %v7365_v30  ;;  %4178 = vmatpush1.bf16.msra.mxu1 %v7367_v31  ;;  %v1189_v30 = vld [vmem:[#allocation8 + $0xc40] sm:$0xff]  ;;  %v1242_v34 = vld [vmem:[#allocation8 + $0xde8] sm:$0xff] }
 0x253   : > { %4015 = vmatprep.subr.bf16.mxu0 %v7374_v32  ;;  %4179 = vmatprep.subr.bf16.mxu1 %v7376_v33  ;;  %v1193_v31 = vld [vmem:[#allocation8 + $0xc60] sm:$0xff]  ;;  %v1190_v32 = vld [vmem:[#allocation8 + $0xc48] sm:$0xff] }
 0x254   : > { %v1194_v33 = vld [vmem:[#allocation8 + $0xc68] sm:$0xff]  ;;  %v7422_v37 = vcombine.high %v1189_v30, %v1193_v31  ;;  %v7421_v43 = vcombine.low %v1189_v30, %v1193_v31  ;;  %v1237_v31 = vld [vmem:[#allocation8 + $0xdc0] sm:$0xff] }
 0x255   : > { %v7423_v44 = vcombine.low %v1190_v32, %v1194_v33 }
 0x256   : > { %4016 = vmatpush1.bf16.msra.mxu0 %v7373_v38  ;;  %4180 = vmatpush1.bf16.msra.mxu1 %v7375_v39  ;;  %v7424_v38 = vcombine.high %v1190_v32, %v1194_v33  ;;  %v1197_v39 = vld [vmem:[#allocation8 + $0xc80] sm:$0xff]  ;;  %v1238_v33 = vld [vmem:[#allocation8 + $0xdc8] sm:$0xff] }
 0x257   : > { %4017 = vmatprep.subr.bf16.mxu0 %v7382_v40  ;;  %4181 = vmatprep.subr.bf16.mxu1 %v7384_v60  ;;  %v1201_v40 = vld [vmem:[#allocation8 + $0xca0] sm:$0xff]  ;;  %v1198_v60 = vld [vmem:[#allocation8 + $0xc88] sm:$0xff] }
 0x258   : > { %v7429_v57 = vcombine.low %v1197_v39, %v1201_v40  ;;  %v7431_v58 = vcombine.low %v1198_v60, %v1202_v41  ;;  %v1241_v32 = vld [vmem:[#allocation8 + $0xde0] sm:$0xff] }
 0x25a   : > { %4018 = vmatpush1.bf16.msra.mxu0 %v7381_v46  ;;  %4182 = vmatpush1.bf16.msra.mxu1 %v7383_v53  ;;  %v7430_v46 = vcombine.high %v1197_v39, %v1201_v40  ;;  %v7432_v53 = vcombine.high %v1198_v60, %v1202_v41  ;;  %v1245_v39 = vld [vmem:[#allocation8 + $0xe00] sm:$0xff]  ;;  %v1246_v60 = vld [vmem:[#allocation8 + $0xe08] sm:$0xff] }
 0x25b   : > { %4019 = vmatprep.subr.bf16.mxu0 %v7390_v19  ;;  %4183 = vmatprep.subr.bf16.mxu1 %v7392_v54  ;;  %v1205_v19 = vld [vmem:[#allocation8 + $0xcc0] sm:$0xff]  ;;  %v1250_v41 = vld [vmem:[#allocation8 + $0xe28] sm:$0xff] }
 0x25c   : > { %v1209_v54 = vld [vmem:[#allocation8 + $0xce0] sm:$0xff] }
 0x25d   : > { %v7438_v62 = vcombine.high %v1205_v19, %v1209_v54  ;;  %v7437_v7 = vcombine.low %v1205_v19, %v1209_v54  ;;  %v1249_v40 = vld [vmem:[#allocation8 + $0xe20] sm:$0xff] }
 0x25e   : > { %4020 = vmatpush1.bf16.msra.mxu0 %v7389_v0  ;;  %4184 = vmatpush1.bf16.msra.mxu1 %v7391_v1  ;;  %v7440_v0 = vcombine.high %v1206_v55, %v1210_v56  ;;  %v1213_v1 = vld [vmem:[#allocation8 + $0xd00] sm:$0xff]  ;;  %v1254_v55 = vld [vmem:[#allocation8 + $0xe48] sm:$0xff] }
 0x25f   : > { %4021 = vmatprep.subr.bf16.mxu0 %v7398_v3  ;;  %4185 = vmatprep.subr.bf16.mxu1 %v7400_v4  ;;  %v1217_v3 = vld [vmem:[#allocation8 + $0xd20] sm:$0xff]  ;;  %v1214_v4 = vld [vmem:[#allocation8 + $0xd08] sm:$0xff] }
 0x260   : > { %v7446_v11 = vcombine.high %v1213_v1, %v1217_v3  ;;  %v7448_v13 = vcombine.high %v1214_v4, %v1218_v5  ;;  %v7447_v22 = vcombine.low %v1214_v4, %v1218_v5  ;;  %v1253_v19 = vld [vmem:[#allocation8 + $0xe40] sm:$0xff]  ;;  %v1258_v56 = vld [vmem:[#allocation8 + $0xe68] sm:$0xff] }
 0x261   : > { %v1257_v54 = vld [vmem:[#allocation8 + $0xe60] sm:$0xff]  ;;  %v1262_v4 = vld [vmem:[#allocation8 + $0xe88] sm:$0xff] }
 0x262   : > { %4022 = vmatpush1.bf16.msra.mxu0 %v7397_v15  ;;  %4186 = vmatpush1.bf16.msra.mxu1 %v7399_v16  ;;  %v1225_v15 = vld [vmem:[#allocation8 + $0xd60] sm:$0xff]  ;;  %v1222_v16 = vld [vmem:[#allocation8 + $0xd48] sm:$0xff] }
 0x263   : > { %4023 = vmatprep.subr.bf16.mxu0 %v7406_v20  ;;  %4187 = vmatprep.subr.bf16.mxu1 %v7408_v21  ;;  %v1226_v20 = vld [vmem:[#allocation8 + $0xd68] sm:$0xff]  ;;  %v7445_v21 = vcombine.low %v1213_v1, %v1217_v3  ;;  %v7454_v23 = vcombine.high %v1221_v14, %v1225_v15  ;;  %v1261_v1 = vld [vmem:[#allocation8 + $0xe80] sm:$0xff] }
 0x264   : > { %v7456_v24 = vcombine.high %v1222_v16, %v1226_v20  ;;  %v1265_v3 = vld [vmem:[#allocation8 + $0xea0] sm:$0xff]  ;;  %v1266_v5 = vld [vmem:[#allocation8 + $0xea8] sm:$0xff] }
 0x266   : > { %4024 = vmatpush1.bf16.msra.mxu0 %v7405_v49  ;;  %4188 = vmatpush1.bf16.msra.mxu1 %v7407_v28  ;;  %v1234_v49 = vld [vmem:[#allocation8 + $0xda8] sm:$0xff]  ;;  %v7453_v28 = vcombine.low %v1221_v14, %v1225_v15  ;;  %v1269_v14 = vld [vmem:[#allocation8 + $0xec0] sm:$0xff] }
 0x267   : > { %4034 = vmatprep.subr.bf16.mxu0 %v7414_v18  ;;  %4198 = vmatprep.subr.bf16.mxu1 %v7416_v29  ;;  %v7455_v18 = vcombine.low %v1222_v16, %v1226_v20  ;;  %v7462_v29 = vcombine.high %v1229_v25, %v1233_v26  ;;  %v7464_v30 = vcombine.high %v1230_v27, %v1234_v49  ;;  %v1273_v15 = vld [vmem:[#allocation8 + $0xee0] sm:$0xff]  ;;  %v1270_v16 = vld [vmem:[#allocation8 + $0xec8] sm:$0xff] }
 0x268   : > { %v1274_v20 = vld [vmem:[#allocation8 + $0xee8] sm:$0xff] }
 0x269   : > { %4026 = vmatmul.mubr.bf16.vlgmr.msra.gmra.mrb[8].mxu0 %v9331_v35  ;;  %4190 = vmatmul.mubr.bf16.vlgmr.msra.gmra.mrb[8].mxu1 %v9331_v35 }
 0x26a   : > { %4035 = vmatpush1.bf16.msra.mxu0 %v7413_v36  ;;  %4199 = vmatpush1.bf16.msra.mxu1 %v7415_v6  ;;  %v7461_v36 = vcombine.low %v1229_v25, %v1233_v26  ;;  %v7463_v6 = vcombine.low %v1230_v27, %v1234_v49  ;;  %v1277_v25 = vld [vmem:[#allocation8 + $0xf00] sm:$0xff]  ;;  %v1278_v27 = vld [vmem:[#allocation8 + $0xf08] sm:$0xff] }
 0x26b   : > { %4036 = vmatprep.subr.bf16.mxu0 %v7422_v37  ;;  %4200 = vmatprep.subr.bf16.mxu1 %v7424_v38  ;;  %v7470_v37 = vcombine.high %v1237_v31, %v1241_v32  ;;  %v7472_v38 = vcombine.high %v1238_v33, %v1242_v34  ;;  %v1281_v26 = vld [vmem:[#allocation8 + $0xf20] sm:$0xff]  ;;  %v1282_v49 = vld [vmem:[#allocation8 + $0xf28] sm:$0xff] }
 0x26c   : > { %4066 = vmatprep.mubr.bf16.mxu0 %v9333_v42  ;;  %4230 = vmatprep.mubr.bf16.mxu1 %v9333_v42 }
 0x26e   : > { %4037 = vmatpush1.bf16.msra.mxu0 %v7421_v43  ;;  %4201 = vmatpush1.bf16.msra.mxu1 %v7423_v44  ;;  %v7469_v43 = vcombine.low %v1237_v31, %v1241_v32  ;;  %v7471_v44 = vcombine.low %v1238_v33, %v1242_v34  ;;  %v1285_v31 = vld [vmem:[#allocation8 + $0xf40] sm:$0xff]  ;;  %v1286_v33 = vld [vmem:[#allocation8 + $0xf48] sm:$0xff] }
 0x26f   : > { %4038 = vmatprep.subr.bf16.mxu0 %v7430_v46  ;;  %4202 = vmatprep.subr.bf16.mxu1 %v7432_v53  ;;  %v7478_v46 = vcombine.high %v1245_v39, %v1249_v40  ;;  %v7480_v53 = vcombine.high %v1246_v60, %v1250_v41  ;;  %v1289_v32 = vld [vmem:[#allocation8 + $0xf60] sm:$0xff]  ;;  %v1290_v34 = vld [vmem:[#allocation8 + $0xf68] sm:$0xff] }
 0x272   : > { %4039 = vmatpush1.bf16.msra.mxu0 %v7429_v57  ;;  %4203 = vmatpush1.bf16.msra.mxu1 %v7431_v58  ;;  %v7477_v57 = vcombine.low %v1245_v39, %v1249_v40  ;;  %v7479_v58 = vcombine.low %v1246_v60, %v1250_v41  ;;  %v7520_v39 = vcombine.high %v1286_v33, %v1290_v34  ;;  %v1293_v40 = vld [vmem:[#allocation8 + $0xf80] sm:$0xff]  ;;  %v1294_v41 = vld [vmem:[#allocation8 + $0xf88] sm:$0xff] }
 0x273   : > { %4040 = vmatprep.subr.bf16.mxu0 %v7438_v62  ;;  %4204 = vmatprep.subr.bf16.mxu1 %v7440_v0  ;;  %v7486_v62 = vcombine.high %v1253_v19, %v1257_v54  ;;  %v7488_v0 = vcombine.high %v1254_v55, %v1258_v56  ;;  %v1297_v60 = vld [vmem:[#allocation8 + $0xfa0] sm:$0xff] }
 0x276   : > { %4041 = vmatpush1.bf16.msra.mxu0 %v7437_v7  ;;  %4205 = vmatpush1.bf16.msra.mxu1 %v7439_v9  ;;  %v7485_v7 = vcombine.low %v1253_v19, %v1257_v54  ;;  %v7487_v9 = vcombine.low %v1254_v55, %v1258_v56  ;;  %v7526_v54 = vcombine.high %v1293_v40, %v1297_v60  ;;  %v1301_v56 = vld [vmem:[#allocation8 + $0xfc0] sm:$0xff] }
 0x277   : > { %4042 = vmatprep.subr.bf16.mxu0 %v7446_v11  ;;  %4206 = vmatprep.subr.bf16.mxu1 %v7448_v13  ;;  %v7494_v11 = vcombine.high %v1261_v1, %v1265_v3  ;;  %v7496_v13 = vcombine.high %v1262_v4, %v1266_v5 }
 0x27a   : > { %4043 = vmatpush1.bf16.msra.mxu0 %v7445_v21  ;;  %4207 = vmatpush1.bf16.msra.mxu1 %v7447_v22  ;;  %v7493_v21 = vcombine.low %v1261_v1, %v1265_v3  ;;  %v7495_v22 = vcombine.low %v1262_v4, %v1266_v5 }
 0x27b   : > { %4044 = vmatprep.subr.bf16.mxu0 %v7454_v23  ;;  %4208 = vmatprep.subr.bf16.mxu1 %v7456_v24  ;;  %v7502_v23 = vcombine.high %v1269_v14, %v1273_v15  ;;  %v7504_v24 = vcombine.high %v1270_v16, %v1274_v20 }
 0x27e   : > { %4045 = vmatpush1.bf16.msra.mxu0 %v7453_v28  ;;  %4209 = vmatpush1.bf16.msra.mxu1 %v7455_v18  ;;  %v7501_v28 = vcombine.low %v1269_v14, %v1273_v15  ;;  %v7503_v18 = vcombine.low %v1270_v16, %v1274_v20 }
 0x27f   : > { %4046 = vmatprep.subr.bf16.mxu0 %v7462_v29  ;;  %4210 = vmatprep.subr.bf16.mxu1 %v7464_v30  ;;  %v7510_v29 = vcombine.high %v1277_v25, %v1281_v26  ;;  %v7512_v30 = vcombine.high %v1278_v27, %v1282_v49 }
 0x282   : > { %4047 = vmatpush1.bf16.msra.mxu0 %v7461_v36  ;;  %4211 = vmatpush1.bf16.msra.mxu1 %v7463_v6  ;;  %v7509_v36 = vcombine.low %v1277_v25, %v1281_v26  ;;  %v7511_v6 = vcombine.low %v1278_v27, %v1282_v49 }
 0x283   : > { %4048 = vmatprep.subr.bf16.mxu0 %v7470_v37  ;;  %4212 = vmatprep.subr.bf16.mxu1 %v7472_v38  ;;  %v502_v37 = vsub.s32 6, %v9261_v47  ;;  %v7518_v38 = vcombine.high %v1285_v31, %v1289_v32 }
 0x286   : > { %4049 = vmatpush1.bf16.msra.mxu0 %v7469_v43  ;;  %4213 = vmatpush1.bf16.msra.mxu1 %v7471_v44  ;;  %v1298_v43 = vld [vmem:[#allocation8 + $0xfa8] sm:$0xff]  ;;  %v7517_v44 = vcombine.low %v1285_v31, %v1289_v32  ;;  %v820_v31 = vld [vmem:[#allocation8 + $0xb8] sm:$0xff] }
 0x287   : > { %4050 = vmatprep.subr.bf16.mxu0 %v7478_v46  ;;  %4214 = vmatprep.subr.bf16.mxu1 %v7480_v53  ;;  %v7519_v46 = vcombine.low %v1286_v33, %v1290_v34  ;;  %v8512_v53 = vld [vmem:[#allocation7] sm:$0xff]  ;;  %v7528_v55 = vcombine.high %v1294_v41, %v1298_v43  ;;  %v7527_v1 = vcombine.low %v1294_v41, %v1298_v43 }
 0x288   : > { %v503_v19 = vrot.slane %v8512_v53, %v502_v37  ;;  %v835_v53 = vld [vmem:[#allocation8 + $0x130] sm:$0xff] }
 0x28a   : > { %4051 = vmatpush1.bf16.msra.mxu0 %v7477_v57  ;;  %4215 = vmatpush1.bf16.msra.mxu1 %v7479_v58  ;;  %v1305_v57 = vld [vmem:[#allocation8 + $0xfe0] sm:$0xff]  ;;  %v1302_v58 = vld [vmem:[#allocation8 + $0xfc8] sm:$0xff]  ;;  %v775_v3 = vadd.f32 %v9301_v2, %v503_v19  ;;  %v808_v2 = vld [vmem:[#allocation8 + $0x58] sm:$0xff] }
 0x28b   : > { %4052 = vmatprep.subr.bf16.mxu0 %v7486_v62  ;;  %4216 = vmatprep.subr.bf16.mxu1 %v7488_v0  ;;  %v1306_v62 = vld [vmem:[#allocation8 + $0xfe8] sm:$0xff]  ;;  %v7525_v0 = vcombine.low %v1293_v40, %v1297_v60  ;;  %v7534_v4 = vcombine.high %v1301_v56, %v1305_v57  ;;  %v7533_v14 = vcombine.low %v1301_v56, %v1305_v57  ;;  %v828_v40 = vld [vmem:[#allocation8 + $0xf8] sm:$0xff] }
 0x28c   : > { %v7536_v5 = vcombine.high %v1302_v58, %v1306_v62  ;;  %v7535_v15 = vcombine.low %v1302_v58, %v1306_v62  ;;  %v787_v16 = vmax.f32 %v775_v3, 0.0  ;;  %v836_v19 = vld [vmem:[#allocation8 + $0x138] sm:$0xff]  ;;  %v839_v58 = vld [vmem:[#allocation8 + $0x150] sm:$0xff] }
 0x28d   : > { %v843_v62 = vld [vmem:[#allocation8 + $0x170] sm:$0xff] }
 0x28e   : > { %4053 = vmatpush1.bf16.msra.mxu0 %v7485_v7  ;;  %4217 = vmatpush1.bf16.msra.mxu1 %v7487_v9  ;;  %v799_v7 = vld [vmem:[#allocation8 + $0x10] sm:$0xff]  ;;  %v9343_v26 = vpack.c.bf16 %v787_v16, %v787_v16 }
 0x28f   : > { %4054 = vmatprep.subr.bf16.mxu0 %v7494_v11  ;;  %4218 = vmatprep.subr.bf16.mxu1 %v7496_v13  ;;  %v803_v9 = vld [vmem:[#allocation8 + $0x30] sm:$0xff]  ;;  %v800_v11 = vld [vmem:[#allocation8 + $0x18] sm:$0xff] }
 0x290   : > { %v804_v13 = vld [vmem:[#allocation8 + $0x38] sm:$0xff]  ;;  %v7034_v20 = vcombine.high %v799_v7, %v803_v9  ;;  %v7033_v25 = vcombine.low %v799_v7, %v803_v9  ;;  %v847_v9 = vld [vmem:[#allocation8 + $0x190] sm:$0xff] }
 0x291   : > { %v7035_v27 = vcombine.low %v800_v11, %v804_v13 }
 0x292   : > { %4055 = vmatpush1.bf16.msra.mxu0 %v7493_v21  ;;  %4219 = vmatpush1.bf16.msra.mxu1 %v7495_v22  ;;  %v7036_v21 = vcombine.high %v800_v11, %v804_v13  ;;  %v807_v22 = vld [vmem:[#allocation8 + $0x50] sm:$0xff]  ;;  %v848_v13 = vld [vmem:[#allocation8 + $0x198] sm:$0xff] }
 0x293   : > { %4056 = vmatprep.subr.bf16.mxu0 %v7502_v23  ;;  %4220 = vmatprep.subr.bf16.mxu1 %v7504_v24  ;;  %v811_v23 = vld [vmem:[#allocation8 + $0x70] sm:$0xff]  ;;  %v812_v24 = vld [vmem:[#allocation8 + $0x78] sm:$0xff] }
 0x294   : > { %v7042_v49 = vcombine.high %v807_v22, %v811_v23  ;;  %v7041_v32 = vcombine.low %v807_v22, %v811_v23  ;;  %v7043_v33 = vcombine.low %v808_v2, %v812_v24  ;;  %v851_v11 = vld [vmem:[#allocation8 + $0x1b0] sm:$0xff] }
 0x295   : > { %v855_v22 = vld [vmem:[#allocation8 + $0x1d0] sm:$0xff] }
 0x296   : > { %4057 = vmatpush1.bf16.msra.mxu0 %v7501_v28  ;;  %4221 = vmatpush1.bf16.msra.mxu1 %v7503_v18  ;;  %v7044_v28 = vcombine.high %v808_v2, %v812_v24  ;;  %v815_v18 = vld [vmem:[#allocation8 + $0x90] sm:$0xff]  ;;  %v856_v2 = vld [vmem:[#allocation8 + $0x1d8] sm:$0xff] }
 0x297   : > { %4058 = vmatprep.subr.bf16.mxu0 %v7510_v29  ;;  %4222 = vmatprep.subr.bf16.mxu1 %v7512_v30  ;;  %v819_v29 = vld [vmem:[#allocation8 + $0xb0] sm:$0xff]  ;;  %v816_v30 = vld [vmem:[#allocation8 + $0x98] sm:$0xff] }
 0x298   : > { %v7050_v34 = vcombine.high %v815_v18, %v819_v29  ;;  %v7049_v60 = vcombine.low %v815_v18, %v819_v29  ;;  %v7051_v41 = vcombine.low %v816_v30, %v820_v31  ;;  %v859_v23 = vld [vmem:[#allocation8 + $0x1f0] sm:$0xff]  ;;  %v860_v24 = vld [vmem:[#allocation8 + $0x1f8] sm:$0xff] }
 0x299   : > { %v863_v18 = vld [vmem:[#allocation8 + $0x210] sm:$0xff] }
 0x29a   : > { %4059 = vmatpush1.bf16.msra.mxu0 %v7509_v36  ;;  %4223 = vmatpush1.bf16.msra.mxu1 %v7511_v6  ;;  %v7052_v36 = vcombine.high %v816_v30, %v820_v31  ;;  %v823_v6 = vld [vmem:[#allocation8 + $0xd0] sm:$0xff]  ;;  %v864_v30 = vld [vmem:[#allocation8 + $0x218] sm:$0xff] }
 0x29b   : > { %4060 = vmatprep.subr.bf16.mxu0 %v7518_v38  ;;  %4224 = vmatprep.subr.bf16.mxu1 %v7520_v39  ;;  %v827_v38 = vld [vmem:[#allocation8 + $0xf0] sm:$0xff]  ;;  %v824_v39 = vld [vmem:[#allocation8 + $0xd8] sm:$0xff] }
 0x29c   : > { %v7058_v43 = vcombine.high %v823_v6, %v827_v38  ;;  %v867_v29 = vld [vmem:[#allocation8 + $0x230] sm:$0xff]  ;;  %v868_v31 = vld [vmem:[#allocation8 + $0x238] sm:$0xff] }
 0x29e   : > { %4061 = vmatpush1.bf16.msra.mxu0 %v7517_v44  ;;  %4225 = vmatpush1.bf16.msra.mxu1 %v7519_v46  ;;  %v7060_v44 = vcombine.high %v824_v39, %v828_v40  ;;  %v831_v46 = vld [vmem:[#allocation8 + $0x110] sm:$0xff] }
 0x29f   : > { %4062 = vmatprep.subr.bf16.mxu0 %v7526_v54  ;;  %4226 = vmatprep.subr.bf16.mxu1 %v7528_v55  ;;  %v7057_v54 = vcombine.low %v823_v6, %v827_v38  ;;  %v7059_v55 = vcombine.low %v824_v39, %v828_v40  ;;  %v7066_v56 = vcombine.high %v831_v46, %v835_v53  ;;  %v871_v6 = vld [vmem:[#allocation8 + $0x250] sm:$0xff]  ;;  %v872_v39 = vld [vmem:[#allocation8 + $0x258] sm:$0xff] }
 0x2a0   : > { %v7065_v3 = vcombine.low %v831_v46, %v835_v53  ;;  %v875_v38 = vld [vmem:[#allocation8 + $0x270] sm:$0xff]  ;;  %v876_v40 = vld [vmem:[#allocation8 + $0x278] sm:$0xff] }
 0x2a1   : > { %v879_v46 = vld [vmem:[#allocation8 + $0x290] sm:$0xff] }
 0x2a2   : > { %4063 = vmatpush1.bf16.msra.mxu0 %v7525_v0  ;;  %4227 = vmatpush1.bf16.msra.mxu1 %v7527_v1  ;;  %v840_v0 = vld [vmem:[#allocation8 + $0x158] sm:$0xff]  ;;  %v883_v53 = vld [vmem:[#allocation8 + $0x2b0] sm:$0xff] }
 0x2a3   : > { %4064 = vmatprep.subr.bf16.mxu0 %v7534_v4  ;;  %4228 = vmatprep.subr.bf16.mxu1 %v7536_v5  ;;  %v844_v1 = vld [vmem:[#allocation8 + $0x178] sm:$0xff]  ;;  %v7074_v5 = vcombine.high %v839_v58, %v843_v62 }
 0x2a4   : > { %v7076_v7 = vcombine.high %v840_v0, %v844_v1  ;;  %v7075_v16 = vcombine.low %v840_v0, %v844_v1  ;;  %v888_v0 = vld [vmem:[#allocation8 + $0x2d8] sm:$0xff] }
 0x2a5   : > { %v892_v1 = vld [vmem:[#allocation8 + $0x2f8] sm:$0xff] }
 0x2a6   : > { %4065 = vmatpush1.bf16.msra.mxu0 %v7533_v14  ;;  %4229 = vmatpush1.bf16.msra.mxu1 %v7535_v15  ;;  %v852_v14 = vld [vmem:[#allocation8 + $0x1b8] sm:$0xff]  ;;  %v7073_v15 = vcombine.low %v839_v58, %v843_v62  ;;  %v887_v58 = vld [vmem:[#allocation8 + $0x2d0] sm:$0xff] }
 0x2a7   : > { %4239 = vmatprep.subr.bf16.mxu0 %v7034_v20  ;;  %4403 = vmatprep.subr.bf16.mxu1 %v7036_v21  ;;  %v7082_v20 = vcombine.high %v847_v9, %v851_v11  ;;  %v7084_v21 = vcombine.high %v848_v13, %v852_v14  ;;  %v891_v62 = vld [vmem:[#allocation8 + $0x2f0] sm:$0xff] }
 0x2a9   : > { %4067 = vmatmul.mubr.bf16.vlgmr.msra.gmra.mrb[8].mxu0 %v9343_v26  ;;  %4231 = vmatmul.mubr.bf16.vlgmr.msra.gmra.mrb[8].mxu1 %v9343_v26 }
 0x2aa   : > { %4240 = vmatpush1.bf16.msra.mxu0 %v7033_v25  ;;  %4271 = vmatprep.mubr.bf16.mxu0 %v9282_v8  ;;  %v7081_v25 = vcombine.low %v847_v9, %v851_v11  ;;  %v895_v9 = vld [vmem:[#allocation8 + $0x310] sm:$0xff] }
 0x2ab   : > { %4404 = vmatpush1.bf16.msra.mxu1 %v7035_v27  ;;  %4435 = vmatprep.mubr.bf16.mxu1 %v9282_v8  ;;  %v832_v8 = vld [vmem:[#allocation8 + $0x118] sm:$0xff]  ;;  %v7083_v27 = vcombine.low %v848_v13, %v852_v14  ;;  %v899_v11 = vld [vmem:[#allocation8 + $0x330] sm:$0xff] }
 0x2ac   : > { %4241 = vmatprep.subr.bf16.mxu0 %v7042_v49  ;;  %4405 = vmatprep.subr.bf16.mxu1 %v7044_v28  ;;  %v7068_v57 = vcombine.high %v832_v8, %v836_v19  ;;  %v7067_v4 = vcombine.low %v832_v8, %v836_v19  ;;  %v7090_v49 = vcombine.high %v855_v22, %v859_v23  ;;  %v880_v8 = vld [vmem:[#allocation8 + $0x298] sm:$0xff] }
 0x2ad   : > { %v7092_v28 = vcombine.high %v856_v2, %v860_v24  ;;  %v884_v19 = vld [vmem:[#allocation8 + $0x2b8] sm:$0xff] }
 0x2ae   : > { %4242 = vmatpush1.bf16.msra.mxu0 %v7041_v32  ;;  %v7089_v32 = vcombine.low %v855_v22, %v859_v23  ;;  %v896_v13 = vld [vmem:[#allocation8 + $0x318] sm:$0xff]  ;;  %v903_v22 = vld [vmem:[#allocation8 + $0x350] sm:$0xff] }
 0x2af   : > { %4406 = vmatpush1.bf16.msra.mxu1 %v7043_v33  ;;  %4243 = vmatprep.subr.bf16.mxu0 %v7050_v34  ;;  %v7091_v33 = vcombine.low %v856_v2, %v860_v24  ;;  %v7098_v34 = vcombine.high %v863_v18, %v867_v29  ;;  %v900_v14 = vld [vmem:[#allocation8 + $0x338] sm:$0xff]  ;;  %v907_v23 = vld [vmem:[#allocation8 + $0x370] sm:$0xff] }
 0x2b0   : > { %4407 = vmatprep.subr.bf16.mxu1 %v7052_v36  ;;  %v7100_v36 = vcombine.high %v864_v30, %v868_v31  ;;  %v904_v2 = vld [vmem:[#allocation8 + $0x358] sm:$0xff] }
 0x2b1   : > { %v908_v24 = vld [vmem:[#allocation8 + $0x378] sm:$0xff] }
 0x2b2   : > { %4244 = vmatpush1.bf16.msra.mxu0 %v7049_v60  ;;  %v7097_v60 = vcombine.low %v863_v18, %v867_v29  ;;  %v911_v18 = vld [vmem:[#allocation8 + $0x390] sm:$0xff] }
 0x2b3   : > { %4408 = vmatpush1.bf16.msra.mxu1 %v7051_v41  ;;  %4245 = vmatprep.subr.bf16.mxu0 %v7058_v43  ;;  %v7099_v41 = vcombine.low %v864_v30, %v868_v31  ;;  %v7106_v43 = vcombine.high %v871_v6, %v875_v38  ;;  %v915_v29 = vld [vmem:[#allocation8 + $0x3b0] sm:$0xff]  ;;  %v912_v30 = vld [vmem:[#allocation8 + $0x398] sm:$0xff] }
 0x2b4   : > { %4409 = vmatprep.subr.bf16.mxu1 %v7060_v44  ;;  %v7108_v44 = vcombine.high %v872_v39, %v876_v40  ;;  %v916_v31 = vld [vmem:[#allocation8 + $0x3b8] sm:$0xff] }
 0x2b6   : > { %4246 = vmatpush1.bf16.msra.mxu0 %v7057_v54  ;;  %v7105_v54 = vcombine.low %v871_v6, %v875_v38  ;;  %v919_v6 = vld [vmem:[#allocation8 + $0x3d0] sm:$0xff] }
 0x2b7   : > { %4410 = vmatpush1.bf16.msra.mxu1 %v7059_v55  ;;  %4247 = vmatprep.subr.bf16.mxu0 %v7066_v56  ;;  %v7107_v55 = vcombine.low %v872_v39, %v876_v40  ;;  %v7114_v56 = vcombine.high %v879_v46, %v883_v53  ;;  %v923_v38 = vld [vmem:[#allocation8 + $0x3f0] sm:$0xff]  ;;  %v920_v39 = vld [vmem:[#allocation8 + $0x3d8] sm:$0xff] }
 0x2b8   : > { %4411 = vmatprep.subr.bf16.mxu1 %v7068_v57  ;;  %v7116_v57 = vcombine.high %v880_v8, %v884_v19  ;;  %v924_v40 = vld [vmem:[#allocation8 + $0x3f8] sm:$0xff] }
 0x2ba   : > { %4248 = vmatpush1.bf16.msra.mxu0 %v7065_v3  ;;  %v7113_v3 = vcombine.low %v879_v46, %v883_v53  ;;  %v927_v46 = vld [vmem:[#allocation8 + $0x410] sm:$0xff] }
 0x2bb   : > { %4412 = vmatpush1.bf16.msra.mxu1 %v7067_v4  ;;  %4249 = vmatprep.subr.bf16.mxu0 %v7074_v5  ;;  %v7115_v4 = vcombine.low %v880_v8, %v884_v19  ;;  %v7122_v5 = vcombine.high %v887_v58, %v891_v62  ;;  %v931_v53 = vld [vmem:[#allocation8 + $0x430] sm:$0xff]  ;;  %v928_v8 = vld [vmem:[#allocation8 + $0x418] sm:$0xff] }
 0x2bc   : > { %4413 = vmatprep.subr.bf16.mxu1 %v7076_v7  ;;  %v7124_v7 = vcombine.high %v888_v0, %v892_v1  ;;  %v932_v19 = vld [vmem:[#allocation8 + $0x438] sm:$0xff] }
 0x2be   : > { %4250 = vmatpush1.bf16.msra.mxu0 %v7073_v15  ;;  %v7121_v15 = vcombine.low %v887_v58, %v891_v62  ;;  %v935_v58 = vld [vmem:[#allocation8 + $0x450] sm:$0xff] }
 0x2bf   : > { %4414 = vmatpush1.bf16.msra.mxu1 %v7075_v16  ;;  %4251 = vmatprep.subr.bf16.mxu0 %v7082_v20  ;;  %v7123_v16 = vcombine.low %v888_v0, %v892_v1  ;;  %v7130_v20 = vcombine.high %v895_v9, %v899_v11  ;;  %v939_v62 = vld [vmem:[#allocation8 + $0x470] sm:$0xff]  ;;  %v7161_v0 = vcombine.low %v927_v46, %v931_v53  ;;  %v936_v1 = vld [vmem:[#allocation8 + $0x458] sm:$0xff] }
 0x2c0   : > { %4415 = vmatprep.subr.bf16.mxu1 %v7084_v21  ;;  %v7132_v21 = vcombine.high %v896_v13, %v900_v14 }
 0x2c2   : > { %4252 = vmatpush1.bf16.msra.mxu0 %v7081_v25  ;;  %v7129_v25 = vcombine.low %v895_v9, %v899_v11  ;;  %v947_v9 = vld [vmem:[#allocation8 + $0x4b0] sm:$0xff] }
 0x2c3   : > { %4416 = vmatpush1.bf16.msra.mxu1 %v7083_v27  ;;  %4253 = vmatprep.subr.bf16.mxu0 %v7090_v49  ;;  %v7131_v27 = vcombine.low %v896_v13, %v900_v14  ;;  %v7138_v49 = vcombine.high %v903_v22, %v907_v23  ;;  %v944_v13 = vld [vmem:[#allocation8 + $0x498] sm:$0xff] }
 0x2c4   : > { %4417 = vmatprep.subr.bf16.mxu1 %v7092_v28  ;;  %v7140_v28 = vcombine.high %v904_v2, %v908_v24  ;;  %v948_v14 = vld [vmem:[#allocation8 + $0x4b8] sm:$0xff] }
 0x2c6   : > { %4254 = vmatpush1.bf16.msra.mxu0 %v7089_v32  ;;  %v7137_v32 = vcombine.low %v903_v22, %v907_v23  ;;  %v951_v22 = vld [vmem:[#allocation8 + $0x4d0] sm:$0xff] }
 0x2c7   : > { %4418 = vmatpush1.bf16.msra.mxu1 %v7091_v33  ;;  %4255 = vmatprep.subr.bf16.mxu0 %v7098_v34  ;;  %v7139_v33 = vcombine.low %v904_v2, %v908_v24  ;;  %v7146_v34 = vcombine.high %v911_v18, %v915_v29  ;;  %v955_v23 = vld [vmem:[#allocation8 + $0x4f0] sm:$0xff]  ;;  %v952_v2 = vld [vmem:[#allocation8 + $0x4d8] sm:$0xff] }
 0x2c8   : > { %4419 = vmatprep.subr.bf16.mxu1 %v7100_v36  ;;  %v7148_v36 = vcombine.high %v912_v30, %v916_v31  ;;  %v956_v24 = vld [vmem:[#allocation8 + $0x4f8] sm:$0xff] }
 0x2ca   : > { %4256 = vmatpush1.bf16.msra.mxu0 %v7097_v60  ;;  %v7145_v60 = vcombine.low %v911_v18, %v915_v29  ;;  %v963_v18 = vld [vmem:[#allocation8 + $0x530] sm:$0xff]  ;;  %v960_v29 = vld [vmem:[#allocation8 + $0x518] sm:$0xff] }
 0x2cb   : > { %4420 = vmatpush1.bf16.msra.mxu1 %v7099_v41  ;;  %4257 = vmatprep.subr.bf16.mxu0 %v7106_v43  ;;  %v7147_v41 = vcombine.low %v912_v30, %v916_v31  ;;  %v7154_v43 = vcombine.high %v919_v6, %v923_v38  ;;  %v964_v30 = vld [vmem:[#allocation8 + $0x538] sm:$0xff]  ;;  %v7187_v31 = vcombine.low %v952_v2, %v956_v24 }
 0x2cc   : > { %4421 = vmatprep.subr.bf16.mxu1 %v7108_v44  ;;  %v7156_v44 = vcombine.high %v920_v39, %v924_v40 }
 0x2ce   : > { %4258 = vmatpush1.bf16.msra.mxu0 %v7105_v54  ;;  %v7153_v54 = vcombine.low %v919_v6, %v923_v38  ;;  %v968_v6 = vld [vmem:[#allocation8 + $0x558] sm:$0xff] }
 0x2cf   : > { %4422 = vmatpush1.bf16.msra.mxu1 %v7107_v55  ;;  %4259 = vmatprep.subr.bf16.mxu0 %v7114_v56  ;;  %v7155_v55 = vcombine.low %v920_v39, %v924_v40  ;;  %v7162_v56 = vcombine.high %v927_v46, %v931_v53  ;;  %v972_v38 = vld [vmem:[#allocation8 + $0x578] sm:$0xff]  ;;  %v7195_v40 = vcombine.low %v960_v29, %v964_v30 }
 0x2d0   : > { %4423 = vmatprep.subr.bf16.mxu1 %v7116_v57  ;;  %v7164_v57 = vcombine.high %v928_v8, %v932_v19  ;;  %v976_v46 = vld [vmem:[#allocation8 + $0x598] sm:$0xff] }
 0x2d1   : > { %v980_v53 = vld [vmem:[#allocation8 + $0x5b8] sm:$0xff] }
 0x2d2   : > { %4260 = vmatpush1.bf16.msra.mxu0 %v7113_v3  ;;  %v940_v3 = vld [vmem:[#allocation8 + $0x478] sm:$0xff] }
 0x2d3   : > { %4424 = vmatpush1.bf16.msra.mxu1 %v7115_v4  ;;  %4261 = vmatprep.subr.bf16.mxu0 %v7122_v5  ;;  %v7163_v4 = vcombine.low %v928_v8, %v932_v19  ;;  %v7170_v5 = vcombine.high %v935_v58, %v939_v62  ;;  %v7172_v11 = vcombine.high %v936_v1, %v940_v3 }
 0x2d4   : > { %4425 = vmatprep.subr.bf16.mxu1 %v7124_v7  ;;  %v943_v7 = vld [vmem:[#allocation8 + $0x490] sm:$0xff]  ;;  %v7203_v19 = vcombine.low %v968_v6, %v972_v38 }
 0x2d6   : > { %4262 = vmatpush1.bf16.msra.mxu0 %v7121_v15  ;;  %v7169_v15 = vcombine.low %v935_v58, %v939_v62  ;;  %v984_v58 = vld [vmem:[#allocation8 + $0x5d8] sm:$0xff] }
 0x2d7   : > { %4426 = vmatpush1.bf16.msra.mxu1 %v7123_v16  ;;  %4263 = vmatprep.subr.bf16.mxu0 %v7130_v20  ;;  %v7171_v16 = vcombine.low %v936_v1, %v940_v3  ;;  %v7178_v20 = vcombine.high %v943_v7, %v947_v9  ;;  %v988_v62 = vld [vmem:[#allocation8 + $0x5f8] sm:$0xff]  ;;  %v7211_v1 = vcombine.low %v976_v46, %v980_v53 }
 0x2d8   : > { %4427 = vmatprep.subr.bf16.mxu1 %v7132_v21  ;;  %v7180_v21 = vcombine.high %v944_v13, %v948_v14 }
 0x2da   : > { %4264 = vmatpush1.bf16.msra.mxu0 %v7129_v25  ;;  %v7177_v25 = vcombine.low %v943_v7, %v947_v9  ;;  %v995_v7 = vld [vmem:[#allocation8 + $0x630] sm:$0xff]  ;;  %v992_v9 = vld [vmem:[#allocation8 + $0x618] sm:$0xff] }
 0x2db   : > { %4428 = vmatpush1.bf16.msra.mxu1 %v7131_v27  ;;  %4265 = vmatprep.subr.bf16.mxu0 %v7138_v49  ;;  %v7186_v27 = vcombine.high %v951_v22, %v955_v23  ;;  %v7188_v49 = vcombine.high %v952_v2, %v956_v24 }
 0x2dc   : > { %4429 = vmatprep.subr.bf16.mxu1 %v7140_v28  ;;  %v959_v28 = vld [vmem:[#allocation8 + $0x510] sm:$0xff] }
 0x2dd   : > { %v7193_v39 = vcombine.low %v959_v28, %v963_v18 }
 0x2de   : > { %4266 = vmatpush1.bf16.msra.mxu0 %v7137_v32  ;;  %v7194_v32 = vcombine.high %v959_v28, %v963_v18  ;;  %v1008_v28 = vld [vmem:[#allocation8 + $0x698] sm:$0xff] }
 0x2df   : > { %4430 = vmatpush1.bf16.msra.mxu1 %v7139_v33  ;;  %4267 = vmatprep.subr.bf16.mxu0 %v7146_v34  ;;  %v7196_v33 = vcombine.high %v960_v29, %v964_v30  ;;  %v967_v34 = vld [vmem:[#allocation8 + $0x550] sm:$0xff]  ;;  %v1012_v18 = vld [vmem:[#allocation8 + $0x6b8] sm:$0xff] }
 0x2e0   : > { %4431 = vmatprep.subr.bf16.mxu1 %v7148_v36  ;;  %v971_v36 = vld [vmem:[#allocation8 + $0x570] sm:$0xff] }
 0x2e1   : > { %v7201_v8 = vcombine.low %v967_v34, %v971_v36 }
 0x2e2   : > { %4268 = vmatpush1.bf16.msra.mxu0 %v7145_v60  ;;  %v7202_v60 = vcombine.high %v967_v34, %v971_v36  ;;  %v1016_v34 = vld [vmem:[#allocation8 + $0x6d8] sm:$0xff] }
 0x2e3   : > { %4432 = vmatpush1.bf16.msra.mxu1 %v7147_v41  ;;  %4269 = vmatprep.subr.bf16.mxu0 %v7154_v43  ;;  %v7204_v41 = vcombine.high %v968_v6, %v972_v38  ;;  %v975_v43 = vld [vmem:[#allocation8 + $0x590] sm:$0xff]  ;;  %v1020_v36 = vld [vmem:[#allocation8 + $0x6f8] sm:$0xff]  ;;  %v7243_v38 = vcombine.low %v1008_v28, %v1012_v18 }
 0x2e4   : > { %4433 = vmatprep.subr.bf16.mxu1 %v7156_v44  ;;  %v979_v44 = vld [vmem:[#allocation8 + $0x5b0] sm:$0xff] }
 0x2e6   : > { %4270 = vmatpush1.bf16.msra.mxu0 %v7153_v54  ;;  %v7210_v54 = vcombine.high %v975_v43, %v979_v44 }
 0x2e7   : > { %4434 = vmatpush1.bf16.msra.mxu1 %v7155_v55  ;;  %4280 = vmatprep.subr.bf16.mxu0 %v7162_v56  ;;  %v7212_v55 = vcombine.high %v976_v46, %v980_v53  ;;  %v983_v56 = vld [vmem:[#allocation8 + $0x5d0] sm:$0xff]  ;;  %v7251_v53 = vcombine.low %v1016_v34, %v1020_v36 }
 0x2e8   : > { %4444 = vmatprep.subr.bf16.mxu1 %v7164_v57  ;;  %v987_v57 = vld [vmem:[#allocation8 + $0x5f0] sm:$0xff] }
 0x2e9   : > { %4272 = vmatmul.mubr.bf16.vlgmr.msra.gmra.mrb[12].mxu0 %v9284_v10  ;;  %v7218_v3 = vcombine.high %v983_v56, %v987_v57 }
 0x2ea   : > { %4436 = vmatmul.mubr.bf16.vlgmr.msra.gmra.mrb[12].mxu1 %v9284_v10  ;;  %4281 = vmatpush1.bf16.msra.mxu0 %v7161_v0  ;;  %v7179_v10 = vcombine.low %v944_v13, %v948_v14  ;;  %v7209_v0 = vcombine.low %v975_v43, %v979_v44  ;;  %v7217_v13 = vcombine.low %v983_v56, %v987_v57  ;;  %v1024_v43 = vld [vmem:[#allocation8 + $0x718] sm:$0xff] }
 0x2eb   : > { %4312 = vmatprep.mubr.bf16.mxu0 %v9288_v17  ;;  %4445 = vmatpush1.bf16.msra.mxu1 %v7163_v4  ;;  %v7220_v4 = vcombine.high %v984_v58, %v988_v62  ;;  %v7219_v14 = vcombine.low %v984_v58, %v988_v62  ;;  %v1028_v44 = vld [vmem:[#allocation8 + $0x738] sm:$0xff] }
 0x2ec   : > { %4476 = vmatprep.mubr.bf16.mxu1 %v9288_v17  ;;  %4282 = vmatprep.subr.bf16.mxu0 %v7170_v5  ;;  %v7185_v17 = vcombine.low %v951_v22, %v955_v23  ;;  %v991_v5 = vld [vmem:[#allocation8 + $0x610] sm:$0xff]  ;;  %v1000_v22 = vld [vmem:[#allocation8 + $0x658] sm:$0xff]  ;;  %v7259_v62 = vcombine.low %v1024_v43, %v1028_v44 }
 0x2ed   : > { %4446 = vmatprep.subr.bf16.mxu1 %v7172_v11  ;;  %v996_v11 = vld [vmem:[#allocation8 + $0x638] sm:$0xff]  ;;  %v7225_v2 = vcombine.low %v991_v5, %v995_v7 }
 0x2ee   : > { %4283 = vmatpush1.bf16.msra.mxu0 %v7169_v15  ;;  %v7226_v15 = vcombine.high %v991_v5, %v995_v7  ;;  %v1004_v23 = vld [vmem:[#allocation8 + $0x678] sm:$0xff]  ;;  %v7227_v24 = vcombine.low %v992_v9, %v996_v11 }
 0x2ef   : > { %4447 = vmatpush1.bf16.msra.mxu1 %v7171_v16  ;;  %4284 = vmatprep.subr.bf16.mxu0 %v7178_v20  ;;  %v7228_v16 = vcombine.high %v992_v9, %v996_v11  ;;  %v999_v20 = vld [vmem:[#allocation8 + $0x650] sm:$0xff]  ;;  %v7235_v30 = vcombine.low %v1000_v22, %v1004_v23  ;;  %v1032_v56 = vld [vmem:[#allocation8 + $0x758] sm:$0xff] }
 0x2f0   : > { %4448 = vmatprep.subr.bf16.mxu1 %v7180_v21  ;;  %v1003_v21 = vld [vmem:[#allocation8 + $0x670] sm:$0xff]  ;;  %v1036_v57 = vld [vmem:[#allocation8 + $0x778] sm:$0xff] }
 0x2f1   : > { %v7233_v29 = vcombine.low %v999_v20, %v1003_v21  ;;  %v1040_v5 = vld [vmem:[#allocation8 + $0x798] sm:$0xff]  ;;  %v7267_v11 = vcombine.low %v1032_v56, %v1036_v57 }
 0x2f2   : > { %4285 = vmatpush1.bf16.msra.mxu0 %v7177_v25  ;;  %v7234_v25 = vcombine.high %v999_v20, %v1003_v21  ;;  %v1044_v7 = vld [vmem:[#allocation8 + $0x7b8] sm:$0xff] }
 0x2f3   : > { %4449 = vmatpush1.bf16.msra.mxu1 %v7179_v10  ;;  %4286 = vmatprep.subr.bf16.mxu0 %v7186_v27  ;;  %v7236_v10 = vcombine.high %v1000_v22, %v1004_v23  ;;  %v1007_v27 = vld [vmem:[#allocation8 + $0x690] sm:$0xff]  ;;  %v1048_v20 = vld [vmem:[#allocation8 + $0x7d8] sm:$0xff]  ;;  %v7275_v23 = vcombine.low %v1040_v5, %v1044_v7 }
 0x2f4   : > { %4450 = vmatprep.subr.bf16.mxu1 %v7188_v49  ;;  %v1011_v49 = vld [vmem:[#allocation8 + $0x6b0] sm:$0xff]  ;;  %v1052_v21 = vld [vmem:[#allocation8 + $0x7f8] sm:$0xff] }
 0x2f5   : > { %v7241_v6 = vcombine.low %v1007_v27, %v1011_v49 }
 0x2f6   : > { %4287 = vmatpush1.bf16.msra.mxu0 %v7185_v17  ;;  %v7242_v17 = vcombine.high %v1007_v27, %v1011_v49  ;;  %v1056_v27 = vld [vmem:[#allocation8 + $0x818] sm:$0xff] }
 0x2f7   : > { %4451 = vmatpush1.bf16.msra.mxu1 %v7187_v31  ;;  %4288 = vmatprep.subr.bf16.mxu0 %v7194_v32  ;;  %v7244_v31 = vcombine.high %v1008_v28, %v1012_v18  ;;  %v1015_v32 = vld [vmem:[#allocation8 + $0x6d0] sm:$0xff]  ;;  %v1060_v49 = vld [vmem:[#allocation8 + $0x838] sm:$0xff]  ;;  %v7283_v18 = vcombine.low %v1048_v20, %v1052_v21 }
 0x2f8   : > { %4452 = vmatprep.subr.bf16.mxu1 %v7196_v33  ;;  %v1019_v33 = vld [vmem:[#allocation8 + $0x6f0] sm:$0xff] }
 0x2f9   : > { %v7249_v46 = vcombine.low %v1015_v32, %v1019_v33 }
 0x2fa   : > { %4289 = vmatpush1.bf16.msra.mxu0 %v7193_v39  ;;  %v7250_v39 = vcombine.high %v1015_v32, %v1019_v33  ;;  %v1064_v33 = vld [vmem:[#allocation8 + $0x858] sm:$0xff] }
 0x2fb   : > { %4453 = vmatpush1.bf16.msra.mxu1 %v7195_v40  ;;  %4290 = vmatprep.subr.bf16.mxu0 %v7202_v60  ;;  %v7252_v40 = vcombine.high %v1016_v34, %v1020_v36  ;;  %v1023_v60 = vld [vmem:[#allocation8 + $0x710] sm:$0xff]  ;;  %v1068_v34 = vld [vmem:[#allocation8 + $0x878] sm:$0xff]  ;;  %v7291_v36 = vcombine.low %v1056_v27, %v1060_v49 }
 0x2fc   : > { %4454 = vmatprep.subr.bf16.mxu1 %v7204_v41  ;;  %v1027_v41 = vld [vmem:[#allocation8 + $0x730] sm:$0xff] }
 0x2fd   : > { %v7257_v58 = vcombine.low %v1023_v60, %v1027_v41 }
 0x2fe   : > { %4291 = vmatpush1.bf16.msra.mxu0 %v7201_v8  ;;  %v7258_v8 = vcombine.high %v1023_v60, %v1027_v41  ;;  %v1072_v60 = vld [vmem:[#allocation8 + $0x898] sm:$0xff] }
 0x2ff   : > { %4455 = vmatpush1.bf16.msra.mxu1 %v7203_v19  ;;  %4292 = vmatprep.subr.bf16.mxu0 %v7210_v54  ;;  %v7260_v19 = vcombine.high %v1024_v43, %v1028_v44  ;;  %v1031_v54 = vld [vmem:[#allocation8 + $0x750] sm:$0xff]  ;;  %v1076_v41 = vld [vmem:[#allocation8 + $0x8b8] sm:$0xff]  ;;  %v7299_v44 = vcombine.low %v1064_v33, %v1068_v34 }
 0x300   : > { %4456 = vmatprep.subr.bf16.mxu1 %v7212_v55  ;;  %v1035_v55 = vld [vmem:[#allocation8 + $0x770] sm:$0xff] }
 0x301   : > { %v7265_v9 = vcombine.low %v1031_v54, %v1035_v55 }
 0x302   : > { %4293 = vmatpush1.bf16.msra.mxu0 %v7209_v0  ;;  %v7266_v0 = vcombine.high %v1031_v54, %v1035_v55  ;;  %v1080_v54 = vld [vmem:[#allocation8 + $0x8d8] sm:$0xff] }
 0x303   : > { %4457 = vmatpush1.bf16.msra.mxu1 %v7211_v1  ;;  %4294 = vmatprep.subr.bf16.mxu0 %v7218_v3  ;;  %v7268_v1 = vcombine.high %v1032_v56, %v1036_v57  ;;  %v1039_v3 = vld [vmem:[#allocation8 + $0x790] sm:$0xff]  ;;  %v1084_v55 = vld [vmem:[#allocation8 + $0x8f8] sm:$0xff] }
 0x304   : > { %4458 = vmatprep.subr.bf16.mxu1 %v7220_v4  ;;  %v1043_v4 = vld [vmem:[#allocation8 + $0x7b0] sm:$0xff] }
 0x305   : > { %v7273_v22 = vcombine.low %v1039_v3, %v1043_v4 }
 0x306   : > { %4295 = vmatpush1.bf16.msra.mxu0 %v7217_v13  ;;  %v7274_v13 = vcombine.high %v1039_v3, %v1043_v4  ;;  %v1092_v3 = vld [vmem:[#allocation8 + $0x938] sm:$0xff]  ;;  %v7315_v4 = vcombine.low %v1080_v54, %v1084_v55 }
 0x307   : > { %4459 = vmatpush1.bf16.msra.mxu1 %v7219_v14  ;;  %4296 = vmatprep.subr.bf16.mxu0 %v7226_v15  ;;  %v7276_v14 = vcombine.high %v1040_v5, %v1044_v7  ;;  %v1047_v15 = vld [vmem:[#allocation8 + $0x7d0] sm:$0xff] }
 0x308   : > { %4460 = vmatprep.subr.bf16.mxu1 %v7228_v16  ;;  %v1051_v16 = vld [vmem:[#allocation8 + $0x7f0] sm:$0xff] }
 0x309   : > { %v7281_v28 = vcombine.low %v1047_v15, %v1051_v16 }
 0x30a   : > { %4297 = vmatpush1.bf16.msra.mxu0 %v7225_v2  ;;  %v7282_v2 = vcombine.high %v1047_v15, %v1051_v16 }
 0x30b   : > { %4461 = vmatpush1.bf16.msra.mxu1 %v7227_v24  ;;  %4298 = vmatprep.subr.bf16.mxu0 %v7234_v25  ;;  %v7284_v24 = vcombine.high %v1048_v20, %v1052_v21  ;;  %v1055_v25 = vld [vmem:[#allocation8 + $0x810] sm:$0xff] }
 0x30c   : > { %4462 = vmatprep.subr.bf16.mxu1 %v7236_v10  ;;  %v1059_v10 = vld [vmem:[#allocation8 + $0x830] sm:$0xff] }
 0x30d   : > { %v7289_v32 = vcombine.low %v1055_v25, %v1059_v10 }
 0x30e   : > { %4299 = vmatpush1.bf16.msra.mxu0 %v7233_v29  ;;  %v7290_v29 = vcombine.high %v1055_v25, %v1059_v10 }
 0x30f   : > { %4463 = vmatpush1.bf16.msra.mxu1 %v7235_v30  ;;  %4300 = vmatprep.subr.bf16.mxu0 %v7242_v17  ;;  %v7292_v30 = vcombine.high %v1056_v27, %v1060_v49  ;;  %v1063_v17 = vld [vmem:[#allocation8 + $0x850] sm:$0xff] }
 0x310   : > { %4464 = vmatprep.subr.bf16.mxu1 %v7244_v31  ;;  %v1067_v31 = vld [vmem:[#allocation8 + $0x870] sm:$0xff] }
 0x311   : > { %v7297_v43 = vcombine.low %v1063_v17, %v1067_v31 }
 0x312   : > { %4301 = vmatpush1.bf16.msra.mxu0 %v7241_v6  ;;  %v7298_v6 = vcombine.high %v1063_v17, %v1067_v31 }
 0x313   : > { %4465 = vmatpush1.bf16.msra.mxu1 %v7243_v38  ;;  %4302 = vmatprep.subr.bf16.mxu0 %v7250_v39  ;;  %v1071_v38 = vld [vmem:[#allocation8 + $0x890] sm:$0xff] }
 0x314   : > { %4466 = vmatprep.subr.bf16.mxu1 %v7252_v40  ;;  %v1075_v39 = vld [vmem:[#allocation8 + $0x8b0] sm:$0xff]  ;;  %v7300_v40 = vcombine.high %v1064_v33, %v1068_v34 }
 0x315   : > { %v7305_v56 = vcombine.low %v1071_v38, %v1075_v39  ;;  %v1119_v34 = vld [vmem:[#allocation8 + $0xa10] sm:$0xff] }
 0x316   : > { %4303 = vmatpush1.bf16.msra.mxu0 %v7249_v46  ;;  %v7306_v46 = vcombine.high %v1071_v38, %v1075_v39  ;;  %v1124_v38 = vld [vmem:[#allocation8 + $0xa38] sm:$0xff] }
 0x317   : > { %4467 = vmatpush1.bf16.msra.mxu1 %v7251_v53  ;;  %4304 = vmatprep.subr.bf16.mxu0 %v7258_v8  ;;  %v7308_v53 = vcombine.high %v1072_v60, %v1076_v41  ;;  %v1079_v8 = vld [vmem:[#allocation8 + $0x8d0] sm:$0xff] }
 0x318   : > { %4468 = vmatprep.subr.bf16.mxu1 %v7260_v19  ;;  %v1083_v19 = vld [vmem:[#allocation8 + $0x8f0] sm:$0xff] }
 0x319   : > { %v7314_v57 = vcombine.high %v1079_v8, %v1083_v19 }
 0x31a   : > { %4305 = vmatpush1.bf16.msra.mxu0 %v7257_v58  ;;  %v7316_v58 = vcombine.high %v1080_v54, %v1084_v55 }
 0x31b   : > { %4469 = vmatpush1.bf16.msra.mxu1 %v7259_v62  ;;  %4306 = vmatprep.subr.bf16.mxu0 %v7266_v0  ;;  %v1087_v62 = vld [vmem:[#allocation8 + $0x910] sm:$0xff] }
 0x31c   : > { %4470 = vmatprep.subr.bf16.mxu1 %v7268_v1  ;;  %v1091_v0 = vld [vmem:[#allocation8 + $0x930] sm:$0xff]  ;;  %v1088_v1 = vld [vmem:[#allocation8 + $0x918] sm:$0xff] }
 0x31d   : > { %v7322_v5 = vcombine.high %v1087_v62, %v1091_v0  ;;  %v7324_v7 = vcombine.high %v1088_v1, %v1092_v3  ;;  %v7321_v15 = vcombine.low %v1087_v62, %v1091_v0  ;;  %v7323_v16 = vcombine.low %v1088_v1, %v1092_v3 }
 0x31e   : > { %4307 = vmatpush1.bf16.msra.mxu0 %v7265_v9  ;;  %v1095_v9 = vld [vmem:[#allocation8 + $0x950] sm:$0xff] }
 0x31f   : > { %4471 = vmatpush1.bf16.msra.mxu1 %v7267_v11  ;;  %4308 = vmatprep.subr.bf16.mxu0 %v7274_v13  ;;  %v1099_v11 = vld [vmem:[#allocation8 + $0x970] sm:$0xff]  ;;  %v1096_v13 = vld [vmem:[#allocation8 + $0x958] sm:$0xff] }
 0x320   : > { %4472 = vmatprep.subr.bf16.mxu1 %v7276_v14  ;;  %v1100_v14 = vld [vmem:[#allocation8 + $0x978] sm:$0xff]  ;;  %v7330_v20 = vcombine.high %v1095_v9, %v1099_v11  ;;  %v7329_v25 = vcombine.low %v1095_v9, %v1099_v11 }
 0x321   : > { %v7332_v21 = vcombine.high %v1096_v13, %v1100_v14  ;;  %v7331_v10 = vcombine.low %v1096_v13, %v1100_v14 }
 0x322   : > { %4309 = vmatpush1.bf16.msra.mxu0 %v7273_v22  ;;  %v1103_v22 = vld [vmem:[#allocation8 + $0x990] sm:$0xff] }
 0x323   : > { %4473 = vmatpush1.bf16.msra.mxu1 %v7275_v23  ;;  %4310 = vmatprep.subr.bf16.mxu0 %v7282_v2  ;;  %v1107_v23 = vld [vmem:[#allocation8 + $0x9b0] sm:$0xff]  ;;  %v1104_v2 = vld [vmem:[#allocation8 + $0x998] sm:$0xff] }
 0x324   : > { %4474 = vmatprep.subr.bf16.mxu1 %v7284_v24  ;;  %v1108_v24 = vld [vmem:[#allocation8 + $0x9b8] sm:$0xff]  ;;  %v7338_v27 = vcombine.high %v1103_v22, %v1107_v23  ;;  %v7337_v17 = vcombine.low %v1103_v22, %v1107_v23 }
 0x325   : > { %v7340_v49 = vcombine.high %v1104_v2, %v1108_v24  ;;  %v7339_v31 = vcombine.low %v1104_v2, %v1108_v24 }
 0x326   : > { %4311 = vmatpush1.bf16.msra.mxu0 %v7281_v28  ;;  %v1111_v28 = vld [vmem:[#allocation8 + $0x9d0] sm:$0xff] }
 0x327   : > { %4475 = vmatpush1.bf16.msra.mxu1 %v7283_v18  ;;  %4321 = vmatprep.subr.bf16.mxu0 %v7290_v29  ;;  %v1115_v18 = vld [vmem:[#allocation8 + $0x9f0] sm:$0xff]  ;;  %v1112_v29 = vld [vmem:[#allocation8 + $0x9d8] sm:$0xff] }
 0x328   : > { %4485 = vmatprep.subr.bf16.mxu1 %v7292_v30  ;;  %v1116_v30 = vld [vmem:[#allocation8 + $0x9f8] sm:$0xff]  ;;  %v7345_v39 = vcombine.low %v1111_v28, %v1115_v18 }
 0x329   : > { %4313 = vmatmul.mubr.bf16.vlgmr.msra.gmra.mrb[12].mxu0 %v9313_v52  ;;  %v7348_v33 = vcombine.high %v1112_v29, %v1116_v30 }
 0x32a   : > { %4477 = vmatmul.mubr.bf16.vlgmr.msra.gmra.mrb[12].mxu1 %v9313_v52  ;;  %4322 = vmatpush1.bf16.msra.mxu0 %v7289_v32  ;;  %v7307_v52 = vcombine.low %v1072_v60, %v1076_v41  ;;  %v7346_v32 = vcombine.high %v1111_v28, %v1115_v18 }
 0x32b   : > { %4353 = vmatprep.mubr.bf16.mxu0 %v9315_v61  ;;  %4486 = vmatpush1.bf16.msra.mxu1 %v7291_v36  ;;  %v1123_v36 = vld [vmem:[#allocation8 + $0xa30] sm:$0xff] }
 0x32c   : > { %4517 = vmatprep.mubr.bf16.mxu1 %v9315_v61  ;;  %4323 = vmatprep.subr.bf16.mxu0 %v7298_v6  ;;  %v7313_v61 = vcombine.low %v1079_v8, %v1083_v19  ;;  %v1120_v6 = vld [vmem:[#allocation8 + $0xa18] sm:$0xff]  ;;  %v7354_v60 = vcombine.high %v1119_v34, %v1123_v36  ;;  %v7353_v8 = vcombine.low %v1119_v34, %v1123_v36 }
 0x32d   : > { %4487 = vmatprep.subr.bf16.mxu1 %v7300_v40  ;;  %v7347_v40 = vcombine.low %v1112_v29, %v1116_v30  ;;  %v7356_v41 = vcombine.high %v1120_v6, %v1124_v38  ;;  %v7355_v19 = vcombine.low %v1120_v6, %v1124_v38 }
 0x32e   : > { %4324 = vmatpush1.bf16.msra.mxu0 %v7297_v43  ;;  %v1127_v43 = vld [vmem:[#allocation8 + $0xa50] sm:$0xff] }
 0x32f   : > { %4488 = vmatpush1.bf16.msra.mxu1 %v7299_v44  ;;  %4325 = vmatprep.subr.bf16.mxu0 %v7306_v46  ;;  %v1131_v44 = vld [vmem:[#allocation8 + $0xa70] sm:$0xff]  ;;  %v1128_v46 = vld [vmem:[#allocation8 + $0xa58] sm:$0xff] }
 0x330   : > { %4489 = vmatprep.subr.bf16.mxu1 %v7308_v53  ;;  %v1132_v53 = vld [vmem:[#allocation8 + $0xa78] sm:$0xff]  ;;  %v7362_v54 = vcombine.high %v1127_v43, %v1131_v44  ;;  %v7361_v62 = vcombine.low %v1127_v43, %v1131_v44 }
 0x331   : > { %v7364_v55 = vcombine.high %v1128_v46, %v1132_v53  ;;  %v7363_v0 = vcombine.low %v1128_v46, %v1132_v53 }
 0x332   : > { %4326 = vmatpush1.bf16.msra.mxu0 %v7305_v56  ;;  %v1135_v56 = vld [vmem:[#allocation8 + $0xa90] sm:$0xff] }
 0x333   : > { %4490 = vmatpush1.bf16.msra.mxu1 %v7307_v52  ;;  %4327 = vmatprep.subr.bf16.mxu0 %v7314_v57  ;;  %v1139_v52 = vld [vmem:[#allocation8 + $0xab0] sm:$0xff]  ;;  %v1136_v57 = vld [vmem:[#allocation8 + $0xa98] sm:$0xff] }
 0x334   : > { %4491 = vmatprep.subr.bf16.mxu1 %v7316_v58  ;;  %v1140_v58 = vld [vmem:[#allocation8 + $0xab8] sm:$0xff]  ;;  %v7370_v1 = vcombine.high %v1135_v56, %v1139_v52  ;;  %v7369_v9 = vcombine.low %v1135_v56, %v1139_v52 }
 0x335   : > { %v7372_v3 = vcombine.high %v1136_v57, %v1140_v58  ;;  %v7371_v11 = vcombine.low %v1136_v57, %v1140_v58 }
 0x336   : > { %4328 = vmatpush1.bf16.msra.mxu0 %v7313_v61  ;;  %v1143_v61 = vld [vmem:[#allocation8 + $0xad0] sm:$0xff] }
 0x337   : > { %4492 = vmatpush1.bf16.msra.mxu1 %v7315_v4  ;;  %4329 = vmatprep.subr.bf16.mxu0 %v7322_v5  ;;  %v1147_v4 = vld [vmem:[#allocation8 + $0xaf0] sm:$0xff]  ;;  %v1144_v5 = vld [vmem:[#allocation8 + $0xad8] sm:$0xff] }
 0x338   : > { %4493 = vmatprep.subr.bf16.mxu1 %v7324_v7  ;;  %v1148_v7 = vld [vmem:[#allocation8 + $0xaf8] sm:$0xff]  ;;  %v7378_v13 = vcombine.high %v1143_v61, %v1147_v4  ;;  %v7377_v22 = vcombine.low %v1143_v61, %v1147_v4 }
 0x339   : > { %v7380_v14 = vcombine.high %v1144_v5, %v1148_v7  ;;  %v7379_v23 = vcombine.low %v1144_v5, %v1148_v7  ;;  %v1196_v61 = vld [vmem:[#allocation8 + $0xc78] sm:$0xff]  ;;  %v1199_v7 = vld [vmem:[#allocation8 + $0xc90] sm:$0xff] }
 0x33a   : > { %4330 = vmatpush1.bf16.msra.mxu0 %v7321_v15  ;;  %v1151_v15 = vld [vmem:[#allocation8 + $0xb10] sm:$0xff] }
 0x33b   : > { %4494 = vmatpush1.bf16.msra.mxu1 %v7323_v16  ;;  %4331 = vmatprep.subr.bf16.mxu0 %v7330_v20  ;;  %v1155_v16 = vld [vmem:[#allocation8 + $0xb30] sm:$0xff]  ;;  %v1152_v20 = vld [vmem:[#allocation8 + $0xb18] sm:$0xff] }
 0x33c   : > { %4495 = vmatprep.subr.bf16.mxu1 %v7332_v21  ;;  %v1156_v21 = vld [vmem:[#allocation8 + $0xb38] sm:$0xff]  ;;  %v7386_v2 = vcombine.high %v1151_v15, %v1155_v16  ;;  %v7385_v28 = vcombine.low %v1151_v15, %v1155_v16 }
 0x33d   : > { %v7388_v24 = vcombine.high %v1152_v20, %v1156_v21  ;;  %v7387_v18 = vcombine.low %v1152_v20, %v1156_v21 }
 0x33e   : > { %4332 = vmatpush1.bf16.msra.mxu0 %v7329_v25  ;;  %v1159_v25 = vld [vmem:[#allocation8 + $0xb50] sm:$0xff] }
 0x33f   : > { %4496 = vmatpush1.bf16.msra.mxu1 %v7331_v10  ;;  %4333 = vmatprep.subr.bf16.mxu0 %v7338_v27  ;;  %v1163_v10 = vld [vmem:[#allocation8 + $0xb70] sm:$0xff]  ;;  %v1160_v27 = vld [vmem:[#allocation8 + $0xb58] sm:$0xff] }
 0x340   : > { %4497 = vmatprep.subr.bf16.mxu1 %v7340_v49  ;;  %v1164_v49 = vld [vmem:[#allocation8 + $0xb78] sm:$0xff]  ;;  %v7394_v29 = vcombine.high %v1159_v25, %v1163_v10  ;;  %v7393_v34 = vcombine.low %v1159_v25, %v1163_v10 }
 0x341   : > { %v7396_v30 = vcombine.high %v1160_v27, %v1164_v49  ;;  %v7395_v36 = vcombine.low %v1160_v27, %v1164_v49  ;;  %v1215_v49 = vld [vmem:[#allocation8 + $0xd10] sm:$0xff] }
 0x342   : > { %4334 = vmatpush1.bf16.msra.mxu0 %v7337_v17  ;;  %v1167_v17 = vld [vmem:[#allocation8 + $0xb90] sm:$0xff] }
 0x343   : > { %4498 = vmatpush1.bf16.msra.mxu1 %v7339_v31  ;;  %4335 = vmatprep.subr.bf16.mxu0 %v7346_v32  ;;  %v1171_v31 = vld [vmem:[#allocation8 + $0xbb0] sm:$0xff]  ;;  %v1168_v32 = vld [vmem:[#allocation8 + $0xb98] sm:$0xff] }
 0x344   : > { %4499 = vmatprep.subr.bf16.mxu1 %v7348_v33  ;;  %v1172_v33 = vld [vmem:[#allocation8 + $0xbb8] sm:$0xff]  ;;  %v7402_v6 = vcombine.high %v1167_v17, %v1171_v31  ;;  %v7401_v43 = vcombine.low %v1167_v17, %v1171_v31 }
 0x345   : > { %v7404_v38 = vcombine.high %v1168_v32, %v1172_v33  ;;  %v7403_v44 = vcombine.low %v1168_v32, %v1172_v33  ;;  %v1223_v32 = vld [vmem:[#allocation8 + $0xd50] sm:$0xff] }
 0x346   : > { %4336 = vmatpush1.bf16.msra.mxu0 %v7345_v39  ;;  %v1175_v39 = vld [vmem:[#allocation8 + $0xbd0] sm:$0xff] }
 0x347   : > { %4500 = vmatpush1.bf16.msra.mxu1 %v7347_v40  ;;  %4337 = vmatprep.subr.bf16.mxu0 %v7354_v60  ;;  %v1179_v40 = vld [vmem:[#allocation8 + $0xbf0] sm:$0xff]  ;;  %v1176_v60 = vld [vmem:[#allocation8 + $0xbd8] sm:$0xff] }
 0x348   : > { %4501 = vmatprep.subr.bf16.mxu1 %v7356_v41  ;;  %v1180_v41 = vld [vmem:[#allocation8 + $0xbf8] sm:$0xff]  ;;  %v7410_v46 = vcombine.high %v1175_v39, %v1179_v40  ;;  %v7409_v56 = vcombine.low %v1175_v39, %v1179_v40  ;;  %v1227_v33 = vld [vmem:[#allocation8 + $0xd70] sm:$0xff] }
 0x349   : > { %v7412_v53 = vcombine.high %v1176_v60, %v1180_v41  ;;  %v7411_v52 = vcombine.low %v1176_v60, %v1180_v41  ;;  %v7458_v39 = vcombine.high %v1223_v32, %v1227_v33  ;;  %v1231_v60 = vld [vmem:[#allocation8 + $0xd90] sm:$0xff] }
 0x34a   : > { %4338 = vmatpush1.bf16.msra.mxu0 %v7353_v8  ;;  %v1183_v8 = vld [vmem:[#allocation8 + $0xc10] sm:$0xff] }
 0x34b   : > { %4502 = vmatpush1.bf16.msra.mxu1 %v7355_v19  ;;  %4339 = vmatprep.subr.bf16.mxu0 %v7362_v54  ;;  %v1187_v19 = vld [vmem:[#allocation8 + $0xc30] sm:$0xff]  ;;  %v1184_v54 = vld [vmem:[#allocation8 + $0xc18] sm:$0xff] }
 0x34c   : > { %4503 = vmatprep.subr.bf16.mxu1 %v7364_v55  ;;  %v1188_v55 = vld [vmem:[#allocation8 + $0xc38] sm:$0xff]  ;;  %v7418_v57 = vcombine.high %v1183_v8, %v1187_v19  ;;  %v1235_v41 = vld [vmem:[#allocation8 + $0xdb0] sm:$0xff] }
 0x34d   : > { %v7420_v58 = vcombine.high %v1184_v54, %v1188_v55  ;;  %v7419_v4 = vcombine.low %v1184_v54, %v1188_v55 }
 0x34e   : > { %4340 = vmatpush1.bf16.msra.mxu0 %v7361_v62  ;;  %v1191_v62 = vld [vmem:[#allocation8 + $0xc50] sm:$0xff] }
 0x34f   : > { %4504 = vmatpush1.bf16.msra.mxu1 %v7363_v0  ;;  %4341 = vmatprep.subr.bf16.mxu0 %v7370_v1  ;;  %v1195_v0 = vld [vmem:[#allocation8 + $0xc70] sm:$0xff]  ;;  %v7417_v1 = vcombine.low %v1183_v8, %v1187_v19  ;;  %v7466_v8 = vcombine.high %v1231_v60, %v1235_v41 }
 0x350   : > { %4505 = vmatprep.subr.bf16.mxu1 %v7372_v3  ;;  %v1192_v3 = vld [vmem:[#allocation8 + $0xc58] sm:$0xff]  ;;  %v7426_v5 = vcombine.high %v1191_v62, %v1195_v0  ;;  %v7425_v15 = vcombine.low %v1191_v62, %v1195_v0 }
 0x351   : > { %v7427_v16 = vcombine.low %v1192_v3, %v1196_v61  ;;  %v1240_v62 = vld [vmem:[#allocation8 + $0xdd8] sm:$0xff] }
 0x352   : > { %4342 = vmatpush1.bf16.msra.mxu0 %v7369_v9  ;;  %v1203_v9 = vld [vmem:[#allocation8 + $0xcb0] sm:$0xff]  ;;  %v1244_v0 = vld [vmem:[#allocation8 + $0xdf8] sm:$0xff] }
 0x353   : > { %4506 = vmatpush1.bf16.msra.mxu1 %v7371_v11  ;;  %4343 = vmatprep.subr.bf16.mxu0 %v7378_v13  ;;  %v7428_v11 = vcombine.high %v1192_v3, %v1196_v61  ;;  %v1200_v13 = vld [vmem:[#allocation8 + $0xc98] sm:$0xff]  ;;  %v7434_v20 = vcombine.high %v1199_v7, %v1203_v9  ;;  %v7433_v25 = vcombine.low %v1199_v7, %v1203_v9 }
 0x354   : > { %4507 = vmatprep.subr.bf16.mxu1 %v7380_v14  ;;  %v1204_v14 = vld [vmem:[#allocation8 + $0xcb8] sm:$0xff]  ;;  %v7465_v61 = vcombine.low %v1231_v60, %v1235_v41 }
 0x355   : > { %v7436_v21 = vcombine.high %v1200_v13, %v1204_v14 }
 0x356   : > { %4344 = vmatpush1.bf16.msra.mxu0 %v7377_v22  ;;  %v1207_v22 = vld [vmem:[#allocation8 + $0xcd0] sm:$0xff] }
 0x357   : > { %4508 = vmatpush1.bf16.msra.mxu1 %v7379_v23  ;;  %4345 = vmatprep.subr.bf16.mxu0 %v7386_v2  ;;  %v1211_v23 = vld [vmem:[#allocation8 + $0xcf0] sm:$0xff]  ;;  %v1208_v2 = vld [vmem:[#allocation8 + $0xcd8] sm:$0xff] }
 0x358   : > { %4509 = vmatprep.subr.bf16.mxu1 %v7388_v24  ;;  %v1212_v24 = vld [vmem:[#allocation8 + $0xcf8] sm:$0xff]  ;;  %v7442_v10 = vcombine.high %v1207_v22, %v1211_v23 }
 0x359   : > { %v7444_v27 = vcombine.high %v1208_v2, %v1212_v24 }
 0x35a   : > { %4346 = vmatpush1.bf16.msra.mxu0 %v7385_v28  ;;  %v1219_v28 = vld [vmem:[#allocation8 + $0xd30] sm:$0xff] }
 0x35b   : > { %4510 = vmatpush1.bf16.msra.mxu1 %v7387_v18  ;;  %4347 = vmatprep.subr.bf16.mxu0 %v7394_v29  ;;  %v1216_v18 = vld [vmem:[#allocation8 + $0xd18] sm:$0xff]  ;;  %v7450_v17 = vcombine.high %v1215_v49, %v1219_v28 }
 0x35c   : > { %4511 = vmatprep.subr.bf16.mxu1 %v7396_v30  ;;  %v1220_v29 = vld [vmem:[#allocation8 + $0xd38] sm:$0xff]  ;;  %v7443_v30 = vcombine.low %v1208_v2, %v1212_v24  ;;  %v1255_v2 = vld [vmem:[#allocation8 + $0xe50] sm:$0xff] }
 0x35d   : > { %v7452_v31 = vcombine.high %v1216_v18, %v1220_v29  ;;  %v1259_v24 = vld [vmem:[#allocation8 + $0xe70] sm:$0xff] }
 0x35e   : > { %4348 = vmatpush1.bf16.msra.mxu0 %v7393_v34  ;;  %v1224_v34 = vld [vmem:[#allocation8 + $0xd58] sm:$0xff] }
 0x35f   : > { %4512 = vmatpush1.bf16.msra.mxu1 %v7395_v36  ;;  %4349 = vmatprep.subr.bf16.mxu0 %v7402_v6  ;;  %v1228_v36 = vld [vmem:[#allocation8 + $0xd78] sm:$0xff]  ;;  %v7449_v6 = vcombine.low %v1215_v49, %v1219_v28  ;;  %v7490_v49 = vcombine.high %v1255_v2, %v1259_v24 }
 0x360   : > { %4513 = vmatprep.subr.bf16.mxu1 %v7404_v38  ;;  %v7451_v38 = vcombine.low %v1216_v18, %v1220_v29  ;;  %v7460_v40 = vcombine.high %v1224_v34, %v1228_v36  ;;  %v1263_v18 = vld [vmem:[#allocation8 + $0xe90] sm:$0xff] }
 0x361   : > { %v1267_v29 = vld [vmem:[#allocation8 + $0xeb0] sm:$0xff] }
 0x362   : > { %4350 = vmatpush1.bf16.msra.mxu0 %v7401_v43  ;;  %v1232_v43 = vld [vmem:[#allocation8 + $0xd98] sm:$0xff] }
 0x363   : > { %4514 = vmatpush1.bf16.msra.mxu1 %v7403_v44  ;;  %4351 = vmatprep.subr.bf16.mxu0 %v7410_v46  ;;  %v1236_v44 = vld [vmem:[#allocation8 + $0xdb8] sm:$0xff]  ;;  %v7457_v46 = vcombine.low %v1223_v32, %v1227_v33  ;;  %v7498_v32 = vcombine.high %v1263_v18, %v1267_v29 }
 0x364   : > { %4515 = vmatprep.subr.bf16.mxu1 %v7412_v53  ;;  %v7459_v53 = vcombine.low %v1224_v34, %v1228_v36  ;;  %v7468_v55 = vcombine.high %v1232_v43, %v1236_v44  ;;  %v7467_v7 = vcombine.low %v1232_v43, %v1236_v44  ;;  %v1271_v34 = vld [vmem:[#allocation8 + $0xed0] sm:$0xff] }
 0x365   : > { %v1275_v36 = vld [vmem:[#allocation8 + $0xef0] sm:$0xff] }
 0x366   : > { %4352 = vmatpush1.bf16.msra.mxu0 %v7409_v56  ;;  %v1239_v56 = vld [vmem:[#allocation8 + $0xdd0] sm:$0xff]  ;;  %v7506_v60 = vcombine.high %v1271_v34, %v1275_v36 }
 0x367   : > { %4516 = vmatpush1.bf16.msra.mxu1 %v7411_v52  ;;  %4362 = vmatprep.subr.bf16.mxu0 %v7418_v57  ;;  %v1243_v52 = vld [vmem:[#allocation8 + $0xdf0] sm:$0xff] }
 0x368   : > { %4526 = vmatprep.subr.bf16.mxu1 %v7420_v58  ;;  %v7474_v9 = vcombine.high %v1239_v56, %v1243_v52  ;;  %v1279_v43 = vld [vmem:[#allocation8 + $0xf10] sm:$0xff] }
 0x369   : > { %4354 = vmatmul.mubr.bf16.vlgmr.msra.gmra.mrb[12].mxu0 %v9331_v35  ;;  %v1283_v44 = vld [vmem:[#allocation8 + $0xf30] sm:$0xff] }
 0x36a   : > { %4518 = vmatmul.mubr.bf16.vlgmr.msra.gmra.mrb[12].mxu1 %v9331_v35  ;;  %4363 = vmatpush1.bf16.msra.mxu0 %v7417_v1  ;;  %v7435_v35 = vcombine.low %v1200_v13, %v1204_v14  ;;  %v1247_v13 = vld [vmem:[#allocation8 + $0xe10] sm:$0xff] }
 0x36b   : > { %4394 = vmatprep.mubr.bf16.mxu0 %v9333_v42  ;;  %4527 = vmatpush1.bf16.msra.mxu1 %v7419_v4  ;;  %v1251_v14 = vld [vmem:[#allocation8 + $0xe30] sm:$0xff] }
 0x36c   : > { %4558 = vmatprep.mubr.bf16.mxu1 %v9333_v42  ;;  %4364 = vmatprep.subr.bf16.mxu0 %v7426_v5  ;;  %v7441_v42 = vcombine.low %v1207_v22, %v1211_v23  ;;  %v7482_v22 = vcombine.high %v1247_v13, %v1251_v14 }
 0x36d   : > { %4528 = vmatprep.subr.bf16.mxu1 %v7428_v11  ;;  %v7476_v11 = vcombine.high %v1240_v62, %v1244_v0 }
 0x36e   : > { %4365 = vmatpush1.bf16.msra.mxu0 %v7425_v15  ;;  %v1248_v15 = vld [vmem:[#allocation8 + $0xe18] sm:$0xff] }
 0x36f   : > { %4529 = vmatpush1.bf16.msra.mxu1 %v7427_v16  ;;  %4366 = vmatprep.subr.bf16.mxu0 %v7434_v20  ;;  %v1252_v16 = vld [vmem:[#allocation8 + $0xe38] sm:$0xff]  ;;  %v7473_v20 = vcombine.low %v1239_v56, %v1243_v52  ;;  %v7514_v56 = vcombine.high %v1279_v43, %v1283_v44 }
 0x370   : > { %4530 = vmatprep.subr.bf16.mxu1 %v7436_v21  ;;  %v7475_v21 = vcombine.low %v1240_v62, %v1244_v0  ;;  %v7484_v23 = vcombine.high %v1248_v15, %v1252_v16  ;;  %v1287_v62 = vld [vmem:[#allocation8 + $0xf50] sm:$0xff] }
 0x371   : > { %v1291_v0 = vld [vmem:[#allocation8 + $0xf70] sm:$0xff] }
 0x372   : > { %4367 = vmatpush1.bf16.msra.mxu0 %v7433_v25  ;;  %v1256_v25 = vld [vmem:[#allocation8 + $0xe58] sm:$0xff] }
 0x373   : > { %4531 = vmatpush1.bf16.msra.mxu1 %v7435_v35  ;;  %4368 = vmatprep.subr.bf16.mxu0 %v7442_v10  ;;  %v1260_v35 = vld [vmem:[#allocation8 + $0xe78] sm:$0xff]  ;;  %v7481_v10 = vcombine.low %v1247_v13, %v1251_v14 }
 0x374   : > { %4532 = vmatprep.subr.bf16.mxu1 %v7444_v27  ;;  %v7483_v27 = vcombine.low %v1248_v15, %v1252_v16  ;;  %v7492_v28 = vcombine.high %v1256_v25, %v1260_v35  ;;  %v1296_v13 = vld [vmem:[#allocation8 + $0xf98] sm:$0xff]  ;;  %v9369_v15 = vld [vmem:[#allocation10] sm:$0xff]  ;;  %v7521_v16 = vcombine.low %v1287_v62, %v1291_v0 }
 0x375   : > { %v1300_v14 = vld [vmem:[#allocation8 + $0xfb8] sm:$0xff] }
 0x376   : > { %4369 = vmatpush1.bf16.msra.mxu0 %v7441_v42  ;;  %v1264_v42 = vld [vmem:[#allocation8 + $0xe98] sm:$0xff] }
 0x377   : > { %4533 = vmatpush1.bf16.msra.mxu1 %v7443_v30  ;;  %4370 = vmatprep.subr.bf16.mxu0 %v7450_v17  ;;  %v1268_v30 = vld [vmem:[#allocation8 + $0xeb8] sm:$0xff]  ;;  %v7489_v17 = vcombine.low %v1255_v2, %v1259_v24  ;;  %v1307_v2 = vld [vmem:[#allocation8 + $0xff0] sm:$0xff]  ;;  %v1318_v24 = vrot.slane %v9369_v15, %v9269_v50 }
 0x378   : > { %4534 = vmatprep.subr.bf16.mxu1 %v7452_v31  ;;  %v7491_v31 = vcombine.low %v1256_v25, %v1260_v35  ;;  %v7500_v33 = vcombine.high %v1264_v42, %v1268_v30  ;;  %v1304_v25 = vld [vmem:[#allocation8 + $0xfd8] sm:$0xff] }
 0x379   : > { %v1308_v35 = vld [vmem:[#allocation8 + $0xff8] sm:$0xff] }
 0x37a   : > { %4371 = vmatpush1.bf16.msra.mxu0 %v7449_v6  ;;  %v1272_v6 = vld [vmem:[#allocation8 + $0xed8] sm:$0xff] }
 0x37b   : > { %4535 = vmatpush1.bf16.msra.mxu1 %v7451_v38  ;;  %4372 = vmatprep.subr.bf16.mxu0 %v7458_v39  ;;  %v1276_v38 = vld [vmem:[#allocation8 + $0xef8] sm:$0xff]  ;;  %v7497_v39 = vcombine.low %v1263_v18, %v1267_v29 }
 0x37c   : > { %v9361_v19 = vpop.f32.mrb[8].mxu0  ;;  %v9363_v54 = vpop.f32.mrb[8].mxu1  ;;  %4536 = vmatprep.subr.bf16.mxu1 %v7460_v40  ;;  %v7499_v40 = vcombine.low %v1264_v42, %v1268_v30  ;;  %v7508_v41 = vcombine.high %v1272_v6, %v1276_v38  ;;  %v7539_v42 = vcombine.low %v1304_v25, %v1308_v35  ;;  %v8098_v30 = vld [vmem:[#allocation11 + $0x4] ss:$16 sps:$4 sm:$0xff]  }
 0x37d   : > { %v9365_v57 = vpop.f32.mrb[9].mxu0  ;;  %v9367_v58 = vpop.f32.mrb[9].mxu1 }
 0x37e   : > { %v4072_v1 = vpop.f32.mrb[10].mxu0  ;;  %v4236_v3 = vpop.f32.mrb[10].mxu1  ;;  %4373 = vmatpush1.bf16.msra.mxu0 %v7457_v46  ;;  %v1280_v46 = vld [vmem:[#allocation8 + $0xf18] sm:$0xff]  ;;  %v7879_v18 = vadd.f32 %v9365_v57, %v1318_v24  ;;  %v8107_v57 = vld [vmem:[#allocation11 + $0x2c] ss:$16 sps:$4 sm:$0xff]  }
 0x37f   : > { %4537 = vmatpush1.bf16.msra.mxu1 %v7459_v53  ;;  %v4073_v4 = vpop.f32.mrb[11].mxu0  ;;  %v4237_v5 = vpop.f32.mrb[11].mxu1  ;;  %4374 = vmatprep.subr.bf16.mxu0 %v7466_v8  ;;  %v1284_v53 = vld [vmem:[#allocation8 + $0xf38] sm:$0xff]  ;;  %v7505_v8 = vcombine.low %v1271_v34, %v1275_v36  ;;  %v8153_v24 = vld [vmem:[#allocation11 + $0x128] ss:$16 sps:$4 sm:$0xff]  }
 0x380   : > { %4538 = vmatprep.subr.bf16.mxu1 %v7468_v55  ;;  %v7507_v55 = vcombine.low %v1272_v6, %v1276_v38  ;;  %v7516_v52 = vcombine.high %v1280_v46, %v1284_v53  ;;  %v1288_v1 = vld [vmem:[#allocation8 + $0xf58] sm:$0xff]  ;;  %v7515_v4 = vcombine.low %v1280_v46, %v1284_v53  ;;  %v7522_v5 = vcombine.high %v1287_v62, %v1291_v0  ;;  %v8105_v38 = vld [vmem:[#allocation11 + $0x28] ss:$16 sps:$4 sm:$0xff]   ;;  %v8131_v62 = vld [vmem:[#allocation11 + $0xac] ss:$16 sps:$4 sm:$0xff]  }
 0x381   : > { %v1292_v3 = vld [vmem:[#allocation8 + $0xf78] sm:$0xff]  ;;  %v8117_v46 = vld [vmem:[#allocation11 + $0x68] ss:$16 sps:$4 sm:$0xff]  }
 0x382   : > { %4375 = vmatpush1.bf16.msra.mxu0 %v7465_v61  ;;  %v7513_v61 = vcombine.low %v1279_v43, %v1283_v44  ;;  %v8104_v34 = vld [vmem:[#allocation11 + $0x24] ss:$16 sps:$4 sm:$0xff]   ;;  %v8102_v6 = vld [vmem:[#allocation11 + $0x20] ss:$16 sps:$4 sm:$0xff]   ;;  %v8119_v44 = vld [vmem:[#allocation11 + $0x6c] ss:$16 sps:$4 sm:$0xff]  }
 0x383   : > { %4539 = vmatpush1.bf16.msra.mxu1 %v7467_v7  ;;  %4376 = vmatprep.subr.bf16.mxu0 %v7474_v9  ;;  %v7524_v7 = vcombine.high %v1288_v1, %v1292_v3  ;;  %v1295_v9 = vld [vmem:[#allocation8 + $0xf90] sm:$0xff]  ;;  %v8116_v43 = vld [vmem:[#allocation11 + $0x64] ss:$16 sps:$4 sm:$0xff]   ;;  %v8126_v0 = vld [vmem:[#allocation11 + $0xa0] ss:$16 sps:$4 sm:$0xff]  }
 0x384   : > { %4540 = vmatprep.subr.bf16.mxu1 %v7476_v11  ;;  %v1299_v11 = vld [vmem:[#allocation8 + $0xfb0] sm:$0xff]  ;;  %v8122_v53 = vld [vmem:[#allocation11 + $0x84] ss:$16 sps:$4 sm:$0xff]  }
 0x386   : > { %4377 = vmatpush1.bf16.msra.mxu0 %v7473_v20  ;;  %v7523_v20 = vcombine.low %v1288_v1, %v1292_v3  ;;  %v8129_v1 = vld [vmem:[#allocation11 + $0xa8] ss:$16 sps:$4 sm:$0xff]   ;;  %v8134_v3 = vld [vmem:[#allocation11 + $0xc4] ss:$16 sps:$4 sm:$0xff]  }
 0x387   : > { %4541 = vmatpush1.bf16.msra.mxu1 %v7475_v21  ;;  %4378 = vmatprep.subr.bf16.mxu0 %v7482_v22  ;;  %v7530_v21 = vcombine.high %v1295_v9, %v1299_v11  ;;  %v7532_v22 = vcombine.high %v1296_v13, %v1300_v14 }
 0x388   : > { %4542 = vmatprep.subr.bf16.mxu1 %v7484_v23  ;;  %v1303_v23 = vld [vmem:[#allocation8 + $0xfd0] sm:$0xff] }
 0x389   : > { %v7537_v29 = vcombine.low %v1303_v23, %v1307_v2 }
 0x38a   : > { %4379 = vmatpush1.bf16.msra.mxu0 %v7481_v10  ;;  %v7529_v10 = vcombine.low %v1295_v9, %v1299_v11  ;;  %v8143_v9 = vld [vmem:[#allocation11 + $0xec] ss:$16 sps:$4 sm:$0xff]   ;;  %v8138_v11 = vld [vmem:[#allocation11 + $0xe0] ss:$16 sps:$4 sm:$0xff]  }
 0x38b   : > { %4543 = vmatpush1.bf16.msra.mxu1 %v7483_v27  ;;  %4380 = vmatprep.subr.bf16.mxu0 %v7490_v49  ;;  %v7531_v27 = vcombine.low %v1296_v13, %v1300_v14  ;;  %v7538_v49 = vcombine.high %v1303_v23, %v1307_v2  ;;  %v8141_v13 = vld [vmem:[#allocation11 + $0xe8] ss:$16 sps:$4 sm:$0xff]   ;;  %v8146_v14 = vld [vmem:[#allocation11 + $0x104] ss:$16 sps:$4 sm:$0xff]   ;;  %v8155_v23 = vld [vmem:[#allocation11 + $0x12c] ss:$16 sps:$4 sm:$0xff]  }
 0x38c   : > { %4544 = vmatprep.subr.bf16.mxu1 %v7492_v28  ;;  %v7540_v28 = vcombine.high %v1304_v25, %v1308_v35  ;;  %v8150_v2 = vld [vmem:[#allocation11 + $0x120] ss:$16 sps:$4 sm:$0xff]   ;;  %v8158_v25 = vld [vmem:[#allocation11 + $0x144] ss:$16 sps:$4 sm:$0xff]   ;;  %v8161_v35 = vld [vmem:[#allocation11 + $0x14c] ss:$16 sps:$4 sm:$0xff]  }
 0x38e   : > { %4381 = vmatpush1.bf16.msra.mxu0 %v7489_v17  ;;  %v8101_v17 = vld [vmem:[#allocation11 + $0xc] ss:$16 sps:$4 sm:$0xff]  }
 0x38f   : > { %4545 = vmatpush1.bf16.msra.mxu1 %v7491_v31  ;;  %4382 = vmatprep.subr.bf16.mxu0 %v7498_v32  ;;  %v4568_v31 = vmax.f32 %v7879_v18, 0.0  ;;  %v8096_v32 = vld [vmem:[#allocation11] ss:$16 sps:$4 sm:$0xff]  }
 0x390   : > { %4546 = vmatprep.subr.bf16.mxu1 %v7500_v33  ;;  %v8099_v33 = vld [vmem:[#allocation11 + $0x8] ss:$16 sps:$4 sm:$0xff]   ;;  %v8162_v18 = vld [vmem:[#allocation11 + $0x160] ss:$16 sps:$4 sm:$0xff]  }
 0x391   : > { %v4576_v36 = vpack.c.bf16 %v4568_v31, %v4568_v31  ;;  %v8171_v31 = vld [vmem:[#allocation11 + $0x188] ss:$16 sps:$4 sm:$0xff]  }
 0x392   : > { %4383 = vmatpush1.bf16.msra.mxu0 %v7497_v39  ;;  %v8110_v39 = vld [vmem:[#allocation11 + $0x44] ss:$16 sps:$4 sm:$0xff]  }
 0x393   : > { %4547 = vmatpush1.bf16.msra.mxu1 %v7499_v40  ;;  %4384 = vmatprep.subr.bf16.mxu0 %v7506_v60  ;;  %v8113_v40 = vld [vmem:[#allocation11 + $0x4c] ss:$16 sps:$4 sm:$0xff]   ;;  %v8108_v60 = vld [vmem:[#allocation11 + $0x40] ss:$16 sps:$4 sm:$0xff]  }
 0x394   : > { %4548 = vmatprep.subr.bf16.mxu1 %v7508_v41  ;;  %v8111_v41 = vld [vmem:[#allocation11 + $0x48] ss:$16 sps:$4 sm:$0xff]  }
 0x396   : > { %4385 = vmatpush1.bf16.msra.mxu0 %v7505_v8  ;;  %v8125_v8 = vld [vmem:[#allocation11 + $0x8c] ss:$16 sps:$4 sm:$0xff]  }
 0x397   : > { %4549 = vmatpush1.bf16.msra.mxu1 %v7507_v55  ;;  %4386 = vmatprep.subr.bf16.mxu0 %v7514_v56  ;;  %v8120_v55 = vld [vmem:[#allocation11 + $0x80] ss:$16 sps:$4 sm:$0xff]   ;;  %v8123_v56 = vld [vmem:[#allocation11 + $0x88] ss:$16 sps:$4 sm:$0xff]  }
 0x398   : > { %4550 = vmatprep.subr.bf16.mxu1 %v7516_v52  ;;  %v8128_v52 = vld [vmem:[#allocation11 + $0xa4] ss:$16 sps:$4 sm:$0xff]  }
 0x39a   : > { %4387 = vmatpush1.bf16.msra.mxu0 %v7513_v61  ;;  %v8137_v61 = vld [vmem:[#allocation11 + $0xcc] ss:$16 sps:$4 sm:$0xff]  }
 0x39b   : > { %4551 = vmatpush1.bf16.msra.mxu1 %v7515_v4  ;;  %4388 = vmatprep.subr.bf16.mxu0 %v7522_v5  ;;  %v8132_v4 = vld [vmem:[#allocation11 + $0xc0] ss:$16 sps:$4 sm:$0xff]   ;;  %v8135_v5 = vld [vmem:[#allocation11 + $0xc8] ss:$16 sps:$4 sm:$0xff]  }
 0x39c   : > { %4552 = vmatprep.subr.bf16.mxu1 %v7524_v7  ;;  %v8140_v7 = vld [vmem:[#allocation11 + $0xe4] ss:$16 sps:$4 sm:$0xff]  }
 0x39e   : > { %4389 = vmatpush1.bf16.msra.mxu0 %v7521_v16  ;;  %v8149_v16 = vld [vmem:[#allocation11 + $0x10c] ss:$16 sps:$4 sm:$0xff]  }
 0x39f   : > { %4553 = vmatpush1.bf16.msra.mxu1 %v7523_v20  ;;  %4390 = vmatprep.subr.bf16.mxu0 %v7530_v21  ;;  %v8144_v20 = vld [vmem:[#allocation11 + $0x100] ss:$16 sps:$4 sm:$0xff]   ;;  %v8147_v21 = vld [vmem:[#allocation11 + $0x108] ss:$16 sps:$4 sm:$0xff]  }
 0x3a0   : > { %4554 = vmatprep.subr.bf16.mxu1 %v7532_v22  ;;  %v8152_v22 = vld [vmem:[#allocation11 + $0x124] ss:$16 sps:$4 sm:$0xff]  }
 0x3a2   : > { %4391 = vmatpush1.bf16.msra.mxu0 %v7529_v10  ;;  %v8156_v10 = vld [vmem:[#allocation11 + $0x140] ss:$16 sps:$4 sm:$0xff]  }
 0x3a3   : > { %4555 = vmatpush1.bf16.msra.mxu1 %v7531_v27  ;;  %4392 = vmatprep.subr.bf16.mxu0 %v7538_v49  ;;  %v8159_v27 = vld [vmem:[#allocation11 + $0x148] ss:$16 sps:$4 sm:$0xff]   ;;  %v8164_v49 = vld [vmem:[#allocation11 + $0x164] ss:$16 sps:$4 sm:$0xff]  }
 0x3a4   : > { %4556 = vmatprep.subr.bf16.mxu1 %v7540_v28  ;;  %v8167_v28 = vld [vmem:[#allocation11 + $0x16c] ss:$16 sps:$4 sm:$0xff]  }
 0x3a6   : > { %4393 = vmatpush1.bf16.msra.mxu0 %v7537_v29  ;;  %v8165_v29 = vld [vmem:[#allocation11 + $0x168] ss:$16 sps:$4 sm:$0xff]  }
 0x3a7   : > { %4557 = vmatpush1.bf16.msra.mxu1 %v7539_v42  ;;  %6141 = vmatprep.subr.bf16.mxu0 %v8098_v30  ;;  %v8170_v42 = vld [vmem:[#allocation11 + $0x184] ss:$16 sps:$4 sm:$0xff]   ;;  %v8173_v30 = vld [vmem:[#allocation11 + $0x18c] ss:$16 sps:$4 sm:$0xff]  }
 0x3a8   : > { %6305 = vmatprep.subr.bf16.mxu1 %v8101_v17  ;;  %v8168_v17 = vld [vmem:[#allocation11 + $0x180] ss:$16 sps:$4 sm:$0xff]  }
 0x3a9   : > { %4395 = vmatmul.mubr.bf16.vlgmr.msra.gmra.mrb[12].mxu0 %v9343_v26 }
 0x3aa   : > { %4559 = vmatmul.mubr.bf16.vlgmr.msra.gmra.mrb[12].mxu1 %v9343_v26  ;;  %6142 = vmatpush1.bf16.msra.mxu0 %v8096_v32  ;;  %v8114_v26 = vld [vmem:[#allocation11 + $0x60] ss:$16 sps:$4 sm:$0xff]   ;;  %v8176_v32 = vld [vmem:[#allocation11 + $0x1a4] ss:$16 sps:$4 sm:$0xff]  }
 0x3ab   : > { %6173 = vmatprep.mubr.bf16.mxu0 %v4576_v36  ;;  %6306 = vmatpush1.bf16.msra.mxu1 %v8099_v33  ;;  %v8179_v33 = vld [vmem:[#allocation11 + $0x1ac] ss:$16 sps:$4 sm:$0xff]  }
 0x3ac   : > { %6337 = vmatprep.mubr.bf16.mxu1 %v4576_v36  ;;  %6143 = vmatprep.subr.bf16.mxu0 %v8104_v34  ;;  %v8174_v34 = vld [vmem:[#allocation11 + $0x1a0] ss:$16 sps:$4 sm:$0xff]   ;;  %v1314_v36 = vrot.slane %v9369_v15, %v9264_v48 }
 0x3ad   : > { %6307 = vmatprep.subr.bf16.mxu1 %v8107_v57  ;;  %v8177_v57 = vld [vmem:[#allocation11 + $0x1a8] ss:$16 sps:$4 sm:$0xff]  }
 0x3ae   : > { %6144 = vmatpush1.bf16.msra.mxu0 %v8102_v6  ;;  %v8182_v6 = vld [vmem:[#allocation11 + $0x1c4] ss:$16 sps:$4 sm:$0xff]  }
 0x3af   : > { %6308 = vmatpush1.bf16.msra.mxu1 %v8105_v38  ;;  %6145 = vmatprep.subr.bf16.mxu0 %v8110_v39  ;;  %v8185_v38 = vld [vmem:[#allocation11 + $0x1cc] ss:$16 sps:$4 sm:$0xff]   ;;  %v1326_v39 = vrot.slane %v9369_v15, %v9272_v51 }
 0x3b0   : > { %6309 = vmatprep.subr.bf16.mxu1 %v8113_v40  ;;  %v8180_v40 = vld [vmem:[#allocation11 + $0x1c0] ss:$16 sps:$4 sm:$0xff]  }
 0x3b2   : > { %6146 = vmatpush1.bf16.msra.mxu0 %v8108_v60  ;;  %v7878_v60 = vadd.f32 %v9361_v19, %v1314_v36  ;;  %v8192_v19 = vld [vmem:[#allocation11 + $0x200] ss:$16 sps:$4 sm:$0xff]   ;;  %v8248_v36 = vld [vmem:[#allocation11 + $0x324] ss:$16 sps:$4 sm:$0xff]  }
 0x3b3   : > { %6310 = vmatpush1.bf16.msra.mxu1 %v8111_v41  ;;  %6147 = vmatprep.subr.bf16.mxu0 %v8116_v43  ;;  %v8183_v41 = vld [vmem:[#allocation11 + $0x1c8] ss:$16 sps:$4 sm:$0xff]   ;;  %v8188_v43 = vld [vmem:[#allocation11 + $0x1e4] ss:$16 sps:$4 sm:$0xff]  }
 0x3b4   : > { %6311 = vmatprep.subr.bf16.mxu1 %v8119_v44  ;;  %v8191_v44 = vld [vmem:[#allocation11 + $0x1ec] ss:$16 sps:$4 sm:$0xff]  }
 0x3b6   : > { %6148 = vmatpush1.bf16.msra.mxu0 %v8114_v26  ;;  %v7881_v26 = vadd.f32 %v9367_v58, %v1326_v39  ;;  %v8203_v58 = vld [vmem:[#allocation11 + $0x22c] ss:$16 sps:$4 sm:$0xff]   ;;  %v8254_v39 = vld [vmem:[#allocation11 + $0x344] ss:$16 sps:$4 sm:$0xff]  }
 0x3b7   : > { %6312 = vmatpush1.bf16.msra.mxu1 %v8117_v46  ;;  %6149 = vmatprep.subr.bf16.mxu0 %v8122_v53  ;;  %v8186_v46 = vld [vmem:[#allocation11 + $0x1e0] ss:$16 sps:$4 sm:$0xff]   ;;  %v4567_v53 = vmax.f32 %v7878_v60, 0.0 }
 0x3b8   : > { %6313 = vmatprep.subr.bf16.mxu1 %v8125_v8  ;;  %v8189_v8 = vld [vmem:[#allocation11 + $0x1e8] ss:$16 sps:$4 sm:$0xff]   ;;  %v8252_v60 = vld [vmem:[#allocation11 + $0x340] ss:$16 sps:$4 sm:$0xff]  }
 0x3ba   : > { %6150 = vmatpush1.bf16.msra.mxu0 %v8120_v55  ;;  %v8194_v55 = vld [vmem:[#allocation11 + $0x204] ss:$16 sps:$4 sm:$0xff]  }
 0x3bb   : > { %6314 = vmatpush1.bf16.msra.mxu1 %v8123_v56  ;;  %6151 = vmatprep.subr.bf16.mxu0 %v8128_v52  ;;  %v8197_v56 = vld [vmem:[#allocation11 + $0x20c] ss:$16 sps:$4 sm:$0xff]   ;;  %v4570_v52 = vmax.f32 %v7881_v26, 0.0  ;;  %v8258_v26 = vld [vmem:[#allocation11 + $0x360] ss:$16 sps:$4 sm:$0xff]  }
 0x3bc   : > { %6315 = vmatprep.subr.bf16.mxu1 %v8131_v62  ;;  %v4575_v62 = vpack.c.bf16 %v4567_v53, %v4567_v53  ;;  %v8266_v53 = vld [vmem:[#allocation11 + $0x384] ss:$16 sps:$4 sm:$0xff]  }
 0x3be   : > { %6152 = vmatpush1.bf16.msra.mxu0 %v8126_v0  ;;  %v8195_v0 = vld [vmem:[#allocation11 + $0x208] ss:$16 sps:$4 sm:$0xff]  }
 0x3bf   : > { %6316 = vmatpush1.bf16.msra.mxu1 %v8129_v1  ;;  %6153 = vmatprep.subr.bf16.mxu0 %v8134_v3  ;;  %v8200_v1 = vld [vmem:[#allocation11 + $0x224] ss:$16 sps:$4 sm:$0xff]   ;;  %v4578_v3 = vpack.c.bf16 %v4570_v52, %v4570_v52 }
 0x3c0   : > { %6317 = vmatprep.subr.bf16.mxu1 %v8137_v61  ;;  %v8198_v61 = vld [vmem:[#allocation11 + $0x220] ss:$16 sps:$4 sm:$0xff]   ;;  %v8272_v52 = vld [vmem:[#allocation11 + $0x3a4] ss:$16 sps:$4 sm:$0xff]  }
 0x3c2   : > { %6154 = vmatpush1.bf16.msra.mxu0 %v8132_v4  ;;  %v8201_v4 = vld [vmem:[#allocation11 + $0x228] ss:$16 sps:$4 sm:$0xff]  }
 0x3c3   : > { %6318 = vmatpush1.bf16.msra.mxu1 %v8135_v5  ;;  %6155 = vmatprep.subr.bf16.mxu0 %v8140_v7  ;;  %v8206_v5 = vld [vmem:[#allocation11 + $0x244] ss:$16 sps:$4 sm:$0xff]   ;;  %v8209_v7 = vld [vmem:[#allocation11 + $0x24c] ss:$16 sps:$4 sm:$0xff]  }
 0x3c4   : > { %6319 = vmatprep.subr.bf16.mxu1 %v8143_v9  ;;  %v8204_v9 = vld [vmem:[#allocation11 + $0x240] ss:$16 sps:$4 sm:$0xff]  }
 0x3c6   : > { %6156 = vmatpush1.bf16.msra.mxu0 %v8138_v11  ;;  %v8207_v11 = vld [vmem:[#allocation11 + $0x248] ss:$16 sps:$4 sm:$0xff]  }
 0x3c7   : > { %6320 = vmatpush1.bf16.msra.mxu1 %v8141_v13  ;;  %6157 = vmatprep.subr.bf16.mxu0 %v8146_v14  ;;  %v8212_v13 = vld [vmem:[#allocation11 + $0x264] ss:$16 sps:$4 sm:$0xff]   ;;  %v8215_v14 = vld [vmem:[#allocation11 + $0x26c] ss:$16 sps:$4 sm:$0xff]  }
 0x3c8   : > { %6321 = vmatprep.subr.bf16.mxu1 %v8149_v16  ;;  %v8210_v16 = vld [vmem:[#allocation11 + $0x260] ss:$16 sps:$4 sm:$0xff]  }
 0x3ca   : > { %6158 = vmatpush1.bf16.msra.mxu0 %v8144_v20  ;;  %v8213_v20 = vld [vmem:[#allocation11 + $0x268] ss:$16 sps:$4 sm:$0xff]  }
 0x3cb   : > { %6322 = vmatpush1.bf16.msra.mxu1 %v8147_v21  ;;  %6159 = vmatprep.subr.bf16.mxu0 %v8152_v22  ;;  %v8218_v21 = vld [vmem:[#allocation11 + $0x284] ss:$16 sps:$4 sm:$0xff]   ;;  %v8221_v22 = vld [vmem:[#allocation11 + $0x28c] ss:$16 sps:$4 sm:$0xff]  }
 0x3cc   : > { %6323 = vmatprep.subr.bf16.mxu1 %v8155_v23  ;;  %v8216_v23 = vld [vmem:[#allocation11 + $0x280] ss:$16 sps:$4 sm:$0xff]  }
 0x3ce   : > { %6160 = vmatpush1.bf16.msra.mxu0 %v8150_v2  ;;  %v8219_v2 = vld [vmem:[#allocation11 + $0x288] ss:$16 sps:$4 sm:$0xff]  }
 0x3cf   : > { %6324 = vmatpush1.bf16.msra.mxu1 %v8153_v24  ;;  %6161 = vmatprep.subr.bf16.mxu0 %v8158_v25  ;;  %v8224_v24 = vld [vmem:[#allocation11 + $0x2a4] ss:$16 sps:$4 sm:$0xff]   ;;  %v8227_v25 = vld [vmem:[#allocation11 + $0x2ac] ss:$16 sps:$4 sm:$0xff]  }
 0x3d0   : > { %6325 = vmatprep.subr.bf16.mxu1 %v8161_v35  ;;  %v8222_v35 = vld [vmem:[#allocation11 + $0x2a0] ss:$16 sps:$4 sm:$0xff]  }
 0x3d2   : > { %6162 = vmatpush1.bf16.msra.mxu0 %v8156_v10  ;;  %v8225_v10 = vld [vmem:[#allocation11 + $0x2a8] ss:$16 sps:$4 sm:$0xff]  }
 0x3d3   : > { %6326 = vmatpush1.bf16.msra.mxu1 %v8159_v27  ;;  %6163 = vmatprep.subr.bf16.mxu0 %v8164_v49  ;;  %v8230_v27 = vld [vmem:[#allocation11 + $0x2c4] ss:$16 sps:$4 sm:$0xff]   ;;  %v8233_v49 = vld [vmem:[#allocation11 + $0x2cc] ss:$16 sps:$4 sm:$0xff]  }
 0x3d4   : > { %6327 = vmatprep.subr.bf16.mxu1 %v8167_v28  ;;  %v8228_v28 = vld [vmem:[#allocation11 + $0x2c0] ss:$16 sps:$4 sm:$0xff]  }
 0x3d6   : > { %6164 = vmatpush1.bf16.msra.mxu0 %v8162_v18  ;;  %v8231_v18 = vld [vmem:[#allocation11 + $0x2c8] ss:$16 sps:$4 sm:$0xff]  }
 0x3d7   : > { %6328 = vmatpush1.bf16.msra.mxu1 %v8165_v29  ;;  %6165 = vmatprep.subr.bf16.mxu0 %v8170_v42  ;;  %v8236_v29 = vld [vmem:[#allocation11 + $0x2e4] ss:$16 sps:$4 sm:$0xff]   ;;  %v8239_v42 = vld [vmem:[#allocation11 + $0x2ec] ss:$16 sps:$4 sm:$0xff]  }
 0x3d8   : > { %6329 = vmatprep.subr.bf16.mxu1 %v8173_v30  ;;  %v8234_v30 = vld [vmem:[#allocation11 + $0x2e0] ss:$16 sps:$4 sm:$0xff]  }
 0x3da   : > { %6166 = vmatpush1.bf16.msra.mxu0 %v8168_v17  ;;  %v8237_v17 = vld [vmem:[#allocation11 + $0x2e8] ss:$16 sps:$4 sm:$0xff]  }
 0x3db   : > { %6330 = vmatpush1.bf16.msra.mxu1 %v8171_v31  ;;  %6167 = vmatprep.subr.bf16.mxu0 %v8176_v32  ;;  %v8242_v31 = vld [vmem:[#allocation11 + $0x304] ss:$16 sps:$4 sm:$0xff]   ;;  %v8245_v32 = vld [vmem:[#allocation11 + $0x30c] ss:$16 sps:$4 sm:$0xff]  }
 0x3dc   : > { %6331 = vmatprep.subr.bf16.mxu1 %v8179_v33  ;;  %v8240_v33 = vld [vmem:[#allocation11 + $0x300] ss:$16 sps:$4 sm:$0xff]  }
 0x3de   : > { %6168 = vmatpush1.bf16.msra.mxu0 %v8174_v34  ;;  %v8243_v34 = vld [vmem:[#allocation11 + $0x308] ss:$16 sps:$4 sm:$0xff]  }
 0x3df   : > { %6332 = vmatpush1.bf16.msra.mxu1 %v8177_v57  ;;  %6169 = vmatprep.subr.bf16.mxu0 %v8182_v6  ;;  %v8251_v57 = vld [vmem:[#allocation11 + $0x32c] ss:$16 sps:$4 sm:$0xff]   ;;  %v8246_v6 = vld [vmem:[#allocation11 + $0x320] ss:$16 sps:$4 sm:$0xff]  }
 0x3e0   : > { %6333 = vmatprep.subr.bf16.mxu1 %v8185_v38  ;;  %v8249_v38 = vld [vmem:[#allocation11 + $0x328] ss:$16 sps:$4 sm:$0xff]  }
 0x3e2   : > { %6170 = vmatpush1.bf16.msra.mxu0 %v8180_v40  ;;  %v8257_v40 = vld [vmem:[#allocation11 + $0x34c] ss:$16 sps:$4 sm:$0xff]  }
 0x3e3   : > { %6334 = vmatpush1.bf16.msra.mxu1 %v8183_v41  ;;  %6171 = vmatprep.subr.bf16.mxu0 %v8188_v43  ;;  %v8255_v41 = vld [vmem:[#allocation11 + $0x348] ss:$16 sps:$4 sm:$0xff]   ;;  %v8260_v43 = vld [vmem:[#allocation11 + $0x364] ss:$16 sps:$4 sm:$0xff]  }
 0x3e4   : > { %6335 = vmatprep.subr.bf16.mxu1 %v8191_v44  ;;  %v8263_v44 = vld [vmem:[#allocation11 + $0x36c] ss:$16 sps:$4 sm:$0xff]  }
 0x3e6   : > { %6172 = vmatpush1.bf16.msra.mxu0 %v8186_v46  ;;  %v8261_v46 = vld [vmem:[#allocation11 + $0x368] ss:$16 sps:$4 sm:$0xff]  }
 0x3e7   : > { %6336 = vmatpush1.bf16.msra.mxu1 %v8189_v8  ;;  %6182 = vmatprep.subr.bf16.mxu0 %v8194_v55  ;;  %v8269_v8 = vld [vmem:[#allocation11 + $0x38c] ss:$16 sps:$4 sm:$0xff]   ;;  %v8264_v55 = vld [vmem:[#allocation11 + $0x380] ss:$16 sps:$4 sm:$0xff]  }
 0x3e8   : > { %6346 = vmatprep.subr.bf16.mxu1 %v8197_v56  ;;  %v8267_v56 = vld [vmem:[#allocation11 + $0x388] ss:$16 sps:$4 sm:$0xff]  }
 0x3e9   : > { %6174 = vmatmul.mubr.bf16.vlgmr.msra.gmra.mrb[16].mxu0 %v4575_v62 }
 0x3ea   : > { %6338 = vmatmul.mubr.bf16.vlgmr.msra.gmra.mrb[16].mxu1 %v4575_v62  ;;  %6183 = vmatpush1.bf16.msra.mxu0 %v8192_v19  ;;  %v8275_v19 = vld [vmem:[#allocation11 + $0x3ac] ss:$16 sps:$4 sm:$0xff]   ;;  %v8270_v62 = vld [vmem:[#allocation11 + $0x3a0] ss:$16 sps:$4 sm:$0xff]  }
 0x3eb   : > { %6214 = vmatprep.mubr.bf16.mxu0 %v4578_v3  ;;  %6347 = vmatpush1.bf16.msra.mxu1 %v8195_v0  ;;  %v1322_v0 = vrot.slane %v9369_v15, %v9299_v63 }
 0x3ec   : > { %6378 = vmatprep.mubr.bf16.mxu1 %v4578_v3  ;;  %6184 = vmatprep.subr.bf16.mxu0 %v8200_v1  ;;  %v8273_v1 = vld [vmem:[#allocation11 + $0x3a8] ss:$16 sps:$4 sm:$0xff]   ;;  %v8278_v3 = vld [vmem:[#allocation11 + $0x3c4] ss:$16 sps:$4 sm:$0xff]  }
 0x3ed   : > { %6348 = vmatprep.subr.bf16.mxu1 %v8203_v58  ;;  %v8281_v58 = vld [vmem:[#allocation11 + $0x3cc] ss:$16 sps:$4 sm:$0xff]  }
 0x3ee   : > { %6185 = vmatpush1.bf16.msra.mxu0 %v8198_v61  ;;  %v8276_v61 = vld [vmem:[#allocation11 + $0x3c0] ss:$16 sps:$4 sm:$0xff]  }
 0x3ef   : > { %6349 = vmatpush1.bf16.msra.mxu1 %v8201_v4  ;;  %6186 = vmatprep.subr.bf16.mxu0 %v8206_v5  ;;  %v7880_v4 = vadd.f32 %v9363_v54, %v1322_v0  ;;  %v8279_v5 = vld [vmem:[#allocation11 + $0x3c8] ss:$16 sps:$4 sm:$0xff]   ;;  %v8353_v0 = vld [vmem:[#allocation11 + $0x54c] ss:$16 sps:$4 sm:$0xff]  }
 0x3f0   : > { %6350 = vmatprep.subr.bf16.mxu1 %v8209_v7  ;;  %v8284_v7 = vld [vmem:[#allocation11 + $0x3e4] ss:$16 sps:$4 sm:$0xff]   ;;  %v8291_v54 = vld [vmem:[#allocation11 + $0x408] ss:$16 sps:$4 sm:$0xff]  }
 0x3f2   : > { %6187 = vmatpush1.bf16.msra.mxu0 %v8204_v9  ;;  %v8287_v9 = vld [vmem:[#allocation11 + $0x3ec] ss:$16 sps:$4 sm:$0xff]  }
 0x3f3   : > { %6351 = vmatpush1.bf16.msra.mxu1 %v8207_v11  ;;  %6188 = vmatprep.subr.bf16.mxu0 %v8212_v13  ;;  %v8282_v11 = vld [vmem:[#allocation11 + $0x3e0] ss:$16 sps:$4 sm:$0xff]   ;;  %v4569_v13 = vmax.f32 %v7880_v4, 0.0 }
 0x3f4   : > { %6352 = vmatprep.subr.bf16.mxu1 %v8215_v14  ;;  %v8285_v14 = vld [vmem:[#allocation11 + $0x3e8] ss:$16 sps:$4 sm:$0xff]   ;;  %v8354_v4 = vld [vmem:[#allocation11 + $0x560] ss:$16 sps:$4 sm:$0xff]  }
 0x3f6   : > { %6189 = vmatpush1.bf16.msra.mxu0 %v8210_v16  ;;  %v8290_v16 = vld [vmem:[#allocation11 + $0x404] ss:$16 sps:$4 sm:$0xff]  }
 0x3f7   : > { %6353 = vmatpush1.bf16.msra.mxu1 %v8213_v20  ;;  %6190 = vmatprep.subr.bf16.mxu0 %v8218_v21  ;;  %v8293_v20 = vld [vmem:[#allocation11 + $0x40c] ss:$16 sps:$4 sm:$0xff]   ;;  %v8288_v21 = vld [vmem:[#allocation11 + $0x400] ss:$16 sps:$4 sm:$0xff]  }
 0x3f8   : > { %6354 = vmatprep.subr.bf16.mxu1 %v8221_v22  ;;  %v4577_v22 = vpack.c.bf16 %v4569_v13, %v4569_v13  ;;  %v8363_v13 = vld [vmem:[#allocation11 + $0x588] ss:$16 sps:$4 sm:$0xff]  }
 0x3fa   : > { %6191 = vmatpush1.bf16.msra.mxu0 %v8216_v23  ;;  %v8296_v23 = vld [vmem:[#allocation11 + $0x424] ss:$16 sps:$4 sm:$0xff]  }
 0x3fb   : > { %6355 = vmatpush1.bf16.msra.mxu1 %v8219_v2  ;;  %6192 = vmatprep.subr.bf16.mxu0 %v8224_v24  ;;  %v8299_v2 = vld [vmem:[#allocation11 + $0x42c] ss:$16 sps:$4 sm:$0xff]   ;;  %v8294_v24 = vld [vmem:[#allocation11 + $0x420] ss:$16 sps:$4 sm:$0xff]  }
 0x3fc   : > { %6356 = vmatprep.subr.bf16.mxu1 %v8227_v25  ;;  %v8297_v25 = vld [vmem:[#allocation11 + $0x428] ss:$16 sps:$4 sm:$0xff]  }
 0x3fe   : > { %6193 = vmatpush1.bf16.msra.mxu0 %v8222_v35  ;;  %v8302_v35 = vld [vmem:[#allocation11 + $0x444] ss:$16 sps:$4 sm:$0xff]  }
 0x3ff   : > { %6357 = vmatpush1.bf16.msra.mxu1 %v8225_v10  ;;  %6194 = vmatprep.subr.bf16.mxu0 %v8230_v27  ;;  %v8305_v10 = vld [vmem:[#allocation11 + $0x44c] ss:$16 sps:$4 sm:$0xff]   ;;  %v8300_v27 = vld [vmem:[#allocation11 + $0x440] ss:$16 sps:$4 sm:$0xff]  }
 0x400   : > { %6358 = vmatprep.subr.bf16.mxu1 %v8233_v49  ;;  %v8303_v49 = vld [vmem:[#allocation11 + $0x448] ss:$16 sps:$4 sm:$0xff]  }
 0x402   : > { %6195 = vmatpush1.bf16.msra.mxu0 %v8228_v28  ;;  %v8308_v28 = vld [vmem:[#allocation11 + $0x464] ss:$16 sps:$4 sm:$0xff]  }
 0x403   : > { %6359 = vmatpush1.bf16.msra.mxu1 %v8231_v18  ;;  %6196 = vmatprep.subr.bf16.mxu0 %v8236_v29  ;;  %v8311_v18 = vld [vmem:[#allocation11 + $0x46c] ss:$16 sps:$4 sm:$0xff]   ;;  %v8306_v29 = vld [vmem:[#allocation11 + $0x460] ss:$16 sps:$4 sm:$0xff]  }
 0x404   : > { %6360 = vmatprep.subr.bf16.mxu1 %v8239_v42  ;;  %v8309_v42 = vld [vmem:[#allocation11 + $0x468] ss:$16 sps:$4 sm:$0xff]  }
 0x406   : > { %6197 = vmatpush1.bf16.msra.mxu0 %v8234_v30  ;;  %v8314_v30 = vld [vmem:[#allocation11 + $0x484] ss:$16 sps:$4 sm:$0xff]  }
 0x407   : > { %6361 = vmatpush1.bf16.msra.mxu1 %v8237_v17  ;;  %6198 = vmatprep.subr.bf16.mxu0 %v8242_v31  ;;  %v8317_v17 = vld [vmem:[#allocation11 + $0x48c] ss:$16 sps:$4 sm:$0xff]   ;;  %v8312_v31 = vld [vmem:[#allocation11 + $0x480] ss:$16 sps:$4 sm:$0xff]  }
 0x408   : > { %6362 = vmatprep.subr.bf16.mxu1 %v8245_v32  ;;  %v8315_v32 = vld [vmem:[#allocation11 + $0x488] ss:$16 sps:$4 sm:$0xff]  }
 0x40a   : > { %6199 = vmatpush1.bf16.msra.mxu0 %v8240_v33  ;;  %v8320_v33 = vld [vmem:[#allocation11 + $0x4a4] ss:$16 sps:$4 sm:$0xff]  }
 0x40b   : > { %6363 = vmatpush1.bf16.msra.mxu1 %v8243_v34  ;;  %6200 = vmatprep.subr.bf16.mxu0 %v8248_v36  ;;  %v8323_v34 = vld [vmem:[#allocation11 + $0x4ac] ss:$16 sps:$4 sm:$0xff]   ;;  %v8318_v36 = vld [vmem:[#allocation11 + $0x4a0] ss:$16 sps:$4 sm:$0xff]  }
 0x40c   : > { %6364 = vmatprep.subr.bf16.mxu1 %v8251_v57  ;;  %v8321_v57 = vld [vmem:[#allocation11 + $0x4a8] ss:$16 sps:$4 sm:$0xff]  }
 0x40e   : > { %6201 = vmatpush1.bf16.msra.mxu0 %v8246_v6  ;;  %v8326_v6 = vld [vmem:[#allocation11 + $0x4c4] ss:$16 sps:$4 sm:$0xff]  }
 0x40f   : > { %6365 = vmatpush1.bf16.msra.mxu1 %v8249_v38  ;;  %6202 = vmatprep.subr.bf16.mxu0 %v8254_v39  ;;  %v8329_v38 = vld [vmem:[#allocation11 + $0x4cc] ss:$16 sps:$4 sm:$0xff]   ;;  %v8324_v39 = vld [vmem:[#allocation11 + $0x4c0] ss:$16 sps:$4 sm:$0xff]  }
 0x410   : > { %6366 = vmatprep.subr.bf16.mxu1 %v8257_v40  ;;  %v8327_v40 = vld [vmem:[#allocation11 + $0x4c8] ss:$16 sps:$4 sm:$0xff]  }
 0x412   : > { %6203 = vmatpush1.bf16.msra.mxu0 %v8252_v60  ;;  %v8332_v60 = vld [vmem:[#allocation11 + $0x4e4] ss:$16 sps:$4 sm:$0xff]  }
 0x413   : > { %6367 = vmatpush1.bf16.msra.mxu1 %v8255_v41  ;;  %6204 = vmatprep.subr.bf16.mxu0 %v8260_v43  ;;  %v8335_v41 = vld [vmem:[#allocation11 + $0x4ec] ss:$16 sps:$4 sm:$0xff]   ;;  %v8330_v43 = vld [vmem:[#allocation11 + $0x4e0] ss:$16 sps:$4 sm:$0xff]  }
 0x414   : > { %6368 = vmatprep.subr.bf16.mxu1 %v8263_v44  ;;  %v8333_v44 = vld [vmem:[#allocation11 + $0x4e8] ss:$16 sps:$4 sm:$0xff]  }
 0x416   : > { %6205 = vmatpush1.bf16.msra.mxu0 %v8258_v26  ;;  %v8338_v26 = vld [vmem:[#allocation11 + $0x504] ss:$16 sps:$4 sm:$0xff]  }
 0x417   : > { %6369 = vmatpush1.bf16.msra.mxu1 %v8261_v46  ;;  %6206 = vmatprep.subr.bf16.mxu0 %v8266_v53  ;;  %v8341_v46 = vld [vmem:[#allocation11 + $0x50c] ss:$16 sps:$4 sm:$0xff]   ;;  %v8336_v53 = vld [vmem:[#allocation11 + $0x500] ss:$16 sps:$4 sm:$0xff]  }
 0x418   : > { %6370 = vmatprep.subr.bf16.mxu1 %v8269_v8  ;;  %v8339_v8 = vld [vmem:[#allocation11 + $0x508] ss:$16 sps:$4 sm:$0xff]  }
 0x41a   : > { %6207 = vmatpush1.bf16.msra.mxu0 %v8264_v55  ;;  %v8344_v55 = vld [vmem:[#allocation11 + $0x524] ss:$16 sps:$4 sm:$0xff]  }
 0x41b   : > { %6371 = vmatpush1.bf16.msra.mxu1 %v8267_v56  ;;  %6208 = vmatprep.subr.bf16.mxu0 %v8272_v52  ;;  %v8347_v56 = vld [vmem:[#allocation11 + $0x52c] ss:$16 sps:$4 sm:$0xff]   ;;  %v8342_v52 = vld [vmem:[#allocation11 + $0x520] ss:$16 sps:$4 sm:$0xff]  }
 0x41c   : > { %6372 = vmatprep.subr.bf16.mxu1 %v8275_v19  ;;  %v8345_v19 = vld [vmem:[#allocation11 + $0x528] ss:$16 sps:$4 sm:$0xff]  }
 0x41e   : > { %6209 = vmatpush1.bf16.msra.mxu0 %v8270_v62  ;;  %v8350_v62 = vld [vmem:[#allocation11 + $0x544] ss:$16 sps:$4 sm:$0xff]  }
 0x41f   : > { %6373 = vmatpush1.bf16.msra.mxu1 %v8273_v1  ;;  %6210 = vmatprep.subr.bf16.mxu0 %v8278_v3  ;;  %v8348_v1 = vld [vmem:[#allocation11 + $0x540] ss:$16 sps:$4 sm:$0xff]   ;;  %v8351_v3 = vld [vmem:[#allocation11 + $0x548] ss:$16 sps:$4 sm:$0xff]  }
 0x420   : > { %6374 = vmatprep.subr.bf16.mxu1 %v8281_v58  ;;  %v8356_v58 = vld [vmem:[#allocation11 + $0x564] ss:$16 sps:$4 sm:$0xff]  }
 0x422   : > { %6211 = vmatpush1.bf16.msra.mxu0 %v8276_v61  ;;  %v8359_v61 = vld [vmem:[#allocation11 + $0x56c] ss:$16 sps:$4 sm:$0xff]  }
 0x423   : > { %6375 = vmatpush1.bf16.msra.mxu1 %v8279_v5  ;;  %6212 = vmatprep.subr.bf16.mxu0 %v8284_v7  ;;  %v8357_v5 = vld [vmem:[#allocation11 + $0x568] ss:$16 sps:$4 sm:$0xff]   ;;  %v8362_v7 = vld [vmem:[#allocation11 + $0x584] ss:$16 sps:$4 sm:$0xff]  }
 0x424   : > { %6376 = vmatprep.subr.bf16.mxu1 %v8287_v9  ;;  %v8365_v9 = vld [vmem:[#allocation11 + $0x58c] ss:$16 sps:$4 sm:$0xff]  }
 0x426   : > { %6213 = vmatpush1.bf16.msra.mxu0 %v8282_v11  ;;  %v8360_v11 = vld [vmem:[#allocation11 + $0x580] ss:$16 sps:$4 sm:$0xff]  }
 0x427   : > { %6377 = vmatpush1.bf16.msra.mxu1 %v8285_v14  ;;  %6223 = vmatprep.subr.bf16.mxu0 %v8290_v16  ;;  %v8368_v14 = vld [vmem:[#allocation11 + $0x5a4] ss:$16 sps:$4 sm:$0xff]   ;;  %v8371_v16 = vld [vmem:[#allocation11 + $0x5ac] ss:$16 sps:$4 sm:$0xff]  }
 0x428   : > { %6387 = vmatprep.subr.bf16.mxu1 %v8293_v20  ;;  %v8366_v20 = vld [vmem:[#allocation11 + $0x5a0] ss:$16 sps:$4 sm:$0xff]  }
 0x429   : > { %6215 = vmatmul.mubr.bf16.vlgmr.msra.gmra.mrb[16].mxu0 %v4577_v22 }
 0x42a   : > { %6379 = vmatmul.mubr.bf16.vlgmr.msra.gmra.mrb[16].mxu1 %v4577_v22  ;;  %6224 = vmatpush1.bf16.msra.mxu0 %v8288_v21  ;;  %v8369_v21 = vld [vmem:[#allocation11 + $0x5a8] ss:$16 sps:$4 sm:$0xff]   ;;  %v8374_v22 = vld [vmem:[#allocation11 + $0x5c4] ss:$16 sps:$4 sm:$0xff]  }
 0x42b   : > { %6388 = vmatpush1.bf16.msra.mxu1 %v8291_v54  ;;  %6225 = vmatprep.subr.bf16.mxu0 %v8296_v23  ;;  %v8377_v54 = vld [vmem:[#allocation11 + $0x5cc] ss:$16 sps:$4 sm:$0xff]   ;;  %v8372_v23 = vld [vmem:[#allocation11 + $0x5c0] ss:$16 sps:$4 sm:$0xff]  }
 0x42c   : > { %6389 = vmatprep.subr.bf16.mxu1 %v8299_v2  ;;  %v8375_v2 = vld [vmem:[#allocation11 + $0x5c8] ss:$16 sps:$4 sm:$0xff]  }
 0x42e   : > { %6226 = vmatpush1.bf16.msra.mxu0 %v8294_v24  ;;  %v8380_v24 = vld [vmem:[#allocation11 + $0x5e4] ss:$16 sps:$4 sm:$0xff]  }
 0x42f   : > { %6390 = vmatpush1.bf16.msra.mxu1 %v8297_v25  ;;  %6227 = vmatprep.subr.bf16.mxu0 %v8302_v35  ;;  %v8383_v25 = vld [vmem:[#allocation11 + $0x5ec] ss:$16 sps:$4 sm:$0xff]   ;;  %v8378_v35 = vld [vmem:[#allocation11 + $0x5e0] ss:$16 sps:$4 sm:$0xff]  }
 0x430   : > { %6391 = vmatprep.subr.bf16.mxu1 %v8305_v10  ;;  %v8381_v10 = vld [vmem:[#allocation11 + $0x5e8] ss:$16 sps:$4 sm:$0xff]  }
 0x432   : > { %6228 = vmatpush1.bf16.msra.mxu0 %v8300_v27  ;;  %v8386_v27 = vld [vmem:[#allocation11 + $0x604] ss:$16 sps:$4 sm:$0xff]  }
 0x433   : > { %6392 = vmatpush1.bf16.msra.mxu1 %v8303_v49  ;;  %6229 = vmatprep.subr.bf16.mxu0 %v8308_v28  ;;  %v8389_v49 = vld [vmem:[#allocation11 + $0x60c] ss:$16 sps:$4 sm:$0xff]   ;;  %v1330_v28 = vrot.slane %v9369_v15, %v494_v45 }
 0x434   : > { %6393 = vmatprep.subr.bf16.mxu1 %v8311_v18  ;;  %v1334_v18 = vrot.slane %v9369_v15, %v498_v12 }
 0x436   : > { %6230 = vmatpush1.bf16.msra.mxu0 %v8306_v29  ;;  %v1342_v29 = vrot.slane %v9369_v15, %v506_v59  ;;  %v8392_v59 = vld [vmem:[#allocation11 + $0x624] ss:$16 sps:$4 sm:$0xff]   ;;  %v8395_v15 = vld [vmem:[#allocation11 + $0x62c] ss:$16 sps:$4 sm:$0xff]  }
 0x437   : > { %6394 = vmatpush1.bf16.msra.mxu1 %v8309_v42  ;;  %6231 = vmatprep.subr.bf16.mxu0 %v8314_v30 }
 0x438   : > { %6395 = vmatprep.subr.bf16.mxu1 %v8317_v17 }
 0x43a   : > { %6232 = vmatpush1.bf16.msra.mxu0 %v8312_v31 }
 0x43b   : > { %6396 = vmatpush1.bf16.msra.mxu1 %v8315_v32  ;;  %6233 = vmatprep.subr.bf16.mxu0 %v8320_v33 }
 0x43c   : > { %6397 = vmatprep.subr.bf16.mxu1 %v8323_v34 }
 0x43e   : > { %6234 = vmatpush1.bf16.msra.mxu0 %v8318_v36 }
 0x43f   : > { %6398 = vmatpush1.bf16.msra.mxu1 %v8321_v57  ;;  %6235 = vmatprep.subr.bf16.mxu0 %v8326_v6 }
 0x440   : > { %6399 = vmatprep.subr.bf16.mxu1 %v8329_v38 }
 0x442   : > { %6236 = vmatpush1.bf16.msra.mxu0 %v8324_v39 }
 0x443   : > { %6400 = vmatpush1.bf16.msra.mxu1 %v8327_v40  ;;  %6237 = vmatprep.subr.bf16.mxu0 %v8332_v60  ;;  %v8384_v60 = vld [vmem:[#allocation11 + $0x600] ss:$16 sps:$4 sm:$0xff]  }
 0x444   : > { %6401 = vmatprep.subr.bf16.mxu1 %v8335_v41  ;;  %v8387_v41 = vld [vmem:[#allocation11 + $0x608] ss:$16 sps:$4 sm:$0xff]  }
 0x446   : > { %6238 = vmatpush1.bf16.msra.mxu0 %v8330_v43 }
 0x447   : > { %6402 = vmatpush1.bf16.msra.mxu1 %v8333_v44  ;;  %6239 = vmatprep.subr.bf16.mxu0 %v8338_v26  ;;  %v8390_v26 = vld [vmem:[#allocation11 + $0x620] ss:$16 sps:$4 sm:$0xff]  }
 0x448   : > { %6403 = vmatprep.subr.bf16.mxu1 %v8341_v46  ;;  %v8393_v46 = vld [vmem:[#allocation11 + $0x628] ss:$16 sps:$4 sm:$0xff]  }
 0x44a   : > { %6240 = vmatpush1.bf16.msra.mxu0 %v8336_v53  ;;  %v8398_v53 = vld [vmem:[#allocation11 + $0x644] ss:$16 sps:$4 sm:$0xff]  }
 0x44b   : > { %6404 = vmatpush1.bf16.msra.mxu1 %v8339_v8  ;;  %6241 = vmatprep.subr.bf16.mxu0 %v8344_v55  ;;  %v8401_v8 = vld [vmem:[#allocation11 + $0x64c] ss:$16 sps:$4 sm:$0xff]   ;;  %v8396_v55 = vld [vmem:[#allocation11 + $0x640] ss:$16 sps:$4 sm:$0xff]  }
 0x44c   : > { %6405 = vmatprep.subr.bf16.mxu1 %v8347_v56  ;;  %v8399_v56 = vld [vmem:[#allocation11 + $0x648] ss:$16 sps:$4 sm:$0xff]  }
 0x44e   : > { %6242 = vmatpush1.bf16.msra.mxu0 %v8342_v52  ;;  %v8404_v52 = vld [vmem:[#allocation11 + $0x664] ss:$16 sps:$4 sm:$0xff]  }
 0x44f   : > { %6406 = vmatpush1.bf16.msra.mxu1 %v8345_v19  ;;  %6243 = vmatprep.subr.bf16.mxu0 %v8350_v62  ;;  %v8407_v19 = vld [vmem:[#allocation11 + $0x66c] ss:$16 sps:$4 sm:$0xff]   ;;  %v8402_v62 = vld [vmem:[#allocation11 + $0x660] ss:$16 sps:$4 sm:$0xff]  }
 0x450   : > { %6407 = vmatprep.subr.bf16.mxu1 %v8353_v0  ;;  %v8405_v0 = vld [vmem:[#allocation11 + $0x668] ss:$16 sps:$4 sm:$0xff]  }
 0x452   : > { %6244 = vmatpush1.bf16.msra.mxu0 %v8348_v1  ;;  %v8410_v1 = vld [vmem:[#allocation11 + $0x684] ss:$16 sps:$4 sm:$0xff]  }
 0x453   : > { %6408 = vmatpush1.bf16.msra.mxu1 %v8351_v3  ;;  %6245 = vmatprep.subr.bf16.mxu0 %v8356_v58  ;;  %v8413_v3 = vld [vmem:[#allocation11 + $0x68c] ss:$16 sps:$4 sm:$0xff]   ;;  %v8408_v58 = vld [vmem:[#allocation11 + $0x680] ss:$16 sps:$4 sm:$0xff]  }
 0x454   : > { %6409 = vmatprep.subr.bf16.mxu1 %v8359_v61  ;;  %v8411_v61 = vld [vmem:[#allocation11 + $0x688] ss:$16 sps:$4 sm:$0xff]  }
 0x456   : > { %6246 = vmatpush1.bf16.msra.mxu0 %v8354_v4  ;;  %v8416_v4 = vld [vmem:[#allocation11 + $0x6a4] ss:$16 sps:$4 sm:$0xff]  }
 0x457   : > { %6410 = vmatpush1.bf16.msra.mxu1 %v8357_v5  ;;  %6247 = vmatprep.subr.bf16.mxu0 %v8362_v7  ;;  %v8419_v5 = vld [vmem:[#allocation11 + $0x6ac] ss:$16 sps:$4 sm:$0xff]   ;;  %v8414_v7 = vld [vmem:[#allocation11 + $0x6a0] ss:$16 sps:$4 sm:$0xff]  }
 0x458   : > { %6411 = vmatprep.subr.bf16.mxu1 %v8365_v9  ;;  %v8417_v9 = vld [vmem:[#allocation11 + $0x6a8] ss:$16 sps:$4 sm:$0xff]  }
 0x45a   : > { %6248 = vmatpush1.bf16.msra.mxu0 %v8360_v11  ;;  %v8422_v11 = vld [vmem:[#allocation11 + $0x6c4] ss:$16 sps:$4 sm:$0xff]  }
 0x45b   : > { %6412 = vmatpush1.bf16.msra.mxu1 %v8363_v13  ;;  %6249 = vmatprep.subr.bf16.mxu0 %v8368_v14  ;;  %v8425_v13 = vld [vmem:[#allocation11 + $0x6cc] ss:$16 sps:$4 sm:$0xff]   ;;  %v8420_v14 = vld [vmem:[#allocation11 + $0x6c0] ss:$16 sps:$4 sm:$0xff]  }
 0x45c   : > { %6413 = vmatprep.subr.bf16.mxu1 %v8371_v16  ;;  %v8423_v16 = vld [vmem:[#allocation11 + $0x6c8] ss:$16 sps:$4 sm:$0xff]  }
 0x45e   : > { %6250 = vmatpush1.bf16.msra.mxu0 %v8366_v20  ;;  %v8428_v20 = vld [vmem:[#allocation11 + $0x6e4] ss:$16 sps:$4 sm:$0xff]  }
 0x45f   : > { %6414 = vmatpush1.bf16.msra.mxu1 %v8369_v21  ;;  %6251 = vmatprep.subr.bf16.mxu0 %v8374_v22  ;;  %v8431_v21 = vld [vmem:[#allocation11 + $0x6ec] ss:$16 sps:$4 sm:$0xff]   ;;  %v8426_v22 = vld [vmem:[#allocation11 + $0x6e0] ss:$16 sps:$4 sm:$0xff]  }
 0x460   : > { %6415 = vmatprep.subr.bf16.mxu1 %v8377_v54  ;;  %v8429_v54 = vld [vmem:[#allocation11 + $0x6e8] ss:$16 sps:$4 sm:$0xff]  }
 0x462   : > { %6252 = vmatpush1.bf16.msra.mxu0 %v8372_v23  ;;  %v8434_v23 = vld [vmem:[#allocation11 + $0x704] ss:$16 sps:$4 sm:$0xff]  }
 0x463   : > { %6416 = vmatpush1.bf16.msra.mxu1 %v8375_v2  ;;  %6253 = vmatprep.subr.bf16.mxu0 %v8380_v24  ;;  %v8437_v2 = vld [vmem:[#allocation11 + $0x70c] ss:$16 sps:$4 sm:$0xff]   ;;  %v8432_v24 = vld [vmem:[#allocation11 + $0x700] ss:$16 sps:$4 sm:$0xff]  }
 0x464   : > { %6417 = vmatprep.subr.bf16.mxu1 %v8383_v25  ;;  %v8435_v25 = vld [vmem:[#allocation11 + $0x708] ss:$16 sps:$4 sm:$0xff]  }
 0x466   : > { %6254 = vmatpush1.bf16.msra.mxu0 %v8378_v35  ;;  %v8440_v35 = vld [vmem:[#allocation11 + $0x724] ss:$16 sps:$4 sm:$0xff]  }
 0x467   : > { %6418 = vmatpush1.bf16.msra.mxu1 %v8381_v10  ;;  %6264 = vmatprep.subr.bf16.mxu0 %v8386_v27  ;;  %v8443_v10 = vld [vmem:[#allocation11 + $0x72c] ss:$16 sps:$4 sm:$0xff]   ;;  %v8438_v27 = vld [vmem:[#allocation11 + $0x720] ss:$16 sps:$4 sm:$0xff]  }
 0x468   : > { %6428 = vmatprep.subr.bf16.mxu1 %v8389_v49  ;;  %v8441_v49 = vld [vmem:[#allocation11 + $0x728] ss:$16 sps:$4 sm:$0xff]  }
 0x47c   : > { %v4396_v42 = vpop.f32.mrb[12].mxu0 }
 0x47d   : > { %v7882_v30 = vadd.f32 %v4396_v42, %v1330_v28  ;;  %v9394_v17 = vpop.f32.mrb[12].mxu1  ;;  %v4398_v31 = vpop.f32.mrb[13].mxu0  ;;  %v8446_v28 = vld [vmem:[#allocation11 + $0x744] ss:$16 sps:$4 sm:$0xff]   ;;  %v8447_v42 = vld [vmem:[#allocation11 + $0x748] ss:$16 sps:$4 sm:$0xff]  }
 0x47e   : > { %v7883_v32 = vadd.f32 %v4398_v31, %v1334_v18  ;;  %v4562_v33 = vpop.f32.mrb[13].mxu1  ;;  %v4400_v34 = vpop.f32.mrb[14].mxu0  ;;  %v8449_v18 = vld [vmem:[#allocation11 + $0x74c] ss:$16 sps:$4 sm:$0xff]  }
 0x47f   : > { %v4571_v36 = vmax.f32 %v7882_v30, 0.0  ;;  %v7885_v57 = vadd.f32 %v4562_v33, %v1342_v29  ;;  %v4564_v6 = vpop.f32.mrb[14].mxu1  ;;  %v4401_v45 = vpop.f32.mrb[15].mxu0  ;;  %v8444_v29 = vld [vmem:[#allocation11 + $0x740] ss:$16 sps:$4 sm:$0xff]  }
 0x480   : > { %v4572_v38 = vmax.f32 %v7883_v32, 0.0  ;;  %v4565_v39 = vpop.f32.mrb[15].mxu1  ;;  %v8452_v30 = vld [vmem:[#allocation11 + $0x764] ss:$16 sps:$4 sm:$0xff]   ;;  %v8455_v31 = vld [vmem:[#allocation11 + $0x76c] ss:$16 sps:$4 sm:$0xff]  }
 0x481   : > { %v4574_v40 = vmax.f32 %v7885_v57, 0.0  ;;  %v4579_v43 = vpack.c.bf16 %v4571_v36, %v4571_v36  ;;  %v8450_v32 = vld [vmem:[#allocation11 + $0x760] ss:$16 sps:$4 sm:$0xff]   ;;  %v8453_v33 = vld [vmem:[#allocation11 + $0x768] ss:$16 sps:$4 sm:$0xff]  }
 0x482   : > { %v4580_v12 = vpack.c.bf16 %v4572_v38, %v4572_v38  ;;  %v8458_v34 = vld [vmem:[#allocation11 + $0x784] ss:$16 sps:$4 sm:$0xff]   ;;  %v8461_v36 = vld [vmem:[#allocation11 + $0x78c] ss:$16 sps:$4 sm:$0xff]   ;;  %v8456_v57 = vld [vmem:[#allocation11 + $0x780] ss:$16 sps:$4 sm:$0xff]  }
 0x483   : > { %v4582_v44 = vpack.c.bf16 %v4574_v40, %v4574_v40  ;;  %v8459_v6 = vld [vmem:[#allocation11 + $0x788] ss:$16 sps:$4 sm:$0xff]   ;;  %v8464_v45 = vld [vmem:[#allocation11 + $0x7a4] ss:$16 sps:$4 sm:$0xff]   ;;  %v8467_v38 = vld [vmem:[#allocation11 + $0x7ac] ss:$16 sps:$4 sm:$0xff]  }
 0x484   : > { %6255 = vmatprep.mubr.bf16.mxu0 %v4580_v12  ;;  %6419 = vmatprep.mubr.bf16.mxu1 %v4580_v12  ;;  %v8462_v39 = vld [vmem:[#allocation11 + $0x7a0] ss:$16 sps:$4 sm:$0xff]   ;;  %v8465_v40 = vld [vmem:[#allocation11 + $0x7a8] ss:$16 sps:$4 sm:$0xff]  }
 0x485   : > { %6256 = vmatmul.mubr.bf16.vlgmr.msra.gmra.mrb[16].mxu0 %v4579_v43  ;;  %6420 = vmatmul.mubr.bf16.vlgmr.msra.gmra.mrb[16].mxu1 %v4579_v43  ;;  %v8513_v12 = vld [vmem:[#allocation10] sm:$0xff] }
 0x486   : > { %6265 = vmatpush1.bf16.msra.mxu0 %v8384_v60  ;;  %6429 = vmatpush1.bf16.msra.mxu1 %v8387_v41  ;;  %v1338_v60 = vrot.slane %v8513_v12, %v502_v37  ;;  %v8470_v41 = vld [vmem:[#allocation11 + $0x7c4] ss:$16 sps:$4 sm:$0xff]   ;;  %v8473_v43 = vld [vmem:[#allocation11 + $0x7cc] ss:$16 sps:$4 sm:$0xff]  }
 0x487   : > { %6296 = vmatprep.mubr.bf16.mxu0 %v4582_v44  ;;  %6460 = vmatprep.mubr.bf16.mxu1 %v4582_v44  ;;  %v8480_v37 = vld [vmem:[#allocation14 + $0x40] sm:$0xff]  }
 0x488   : > { %6266 = vmatprep.subr.bf16.mxu0 %v8392_v59  ;;  %6430 = vmatprep.subr.bf16.mxu1 %v8395_v15  ;;  %v8468_v59 = vld [vmem:[#allocation11 + $0x7c0] ss:$16 sps:$4 sm:$0xff]   ;;  %v8471_v15 = vld [vmem:[#allocation11 + $0x7c8] ss:$16 sps:$4 sm:$0xff]   ;;  %v7884_v44 = vadd.f32 %v9394_v17, %v1338_v60 }
 0x489   : > { %v8484_v17 = vld [vmem:[#allocation14 + $0x48] sm:$0xff]  }
 0x48a   : > { %6267 = vmatpush1.bf16.msra.mxu0 %v8390_v26  ;;  %6431 = vmatpush1.bf16.msra.mxu1 %v8393_v46  ;;  %v8476_v26 = vld [vmem:[#allocation11 + $0x7e4] ss:$16 sps:$4 sm:$0xff]   ;;  %v8479_v46 = vld [vmem:[#allocation11 + $0x7ec] ss:$16 sps:$4 sm:$0xff]   ;;  %v4573_v47 = vmax.f32 %v7884_v44, 0.0 }
 0x48b   : > { %6268 = vmatprep.subr.bf16.mxu0 %v8398_v53  ;;  %6432 = vmatprep.subr.bf16.mxu1 %v8401_v8  ;;  %v8474_v53 = vld [vmem:[#allocation11 + $0x7e0] ss:$16 sps:$4 sm:$0xff]   ;;  %v8477_v8 = vld [vmem:[#allocation11 + $0x7e8] ss:$16 sps:$4 sm:$0xff]  }
 0x48e   : > { %6269 = vmatpush1.bf16.msra.mxu0 %v8396_v55  ;;  %6433 = vmatpush1.bf16.msra.mxu1 %v8399_v56  ;;  %v8481_v55 = vld [vmem:[#allocation14 + $0xc0] sm:$0xff]  }
 0x48f   : > { %6270 = vmatprep.subr.bf16.mxu0 %v8404_v52  ;;  %6434 = vmatprep.subr.bf16.mxu1 %v8407_v19  ;;  %v8482_v56 = vld [vmem:[#allocation14] sm:$0xff]   ;;  %v4581_v19 = vpack.c.bf16 %v4573_v47, %v4573_v47 }
 0x490   : > { %v8483_v52 = vld [vmem:[#allocation14 + $0x80] sm:$0xff]  }
 0x492   : > { %6271 = vmatpush1.bf16.msra.mxu0 %v8402_v62  ;;  %6435 = vmatpush1.bf16.msra.mxu1 %v8405_v0  ;;  %v8485_v62 = vld [vmem:[#allocation14 + $0xc8] sm:$0xff]  }
 0x493   : > { %6272 = vmatprep.subr.bf16.mxu0 %v8410_v1  ;;  %6436 = vmatprep.subr.bf16.mxu1 %v8413_v3  ;;  %v8486_v0 = vld [vmem:[#allocation14 + $0x8] sm:$0xff]   ;;  %v8488_v3 = vld [vmem:[#allocation14 + $0x50] sm:$0xff]  }
 0x494   : > { %v8487_v1 = vld [vmem:[#allocation14 + $0x88] sm:$0xff]  }
 0x496   : > { %6273 = vmatpush1.bf16.msra.mxu0 %v8408_v58  ;;  %6437 = vmatpush1.bf16.msra.mxu1 %v8411_v61  ;;  %v8489_v58 = vld [vmem:[#allocation14 + $0xd0] sm:$0xff]  }
 0x497   : > { %6274 = vmatprep.subr.bf16.mxu0 %v8416_v4  ;;  %6438 = vmatprep.subr.bf16.mxu1 %v8419_v5  ;;  %v8490_v61 = vld [vmem:[#allocation14 + $0x10] sm:$0xff]   ;;  %v8492_v5 = vld [vmem:[#allocation14 + $0x58] sm:$0xff]  }
 0x498   : > { %v8491_v4 = vld [vmem:[#allocation14 + $0x90] sm:$0xff]  }
 0x49a   : > { %6275 = vmatpush1.bf16.msra.mxu0 %v8414_v7  ;;  %6439 = vmatpush1.bf16.msra.mxu1 %v8417_v9  ;;  %v8493_v7 = vld [vmem:[#allocation14 + $0xd8] sm:$0xff]  }
 0x49b   : > { %6276 = vmatprep.subr.bf16.mxu0 %v8422_v11  ;;  %6440 = vmatprep.subr.bf16.mxu1 %v8425_v13  ;;  %v8494_v9 = vld [vmem:[#allocation14 + $0x18] sm:$0xff]   ;;  %v8496_v13 = vld [vmem:[#allocation14 + $0x60] sm:$0xff]  }
 0x49c   : > { %v8495_v11 = vld [vmem:[#allocation14 + $0x98] sm:$0xff]  }
 0x49e   : > { %6277 = vmatpush1.bf16.msra.mxu0 %v8420_v14  ;;  %6441 = vmatpush1.bf16.msra.mxu1 %v8423_v16  ;;  %v8497_v14 = vld [vmem:[#allocation14 + $0xe0] sm:$0xff]  }
 0x49f   : > { %6278 = vmatprep.subr.bf16.mxu0 %v8428_v20  ;;  %6442 = vmatprep.subr.bf16.mxu1 %v8431_v21  ;;  %v8498_v16 = vld [vmem:[#allocation14 + $0x20] sm:$0xff]   ;;  %v8500_v21 = vld [vmem:[#allocation14 + $0x68] sm:$0xff]  }
 0x4a0   : > { %v8499_v20 = vld [vmem:[#allocation14 + $0xa0] sm:$0xff]  }
 0x4a2   : > { %6279 = vmatpush1.bf16.msra.mxu0 %v8426_v22  ;;  %6443 = vmatpush1.bf16.msra.mxu1 %v8429_v54  ;;  %v8501_v22 = vld [vmem:[#allocation14 + $0xe8] sm:$0xff]  }
 0x4a3   : > { %6280 = vmatprep.subr.bf16.mxu0 %v8434_v23  ;;  %6444 = vmatprep.subr.bf16.mxu1 %v8437_v2  ;;  %v8502_v54 = vld [vmem:[#allocation14 + $0x28] sm:$0xff]   ;;  %v8504_v2 = vld [vmem:[#allocation14 + $0x70] sm:$0xff]  }
 0x4a4   : > { %v8503_v23 = vld [vmem:[#allocation14 + $0xa8] sm:$0xff]  }
 0x4a6   : > { %6281 = vmatpush1.bf16.msra.mxu0 %v8432_v24  ;;  %6445 = vmatpush1.bf16.msra.mxu1 %v8435_v25  ;;  %v8505_v24 = vld [vmem:[#allocation14 + $0xf0] sm:$0xff]  }
 0x4a7   : > { %6282 = vmatprep.subr.bf16.mxu0 %v8440_v35  ;;  %6446 = vmatprep.subr.bf16.mxu1 %v8443_v10  ;;  %v8506_v25 = vld [vmem:[#allocation14 + $0x30] sm:$0xff]   ;;  %v8508_v10 = vld [vmem:[#allocation14 + $0x78] sm:$0xff]  }
 0x4a8   : > { %v8507_v35 = vld [vmem:[#allocation14 + $0xb0] sm:$0xff]  }
 0x4aa   : > { %6283 = vmatpush1.bf16.msra.mxu0 %v8438_v27  ;;  %6447 = vmatpush1.bf16.msra.mxu1 %v8441_v49  ;;  %v8509_v27 = vld [vmem:[#allocation14 + $0xf8] sm:$0xff]  }
 0x4ab   : > { %6284 = vmatprep.subr.bf16.mxu0 %v8446_v28  ;;  %6448 = vmatprep.subr.bf16.mxu1 %v8449_v18  ;;  %v8510_v49 = vld [vmem:[#allocation14 + $0x38] sm:$0xff]  }
 0x4ac   : > { %v8511_v28 = vld [vmem:[#allocation14 + $0xb8] sm:$0xff]  }
 0x4ad   : > { %v4839_v18 = vld [vmem:[#allocation13] sm:$0xf] }
 0x4ae   : > { %6285 = vmatpush1.bf16.msra.mxu0 %v8444_v29  ;;  %6449 = vmatpush1.bf16.msra.mxu1 %v8447_v42  ;;  %v4844_v29 = vrot.slane %v4839_v18, %v9264_v48  ;;  %v4852_v42 = vrot.slane %v4839_v18, %v9299_v63 }
 0x4af   : > { %6286 = vmatprep.subr.bf16.mxu0 %v8452_v30  ;;  %6450 = vmatprep.subr.bf16.mxu1 %v8455_v31  ;;  %v4848_v30 = vrot.slane %v4839_v18, %v9269_v50  ;;  %v4856_v31 = vrot.slane %v4839_v18, %v9272_v51 }
 0x4b2   : > { %6287 = vmatpush1.bf16.msra.mxu0 %v8450_v32  ;;  %6451 = vmatpush1.bf16.msra.mxu1 %v8453_v33 }
 0x4b3   : > { %6288 = vmatprep.subr.bf16.mxu0 %v8458_v34  ;;  %6452 = vmatprep.subr.bf16.mxu1 %v8461_v36 }
 0x4b6   : > { %6289 = vmatpush1.bf16.msra.mxu0 %v8456_v57  ;;  %6453 = vmatpush1.bf16.msra.mxu1 %v8459_v6 }
 0x4b7   : > { %6290 = vmatprep.subr.bf16.mxu0 %v8464_v45  ;;  %6454 = vmatprep.subr.bf16.mxu1 %v8467_v38 }
 0x4ba   : > { %6291 = vmatpush1.bf16.msra.mxu0 %v8462_v39  ;;  %6455 = vmatpush1.bf16.msra.mxu1 %v8465_v40 }
 0x4bb   : > { %6292 = vmatprep.subr.bf16.mxu0 %v8470_v41  ;;  %6456 = vmatprep.subr.bf16.mxu1 %v8473_v43 }
 0x4be   : > { %6293 = vmatpush1.bf16.msra.mxu0 %v8468_v59  ;;  %6457 = vmatpush1.bf16.msra.mxu1 %v8471_v15 }
 0x4bf   : > { %6294 = vmatprep.subr.bf16.mxu0 %v8476_v26  ;;  %6458 = vmatprep.subr.bf16.mxu1 %v8479_v46  ;;  %v7797_v46 = vld [vmem:[#allocation16] ss:$0 sm:$0xff] }
 0x4c2   : > { %6295 = vmatpush1.bf16.msra.mxu0 %v8474_v53  ;;  %6459 = vmatpush1.bf16.msra.mxu1 %v8477_v8 }
 0x4c3   : > { %7834 = vmatprep.subr.bf16.mxu0 %v8480_v37  ;;  %7856 = vmatprep.subr.bf16.mxu1 %v8481_v55 }
 0x4c5   : > { %6297 = vmatmul.mubr.bf16.vlgmr.msra.gmra.mrb[16].mxu0 %v4581_v19  ;;  %6461 = vmatmul.mubr.bf16.vlgmr.msra.gmra.mrb[16].mxu1 %v4581_v19 }
 0x4c6   : > { %7835 = vmatpush3.bf16.msra.mxu0 %v8482_v56  ;;  %7857 = vmatpush3.bf16.msra.mxu1 %v8483_v52 }
 0x4c7   : > { %7836 = vmatprep.subr.bf16.mxu0 %v8484_v17  ;;  %7858 = vmatprep.subr.bf16.mxu1 %v8485_v62 }
 0x4ca   : > { %7837 = vmatpush3.bf16.msra.mxu0 %v8486_v0  ;;  %7859 = vmatpush3.bf16.msra.mxu1 %v8487_v1 }
 0x4cb   : > { %7838 = vmatprep.subr.bf16.mxu0 %v8488_v3  ;;  %7860 = vmatprep.subr.bf16.mxu1 %v8489_v58 }
 0x4ce   : > { %7839 = vmatpush3.bf16.msra.mxu0 %v8490_v61  ;;  %7861 = vmatpush3.bf16.msra.mxu1 %v8491_v4 }
 0x4cf   : > { %7840 = vmatprep.subr.bf16.mxu0 %v8492_v5  ;;  %7862 = vmatprep.subr.bf16.mxu1 %v8493_v7 }
 0x4d2   : > { %7841 = vmatpush3.bf16.msra.mxu0 %v8494_v9  ;;  %7863 = vmatpush3.bf16.msra.mxu1 %v8495_v11 }
 0x4d3   : > { %7842 = vmatprep.subr.bf16.mxu0 %v8496_v13  ;;  %7864 = vmatprep.subr.bf16.mxu1 %v8497_v14 }
 0x4d6   : > { %7843 = vmatpush3.bf16.msra.mxu0 %v8498_v16  ;;  %7865 = vmatpush3.bf16.msra.mxu1 %v8499_v20 }
 0x4d7   : > { %7844 = vmatprep.subr.bf16.mxu0 %v8500_v21  ;;  %7866 = vmatprep.subr.bf16.mxu1 %v8501_v22 }
 0x4da   : > { %7845 = vmatpush3.bf16.msra.mxu0 %v8502_v54  ;;  %7867 = vmatpush3.bf16.msra.mxu1 %v8503_v23 }
 0x4db   : > { %7846 = vmatprep.subr.bf16.mxu0 %v8504_v2  ;;  %7868 = vmatprep.subr.bf16.mxu1 %v8505_v24 }
 0x4de   : > { %7847 = vmatpush3.bf16.msra.mxu0 %v8506_v25  ;;  %7869 = vmatpush3.bf16.msra.mxu1 %v8507_v35 }
 0x4df   : > { %7848 = vmatprep.subr.bf16.mxu0 %v8508_v10  ;;  %7870 = vmatprep.subr.bf16.mxu1 %v8509_v27 }
 0x4e2   : > { %7849 = vmatpush3.bf16.msra.mxu0 %v8510_v49  ;;  %7871 = vmatpush3.bf16.msra.mxu1 %v8511_v28 }
 0x598   : > { %v6298_v32 = vpop.f32.mrb[16].mxu0  ;;  %v6462_v33 = vpop.f32.mrb[16].mxu1 }
 0x599   : > { %v7886_v34 = vadd.f32 %v6298_v32, %v4844_v29  ;;  %v7888_v36 = vadd.f32 %v6462_v33, %v4852_v42  ;;  %v6300_v57 = vpop.f32.mrb[17].mxu0  ;;  %v6464_v6 = vpop.f32.mrb[17].mxu1 }
 0x59a   : > { %v7887_v45 = vadd.f32 %v6300_v57, %v4848_v30  ;;  %v7889_v38 = vadd.f32 %v6464_v6, %v4856_v31  ;;  %v6302_v39 = vpop.f32.mrb[18].mxu0  ;;  %v6466_v40 = vpop.f32.mrb[18].mxu1 }
 0x59b   : > { %v6469_v12 = vmax.f32 %v7886_v34, 0.0  ;;  %v6471_v60 = vmax.f32 %v7888_v36, 0.0  ;;  %v6303_v48 = vpop.f32.mrb[19].mxu0  ;;  %v6467_v41 = vpop.f32.mrb[19].mxu1 }
 0x59c   : > { %v6470_v63 = vmax.f32 %v7887_v45, 0.0  ;;  %v6472_v43 = vmax.f32 %v7889_v38, 0.0 }
 0x59d   : > { %v6473_v51 = vpack.c.bf16 %v6469_v12, %v6469_v12  ;;  %v6475_v15 = vpack.c.bf16 %v6471_v60, %v6471_v60 }
 0x59e   : > { %v6474_v50 = vpack.c.bf16 %v6470_v63, %v6470_v63  ;;  %v6476_v59 = vpack.c.bf16 %v6472_v43, %v6472_v43 }
 0x5a0   : > { %6772 = vmatprep.mubr.bf16.mxu0 %v6474_v50  ;;  %6812 = vmatprep.mubr.bf16.mxu1 %v6476_v59 }
 0x5a1   : > { %6773 = vmatmul.mubr.bf16.vlgmr.msra.gmra.mrb[20].mxu0 %v6473_v51  ;;  %6813 = vmatmul.mubr.bf16.vlgmr.msra.gmra.mrb[20].mxu1 %v6475_v15 }
 0x674   : > { %v7850_v44 = vpop.f32.mrb[20].mxu0  ;;  %v7872_v26 = vpop.f32.mrb[20].mxu1 }
 0x675   : > { %v7851_v53 = vpop.f32.mrb[21].mxu0  ;;  %v7873_v8 = vpop.f32.mrb[21].mxu1 }
 0x676   : > { %v7852_v47 = vadd.f32 %v7851_v53, %v7850_v44  ;;  %v7874_v37 = vadd.f32 %v7873_v8, %v7872_v26  ;;  %v7853_v55 = vpop.f32.mrb[22].mxu0  ;;  %v7875_v56 = vpop.f32.mrb[22].mxu1 }
 0x677   : > { %v7854_v52 = vpop.f32.mrb[23].mxu0  ;;  %v7876_v19 = vpop.f32.mrb[23].mxu1 }
 0x678   : > { %v6775_v17 = vadd.f32 %v7852_v47, %v7797_v46 }
 0x67a   : > { %v6815_v62 = vadd.f32 %v7874_v37, %v6775_v17 }
 0x67c   : > { %6820 = vst [vmem:[%s455_s26] sm:$0xff] %v6815_v62 }
 0x67d   : > { %8781 = shalt.err (!%p8778_p10)
}
 0x67e   : > { %s8782_s1 = scalar_lea.hbm %s9408_s24, 128  ;;  %s8786_s22 = scalar_lea.hbm %s9487_s25, 256 }
 0x67f   : > { %p8783_p11 = scmp.ne.s32.totalorder %s9408_s24, %s8782_s1  ;;  %p8787_p7 = scmp.lt.u32.totalorder %s9408_s24, %s9487_s25 }
 0x680   : > { %p8788_p6 = scmp.lt.u32.totalorder %s8786_s22, %s8782_s1  ;;  %p8790_p12 = scmp.lt.u32.totalorder %s8782_s1, %s9408_s24 }
 0x681   : > { %p8784_p8 = pnand %p8783_p11, %p9488_p1 }
 0x682   : > { %p8789_p9 = por %p8788_p6, %p8787_p7 }
 0x683   : > { %p8785_p5 = pneg %p8784_p8 }
 0x684   : > { %p8791_p13 = por %p8790_p12, %p8789_p9 }
 0x686   : > { %p8792_p0 = pnand %p8791_p13, %p8785_p5 }
 0x688   : > { %8795 = shalt.err (!%p8792_p0)
}
 0x689   : > { %7996 = dma.vmem_to_hbm [thread:$0]  (%p9488_p1), %s9410_s19, 128, %s9408_s24, %s6822_s13  }
 0x68a PF: > { %s6847_s23 = sand.u32 1, %s8838_s30   ;;  %p9489_p2 = scmp.ne.s32.totalorder %s9476_s29, 0 }
 0x68b   : > { %p9490_p3 = scmp.ge.s32.totalorder %s8850_s12, 2  ;;  %s6848_s18 = scalar_lea.sflag [#allocation4], %s6847_s23 }
 0x68d   : > { %p8028_p4 = pnand %p9490_p3, %p9489_p2 }
 0x68f   : > { %8833 = dma.done.wait (!%p8028_p4), %s6848_s18, 128  }
 0x690   : > { %8835 = vsyncadd (!%p8028_p4), %s6848_s18, 4294967168  ;;  %p26_p10 = scmp.ge.s32.totalorder %s9146_s27, 4   ;;  %s9491_s30 = smov %s8842_s10 }
 0x691   : > { %s9492_s10 = smov %s8846_s11  ;;  %s9493_s11 = smov %s9157_s17 }
 0x692   : > { %s9494_s12 = smov %s9146_s27  ;;  %28 = sbr.rel (!%p26_p10) target bundleno = 12 (0xc), region = 133 }
 0x699   :  { %6853 = vsyncpa [#allocation3], 1 }
 0x69a   :  { %6855 = vsyncpa [#allocation3 + $0x1], 1 }
 0x69b   :  { %6856 = vsyncpa [#allocation6], 1 }
 0x69c   :  { %6857 = vsyncpa [#allocation9], 1 }
 0x69d   :  { %6858 = vsyncpa [#allocation12], 1 }
 0x69e   :  { %6859 = vsyncpa [#allocation15], 1 }
 0x69f   :  { %6860 = vsyncpa [#allocation4], 1 }
 0x6a0   :  { %6862 = vsyncpa [#allocation4 + $0x1], 1 }

// kernel: tpu_custom_call.1
= control target key start
LH: loop header
LB: loop body
LE: loop exit
PB: predicated region body
PF: predicated region fallthrough
CT: control target
= control target key end

     0   :  { %s9452_s0 = inlined_call_operand.hbm [shape: bf16[16,28], index: 0, kind: input, shape index: {}]   ;;  %s9453_s1 = inlined_call_operand.hbm [shape: bf16[28,1024], index: 1, kind: input, shape index: {}]   ;;  %s9454_s2 = inlined_call_operand.hbm [shape: f32[1,1024], index: 2, kind: input, shape index: {}]   ;;  %s9455_s3 = inlined_call_operand.hbm [shape: bf16[1024,1024], index: 3, kind: input, shape index: {}]   ;;  %s9456_s4 = inlined_call_operand.hbm [shape: f32[1,1024], index: 4, kind: input, shape index: {}]   ;;  %s9457_s5 = inlined_call_operand.hbm [shape: bf16[1024,512], index: 5, kind: input, shape index: {}]   ;;  %s9458_s6 = inlined_call_operand.hbm [shape: f32[1,512], index: 6, kind: input, shape index: {}]   ;;  %s9459_s7 = inlined_call_operand.hbm [shape: bf16[512,128], index: 7, kind: input, shape index: {}]   ;;  %s9460_s8 = inlined_call_operand.hbm [shape: f32[1,128], index: 8, kind: input, shape index: {}]   ;;  %s9461_s9 = inlined_call_operand.hbm [shape: f32[16,128], index: 9, kind: output, shape index: {}]  }
   0x1   :  { %9466 = sst [smem:[#allocation24_spill]] %s9453_s1 }
   0x2   :  { %9467 = sst [smem:[#allocation25_spill]] %s9461_s9 }
   0x3   :  { %14 = vsyncpa [#allocation3], 0 }
   0x4   :  { %16 = vsyncpa [#allocation3 + $0x1], 0 }
   0x5   :  { %17 = vsyncpa [#allocation6], 0 }
   0x6   :  { %18 = vsyncpa [#allocation9], 0 }
   0x7   :  { %19 = vsyncpa [#allocation12], 0 }
   0x8   :  { %20 = vsyncpa [#allocation15], 0 }
   0x9   :  { %21 = vsyncpa [#allocation4], 0 }
   0xa   :  { %23 = vsyncpa [#allocation4 + $0x1], 0  ;;  %s8919_s30 = smov 0   ;;  %s8921_s10 = smov 0  }
   0xb   :  { %s8923_s11 = smov 0   ;;  %s8925_s12 = smov 0  }
   0xc LB: > { %s8852_s13 = smov [#allocation5]   ;;  %s8940_s15 = sadd.s32 4294967295, %s8850_s12   ;;  %s8850_s12 = sphi %s8925_s12, %s9494_s12   ;;  %s8846_s11 = sphi %s8923_s11, %s9493_s11   ;;  %s8842_s10 = sphi %s8921_s10, %s9492_s10   ;;  %s8838_s30 = sphi %s8919_s30, %s9491_s30  }
   0xd   : > { %s266_s14 = sshll.u32 %s8852_s13, 4  ;;  %p6982_p0 = scmp.ge.s32.totalorder %s8850_s12, 1  ;;  %s8945_s14 = int_to_ptr.vmem [resolvable:$true] %s266_s14 }
   0xe   : > { %p9463_p1 = scmp.eq.s32.totalorder %s8940_s15, 0  ;;  %p254_p2 = scmp.lt.s32.totalorder %s8850_s12, 3 }
   0xf   : > { %s8853_s17 = smov [#allocation8]   ;;  %s8854_s20 = smov [#allocation11]  }
  0x10   : > { %p8947_p3 = pnand %p6982_p0, %p254_p2  ;;  %s290_s18 = sshll.u32 %s8853_s17, 4  ;;  %s8960_s18 = int_to_ptr.vmem [resolvable:$true] %s290_s18 }
  0x11   : > { %s314_s21 = sshll.u32 %s8854_s20, 4  ;;  %s9470_s1 = sld [smem:[#allocation24_spill]]  ;;  %s8962_s21 = int_to_ptr.vmem [resolvable:$true] %s314_s21 }
  0x12   : > { %s9468_s16 = scalar_select %p8947_p3, 1, 0 }
  0x13   : > { %p7998_p5 = pneg %p8947_p3 }
  0x15   : > { %p8956_p6 = pnand %p7998_p5, %p9463_p1 }
  0x17   : > { %s8514_s24 = scalar_lea.hbm %s9470_s1, 2048  ;;  %p8972_p8 = pneg %p8956_p6 }
  0x18   : > { %p8515_p7 = scmp.ne.s32.totalorder %s9470_s1, %s8514_s24  ;;  %p8521_p11 = scmp.lt.u32.totalorder %s8514_s24, %s9470_s1 }
  0x1a   : > { %p8517_p9 = pnand %p8972_p8, %p8515_p7 }
  0x1c   : > { %p8518_p10 = pneg %p8517_p9 }
  0x1e   : > { %p8523_p12 = pnand %p8521_p11, %p8518_p10 }
  0x20   : > { %8526 = shalt.err (!%p8523_p12)
}
  0x21   : > { %s8527_s13 = scalar_lea.vmem %s8945_s14, 2048  ;;  %p8535_p5 = scmp.lt.s32.totalorder %s8945_s14, %s8945_s14 }
  0x22   : > { %p8528_p13 = scmp.ne.s32.totalorder %s8945_s14, %s8527_s13  ;;  %p8536_p4 = scmp.lt.s32.totalorder %s8527_s13, %s8527_s13 }
  0x24   : > { %p8530_p0 = pnand %p8528_p13, %p8972_p8  ;;  %p8537_p7 = por %p8536_p4, %p8535_p5 }
  0x26   : > { %p8531_p2 = pneg %p8530_p0 }
  0x28   : > { %p8538_p9 = pnand %p8537_p7, %p8531_p2 }
  0x2a   : > { %8541 = shalt.err (!%p8538_p9)
}
  0x2b   : > { %s8855_s17 = smov 512   ;;  %s8856_s20 = smov 32  }
  0x2c   : > { %8001 = dma.hbm_to_vmem [thread:$0]  (!%p8956_p6), %s9470_s1, 2048, %s8945_s14, [#allocation6], %s8855_s17, %s8855_s17, %s8856_s20  }
  0x2d   : > { %s8542_s26 = scalar_lea.hbm %s9455_s3, 65536 }
  0x2e   : > { %p8543_p4 = scmp.ne.s32.totalorder %s9455_s3, %s8542_s26  ;;  %p8549_p12 = scmp.lt.u32.totalorder %s8542_s26, %s9455_s3 }
  0x30   : > { %p8545_p10 = pnand %p8543_p4, %p8972_p8 }
  0x32   : > { %p8546_p11 = pneg %p8545_p10 }
  0x34   : > { %p8551_p13 = pnand %p8549_p12, %p8546_p11 }
  0x36   : > { %8554 = shalt.err (!%p8551_p13)
}
  0x37   : > { %s8555_s14 = scalar_lea.vmem %s8960_s18, 65536  ;;  %p8563_p7 = scmp.lt.s32.totalorder %s8960_s18, %s8960_s18 }
  0x38   : > { %p8556_p0 = scmp.ne.s32.totalorder %s8960_s18, %s8555_s14  ;;  %p8564_p9 = scmp.lt.s32.totalorder %s8555_s14, %s8555_s14 }
  0x3a   : > { %p8558_p2 = pnand %p8556_p0, %p8972_p8  ;;  %p8565_p4 = por %p8564_p9, %p8563_p7 }
  0x3c   : > { %p8559_p5 = pneg %p8558_p2 }
  0x3e   : > { %p8566_p10 = pnand %p8565_p4, %p8559_p5 }
  0x40   : > { %8569 = shalt.err (!%p8566_p10)
}
  0x41   : > { %8007 = dma.hbm_to_vmem [thread:$0]  (!%p8956_p6), %s9455_s3, 65536, %s8960_s18, [#allocation9], %s8855_s17, %s8855_s17, %s8856_s20  }
  0x42   : > { %s8570_s25 = scalar_lea.hbm %s9457_s5, 32768 }
  0x43   : > { %p8571_p11 = scmp.ne.s32.totalorder %s9457_s5, %s8570_s25  ;;  %p8577_p0 = scmp.lt.u32.totalorder %s8570_s25, %s9457_s5 }
  0x45   : > { %p8573_p12 = pnand %p8571_p11, %p8972_p8 }
  0x47   : > { %p8574_p13 = pneg %p8573_p12 }
  0x49   : > { %p8579_p2 = pnand %p8577_p0, %p8574_p13 }
  0x4b   : > { %8582 = shalt.err (!%p8579_p2)
}
  0x4c   : > { %s8583_s18 = scalar_lea.vmem %s8962_s21, 32768  ;;  %p8591_p4 = scmp.lt.s32.totalorder %s8962_s21, %s8962_s21 }
  0x4d   : > { %p8584_p5 = scmp.ne.s32.totalorder %s8962_s21, %s8583_s18  ;;  %p8592_p10 = scmp.lt.s32.totalorder %s8583_s18, %s8583_s18 }
  0x4f   : > { %p8586_p7 = pnand %p8584_p5, %p8972_p8  ;;  %p8593_p11 = por %p8592_p10, %p8591_p4 }
  0x51   : > { %p8587_p9 = pneg %p8586_p7 }
  0x53   : > { %p8594_p12 = pnand %p8593_p11, %p8587_p9 }
  0x55   : > { %8597 = shalt.err (!%p8594_p12)
}
  0x56   : > { %s8857_s17 = smov 256   ;;  %s8858_s20 = smov 16  }
  0x57   : > { %8013 = dma.hbm_to_vmem [thread:$0]  (!%p8956_p6), %s9457_s5, 32768, %s8962_s21, [#allocation12], %s8857_s17, %s8857_s17, %s8858_s20  }
  0x58   : > { %s8859_s22 = smov [#allocation14]   ;;  %s8598_s26 = scalar_lea.hbm %s9459_s7, 4096 }
  0x59   : > { %s338_s23 = sshll.u32 %s8859_s22, 4  ;;  %p8599_p13 = scmp.ne.s32.totalorder %s9459_s7, %s8598_s26  ;;  %s339_s23 = int_to_ptr.vmem [resolvable:$true] %s338_s23 }
  0x5a   : > { %p8605_p5 = scmp.lt.u32.totalorder %s8598_s26, %s9459_s7 }
  0x5b   : > { %p8601_p0 = pnand %p8599_p13, %p8972_p8 }
  0x5d   : > { %p8602_p2 = pneg %p8601_p0 }
  0x5f   : > { %p8607_p7 = pnand %p8605_p5, %p8602_p2 }
  0x61   : > { %8610 = shalt.err (!%p8607_p7)
}
  0x62   : > { %s8611_s21 = scalar_lea.vmem %s339_s23, 4096  ;;  %p8619_p11 = scmp.lt.s32.totalorder %s339_s23, %s339_s23 }
  0x63   : > { %p8612_p9 = scmp.ne.s32.totalorder %s339_s23, %s8611_s21  ;;  %p8620_p12 = scmp.lt.s32.totalorder %s8611_s21, %s8611_s21 }
  0x65   : > { %p8614_p4 = pnand %p8612_p9, %p8972_p8  ;;  %p8621_p1 = por %p8620_p12, %p8619_p11 }
  0x67   : > { %p8615_p10 = pneg %p8614_p4 }
  0x69   : > { %p8622_p3 = pnand %p8621_p1, %p8615_p10 }
  0x6b   : > { %8625 = shalt.err (!%p8622_p3)
}
  0x6c   : > { %s8860_s17 = smov 64   ;;  %s8861_s20 = smov 4  }
  0x6d   : > { %8019 = dma.hbm_to_vmem [thread:$0]  (!%p8956_p6), %s9459_s7, 4096, %s339_s23, [#allocation15], %s8860_s17, %s8860_s17, %s8861_s20  }
  0x6e   : > { %s8862_s22 = smov [#allocation7]   ;;  %s8863_s25 = smov [#allocation10]  }
  0x6f   : > { %s280_s24 = sshll.u32 %s8862_s22, 4  ;;  %s304_s26 = sshll.u32 %s8863_s25, 4  ;;  %s281_s24 = int_to_ptr.vmem [resolvable:$true] %s280_s24  ;;  %s9057_s26 = int_to_ptr.vmem [resolvable:$true] %s304_s26 }
  0x70   : > { %s8626_s13 = scalar_lea.hbm %s9454_s2, 128 }
  0x71   : > { %p8627_p1 = scmp.ne.s32.totalorder %s9454_s2, %s8626_s13  ;;  %p8633_p0 = scmp.lt.u32.totalorder %s8626_s13, %s9454_s2 }
  0x73   : > { %p8629_p3 = pnand %p8627_p1, %p8972_p8 }
  0x75   : > { %p8630_p13 = pneg %p8629_p3 }
  0x77   : > { %p8635_p2 = pnand %p8633_p0, %p8630_p13 }
  0x79   : > { %8638 = shalt.err (!%p8635_p2)
}
  0x7a   : > { %s8639_s17 = scalar_lea.vmem %s281_s24, 128  ;;  %p8647_p4 = scmp.lt.s32.totalorder %s281_s24, %s281_s24 }
  0x7b   : > { %p8640_p5 = scmp.ne.s32.totalorder %s281_s24, %s8639_s17  ;;  %p8648_p10 = scmp.lt.s32.totalorder %s8639_s17, %s8639_s17 }
  0x7d   : > { %p8642_p7 = pnand %p8640_p5, %p8972_p8  ;;  %p8649_p11 = por %p8648_p10, %p8647_p4 }
  0x7f   : > { %p8643_p9 = pneg %p8642_p7 }
  0x81   : > { %p8650_p12 = pnand %p8649_p11, %p8643_p9 }
  0x83   : > { %8653 = shalt.err (!%p8650_p12)
}
  0x84   : > { %8004 = dma.hbm_to_vmem [thread:$0]  (!%p8956_p6), %s9454_s2, 128, %s281_s24, [#allocation6]  }
  0x85   : > { %s8654_s28 = scalar_lea.hbm %s9456_s4, 128 }
  0x86   : > { %p8655_p1 = scmp.ne.s32.totalorder %s9456_s4, %s8654_s28  ;;  %p8661_p0 = scmp.lt.u32.totalorder %s8654_s28, %s9456_s4 }
  0x88   : > { %p8657_p3 = pnand %p8655_p1, %p8972_p8 }
  0x8a   : > { %p8658_p13 = pneg %p8657_p3 }
  0x8c   : > { %p8663_p2 = pnand %p8661_p0, %p8658_p13 }
  0x8e   : > { %8666 = shalt.err (!%p8663_p2)
}
  0x8f   : > { %s8667_s24 = scalar_lea.vmem %s9057_s26, 128  ;;  %p8675_p4 = scmp.lt.s32.totalorder %s9057_s26, %s9057_s26 }
  0x90   : > { %p8668_p5 = scmp.ne.s32.totalorder %s9057_s26, %s8667_s24  ;;  %p8676_p10 = scmp.lt.s32.totalorder %s8667_s24, %s8667_s24 }
  0x92   : > { %p8670_p7 = pnand %p8668_p5, %p8972_p8  ;;  %p8677_p11 = por %p8676_p10, %p8675_p4 }
  0x94   : > { %p8671_p9 = pneg %p8670_p7 }
  0x96   : > { %p8678_p12 = pnand %p8677_p11, %p8671_p9 }
  0x98   : > { %8681 = shalt.err (!%p8678_p12)
}
  0x99   : > { %8010 = dma.hbm_to_vmem [thread:$0]  (!%p8956_p6), %s9456_s4, 128, %s9057_s26, [#allocation9]  }
  0x9a   : > { %s8864_s17 = smov [#allocation13]   ;;  %s8865_s9 = smov [#allocation16]  }
  0x9b   : > { %s328_s20 = sshll.u32 %s8864_s17, 4  ;;  %s352_s22 = sshll.u32 %s8865_s9, 4  ;;  %s329_s20 = int_to_ptr.vmem [resolvable:$true] %s328_s20  ;;  %s9100_s22 = int_to_ptr.vmem [resolvable:$true] %s352_s22 }
  0x9c   : > { %s8682_s29 = scalar_lea.hbm %s9458_s6, 64 }
  0x9d   : > { %p8683_p1 = scmp.ne.s32.totalorder %s9458_s6, %s8682_s29  ;;  %p8689_p0 = scmp.lt.u32.totalorder %s8682_s29, %s9458_s6 }
  0x9f   : > { %p8685_p3 = pnand %p8683_p1, %p8972_p8 }
  0xa1   : > { %p8686_p13 = pneg %p8685_p3 }
  0xa3   : > { %p8691_p2 = pnand %p8689_p0, %p8686_p13 }
  0xa5   : > { %8694 = shalt.err (!%p8691_p2)
}
  0xa6   : > { %s8695_s24 = scalar_lea.vmem %s329_s20, 64  ;;  %p8703_p4 = scmp.lt.s32.totalorder %s329_s20, %s329_s20 }
  0xa7   : > { %p8696_p5 = scmp.ne.s32.totalorder %s329_s20, %s8695_s24  ;;  %p8704_p10 = scmp.lt.s32.totalorder %s8695_s24, %s8695_s24 }
  0xa9   : > { %p8698_p7 = pnand %p8696_p5, %p8972_p8  ;;  %p8705_p11 = por %p8704_p10, %p8703_p4 }
  0xab   : > { %p8699_p9 = pneg %p8698_p7 }
  0xad   : > { %p8706_p12 = pnand %p8705_p11, %p8699_p9 }
  0xaf   : > { %8709 = shalt.err (!%p8706_p12)
}
  0xb0   : > { %8016 = dma.hbm_to_vmem [thread:$0]  (!%p8956_p6), %s9458_s6, 64, %s329_s20, [#allocation12]  }
  0xb1   : > { %s8710_s25 = scalar_lea.hbm %s9460_s8, 16 }
  0xb2   : > { %p8711_p1 = scmp.ne.s32.totalorder %s9460_s8, %s8710_s25  ;;  %p8717_p0 = scmp.lt.u32.totalorder %s8710_s25, %s9460_s8 }
  0xb4   : > { %p8713_p3 = pnand %p8711_p1, %p8972_p8 }
  0xb6   : > { %p8714_p13 = pneg %p8713_p3 }
  0xb8   : > { %p8719_p2 = pnand %p8717_p0, %p8714_p13 }
  0xba   : > { %8722 = shalt.err (!%p8719_p2)
}
  0xbb   : > { %s8723_s20 = scalar_lea.vmem %s9100_s22, 16  ;;  %s8730_s21 = scalar_lea.vmem %s9100_s22, 32 }
  0xbc   : > { %p8724_p5 = scmp.ne.s32.totalorder %s9100_s22, %s8723_s20  ;;  %p8731_p4 = scmp.lt.s32.totalorder %s9100_s22, %s9100_s22 }
  0xbd   : > { %p8732_p10 = scmp.lt.s32.totalorder %s8730_s21, %s8723_s20 }
  0xbe   : > { %p8726_p7 = pnand %p8724_p5, %p8972_p8 }
  0xbf   : > { %p8733_p11 = por %p8732_p10, %p8731_p4 }
  0xc0   : > { %p8727_p9 = pneg %p8726_p7 }
  0xc2   : > { %p8734_p12 = pnand %p8733_p11, %p8727_p9 }
  0xc4   : > { %8737 = shalt.err (!%p8734_p12)
}
  0xc5   : > { %8022 = dma.hbm_to_vmem [thread:$0]  (!%p8956_p6), %s9460_s8, 16, %s9100_s22, [#allocation15]  }
  0xc6   : > { %s6981_s19 = sadd.s32 4294967294, %s8850_s12   ;;  %s9146_s27 = sadd.s32 1, %s8850_s12  }
  0xc7   : > { %s33_s14 = ssub.s32 %s8850_s12, %s9146_s27  ;;  %s36_s23 = sadd.s32 1, %s8846_s11 }
  0xc8   : > { %p34_p8 = scmp.eq.s32.totalorder %s33_s14, 0  ;;  %p43_p1 = scmp.ne.s32.totalorder %s8846_s11, %s8842_s10 }
  0xc9   : > { %p44_p3 = scmp.eq.s32.totalorder %s8850_s12, 0  ;;  %p49_p13 = scmp.ne.s32.totalorder %s8842_s10, %s8838_s30 }
  0xca   : > { %s9157_s17 = scalar_select %p34_p8, %s8846_s11, %s36_s23  }
  0xcb   : > { %p9159_p0 = por %p44_p3, %p43_p1  ;;  %p9473_p2 = scmp.eq.s32.totalorder %s8940_s15, 0 }
  0xcc   : > { %p241_p5 = scmp.eq.s32.totalorder %s8940_s15, 1  ;;  %p247_p7 = scmp.eq.s32.totalorder %s6981_s19, 1 }
  0xcd   : > { %p9165_p6 = por %p9473_p2, %p49_p13  ;;  %p8039_p9 = scmp.lt.s32.totalorder %s8850_s12, 2 }
  0xce   : > { %s363_s25 = sand.u32 1, %s8846_s11   ;;  %p9172_p4 = por %p241_p5, %p43_p1 }
  0xcf   : > { %p9176_p10 = por %p247_p7, %p49_p13  ;;  %s6992_s13 = sshll.u32 %s363_s25, 2 }
  0xd0   : > { %s9475_s28 = scalar_select %p9172_p4, 1, 0 }
  0xd1   : > { %s9476_s29 = scalar_select %p9176_p10, 1, 0 }
  0xd2   : > { %s6993_s18 = sshll.u32 %s8850_s12, 6  ;;  %s367_s24 = scalar_lea.vmem [#allocation2], %s6992_s13 }
  0xd3   : > { %s9184_s26 = scalar_lea.hbm %s9452_s0, %s6993_s18  ;;  %s374_s19 = sshll.u32 %s367_s24, 4  ;;  %s9186_s19 = int_to_ptr.vmem [resolvable:$true] %s374_s19 }
  0xd4   : > { %p9190_p11 = pnand %p8039_p9, %p9159_p0  ;;  %s364_s23 = scalar_lea.sflag [#allocation3], %s363_s25 }
  0xd5   : > { %s8738_s1 = scalar_lea.hbm %s9184_s26, 64  ;;  %s8743_s20 = scalar_lea.hbm %s9452_s0, 128 }
  0xd6   : > { %p8739_p12 = scmp.ne.s32.totalorder %s9184_s26, %s8738_s1  ;;  %p8740_p8 = pneg %p9190_p11 }
  0xd7   : > { %p8744_p13 = scmp.lt.u32.totalorder %s9184_s26, %s9452_s0  ;;  %p8745_p0 = scmp.lt.u32.totalorder %s8743_s20, %s8738_s1 }
  0xd8   : > { %p8741_p1 = pnand %p8740_p8, %p8739_p12  ;;  %p8747_p5 = scmp.lt.u32.totalorder %s8738_s1, %s9184_s26 }
  0xd9   : > { %p8746_p2 = por %p8745_p0, %p8744_p13 }
  0xda   : > { %p8742_p3 = pneg %p8741_p1 }
  0xdb   : > { %p8748_p7 = por %p8747_p5, %p8746_p2 }
  0xdd   : > { %p8749_p9 = pnand %p8748_p7, %p8742_p3 }
  0xdf   : > { %8752 = shalt.err (!%p8749_p9)
}
  0xe0   : > { %s8753_s25 = scalar_lea.vmem %s9186_s19, 64  ;;  %s8866_s24 = smov [#allocation2]  }
  0xe1   : > { %p8754_p12 = scmp.ne.s32.totalorder %s9186_s19, %s8753_s25  ;;  %s8758_s13 = sshll.u32 %s8866_s24, 4  ;;  %s8759_s13 = int_to_ptr.vmem [resolvable:$false] %s8758_s13 }
  0xe2   : > { %s8760_s18 = scalar_lea.vmem %s8759_s13, 128  ;;  %p8761_p4 = scmp.lt.s32.totalorder %s9186_s19, %s8759_s13 }
  0xe3   : > { %p8756_p1 = pnand %p8754_p12, %p8740_p8  ;;  %p8762_p13 = scmp.lt.s32.totalorder %s8760_s18, %s8753_s25 }
  0xe5   : > { %p8757_p10 = pneg %p8756_p1  ;;  %p8763_p0 = por %p8762_p13, %p8761_p4 }
  0xe7   : > { %p8764_p2 = pnand %p8763_p0, %p8757_p10 }
  0xe9   : > { %8767 = shalt.err (!%p8764_p2)
}
  0xea   : > { %8026 = dma.hbm_to_vmem [thread:$0]  (!%p9190_p11), %s9184_s26, 64, %s9186_s19, %s364_s23  }
  0xeb   : > { %p9478_p3 = scmp.ne.s32.totalorder %s9468_s16, 0 }
  0xec   : > { %s9222_s1 = sand.u32 (!%p9478_p3), 1, %s8842_s10  }
  0xed   : > { %383 = sbr.rel (%p9478_p3) target bundleno = 1674 (0x68a), region = 56  ;;  %s6995_s20 = sshll.u32 (!%p9478_p3), %s9222_s1, 2 }
  0xee   : > { %s386_s9 = scalar_lea.sflag (!%p9478_p3), [#allocation3], %s9222_s1  ;;  %s9226_s21 = scalar_lea.vmem (!%p9478_p3), [#allocation2], %s6995_s20 }
  0xf4   : > { %8813 = dma.done.wait (%p9165_p6), %s386_s9, 64  }
  0xf5   : > { %8815 = vsyncadd (%p9165_p6), %s386_s9, 4294967232  ;;  %p9479_p4 = scmp.eq.s32.totalorder %s8940_s15, 0 }
  0xf7   : > { %8817 = dma.done.wait (%p9479_p4), [#allocation6], 2176   ;;  %p9480_p10 = pmov %p9479_p4 }
  0xf8   : > { %p9481_p11 = pmov %p9479_p4 }
  0xf9   : > { %8819 = vsyncadd (%p9480_p10), [#allocation6], 4294965120 }
  0xfa   : > { %8821 = dma.done.wait (%p9481_p11), [#allocation9], 65664   ;;  %p9482_p8 = pmov %p9479_p4 }
  0xfb   : > { %p9483_p5 = pmov %p9479_p4 }
  0xfc   : > { %8823 = vsyncadd (%p9482_p8), [#allocation9], 4294901632 }
  0xfd   : > { %8825 = dma.done.wait (%p9483_p5), [#allocation12], 32832   ;;  %p9484_p7 = pmov %p9479_p4 }
  0xfe   : > { %p9485_p6 = pmov %p9479_p4 }
  0xff   : > { %8827 = vsyncadd (%p9484_p7), [#allocation12], 4294934464 }
 0x100   : > { %8829 = dma.done.wait (%p9485_p6), [#allocation15], 4112   ;;  %p9486_p9 = pmov %p9479_p4 }
 0x101   : > { %v8867_v0 = vmov 0   ;;  %v458_v1 = vld [vmem:[#allocation5] sm:$0xff]  ;;  %v459_v7 = vld [vmem:[#allocation5 + $0x8] sm:$0xff]  ;;  %vm592_vm0 = vcmask 1045504   ;;  %v460_v17 = vld [vmem:[#allocation5 + $0x10] sm:$0xff]  ;;  %vm588_vm1 = vcmask 228352  }
 0x102   : > { %8831 = vsyncadd (%p9486_p9), [#allocation15], 4294963184  ;;  %649 = vmatprep.mubr.bf16.mxu0 %v8867_v0  ;;  %690 = vmatprep.mubr.bf16.mxu1 %v8867_v0  ;;  %v462_v2 = vld [vmem:[#allocation5 + $0x20] sm:$0xff]  ;;  %v463_v10 = vld [vmem:[#allocation5 + $0x28] sm:$0xff]  ;;  %s7004_s16 = sshll.u32 %s9222_s1, 3  ;;  %s7831_s22 = sshll.u32 %s8940_s15, 7 }
 0x103   : > { %v466_v3 = vld [vmem:[#allocation5 + $0x40] sm:$0xff]  ;;  %v7006_v4 = vcombine.high %v458_v1, %v462_v2  ;;  %v7005_v5 = vcombine.low %v458_v1, %v462_v2  ;;  %v467_v11 = vld [vmem:[#allocation5 + $0x48] sm:$0xff]  ;;  %v7008_v13 = vcombine.high %v459_v7, %v463_v10  ;;  %v7007_v14 = vcombine.low %v459_v7, %v463_v10  ;;  %v464_v18 = vld [vmem:[#allocation5 + $0x30] sm:$0xff]  ;;  %s455_s26 = scalar_lea.vmem [#allocation17], %s7004_s16  ;;  %s9487_s25 = sld [smem:[#allocation25_spill]] }
 0x104   : > { %v470_v6 = vld [vmem:[#allocation5 + $0x60] sm:$0x33]  ;;  %v471_v12 = vld [vmem:[#allocation5 + $0x68] sm:$0x33]  ;;  %v461_v19 = vld [vmem:[#allocation5 + $0x18] sm:$0xff]  ;;  %v7010_v22 = vcombine.high %v460_v17, %v464_v18  ;;  %v7009_v28 = vcombine.low %v460_v17, %v464_v18  ;;  %s6835_s19 = sshll.u32 %s455_s26, 4  ;;  %s9410_s19 = int_to_ptr.vmem [resolvable:$true] %s6835_s19 }
 0x105   : > { %v7014_v8 = vcombine.high %v466_v3, %v470_v6  ;;  %v7013_v9 = vcombine.low %v466_v3, %v470_v6  ;;  %617 = vmatprep.subr.bf16.mxu0 %v7006_v4  ;;  %v7016_v15 = vcombine.high %v467_v11, %v471_v12  ;;  %v7015_v16 = vcombine.low %v467_v11, %v471_v12  ;;  %v465_v20 = vld [vmem:[#allocation5 + $0x38] sm:$0xff]  ;;  %v468_v23 = vld [vmem:[#allocation5 + $0x50] sm:$0xff]  ;;  %v797_v34 = vld [vmem:[#allocation8] sm:$0xff]  ;;  %s6822_s13 = scalar_lea.sflag [#allocation4], %s9222_s1  ;;  %s8768_s18 = scalar_lea.vmem %s9410_s19, 128 }
 0x106   : > { %618 = vmatpush1.bf16.msra.mxu0 %v7005_v5  ;;  %658 = vmatprep.subr.bf16.mxu1 %v7008_v13  ;;  %v472_v24 = vld [vmem:[#allocation5 + $0x70] sm:$0x33]  ;;  %v7012_v26 = vcombine.high %v461_v19, %v465_v20  ;;  %v457_v27 = vld [vmem:[%s9226_s21] sm:$0xf]  ;;  %v7011_v33 = vcombine.low %v461_v19, %v465_v20  ;;  %v801_v35 = vld [vmem:[#allocation8 + $0x20] sm:$0xff]  ;;  %p8769_p12 = scmp.ne.s32.totalorder %s9410_s19, %s8768_s18  ;;  %p9488_p1 = scmp.ne.s32.totalorder %s9475_s28, 0 }
 0x107   : > { %7021 = vmatprep.subr.msk.bf16.mxu0 %vm592_vm0, %v7014_v8  ;;  %v594_v21 = vsel %vm592_vm0, %v7013_v9, 0  ;;  %659 = vmatpush1.bf16.msra.mxu1 %v7007_v14  ;;  %v600_v25 = vsel %vm592_vm0, %v7015_v16, 0  ;;  %v469_v29 = vld [vmem:[#allocation5 + $0x58] sm:$0xff]  ;;  %v7018_v31 = vcombine.high %v468_v23, %v472_v24  ;;  %v7017_v32 = vcombine.low %v468_v23, %v472_v24  ;;  %v798_v38 = vld [vmem:[#allocation8 + $0x8] sm:$0xff]  ;;  %v805_v42 = vld [vmem:[#allocation8 + $0x40] sm:$0xff]  ;;  %s8868_s15 = smov [#allocation17]  }
 0x108   : > { %7023 = vmatprep.subr.msk.bf16.mxu1 %vm592_vm0, %v7016_v15  ;;  %v473_v30 = vld [vmem:[#allocation5 + $0x78] sm:$0x33]  ;;  %v802_v39 = vld [vmem:[#allocation8 + $0x28] sm:$0xff]  ;;  %v7030_v41 = vcombine.high %v797_v34, %v801_v35  ;;  %v809_v43 = vld [vmem:[#allocation8 + $0x60] sm:$0xff]  ;;  %v7029_v46 = vcombine.low %v797_v34, %v801_v35  ;;  %p8770_p13 = pnand %p8769_p12, %p9488_p1  ;;  %s8772_s20 = sshll.u32 %s8868_s15, 4  ;;  %s8773_s20 = int_to_ptr.vmem [resolvable:$false] %s8772_s20 }
 0x109   : > { %v7020_v36 = vcombine.high %v469_v29, %v473_v30  ;;  %v7019_v37 = vcombine.low %v469_v29, %v473_v30  ;;  %v606_v40 = vsel %vm592_vm0, %v7017_v32, 0  ;;  %v7032_v45 = vcombine.high %v798_v38, %v802_v39  ;;  %v806_v47 = vld [vmem:[#allocation8 + $0x48] sm:$0xff]  ;;  %v813_v51 = vld [vmem:[#allocation8 + $0x80] sm:$0xff]  ;;  %s9408_s24 = scalar_lea.hbm %s9487_s25, %s7831_s22  ;;  %s8774_s9 = scalar_lea.vmem %s8773_s20, 256 }
 0x10a   : > { %620 = vmatpush1.bf16.msra.mxu0 %v594_v21  ;;  %v810_v48 = vld [vmem:[#allocation8 + $0x68] sm:$0xff]  ;;  %v7038_v49 = vcombine.high %v805_v42, %v809_v43  ;;  %v7031_v50 = vcombine.low %v798_v38, %v802_v39  ;;  %v817_v52 = vld [vmem:[#allocation8 + $0xa0] sm:$0xff]  ;;  %v7037_v54 = vcombine.low %v805_v42, %v809_v43  ;;  %p8771_p0 = pneg %p8770_p13  ;;  %p8775_p2 = scmp.lt.s32.totalorder %s9410_s19, %s8773_s20 }
 0x10b   : > { %699 = vmatprep.subr.bf16.mxu0 %v7010_v22  ;;  %661 = vmatpush1.bf16.msra.mxu1 %v600_v25  ;;  %v612_v44 = vsel %vm592_vm0, %v7019_v37, 0  ;;  %v7040_v53 = vcombine.high %v806_v47, %v810_v48  ;;  %v814_v55 = vld [vmem:[#allocation8 + $0x88] sm:$0xff]  ;;  %v7046_v57 = vcombine.high %v813_v51, %v817_v52  ;;  %v7039_v58 = vcombine.low %v806_v47, %v810_v48  ;;  %v821_v59 = vld [vmem:[#allocation8 + $0xc0] sm:$0xff]  ;;  %p8776_p3 = scmp.lt.s32.totalorder %s8774_s9, %s8768_s18 }
 0x10c   : > { %740 = vmatprep.subr.bf16.mxu1 %v7012_v26  ;;  %v818_v56 = vld [vmem:[#allocation8 + $0xa8] sm:$0xff]  ;;  %v825_v60 = vld [vmem:[#allocation8 + $0xe0] sm:$0xff] }
 0x10d   : > { %7022 = vmatmul.mubr.msk.bf16.vlgmr.msra.gmra.mrb[0].mxu0 %vm588_vm1, %v457_v27  ;;  %v7048_v61 = vcombine.high %v814_v55, %v818_v56  ;;  %v822_v62 = vld [vmem:[#allocation8 + $0xc8] sm:$0xff]  ;;  %v829_v1 = vld [vmem:[#allocation8 + $0x100] sm:$0xff]  ;;  %v7054_v3 = vcombine.high %v821_v59, %v825_v60  ;;  %v7047_v4 = vcombine.low %v814_v55, %v818_v56  ;;  %v7053_v8 = vcombine.low %v821_v59, %v825_v60  ;;  %p8777_p4 = por %p8776_p3, %p8775_p2 }
 0x10e   : > { %700 = vmatpush1.bf16.msra.mxu0 %v7009_v28  ;;  %731 = vmatprep.mubr.bf16.mxu0 %v8867_v0  ;;  %v826_v63 = vld [vmem:[#allocation8 + $0xe8] sm:$0xff]  ;;  %v833_v2 = vld [vmem:[#allocation8 + $0x120] sm:$0xff] }
 0x10f   : > { %7024 = vmatmul.mubr.msk.bf16.vlgmr.msra.gmra.mrb[0].mxu1 %vm588_vm1, %v457_v27  ;;  %7025 = vmatprep.subr.msk.bf16.mxu0 %vm592_vm0, %v7018_v31  ;;  %v830_v5 = vld [vmem:[#allocation8 + $0x108] sm:$0xff]  ;;  %v7056_v7 = vcombine.high %v822_v62, %v826_v63  ;;  %v837_v9 = vld [vmem:[#allocation8 + $0x140] sm:$0xff]  ;;  %v7062_v11 = vcombine.high %v829_v1, %v833_v2  ;;  %v7055_v12 = vcombine.low %v822_v62, %v826_v63  ;;  %p8778_p10 = pnand %p8777_p4, %p8771_p0 }
 0x110   : > { %741 = vmatpush1.bf16.msra.mxu1 %v7011_v33  ;;  %772 = vmatprep.mubr.bf16.mxu1 %v8867_v0  ;;  %v7045_v0 = vcombine.low %v813_v51, %v817_v52  ;;  %v834_v6 = vld [vmem:[#allocation8 + $0x128] sm:$0xff]  ;;  %v841_v10 = vld [vmem:[#allocation8 + $0x160] sm:$0xff]  ;;  %v7061_v16 = vcombine.low %v829_v1, %v833_v2 }
 0x111   : > { %7027 = vmatprep.subr.msk.bf16.mxu1 %vm592_vm0, %v7020_v36  ;;  %v838_v13 = vld [vmem:[#allocation8 + $0x148] sm:$0xff]  ;;  %v7064_v15 = vcombine.high %v830_v5, %v834_v6  ;;  %v845_v17 = vld [vmem:[#allocation8 + $0x180] sm:$0xff]  ;;  %v7070_v19 = vcombine.high %v837_v9, %v841_v10  ;;  %v7063_v20 = vcombine.low %v830_v5, %v834_v6  ;;  %v7069_v24 = vcombine.low %v837_v9, %v841_v10 }
 0x112   : > { %702 = vmatpush1.bf16.msra.mxu0 %v606_v40  ;;  %v842_v14 = vld [vmem:[#allocation8 + $0x168] sm:$0xff]  ;;  %v849_v18 = vld [vmem:[#allocation8 + $0x1a0] sm:$0xff] }
 0x113   : > { %3911 = vmatprep.subr.bf16.mxu0 %v7030_v41  ;;  %v846_v21 = vld [vmem:[#allocation8 + $0x188] sm:$0xff]  ;;  %v7072_v23 = vcombine.high %v838_v13, %v842_v14  ;;  %v853_v25 = vld [vmem:[#allocation8 + $0x1c0] sm:$0xff]  ;;  %v7071_v28 = vcombine.low %v838_v13, %v842_v14  ;;  %v7077_v32 = vcombine.low %v845_v17, %v849_v18 }
 0x114   : > { %743 = vmatpush1.bf16.msra.mxu1 %v612_v44  ;;  %v850_v22 = vld [vmem:[#allocation8 + $0x1a8] sm:$0xff]  ;;  %v857_v26 = vld [vmem:[#allocation8 + $0x1e0] sm:$0xff] }
 0x115   : > { %7026 = vmatmul.mubr.msk.bf16.vlgmr.msra.gmra.mrb[4].mxu0 %vm588_vm1, %v457_v27  ;;  %4075 = vmatprep.subr.bf16.mxu1 %v7032_v45  ;;  %v854_v29 = vld [vmem:[#allocation8 + $0x1c8] sm:$0xff]  ;;  %v7080_v31 = vcombine.high %v846_v21, %v850_v22  ;;  %v861_v33 = vld [vmem:[#allocation8 + $0x200] sm:$0xff]  ;;  %v7086_v35 = vcombine.high %v853_v25, %v857_v26  ;;  %v7079_v36 = vcombine.low %v846_v21, %v850_v22 }
 0x116   : > { %3912 = vmatpush1.bf16.msra.mxu0 %v7029_v46  ;;  %v858_v30 = vld [vmem:[#allocation8 + $0x1e8] sm:$0xff]  ;;  %v865_v34 = vld [vmem:[#allocation8 + $0x220] sm:$0xff]  ;;  %v7085_v40 = vcombine.low %v853_v25, %v857_v26 }
 0x117   : > { %7028 = vmatmul.mubr.msk.bf16.vlgmr.msra.gmra.mrb[4].mxu1 %vm588_vm1, %v457_v27  ;;  %3913 = vmatprep.subr.bf16.mxu0 %v7038_v49  ;;  %v7078_v27 = vcombine.high %v845_v17, %v849_v18  ;;  %v862_v37 = vld [vmem:[#allocation8 + $0x208] sm:$0xff]  ;;  %v7088_v39 = vcombine.high %v854_v29, %v858_v30  ;;  %v869_v41 = vld [vmem:[#allocation8 + $0x240] sm:$0xff]  ;;  %v7094_v43 = vcombine.high %v861_v33, %v865_v34 }
 0x118   : > { %4076 = vmatpush1.bf16.msra.mxu1 %v7031_v50  ;;  %v866_v38 = vld [vmem:[#allocation8 + $0x228] sm:$0xff]  ;;  %v873_v42 = vld [vmem:[#allocation8 + $0x260] sm:$0xff]  ;;  %v7087_v44 = vcombine.low %v854_v29, %v858_v30  ;;  %v7093_v48 = vcombine.low %v861_v33, %v865_v34 }
 0x119   : > { %4077 = vmatprep.subr.bf16.mxu1 %v7040_v53  ;;  %v870_v45 = vld [vmem:[#allocation8 + $0x248] sm:$0xff]  ;;  %v7096_v47 = vcombine.high %v862_v37, %v866_v38  ;;  %v877_v49 = vld [vmem:[#allocation8 + $0x280] sm:$0xff]  ;;  %v7102_v51 = vcombine.high %v869_v41, %v873_v42  ;;  %v7095_v52 = vcombine.low %v862_v37, %v866_v38  ;;  %v7101_v56 = vcombine.low %v869_v41, %v873_v42 }
 0x11a   : > { %3914 = vmatpush1.bf16.msra.mxu0 %v7037_v54  ;;  %v874_v46 = vld [vmem:[#allocation8 + $0x268] sm:$0xff]  ;;  %v881_v50 = vld [vmem:[#allocation8 + $0x2a0] sm:$0xff] }
 0x11b   : > { %3915 = vmatprep.subr.bf16.mxu0 %v7046_v57  ;;  %v878_v53 = vld [vmem:[#allocation8 + $0x288] sm:$0xff]  ;;  %v7104_v55 = vcombine.high %v870_v45, %v874_v46  ;;  %v885_v57 = vld [vmem:[#allocation8 + $0x2c0] sm:$0xff]  ;;  %v7110_v59 = vcombine.high %v877_v49, %v881_v50  ;;  %v7103_v60 = vcombine.low %v870_v45, %v874_v46  ;;  %v476_v46 = vlaneseq }
 0x11c   : > { %4078 = vmatpush1.bf16.msra.mxu1 %v7039_v58  ;;  %v882_v54 = vld [vmem:[#allocation8 + $0x2a8] sm:$0xff]  ;;  %v889_v58 = vld [vmem:[#allocation8 + $0x2e0] sm:$0xff] }
 0x11d   : > { %4079 = vmatprep.subr.bf16.mxu1 %v7048_v61  ;;  %v886_v61 = vld [vmem:[#allocation8 + $0x2c8] sm:$0xff]  ;;  %v7112_v63 = vcombine.high %v878_v53, %v882_v54  ;;  %v893_v1 = vld [vmem:[#allocation8 + $0x300] sm:$0xff] }
 0x11e   : > { %3916 = vmatpush1.bf16.msra.mxu0 %v7045_v0  ;;  %v890_v62 = vld [vmem:[#allocation8 + $0x2e8] sm:$0xff]  ;;  %v7109_v0 = vcombine.low %v877_v49, %v881_v50  ;;  %v897_v2 = vld [vmem:[#allocation8 + $0x320] sm:$0xff]  ;;  %v9266_v49 = vld [vmem:[#allocation7] sm:$0xff] }
 0x11f   : > { %3917 = vmatprep.subr.bf16.mxu0 %v7054_v3  ;;  %v7118_v3 = vcombine.high %v885_v57, %v889_v58  ;;  %v894_v5 = vld [vmem:[#allocation8 + $0x308] sm:$0xff]  ;;  %v901_v9 = vld [vmem:[#allocation8 + $0x340] sm:$0xff] }
 0x120   : > { %4080 = vmatpush1.bf16.msra.mxu1 %v7047_v4  ;;  %v7111_v4 = vcombine.low %v878_v53, %v882_v54  ;;  %v898_v6 = vld [vmem:[#allocation8 + $0x328] sm:$0xff]  ;;  %v905_v10 = vld [vmem:[#allocation8 + $0x360] sm:$0xff] }
 0x121   : > { %4081 = vmatprep.subr.bf16.mxu1 %v7056_v7  ;;  %v7120_v7 = vcombine.high %v886_v61, %v890_v62  ;;  %v902_v13 = vld [vmem:[#allocation8 + $0x348] sm:$0xff]  ;;  %v7134_v17 = vcombine.high %v901_v9, %v905_v10  ;;  %v7127_v18 = vcombine.low %v894_v5, %v898_v6  ;;  %v909_v22 = vld [vmem:[#allocation8 + $0x380] sm:$0xff] }
 0x122   : > { %3918 = vmatpush1.bf16.msra.mxu0 %v7053_v8  ;;  %v7117_v8 = vcombine.low %v885_v57, %v889_v58  ;;  %v906_v14 = vld [vmem:[#allocation8 + $0x368] sm:$0xff]  ;;  %v917_v30 = vld [vmem:[#allocation8 + $0x3c0] sm:$0xff] }
 0x123   : > { %3919 = vmatprep.subr.bf16.mxu0 %v7062_v11  ;;  %v7126_v11 = vcombine.high %v893_v1, %v897_v2  ;;  %v7135_v21 = vcombine.low %v902_v13, %v906_v14  ;;  %v914_v26 = vld [vmem:[#allocation8 + $0x3a8] sm:$0xff]  ;;  %v925_v38 = vld [vmem:[#allocation8 + $0x400] sm:$0xff] }
 0x124   : > { %4082 = vmatpush1.bf16.msra.mxu1 %v7055_v12  ;;  %v7119_v12 = vcombine.low %v886_v61, %v890_v62  ;;  %v922_v34 = vld [vmem:[#allocation8 + $0x3e8] sm:$0xff] }
 0x125   : > { %4083 = vmatprep.subr.bf16.mxu1 %v7064_v15  ;;  %v7128_v15 = vcombine.high %v894_v5, %v898_v6  ;;  %v930_v42 = vld [vmem:[#allocation8 + $0x428] sm:$0xff] }
 0x126   : > { %3920 = vmatpush1.bf16.msra.mxu0 %v7061_v16  ;;  %v7125_v16 = vcombine.low %v893_v1, %v897_v2  ;;  %v937_v2 = vld [vmem:[#allocation8 + $0x460] sm:$0xff] }
 0x127   : > { %3921 = vmatprep.subr.bf16.mxu0 %v7070_v19  ;;  %v7136_v19 = vcombine.high %v902_v13, %v906_v14  ;;  %v941_v13 = vld [vmem:[#allocation8 + $0x480] sm:$0xff] }
 0x128   : > { %4084 = vmatpush1.bf16.msra.mxu1 %v7063_v20  ;;  %v7133_v20 = vcombine.low %v901_v9, %v905_v10  ;;  %v945_v14 = vld [vmem:[#allocation8 + $0x4a0] sm:$0xff] }
 0x129   : > { %4085 = vmatprep.subr.bf16.mxu1 %v7072_v23  ;;  %v913_v23 = vld [vmem:[#allocation8 + $0x3a0] sm:$0xff] }
 0x12a   : > { %3922 = vmatpush1.bf16.msra.mxu0 %v7069_v24  ;;  %v910_v24 = vld [vmem:[#allocation8 + $0x388] sm:$0xff]  ;;  %v7142_v25 = vcombine.high %v909_v22, %v913_v23 }
 0x12b   : > { %3923 = vmatprep.subr.bf16.mxu0 %v7078_v27  ;;  %v7141_v27 = vcombine.low %v909_v22, %v913_v23  ;;  %v7144_v29 = vcombine.high %v910_v24, %v914_v26  ;;  %v7174_v23 = vcombine.high %v941_v13, %v945_v14 }
 0x12c   : > { %4086 = vmatpush1.bf16.msra.mxu1 %v7071_v28  ;;  %v7143_v28 = vcombine.low %v910_v24, %v914_v26 }
 0x12d   : > { %4087 = vmatprep.subr.bf16.mxu1 %v7080_v31  ;;  %v921_v31 = vld [vmem:[#allocation8 + $0x3e0] sm:$0xff] }
 0x12e   : > { %3924 = vmatpush1.bf16.msra.mxu0 %v7077_v32  ;;  %v918_v32 = vld [vmem:[#allocation8 + $0x3c8] sm:$0xff]  ;;  %v7150_v33 = vcombine.high %v917_v30, %v921_v31 }
 0x12f   : > { %3925 = vmatprep.subr.bf16.mxu0 %v7086_v35  ;;  %v7149_v35 = vcombine.low %v917_v30, %v921_v31  ;;  %v7152_v37 = vcombine.high %v918_v32, %v922_v34  ;;  %v7173_v30 = vcombine.low %v941_v13, %v945_v14  ;;  %v994_v13 = vld [vmem:[#allocation8 + $0x628] sm:$0xff] }
 0x130   : > { %4088 = vmatpush1.bf16.msra.mxu1 %v7079_v36  ;;  %v7151_v36 = vcombine.low %v918_v32, %v922_v34  ;;  %v957_v34 = vld [vmem:[#allocation8 + $0x500] sm:$0xff] }
 0x131   : > { %4089 = vmatprep.subr.bf16.mxu1 %v7088_v39  ;;  %v929_v39 = vld [vmem:[#allocation8 + $0x420] sm:$0xff] }
 0x132   : > { %3926 = vmatpush1.bf16.msra.mxu0 %v7085_v40  ;;  %v926_v40 = vld [vmem:[#allocation8 + $0x408] sm:$0xff]  ;;  %v7158_v41 = vcombine.high %v925_v38, %v929_v39 }
 0x133   : > { %3927 = vmatprep.subr.bf16.mxu0 %v7094_v43  ;;  %v7157_v43 = vcombine.low %v925_v38, %v929_v39  ;;  %v7160_v45 = vcombine.high %v926_v40, %v930_v42 }
 0x134   : > { %4090 = vmatpush1.bf16.msra.mxu1 %v7087_v44  ;;  %v7159_v44 = vcombine.low %v926_v40, %v930_v42  ;;  %v965_v42 = vld [vmem:[#allocation8 + $0x540] sm:$0xff] }
 0x135   : > { %4091 = vmatprep.subr.bf16.mxu1 %v7096_v47  ;;  %v9261_v47 = vshrl.u32 %v476_v46, 7 }
 0x136   : > { %3928 = vmatpush1.bf16.msra.mxu0 %v7093_v48 }
 0x137   : > { %3929 = vmatprep.subr.bf16.mxu0 %v7102_v51  ;;  %v9264_v48 = vsub.s32 0, %v9261_v47  ;;  %v9269_v50 = vsub.s32 1, %v9261_v47  ;;  %v9272_v51 = vsub.s32 3, %v9261_v47 }
 0x138   : > { %4092 = vmatpush1.bf16.msra.mxu1 %v7095_v52 }
 0x139   : > { %4093 = vmatprep.subr.bf16.mxu1 %v7104_v55  ;;  %v479_v52 = vrot.slane %v9266_v49, %v9264_v48  ;;  %v483_v53 = vrot.slane %v9266_v49, %v9269_v50  ;;  %v491_v55 = vrot.slane %v9266_v49, %v9272_v51 }
 0x13a   : > { %3930 = vmatpush1.bf16.msra.mxu0 %v7101_v56 }
 0x13b   : > { %3931 = vmatprep.subr.bf16.mxu0 %v7110_v59 }
 0x13c   : > { %4094 = vmatpush1.bf16.msra.mxu1 %v7103_v60 }
 0x13d   : > { %4095 = vmatprep.subr.bf16.mxu1 %v7112_v63  ;;  %v933_v63 = vld [vmem:[#allocation8 + $0x440] sm:$0xff] }
 0x13e   : > { %3932 = vmatpush1.bf16.msra.mxu0 %v7109_v0 }
 0x13f   : > { %3933 = vmatprep.subr.bf16.mxu0 %v7118_v3  ;;  %v934_v3 = vld [vmem:[#allocation8 + $0x448] sm:$0xff] }
 0x140   : > { %4096 = vmatpush1.bf16.msra.mxu1 %v7111_v4  ;;  %v938_v4 = vld [vmem:[#allocation8 + $0x468] sm:$0xff] }
 0x141   : > { %4097 = vmatprep.subr.bf16.mxu1 %v7120_v7 }
 0x142   : > { %3934 = vmatpush1.bf16.msra.mxu0 %v7117_v8 }
 0x143   : > { %3935 = vmatprep.subr.bf16.mxu0 %v7126_v11  ;;  %v7166_v11 = vcombine.high %v933_v63, %v937_v2 }
 0x144   : > { %4098 = vmatpush1.bf16.msra.mxu1 %v7119_v12  ;;  %v7168_v12 = vcombine.high %v934_v3, %v938_v4 }
 0x145   : > { %4099 = vmatprep.subr.bf16.mxu1 %v7128_v15  ;;  %v942_v15 = vld [vmem:[#allocation8 + $0x488] sm:$0xff] }
 0x146   : > { %3936 = vmatpush1.bf16.msra.mxu0 %v7125_v16  ;;  %v946_v16 = vld [vmem:[#allocation8 + $0x4a8] sm:$0xff] }
 0x147   : > { %3937 = vmatprep.subr.bf16.mxu0 %v7134_v17  ;;  %v7176_v24 = vcombine.high %v942_v15, %v946_v16  ;;  %v7175_v31 = vcombine.low %v942_v15, %v946_v16 }
 0x148   : > { %4100 = vmatpush1.bf16.msra.mxu1 %v7127_v18 }
 0x149   : > { %4101 = vmatprep.subr.bf16.mxu1 %v7136_v19 }
 0x14a   : > { %3938 = vmatpush1.bf16.msra.mxu0 %v7133_v20  ;;  %v7165_v20 = vcombine.low %v933_v63, %v937_v2  ;;  %v982_v2 = vld [vmem:[#allocation8 + $0x5c8] sm:$0xff] }
 0x14b   : > { %3939 = vmatprep.subr.bf16.mxu0 %v7142_v25  ;;  %v949_v25 = vld [vmem:[#allocation8 + $0x4c0] sm:$0xff] }
 0x14c   : > { %4102 = vmatpush1.bf16.msra.mxu1 %v7135_v21  ;;  %v7167_v21 = vcombine.low %v934_v3, %v938_v4  ;;  %v986_v3 = vld [vmem:[#allocation8 + $0x5e8] sm:$0xff] }
 0x14d   : > { %4103 = vmatprep.subr.bf16.mxu1 %v7144_v29  ;;  %v954_v29 = vld [vmem:[#allocation8 + $0x4e8] sm:$0xff]  ;;  %v7215_v15 = vcombine.low %v982_v2, %v986_v3 }
 0x14e   : > { %3940 = vmatpush1.bf16.msra.mxu0 %v7141_v27  ;;  %v953_v27 = vld [vmem:[#allocation8 + $0x4e0] sm:$0xff] }
 0x14f   : > { %3941 = vmatprep.subr.bf16.mxu0 %v7150_v33  ;;  %v7182_v32 = vcombine.high %v949_v25, %v953_v27  ;;  %v7181_v38 = vcombine.low %v949_v25, %v953_v27 }
 0x150   : > { %4104 = vmatpush1.bf16.msra.mxu1 %v7143_v28  ;;  %v950_v28 = vld [vmem:[#allocation8 + $0x4c8] sm:$0xff] }
 0x151   : > { %4105 = vmatprep.subr.bf16.mxu1 %v7152_v37  ;;  %v7184_v33 = vcombine.high %v950_v28, %v954_v29  ;;  %v962_v37 = vld [vmem:[#allocation8 + $0x528] sm:$0xff]  ;;  %v7183_v39 = vcombine.low %v950_v28, %v954_v29  ;;  %v1005_v29 = vld [vmem:[#allocation8 + $0x680] sm:$0xff] }
 0x152   : > { %3942 = vmatpush1.bf16.msra.mxu0 %v7149_v35  ;;  %v961_v35 = vld [vmem:[#allocation8 + $0x520] sm:$0xff] }
 0x153   : > { %3952 = vmatprep.subr.bf16.mxu0 %v7158_v41  ;;  %v7190_v40 = vcombine.high %v957_v34, %v961_v35  ;;  %v7189_v46 = vcombine.low %v957_v34, %v961_v35 }
 0x154   : > { %4106 = vmatpush1.bf16.msra.mxu1 %v7151_v36  ;;  %v958_v36 = vld [vmem:[#allocation8 + $0x508] sm:$0xff] }
 0x155   : > { %4116 = vmatprep.subr.bf16.mxu1 %v7160_v45  ;;  %v7192_v41 = vcombine.high %v958_v36, %v962_v37  ;;  %v970_v45 = vld [vmem:[#allocation8 + $0x568] sm:$0xff] }
 0x1e0   : > { %v651_v54 = vpop.f32.mrb[0].mxu0 }
 0x1e1   : > { %v652_v56 = vadd.f32 %v651_v54, %v479_v52  ;;  %v653_v57 = vpop.f32.mrb[1].mxu0  ;;  %v7191_v52 = vcombine.low %v958_v36, %v962_v37  ;;  %v1013_v37 = vld [vmem:[#allocation8 + $0x6c0] sm:$0xff] }
 0x1e2   : > { %v654_v58 = vadd.f32 %v653_v57, %v483_v53  ;;  %v655_v59 = vpop.f32.mrb[2].mxu0  ;;  %v9280_v60 = vpop.f32.mrb[0].mxu1  ;;  %v974_v57 = vld [vmem:[#allocation8 + $0x588] sm:$0xff] }
 0x1e3   : > { %v781_v61 = vmax.f32 %v652_v56, 0.0  ;;  %v656_v62 = vpop.f32.mrb[3].mxu0  ;;  %v694_v0 = vpop.f32.mrb[1].mxu1  ;;  %v977_v56 = vld [vmem:[#allocation8 + $0x5a0] sm:$0xff] }
 0x1e4   : > { %v782_v1 = vmax.f32 %v654_v58, 0.0  ;;  %v695_v5 = vadd.f32 %v694_v0, %v491_v55  ;;  %v696_v6 = vpop.f32.mrb[2].mxu1  ;;  %v973_v55 = vld [vmem:[#allocation8 + $0x580] sm:$0xff]  ;;  %v978_v58 = vld [vmem:[#allocation8 + $0x5a8] sm:$0xff] }
 0x1e5   : > { %v697_v7 = vpop.f32.mrb[3].mxu1  ;;  %v9284_v10 = vpack.c.bf16 %v781_v61, %v781_v61  ;;  %v7206_v62 = vcombine.high %v973_v55, %v977_v56  ;;  %v7208_v63 = vcombine.high %v974_v57, %v978_v58  ;;  %v981_v0 = vld [vmem:[#allocation8 + $0x5c0] sm:$0xff]  ;;  %v7205_v4 = vcombine.low %v973_v55, %v977_v56 }
 0x1e6   : > { %v9282_v8 = vpack.c.bf16 %v782_v1, %v782_v1  ;;  %v784_v9 = vmax.f32 %v695_v5, 0.0  ;;  %v985_v1 = vld [vmem:[#allocation8 + $0x5e0] sm:$0xff]  ;;  %v7207_v5 = vcombine.low %v974_v57, %v978_v58  ;;  %v7216_v7 = vcombine.high %v982_v2, %v986_v3 }
 0x1e7   : > { %v7214_v6 = vcombine.high %v981_v0, %v985_v1  ;;  %v7213_v14 = vcombine.low %v981_v0, %v985_v1  ;;  %v1029_v58 = vld [vmem:[#allocation8 + $0x740] sm:$0xff] }
 0x1e8   : > { %3943 = vmatprep.mubr.bf16.mxu0 %v9282_v8  ;;  %4107 = vmatprep.mubr.bf16.mxu1 %v9282_v8  ;;  %v9288_v17 = vpack.c.bf16 %v784_v9, %v784_v9  ;;  %v9290_v18 = vpop.f32.mrb[4].mxu0  ;;  %v989_v9 = vld [vmem:[#allocation8 + $0x600] sm:$0xff] }
 0x1e9   : > { %3944 = vmatmul.mubr.bf16.vlgmr.msra.gmra.mrb[8].mxu0 %v9284_v10  ;;  %4108 = vmatmul.mubr.bf16.vlgmr.msra.gmra.mrb[8].mxu1 %v9284_v10  ;;  %v9294_v19 = vpop.f32.mrb[5].mxu0 }
 0x1ea   : > { %3953 = vmatpush1.bf16.msra.mxu0 %v7157_v43  ;;  %4117 = vmatpush1.bf16.msra.mxu1 %v7159_v44  ;;  %v737_v22 = vpop.f32.mrb[6].mxu0  ;;  %v969_v43 = vld [vmem:[#allocation8 + $0x560] sm:$0xff]  ;;  %v966_v44 = vld [vmem:[#allocation8 + $0x548] sm:$0xff]  ;;  %v9301_v2 = vpop.f32.mrb[4].mxu1 }
 0x1eb   : > { %3954 = vmatprep.subr.bf16.mxu0 %v7166_v11  ;;  %4118 = vmatprep.subr.bf16.mxu1 %v7168_v12  ;;  %v738_v26 = vpop.f32.mrb[7].mxu0  ;;  %v7198_v53 = vcombine.high %v965_v42, %v969_v43  ;;  %v7200_v54 = vcombine.high %v966_v44, %v970_v45  ;;  %v7197_v59 = vcombine.low %v965_v42, %v969_v43  ;;  %v993_v11 = vld [vmem:[#allocation8 + $0x620] sm:$0xff]  ;;  %v990_v12 = vld [vmem:[#allocation8 + $0x608] sm:$0xff] }
 0x1ec   : > { %3984 = vmatprep.mubr.bf16.mxu0 %v9288_v17  ;;  %4148 = vmatprep.mubr.bf16.mxu1 %v9288_v17  ;;  %v7199_v61 = vcombine.low %v966_v44, %v970_v45  ;;  %v7222_v16 = vcombine.high %v989_v9, %v993_v11  ;;  %v1001_v22 = vld [vmem:[#allocation8 + $0x660] sm:$0xff]  ;;  %v7221_v25 = vcombine.low %v989_v9, %v993_v11  ;;  %v1038_v9 = vld [vmem:[#allocation8 + $0x788] sm:$0xff] }
 0x1ed   : > { %v7223_v26 = vcombine.low %v990_v12, %v994_v13  ;;  %v1021_v45 = vld [vmem:[#allocation8 + $0x700] sm:$0xff]  ;;  %v1042_v11 = vld [vmem:[#allocation8 + $0x7a8] sm:$0xff] }
 0x1ee   : > { %3955 = vmatpush1.bf16.msra.mxu0 %v7165_v20  ;;  %4119 = vmatpush1.bf16.msra.mxu1 %v7167_v21  ;;  %v7224_v20 = vcombine.high %v990_v12, %v994_v13  ;;  %v997_v21 = vld [vmem:[#allocation8 + $0x640] sm:$0xff]  ;;  %v498_v12 = vsub.s32 5, %v9261_v47 }
 0x1ef   : > { %3956 = vmatprep.subr.bf16.mxu0 %v7174_v23  ;;  %4120 = vmatprep.subr.bf16.mxu1 %v7176_v24  ;;  %v998_v23 = vld [vmem:[#allocation8 + $0x648] sm:$0xff]  ;;  %v7230_v27 = vcombine.high %v997_v21, %v1001_v22 }
 0x1f0   : > { %v1002_v24 = vld [vmem:[#allocation8 + $0x668] sm:$0xff] }
 0x1f1   : > { %v7232_v28 = vcombine.high %v998_v23, %v1002_v24  ;;  %v7231_v34 = vcombine.low %v998_v23, %v1002_v24  ;;  %v1045_v23 = vld [vmem:[#allocation8 + $0x7c0] sm:$0xff] }
 0x1f2   : > { %3957 = vmatpush1.bf16.msra.mxu0 %v7173_v30  ;;  %4121 = vmatpush1.bf16.msra.mxu1 %v7175_v31  ;;  %v1009_v30 = vld [vmem:[#allocation8 + $0x6a0] sm:$0xff]  ;;  %v1006_v31 = vld [vmem:[#allocation8 + $0x688] sm:$0xff] }
 0x1f3   : > { %3958 = vmatprep.subr.bf16.mxu0 %v7182_v32  ;;  %4122 = vmatprep.subr.bf16.mxu1 %v7184_v33  ;;  %v1010_v32 = vld [vmem:[#allocation8 + $0x6a8] sm:$0xff]  ;;  %v7229_v33 = vcombine.low %v997_v21, %v1001_v22  ;;  %v7238_v35 = vcombine.high %v1005_v29, %v1009_v30  ;;  %v7272_v22 = vcombine.high %v1038_v9, %v1042_v11  ;;  %v1049_v24 = vld [vmem:[#allocation8 + $0x7e0] sm:$0xff] }
 0x1f4   : > { %v7240_v36 = vcombine.high %v1006_v31, %v1010_v32  ;;  %v7239_v42 = vcombine.low %v1006_v31, %v1010_v32  ;;  %v7278_v31 = vcombine.high %v1045_v23, %v1049_v24 }
 0x1f6   : > { %3959 = vmatpush1.bf16.msra.mxu0 %v7181_v38  ;;  %4123 = vmatpush1.bf16.msra.mxu1 %v7183_v39  ;;  %v1017_v38 = vld [vmem:[#allocation8 + $0x6e0] sm:$0xff]  ;;  %v1014_v39 = vld [vmem:[#allocation8 + $0x6c8] sm:$0xff] }
 0x1f7   : > { %3960 = vmatprep.subr.bf16.mxu0 %v7190_v40  ;;  %4124 = vmatprep.subr.bf16.mxu1 %v7192_v41  ;;  %v1018_v40 = vld [vmem:[#allocation8 + $0x6e8] sm:$0xff]  ;;  %v7237_v41 = vcombine.low %v1005_v29, %v1009_v30  ;;  %v7246_v43 = vcombine.high %v1013_v37, %v1017_v38  ;;  %v7271_v30 = vcombine.low %v1038_v9, %v1042_v11 }
 0x1f8   : > { %v7248_v44 = vcombine.high %v1014_v39, %v1018_v40  ;;  %v7247_v55 = vcombine.low %v1014_v39, %v1018_v40  ;;  %v7277_v39 = vcombine.low %v1045_v23, %v1049_v24  ;;  %v1082_v9 = vld [vmem:[#allocation8 + $0x8e8] sm:$0xff] }
 0x1fa   : > { %3961 = vmatpush1.bf16.msra.mxu0 %v7189_v46  ;;  %4125 = vmatpush1.bf16.msra.mxu1 %v7191_v52  ;;  %v1025_v46 = vld [vmem:[#allocation8 + $0x720] sm:$0xff]  ;;  %v1022_v52 = vld [vmem:[#allocation8 + $0x708] sm:$0xff] }
 0x1fb   : > { %3962 = vmatprep.subr.bf16.mxu0 %v7198_v53  ;;  %4126 = vmatprep.subr.bf16.mxu1 %v7200_v54  ;;  %v1026_v53 = vld [vmem:[#allocation8 + $0x728] sm:$0xff]  ;;  %v7245_v54 = vcombine.low %v1013_v37, %v1017_v38  ;;  %v7254_v56 = vcombine.high %v1021_v45, %v1025_v46  ;;  %v7253_v0 = vcombine.low %v1021_v45, %v1025_v46 }
 0x1fc   : > { %v7256_v57 = vcombine.high %v1022_v52, %v1026_v53  ;;  %v7255_v1 = vcombine.low %v1022_v52, %v1026_v53  ;;  %v1066_v45 = vld [vmem:[#allocation8 + $0x868] sm:$0xff] }
 0x1fe   : > { %3963 = vmatpush1.bf16.msra.mxu0 %v7197_v59  ;;  %4127 = vmatpush1.bf16.msra.mxu1 %v7199_v61  ;;  %v1033_v59 = vld [vmem:[#allocation8 + $0x760] sm:$0xff]  ;;  %v1030_v61 = vld [vmem:[#allocation8 + $0x748] sm:$0xff] }
 0x1ff   : > { %3964 = vmatprep.subr.bf16.mxu0 %v7206_v62  ;;  %4128 = vmatprep.subr.bf16.mxu1 %v7208_v63  ;;  %v1034_v62 = vld [vmem:[#allocation8 + $0x768] sm:$0xff]  ;;  %v9299_v63 = vsub.s32 2, %v9261_v47  ;;  %v7262_v3 = vcombine.high %v1029_v58, %v1033_v59 }
 0x202   : > { %3965 = vmatpush1.bf16.msra.mxu0 %v7205_v4  ;;  %4129 = vmatpush1.bf16.msra.mxu1 %v7207_v5  ;;  %v7264_v4 = vcombine.high %v1030_v61, %v1034_v62  ;;  %v1037_v5 = vld [vmem:[#allocation8 + $0x780] sm:$0xff] }
 0x203   : > { %3966 = vmatprep.subr.bf16.mxu0 %v7214_v6  ;;  %4130 = vmatprep.subr.bf16.mxu1 %v7216_v7  ;;  %v9303_v6 = vpop.f32.mrb[5].mxu1  ;;  %v1041_v7 = vld [vmem:[#allocation8 + $0x7a0] sm:$0xff] }
 0x204   : > { %v778_v13 = vpop.f32.mrb[6].mxu1  ;;  %v7270_v21 = vcombine.high %v1037_v5, %v1041_v7  ;;  %v7269_v29 = vcombine.low %v1037_v5, %v1041_v7  ;;  %v1081_v5 = vld [vmem:[#allocation8 + $0x8e0] sm:$0xff]  ;;  %v1078_v7 = vld [vmem:[#allocation8 + $0x8c8] sm:$0xff] }
 0x205   : > { %v7311_v24 = vcombine.low %v1078_v7, %v1082_v9 }
 0x206   : > { %3967 = vmatpush1.bf16.msra.mxu0 %v7213_v14  ;;  %4131 = vmatpush1.bf16.msra.mxu1 %v7215_v15  ;;  %v487_v14 = vrot.slane %v9266_v49, %v9299_v63  ;;  %v779_v15 = vpop.f32.mrb[7].mxu1 }
 0x207   : > { %3968 = vmatprep.subr.bf16.mxu0 %v7222_v16  ;;  %4132 = vmatprep.subr.bf16.mxu1 %v7224_v20  ;;  %v7261_v16 = vcombine.low %v1029_v58, %v1033_v59  ;;  %v7263_v20 = vcombine.low %v1030_v61, %v1034_v62  ;;  %v1070_v58 = vld [vmem:[#allocation8 + $0x888] sm:$0xff]  ;;  %v7312_v15 = vcombine.high %v1078_v7, %v1082_v9 }
 0x208   : > { %v1074_v59 = vld [vmem:[#allocation8 + $0x8a8] sm:$0xff] }
 0x209   : > { %v7303_v13 = vcombine.low %v1070_v58, %v1074_v59  ;;  %v1130_v7 = vld [vmem:[#allocation8 + $0xa68] sm:$0xff] }
 0x20a   : > { %3969 = vmatpush1.bf16.msra.mxu0 %v7221_v25  ;;  %4133 = vmatpush1.bf16.msra.mxu1 %v7223_v26  ;;  %v1046_v25 = vld [vmem:[#allocation8 + $0x7c8] sm:$0xff] }
 0x20b   : > { %3970 = vmatprep.subr.bf16.mxu0 %v7230_v27  ;;  %4134 = vmatprep.subr.bf16.mxu1 %v7232_v28  ;;  %v1050_v26 = vld [vmem:[#allocation8 + $0x7e8] sm:$0xff]  ;;  %v499_v27 = vrot.slane %v9266_v49, %v498_v12  ;;  %v693_v28 = vadd.f32 %v9280_v60, %v487_v14 }
 0x20c   : > { %v7280_v32 = vcombine.high %v1046_v25, %v1050_v26  ;;  %v7279_v40 = vcombine.low %v1046_v25, %v1050_v26 }
 0x20d   : > { %v736_v37 = vadd.f32 %v9294_v19, %v499_v27  ;;  %v783_v38 = vmax.f32 %v693_v28, 0.0  ;;  %v1093_v27 = vld [vmem:[#allocation8 + $0x940] sm:$0xff] }
 0x20e   : > { %3971 = vmatpush1.bf16.msra.mxu0 %v7229_v33  ;;  %4135 = vmatpush1.bf16.msra.mxu1 %v7231_v34  ;;  %v1053_v33 = vld [vmem:[#allocation8 + $0x800] sm:$0xff] }
 0x20f   : > { %3972 = vmatprep.subr.bf16.mxu0 %v7238_v35  ;;  %4136 = vmatprep.subr.bf16.mxu1 %v7240_v36  ;;  %v1057_v34 = vld [vmem:[#allocation8 + $0x820] sm:$0xff]  ;;  %v1054_v35 = vld [vmem:[#allocation8 + $0x808] sm:$0xff]  ;;  %v786_v46 = vmax.f32 %v736_v37, 0.0  ;;  %v9313_v52 = vpack.c.bf16 %v783_v38, %v783_v38 }
 0x210   : > { %v1058_v36 = vld [vmem:[#allocation8 + $0x828] sm:$0xff]  ;;  %v7286_v60 = vcombine.high %v1053_v33, %v1057_v34  ;;  %v7285_v53 = vcombine.low %v1053_v33, %v1057_v34  ;;  %v1097_v28 = vld [vmem:[#allocation8 + $0x960] sm:$0xff] }
 0x211   : > { %v7287_v19 = vcombine.low %v1054_v35, %v1058_v36  ;;  %v9315_v61 = vpack.c.bf16 %v786_v46, %v786_v46  ;;  %v7326_v33 = vcombine.high %v1093_v27, %v1097_v28  ;;  %v1102_v37 = vld [vmem:[#allocation8 + $0x988] sm:$0xff] }
 0x212   : > { %3973 = vmatpush1.bf16.msra.mxu0 %v7237_v41  ;;  %4137 = vmatpush1.bf16.msra.mxu1 %v7239_v42  ;;  %v7288_v41 = vcombine.high %v1054_v35, %v1058_v36  ;;  %v1061_v42 = vld [vmem:[#allocation8 + $0x840] sm:$0xff]  ;;  %v1106_v38 = vld [vmem:[#allocation8 + $0x9a8] sm:$0xff] }
 0x213   : > { %3974 = vmatprep.subr.bf16.mxu0 %v7246_v43  ;;  %4138 = vmatprep.subr.bf16.mxu1 %v7248_v44  ;;  %v1065_v43 = vld [vmem:[#allocation8 + $0x860] sm:$0xff]  ;;  %v1062_v44 = vld [vmem:[#allocation8 + $0x848] sm:$0xff] }
 0x214   : > { %v7293_v62 = vcombine.low %v1061_v42, %v1065_v43  ;;  %v1101_v35 = vld [vmem:[#allocation8 + $0x980] sm:$0xff] }
 0x215   : > { %v1105_v36 = vld [vmem:[#allocation8 + $0x9a0] sm:$0xff] }
 0x216   : > { %3975 = vmatpush1.bf16.msra.mxu0 %v7245_v54  ;;  %4139 = vmatpush1.bf16.msra.mxu1 %v7247_v55  ;;  %v7294_v54 = vcombine.high %v1061_v42, %v1065_v43  ;;  %v7296_v55 = vcombine.high %v1062_v44, %v1066_v45  ;;  %v1109_v42 = vld [vmem:[#allocation8 + $0x9c0] sm:$0xff]  ;;  %v7333_v46 = vcombine.low %v1101_v35, %v1105_v36 }
 0x217   : > { %3976 = vmatprep.subr.bf16.mxu0 %v7254_v56  ;;  %4140 = vmatprep.subr.bf16.mxu1 %v7256_v57  ;;  %v1069_v56 = vld [vmem:[#allocation8 + $0x880] sm:$0xff] }
 0x218   : > { %v1073_v57 = vld [vmem:[#allocation8 + $0x8a0] sm:$0xff] }
 0x219   : > { %v7301_v11 = vcombine.low %v1069_v56, %v1073_v57  ;;  %v1113_v43 = vld [vmem:[#allocation8 + $0x9e0] sm:$0xff] }
 0x21a   : > { %3977 = vmatpush1.bf16.msra.mxu0 %v7253_v0  ;;  %4141 = vmatpush1.bf16.msra.mxu1 %v7255_v1  ;;  %v7295_v0 = vcombine.low %v1062_v44, %v1066_v45  ;;  %v7302_v1 = vcombine.high %v1069_v56, %v1073_v57  ;;  %v1110_v44 = vld [vmem:[#allocation8 + $0x9c8] sm:$0xff]  ;;  %v1121_v56 = vld [vmem:[#allocation8 + $0xa20] sm:$0xff] }
 0x21b   : > { %3978 = vmatprep.subr.bf16.mxu0 %v7262_v3  ;;  %4142 = vmatprep.subr.bf16.mxu1 %v7264_v4  ;;  %v7304_v3 = vcombine.high %v1070_v58, %v1074_v59  ;;  %v1077_v4 = vld [vmem:[#allocation8 + $0x8c0] sm:$0xff]  ;;  %v1114_v45 = vld [vmem:[#allocation8 + $0x9e8] sm:$0xff]  ;;  %v7341_v59 = vcombine.low %v1109_v42, %v1113_v43 }
 0x21c   : > { %v7310_v14 = vcombine.high %v1077_v4, %v1081_v5  ;;  %v7309_v23 = vcombine.low %v1077_v4, %v1081_v5  ;;  %v1118_v57 = vld [vmem:[#allocation8 + $0xa08] sm:$0xff]  ;;  %v1129_v4 = vld [vmem:[#allocation8 + $0xa60] sm:$0xff] }
 0x21d   : > { %v1122_v58 = vld [vmem:[#allocation8 + $0xa28] sm:$0xff] }
 0x21e   : > { %3979 = vmatpush1.bf16.msra.mxu0 %v7261_v16  ;;  %4143 = vmatpush1.bf16.msra.mxu1 %v7263_v20  ;;  %v1085_v16 = vld [vmem:[#allocation8 + $0x900] sm:$0xff]  ;;  %v1126_v5 = vld [vmem:[#allocation8 + $0xa48] sm:$0xff] }
 0x21f   : > { %3980 = vmatprep.subr.bf16.mxu0 %v7270_v21  ;;  %4144 = vmatprep.subr.bf16.mxu1 %v7272_v22  ;;  %v1089_v20 = vld [vmem:[#allocation8 + $0x920] sm:$0xff]  ;;  %v1086_v21 = vld [vmem:[#allocation8 + $0x908] sm:$0xff] }
 0x220   : > { %v1090_v22 = vld [vmem:[#allocation8 + $0x928] sm:$0xff]  ;;  %v7318_v25 = vcombine.high %v1085_v16, %v1089_v20 }
 0x221   : > { %v7320_v26 = vcombine.high %v1086_v21, %v1090_v22 }
 0x222   : > { %3981 = vmatpush1.bf16.msra.mxu0 %v7269_v29  ;;  %4145 = vmatpush1.bf16.msra.mxu1 %v7271_v30  ;;  %v1094_v29 = vld [vmem:[#allocation8 + $0x948] sm:$0xff] }
 0x223   : > { %3982 = vmatprep.subr.bf16.mxu0 %v7278_v31  ;;  %4146 = vmatprep.subr.bf16.mxu1 %v7280_v32  ;;  %v1098_v30 = vld [vmem:[#allocation8 + $0x968] sm:$0xff]  ;;  %v7317_v31 = vcombine.low %v1085_v16, %v1089_v20  ;;  %v7319_v32 = vcombine.low %v1086_v21, %v1090_v22  ;;  %v1137_v16 = vld [vmem:[#allocation8 + $0xaa0] sm:$0xff] }
 0x224   : > { %v7328_v34 = vcombine.high %v1094_v29, %v1098_v30  ;;  %v1134_v20 = vld [vmem:[#allocation8 + $0xa88] sm:$0xff] }
 0x225   : > { %v1138_v21 = vld [vmem:[#allocation8 + $0xaa8] sm:$0xff] }
 0x226   : > { %3983 = vmatpush1.bf16.msra.mxu0 %v7277_v39  ;;  %4147 = vmatpush1.bf16.msra.mxu1 %v7279_v40  ;;  %v7325_v39 = vcombine.low %v1093_v27, %v1097_v28  ;;  %v7327_v40 = vcombine.low %v1094_v29, %v1098_v30  ;;  %v1145_v27 = vld [vmem:[#allocation8 + $0xae0] sm:$0xff]  ;;  %v1142_v28 = vld [vmem:[#allocation8 + $0xac8] sm:$0xff] }
 0x227   : > { %3993 = vmatprep.subr.bf16.mxu0 %v7286_v60  ;;  %4157 = vmatprep.subr.bf16.mxu1 %v7288_v41  ;;  %v7334_v60 = vcombine.high %v1101_v35, %v1105_v36  ;;  %v7336_v41 = vcombine.high %v1102_v37, %v1106_v38  ;;  %v1146_v29 = vld [vmem:[#allocation8 + $0xae8] sm:$0xff]  ;;  %v1153_v35 = vld [vmem:[#allocation8 + $0xb20] sm:$0xff] }
 0x228   : > { %v1150_v36 = vld [vmem:[#allocation8 + $0xb08] sm:$0xff] }
 0x229   : > { %3985 = vmatmul.mubr.bf16.vlgmr.msra.gmra.mrb[8].mxu0 %v9313_v52  ;;  %4149 = vmatmul.mubr.bf16.vlgmr.msra.gmra.mrb[8].mxu1 %v9313_v52 }
 0x22a   : > { %3994 = vmatpush1.bf16.msra.mxu0 %v7285_v53  ;;  %4158 = vmatpush1.bf16.msra.mxu1 %v7287_v19  ;;  %v7335_v53 = vcombine.low %v1102_v37, %v1106_v38  ;;  %v7342_v19 = vcombine.high %v1109_v42, %v1113_v43  ;;  %v1154_v37 = vld [vmem:[#allocation8 + $0xb28] sm:$0xff]  ;;  %v1161_v42 = vld [vmem:[#allocation8 + $0xb60] sm:$0xff] }
 0x22b   : > { %3995 = vmatprep.subr.bf16.mxu0 %v7294_v54  ;;  %4159 = vmatprep.subr.bf16.mxu1 %v7296_v55  ;;  %v7344_v54 = vcombine.high %v1110_v44, %v1114_v45  ;;  %v1117_v55 = vld [vmem:[#allocation8 + $0xa00] sm:$0xff]  ;;  %v1158_v43 = vld [vmem:[#allocation8 + $0xb48] sm:$0xff] }
 0x22c   : > { %4025 = vmatprep.mubr.bf16.mxu0 %v9315_v61  ;;  %4189 = vmatprep.mubr.bf16.mxu1 %v9315_v61  ;;  %v7349_v9 = vcombine.low %v1117_v55, %v1121_v56 }
 0x22e   : > { %3996 = vmatpush1.bf16.msra.mxu0 %v7293_v62  ;;  %4160 = vmatpush1.bf16.msra.mxu1 %v7295_v0  ;;  %v7343_v62 = vcombine.low %v1110_v44, %v1114_v45  ;;  %v7350_v0 = vcombine.high %v1117_v55, %v1121_v56  ;;  %v1162_v44 = vld [vmem:[#allocation8 + $0xb68] sm:$0xff]  ;;  %v494_v45 = vsub.s32 4, %v9261_v47  ;;  %v1165_v55 = vld [vmem:[#allocation8 + $0xb80] sm:$0xff] }
 0x22f   : > { %3997 = vmatprep.subr.bf16.mxu0 %v7302_v1  ;;  %4161 = vmatprep.subr.bf16.mxu1 %v7304_v3  ;;  %v7352_v1 = vcombine.high %v1118_v57, %v1122_v58  ;;  %v1125_v3 = vld [vmem:[#allocation8 + $0xa40] sm:$0xff] }
 0x230   : > { %v7357_v22 = vcombine.low %v1125_v3, %v1129_v4  ;;  %v1169_v56 = vld [vmem:[#allocation8 + $0xba0] sm:$0xff] }
 0x232   : > { %3998 = vmatpush1.bf16.msra.mxu0 %v7301_v11  ;;  %4162 = vmatpush1.bf16.msra.mxu1 %v7303_v13  ;;  %v7351_v11 = vcombine.low %v1118_v57, %v1122_v58  ;;  %v7358_v13 = vcombine.high %v1125_v3, %v1129_v4  ;;  %v1166_v57 = vld [vmem:[#allocation8 + $0xb88] sm:$0xff]  ;;  %v7398_v3 = vcombine.high %v1165_v55, %v1169_v56 }
 0x233   : > { %3999 = vmatprep.subr.bf16.mxu0 %v7310_v14  ;;  %4163 = vmatprep.subr.bf16.mxu1 %v7312_v15  ;;  %v7360_v14 = vcombine.high %v1126_v5, %v1130_v7  ;;  %v1133_v15 = vld [vmem:[#allocation8 + $0xa80] sm:$0xff]  ;;  %v1170_v58 = vld [vmem:[#allocation8 + $0xba8] sm:$0xff] }
 0x234   : > { %v7365_v30 = vcombine.low %v1133_v15, %v1137_v16  ;;  %v7400_v4 = vcombine.high %v1166_v57, %v1170_v58 }
 0x236   : > { %4000 = vmatpush1.bf16.msra.mxu0 %v7309_v23  ;;  %4164 = vmatpush1.bf16.msra.mxu1 %v7311_v24  ;;  %v7359_v23 = vcombine.low %v1126_v5, %v1130_v7  ;;  %v7366_v24 = vcombine.high %v1133_v15, %v1137_v16  ;;  %v1173_v5 = vld [vmem:[#allocation8 + $0xbc0] sm:$0xff]  ;;  %v7397_v15 = vcombine.low %v1165_v55, %v1169_v56  ;;  %v1206_v55 = vld [vmem:[#allocation8 + $0xcc8] sm:$0xff] }
 0x237   : > { %4001 = vmatprep.subr.bf16.mxu0 %v7318_v25  ;;  %4165 = vmatprep.subr.bf16.mxu1 %v7320_v26  ;;  %v7368_v25 = vcombine.high %v1134_v20, %v1138_v21  ;;  %v1141_v26 = vld [vmem:[#allocation8 + $0xac0] sm:$0xff]  ;;  %v7399_v16 = vcombine.low %v1166_v57, %v1170_v58  ;;  %v1210_v56 = vld [vmem:[#allocation8 + $0xce8] sm:$0xff] }
 0x238   : > { %v7373_v38 = vcombine.low %v1141_v26, %v1145_v27  ;;  %v1177_v7 = vld [vmem:[#allocation8 + $0xbe0] sm:$0xff] }
 0x23a   : > { %4002 = vmatpush1.bf16.msra.mxu0 %v7317_v31  ;;  %4166 = vmatpush1.bf16.msra.mxu1 %v7319_v32  ;;  %v7367_v31 = vcombine.low %v1134_v20, %v1138_v21  ;;  %v7374_v32 = vcombine.high %v1141_v26, %v1145_v27  ;;  %v7406_v20 = vcombine.high %v1173_v5, %v1177_v7 }
 0x23b   : > { %4003 = vmatprep.subr.bf16.mxu0 %v7326_v33  ;;  %4167 = vmatprep.subr.bf16.mxu1 %v7328_v34  ;;  %v7376_v33 = vcombine.high %v1142_v28, %v1146_v29  ;;  %v1149_v34 = vld [vmem:[#allocation8 + $0xb00] sm:$0xff] }
 0x23e   : > { %4004 = vmatpush1.bf16.msra.mxu0 %v7325_v39  ;;  %4168 = vmatpush1.bf16.msra.mxu1 %v7327_v40  ;;  %v7375_v39 = vcombine.low %v1142_v28, %v1146_v29  ;;  %v7382_v40 = vcombine.high %v1149_v34, %v1153_v35 }
 0x23f   : > { %4005 = vmatprep.subr.bf16.mxu0 %v7334_v60  ;;  %4169 = vmatprep.subr.bf16.mxu1 %v7336_v41  ;;  %v7384_v60 = vcombine.high %v1150_v36, %v1154_v37  ;;  %v1157_v41 = vld [vmem:[#allocation8 + $0xb40] sm:$0xff] }
 0x242   : > { %4006 = vmatpush1.bf16.msra.mxu0 %v7333_v46  ;;  %4170 = vmatpush1.bf16.msra.mxu1 %v7335_v53  ;;  %v7381_v46 = vcombine.low %v1149_v34, %v1153_v35  ;;  %v7383_v53 = vcombine.low %v1150_v36, %v1154_v37 }
 0x243   : > { %4007 = vmatprep.subr.bf16.mxu0 %v7342_v19  ;;  %4171 = vmatprep.subr.bf16.mxu1 %v7344_v54  ;;  %v7390_v19 = vcombine.high %v1157_v41, %v1161_v42  ;;  %v7392_v54 = vcombine.high %v1158_v43, %v1162_v44 }
 0x246   : > { %4008 = vmatpush1.bf16.msra.mxu0 %v7341_v59  ;;  %4172 = vmatpush1.bf16.msra.mxu1 %v7343_v62  ;;  %v506_v59 = vsub.s32 7, %v9261_v47  ;;  %v495_v62 = vrot.slane %v9266_v49, %v494_v45 }
 0x247   : > { %4009 = vmatprep.subr.bf16.mxu0 %v7350_v0  ;;  %4173 = vmatprep.subr.bf16.mxu1 %v7352_v1  ;;  %v7389_v0 = vcombine.low %v1157_v41, %v1161_v42  ;;  %v7391_v1 = vcombine.low %v1158_v43, %v1162_v44  ;;  %v1202_v41 = vld [vmem:[#allocation8 + $0xca8] sm:$0xff] }
 0x24a   : > { %4010 = vmatpush1.bf16.msra.mxu0 %v7349_v9  ;;  %4174 = vmatpush1.bf16.msra.mxu1 %v7351_v11  ;;  %v1174_v9 = vld [vmem:[#allocation8 + $0xbc8] sm:$0xff] }
 0x24b   : > { %4011 = vmatprep.subr.bf16.mxu0 %v7358_v13  ;;  %4175 = vmatprep.subr.bf16.mxu1 %v7360_v14  ;;  %v1178_v11 = vld [vmem:[#allocation8 + $0xbe8] sm:$0xff]  ;;  %v507_v13 = vrot.slane %v9266_v49, %v506_v59  ;;  %v734_v14 = vadd.f32 %v9290_v18, %v495_v62  ;;  %v7405_v49 = vcombine.low %v1173_v5, %v1177_v7 }
 0x24c   : > { %v7408_v21 = vcombine.high %v1174_v9, %v1178_v11  ;;  %v7407_v28 = vcombine.low %v1174_v9, %v1178_v11  ;;  %v1218_v5 = vld [vmem:[#allocation8 + $0xd28] sm:$0xff]  ;;  %v7439_v9 = vcombine.low %v1206_v55, %v1210_v56 }
 0x24d   : > { %v777_v26 = vadd.f32 %v9303_v6, %v507_v13  ;;  %v785_v27 = vmax.f32 %v734_v14, 0.0  ;;  %v1221_v14 = vld [vmem:[#allocation8 + $0xd40] sm:$0xff] }
 0x24e   : > { %4012 = vmatpush1.bf16.msra.mxu0 %v7357_v22  ;;  %4176 = vmatpush1.bf16.msra.mxu1 %v7359_v23  ;;  %v1181_v22 = vld [vmem:[#allocation8 + $0xc00] sm:$0xff] }
 0x24f   : > { %4013 = vmatprep.subr.bf16.mxu0 %v7366_v24  ;;  %4177 = vmatprep.subr.bf16.mxu1 %v7368_v25  ;;  %v1185_v23 = vld [vmem:[#allocation8 + $0xc20] sm:$0xff]  ;;  %v1182_v24 = vld [vmem:[#allocation8 + $0xc08] sm:$0xff]  ;;  %v788_v34 = vmax.f32 %v777_v26, 0.0  ;;  %v9331_v35 = vpack.c.bf16 %v785_v27, %v785_v27 }
 0x250   : > { %v1186_v25 = vld [vmem:[#allocation8 + $0xc28] sm:$0xff]  ;;  %v7414_v18 = vcombine.high %v1181_v22, %v1185_v23  ;;  %v7413_v36 = vcombine.low %v1181_v22, %v1185_v23  ;;  %v1233_v26 = vld [vmem:[#allocation8 + $0xda0] sm:$0xff] }
 0x251   : > { %v7416_v29 = vcombine.high %v1182_v24, %v1186_v25  ;;  %v7415_v6 = vcombine.low %v1182_v24, %v1186_v25  ;;  %v9333_v42 = vpack.c.bf16 %v788_v34, %v788_v34  ;;  %v1229_v25 = vld [vmem:[#allocation8 + $0xd80] sm:$0xff]  ;;  %v1230_v27 = vld [vmem:[#allocation8 + $0xd88] sm:$0xff] }
 0x252   : > { %4014 = vmatpush1.bf16.msra.mxu0 %v7365_v30  ;;  %4178 = vmatpush1.bf16.msra.mxu1 %v7367_v31  ;;  %v1189_v30 = vld [vmem:[#allocation8 + $0xc40] sm:$0xff]  ;;  %v1242_v34 = vld [vmem:[#allocation8 + $0xde8] sm:$0xff] }
 0x253   : > { %4015 = vmatprep.subr.bf16.mxu0 %v7374_v32  ;;  %4179 = vmatprep.subr.bf16.mxu1 %v7376_v33  ;;  %v1193_v31 = vld [vmem:[#allocation8 + $0xc60] sm:$0xff]  ;;  %v1190_v32 = vld [vmem:[#allocation8 + $0xc48] sm:$0xff] }
 0x254   : > { %v1194_v33 = vld [vmem:[#allocation8 + $0xc68] sm:$0xff]  ;;  %v7422_v37 = vcombine.high %v1189_v30, %v1193_v31  ;;  %v7421_v43 = vcombine.low %v1189_v30, %v1193_v31  ;;  %v1237_v31 = vld [vmem:[#allocation8 + $0xdc0] sm:$0xff] }
 0x255   : > { %v7423_v44 = vcombine.low %v1190_v32, %v1194_v33 }
 0x256   : > { %4016 = vmatpush1.bf16.msra.mxu0 %v7373_v38  ;;  %4180 = vmatpush1.bf16.msra.mxu1 %v7375_v39  ;;  %v7424_v38 = vcombine.high %v1190_v32, %v1194_v33  ;;  %v1197_v39 = vld [vmem:[#allocation8 + $0xc80] sm:$0xff]  ;;  %v1238_v33 = vld [vmem:[#allocation8 + $0xdc8] sm:$0xff] }
 0x257   : > { %4017 = vmatprep.subr.bf16.mxu0 %v7382_v40  ;;  %4181 = vmatprep.subr.bf16.mxu1 %v7384_v60  ;;  %v1201_v40 = vld [vmem:[#allocation8 + $0xca0] sm:$0xff]  ;;  %v1198_v60 = vld [vmem:[#allocation8 + $0xc88] sm:$0xff] }
 0x258   : > { %v7429_v57 = vcombine.low %v1197_v39, %v1201_v40  ;;  %v7431_v58 = vcombine.low %v1198_v60, %v1202_v41  ;;  %v1241_v32 = vld [vmem:[#allocation8 + $0xde0] sm:$0xff] }
 0x25a   : > { %4018 = vmatpush1.bf16.msra.mxu0 %v7381_v46  ;;  %4182 = vmatpush1.bf16.msra.mxu1 %v7383_v53  ;;  %v7430_v46 = vcombine.high %v1197_v39, %v1201_v40  ;;  %v7432_v53 = vcombine.high %v1198_v60, %v1202_v41  ;;  %v1245_v39 = vld [vmem:[#allocation8 + $0xe00] sm:$0xff]  ;;  %v1246_v60 = vld [vmem:[#allocation8 + $0xe08] sm:$0xff] }
 0x25b   : > { %4019 = vmatprep.subr.bf16.mxu0 %v7390_v19  ;;  %4183 = vmatprep.subr.bf16.mxu1 %v7392_v54  ;;  %v1205_v19 = vld [vmem:[#allocation8 + $0xcc0] sm:$0xff]  ;;  %v1250_v41 = vld [vmem:[#allocation8 + $0xe28] sm:$0xff] }
 0x25c   : > { %v1209_v54 = vld [vmem:[#allocation8 + $0xce0] sm:$0xff] }
 0x25d   : > { %v7438_v62 = vcombine.high %v1205_v19, %v1209_v54  ;;  %v7437_v7 = vcombine.low %v1205_v19, %v1209_v54  ;;  %v1249_v40 = vld [vmem:[#allocation8 + $0xe20] sm:$0xff] }
 0x25e   : > { %4020 = vmatpush1.bf16.msra.mxu0 %v7389_v0  ;;  %4184 = vmatpush1.bf16.msra.mxu1 %v7391_v1  ;;  %v7440_v0 = vcombine.high %v1206_v55, %v1210_v56  ;;  %v1213_v1 = vld [vmem:[#allocation8 + $0xd00] sm:$0xff]  ;;  %v1254_v55 = vld [vmem:[#allocation8 + $0xe48] sm:$0xff] }
 0x25f   : > { %4021 = vmatprep.subr.bf16.mxu0 %v7398_v3  ;;  %4185 = vmatprep.subr.bf16.mxu1 %v7400_v4  ;;  %v1217_v3 = vld [vmem:[#allocation8 + $0xd20] sm:$0xff]  ;;  %v1214_v4 = vld [vmem:[#allocation8 + $0xd08] sm:$0xff] }
 0x260   : > { %v7446_v11 = vcombine.high %v1213_v1, %v1217_v3  ;;  %v7448_v13 = vcombine.high %v1214_v4, %v1218_v5  ;;  %v7447_v22 = vcombine.low %v1214_v4, %v1218_v5  ;;  %v1253_v19 = vld [vmem:[#allocation8 + $0xe40] sm:$0xff]  ;;  %v1258_v56 = vld [vmem:[#allocation8 + $0xe68] sm:$0xff] }
 0x261   : > { %v1257_v54 = vld [vmem:[#allocation8 + $0xe60] sm:$0xff]  ;;  %v1262_v4 = vld [vmem:[#allocation8 + $0xe88] sm:$0xff] }
 0x262   : > { %4022 = vmatpush1.bf16.msra.mxu0 %v7397_v15  ;;  %4186 = vmatpush1.bf16.msra.mxu1 %v7399_v16  ;;  %v1225_v15 = vld [vmem:[#allocation8 + $0xd60] sm:$0xff]  ;;  %v1222_v16 = vld [vmem:[#allocation8 + $0xd48] sm:$0xff] }
 0x263   : > { %4023 = vmatprep.subr.bf16.mxu0 %v7406_v20  ;;  %4187 = vmatprep.subr.bf16.mxu1 %v7408_v21  ;;  %v1226_v20 = vld [vmem:[#allocation8 + $0xd68] sm:$0xff]  ;;  %v7445_v21 = vcombine.low %v1213_v1, %v1217_v3  ;;  %v7454_v23 = vcombine.high %v1221_v14, %v1225_v15  ;;  %v1261_v1 = vld [vmem:[#allocation8 + $0xe80] sm:$0xff] }
 0x264   : > { %v7456_v24 = vcombine.high %v1222_v16, %v1226_v20  ;;  %v1265_v3 = vld [vmem:[#allocation8 + $0xea0] sm:$0xff]  ;;  %v1266_v5 = vld [vmem:[#allocation8 + $0xea8] sm:$0xff] }
 0x266   : > { %4024 = vmatpush1.bf16.msra.mxu0 %v7405_v49  ;;  %4188 = vmatpush1.bf16.msra.mxu1 %v7407_v28  ;;  %v1234_v49 = vld [vmem:[#allocation8 + $0xda8] sm:$0xff]  ;;  %v7453_v28 = vcombine.low %v1221_v14, %v1225_v15  ;;  %v1269_v14 = vld [vmem:[#allocation8 + $0xec0] sm:$0xff] }
 0x267   : > { %4034 = vmatprep.subr.bf16.mxu0 %v7414_v18  ;;  %4198 = vmatprep.subr.bf16.mxu1 %v7416_v29  ;;  %v7455_v18 = vcombine.low %v1222_v16, %v1226_v20  ;;  %v7462_v29 = vcombine.high %v1229_v25, %v1233_v26  ;;  %v7464_v30 = vcombine.high %v1230_v27, %v1234_v49  ;;  %v1273_v15 = vld [vmem:[#allocation8 + $0xee0] sm:$0xff]  ;;  %v1270_v16 = vld [vmem:[#allocation8 + $0xec8] sm:$0xff] }
 0x268   : > { %v1274_v20 = vld [vmem:[#allocation8 + $0xee8] sm:$0xff] }
 0x269   : > { %4026 = vmatmul.mubr.bf16.vlgmr.msra.gmra.mrb[8].mxu0 %v9331_v35  ;;  %4190 = vmatmul.mubr.bf16.vlgmr.msra.gmra.mrb[8].mxu1 %v9331_v35 }
 0x26a   : > { %4035 = vmatpush1.bf16.msra.mxu0 %v7413_v36  ;;  %4199 = vmatpush1.bf16.msra.mxu1 %v7415_v6  ;;  %v7461_v36 = vcombine.low %v1229_v25, %v1233_v26  ;;  %v7463_v6 = vcombine.low %v1230_v27, %v1234_v49  ;;  %v1277_v25 = vld [vmem:[#allocation8 + $0xf00] sm:$0xff]  ;;  %v1278_v27 = vld [vmem:[#allocation8 + $0xf08] sm:$0xff] }
 0x26b   : > { %4036 = vmatprep.subr.bf16.mxu0 %v7422_v37  ;;  %4200 = vmatprep.subr.bf16.mxu1 %v7424_v38  ;;  %v7470_v37 = vcombine.high %v1237_v31, %v1241_v32  ;;  %v7472_v38 = vcombine.high %v1238_v33, %v1242_v34  ;;  %v1281_v26 = vld [vmem:[#allocation8 + $0xf20] sm:$0xff]  ;;  %v1282_v49 = vld [vmem:[#allocation8 + $0xf28] sm:$0xff] }
 0x26c   : > { %4066 = vmatprep.mubr.bf16.mxu0 %v9333_v42  ;;  %4230 = vmatprep.mubr.bf16.mxu1 %v9333_v42 }
 0x26e   : > { %4037 = vmatpush1.bf16.msra.mxu0 %v7421_v43  ;;  %4201 = vmatpush1.bf16.msra.mxu1 %v7423_v44  ;;  %v7469_v43 = vcombine.low %v1237_v31, %v1241_v32  ;;  %v7471_v44 = vcombine.low %v1238_v33, %v1242_v34  ;;  %v1285_v31 = vld [vmem:[#allocation8 + $0xf40] sm:$0xff]  ;;  %v1286_v33 = vld [vmem:[#allocation8 + $0xf48] sm:$0xff] }
 0x26f   : > { %4038 = vmatprep.subr.bf16.mxu0 %v7430_v46  ;;  %4202 = vmatprep.subr.bf16.mxu1 %v7432_v53  ;;  %v7478_v46 = vcombine.high %v1245_v39, %v1249_v40  ;;  %v7480_v53 = vcombine.high %v1246_v60, %v1250_v41  ;;  %v1289_v32 = vld [vmem:[#allocation8 + $0xf60] sm:$0xff]  ;;  %v1290_v34 = vld [vmem:[#allocation8 + $0xf68] sm:$0xff] }
 0x272   : > { %4039 = vmatpush1.bf16.msra.mxu0 %v7429_v57  ;;  %4203 = vmatpush1.bf16.msra.mxu1 %v7431_v58  ;;  %v7477_v57 = vcombine.low %v1245_v39, %v1249_v40  ;;  %v7479_v58 = vcombine.low %v1246_v60, %v1250_v41  ;;  %v7520_v39 = vcombine.high %v1286_v33, %v1290_v34  ;;  %v1293_v40 = vld [vmem:[#allocation8 + $0xf80] sm:$0xff]  ;;  %v1294_v41 = vld [vmem:[#allocation8 + $0xf88] sm:$0xff] }
 0x273   : > { %4040 = vmatprep.subr.bf16.mxu0 %v7438_v62  ;;  %4204 = vmatprep.subr.bf16.mxu1 %v7440_v0  ;;  %v7486_v62 = vcombine.high %v1253_v19, %v1257_v54  ;;  %v7488_v0 = vcombine.high %v1254_v55, %v1258_v56  ;;  %v1297_v60 = vld [vmem:[#allocation8 + $0xfa0] sm:$0xff] }
 0x276   : > { %4041 = vmatpush1.bf16.msra.mxu0 %v7437_v7  ;;  %4205 = vmatpush1.bf16.msra.mxu1 %v7439_v9  ;;  %v7485_v7 = vcombine.low %v1253_v19, %v1257_v54  ;;  %v7487_v9 = vcombine.low %v1254_v55, %v1258_v56  ;;  %v7526_v54 = vcombine.high %v1293_v40, %v1297_v60  ;;  %v1301_v56 = vld [vmem:[#allocation8 + $0xfc0] sm:$0xff] }
 0x277   : > { %4042 = vmatprep.subr.bf16.mxu0 %v7446_v11  ;;  %4206 = vmatprep.subr.bf16.mxu1 %v7448_v13  ;;  %v7494_v11 = vcombine.high %v1261_v1, %v1265_v3  ;;  %v7496_v13 = vcombine.high %v1262_v4, %v1266_v5 }
 0x27a   : > { %4043 = vmatpush1.bf16.msra.mxu0 %v7445_v21  ;;  %4207 = vmatpush1.bf16.msra.mxu1 %v7447_v22  ;;  %v7493_v21 = vcombine.low %v1261_v1, %v1265_v3  ;;  %v7495_v22 = vcombine.low %v1262_v4, %v1266_v5 }
 0x27b   : > { %4044 = vmatprep.subr.bf16.mxu0 %v7454_v23  ;;  %4208 = vmatprep.subr.bf16.mxu1 %v7456_v24  ;;  %v7502_v23 = vcombine.high %v1269_v14, %v1273_v15  ;;  %v7504_v24 = vcombine.high %v1270_v16, %v1274_v20 }
 0x27e   : > { %4045 = vmatpush1.bf16.msra.mxu0 %v7453_v28  ;;  %4209 = vmatpush1.bf16.msra.mxu1 %v7455_v18  ;;  %v7501_v28 = vcombine.low %v1269_v14, %v1273_v15  ;;  %v7503_v18 = vcombine.low %v1270_v16, %v1274_v20 }
 0x27f   : > { %4046 = vmatprep.subr.bf16.mxu0 %v7462_v29  ;;  %4210 = vmatprep.subr.bf16.mxu1 %v7464_v30  ;;  %v7510_v29 = vcombine.high %v1277_v25, %v1281_v26  ;;  %v7512_v30 = vcombine.high %v1278_v27, %v1282_v49 }
 0x282   : > { %4047 = vmatpush1.bf16.msra.mxu0 %v7461_v36  ;;  %4211 = vmatpush1.bf16.msra.mxu1 %v7463_v6  ;;  %v7509_v36 = vcombine.low %v1277_v25, %v1281_v26  ;;  %v7511_v6 = vcombine.low %v1278_v27, %v1282_v49 }
 0x283   : > { %4048 = vmatprep.subr.bf16.mxu0 %v7470_v37  ;;  %4212 = vmatprep.subr.bf16.mxu1 %v7472_v38  ;;  %v502_v37 = vsub.s32 6, %v9261_v47  ;;  %v7518_v38 = vcombine.high %v1285_v31, %v1289_v32 }
 0x286   : > { %4049 = vmatpush1.bf16.msra.mxu0 %v7469_v43  ;;  %4213 = vmatpush1.bf16.msra.mxu1 %v7471_v44  ;;  %v1298_v43 = vld [vmem:[#allocation8 + $0xfa8] sm:$0xff]  ;;  %v7517_v44 = vcombine.low %v1285_v31, %v1289_v32  ;;  %v820_v31 = vld [vmem:[#allocation8 + $0xb8] sm:$0xff] }
 0x287   : > { %4050 = vmatprep.subr.bf16.mxu0 %v7478_v46  ;;  %4214 = vmatprep.subr.bf16.mxu1 %v7480_v53  ;;  %v7519_v46 = vcombine.low %v1286_v33, %v1290_v34  ;;  %v8512_v53 = vld [vmem:[#allocation7] sm:$0xff]  ;;  %v7528_v55 = vcombine.high %v1294_v41, %v1298_v43  ;;  %v7527_v1 = vcombine.low %v1294_v41, %v1298_v43 }
 0x288   : > { %v503_v19 = vrot.slane %v8512_v53, %v502_v37  ;;  %v835_v53 = vld [vmem:[#allocation8 + $0x130] sm:$0xff] }
 0x28a   : > { %4051 = vmatpush1.bf16.msra.mxu0 %v7477_v57  ;;  %4215 = vmatpush1.bf16.msra.mxu1 %v7479_v58  ;;  %v1305_v57 = vld [vmem:[#allocation8 + $0xfe0] sm:$0xff]  ;;  %v1302_v58 = vld [vmem:[#allocation8 + $0xfc8] sm:$0xff]  ;;  %v775_v3 = vadd.f32 %v9301_v2, %v503_v19  ;;  %v808_v2 = vld [vmem:[#allocation8 + $0x58] sm:$0xff] }
 0x28b   : > { %4052 = vmatprep.subr.bf16.mxu0 %v7486_v62  ;;  %4216 = vmatprep.subr.bf16.mxu1 %v7488_v0  ;;  %v1306_v62 = vld [vmem:[#allocation8 + $0xfe8] sm:$0xff]  ;;  %v7525_v0 = vcombine.low %v1293_v40, %v1297_v60  ;;  %v7534_v4 = vcombine.high %v1301_v56, %v1305_v57  ;;  %v7533_v14 = vcombine.low %v1301_v56, %v1305_v57  ;;  %v828_v40 = vld [vmem:[#allocation8 + $0xf8] sm:$0xff] }
 0x28c   : > { %v7536_v5 = vcombine.high %v1302_v58, %v1306_v62  ;;  %v7535_v15 = vcombine.low %v1302_v58, %v1306_v62  ;;  %v787_v16 = vmax.f32 %v775_v3, 0.0  ;;  %v836_v19 = vld [vmem:[#allocation8 + $0x138] sm:$0xff]  ;;  %v839_v58 = vld [vmem:[#allocation8 + $0x150] sm:$0xff] }
 0x28d   : > { %v843_v62 = vld [vmem:[#allocation8 + $0x170] sm:$0xff] }
 0x28e   : > { %4053 = vmatpush1.bf16.msra.mxu0 %v7485_v7  ;;  %4217 = vmatpush1.bf16.msra.mxu1 %v7487_v9  ;;  %v799_v7 = vld [vmem:[#allocation8 + $0x10] sm:$0xff]  ;;  %v9343_v26 = vpack.c.bf16 %v787_v16, %v787_v16 }
 0x28f   : > { %4054 = vmatprep.subr.bf16.mxu0 %v7494_v11  ;;  %4218 = vmatprep.subr.bf16.mxu1 %v7496_v13  ;;  %v803_v9 = vld [vmem:[#allocation8 + $0x30] sm:$0xff]  ;;  %v800_v11 = vld [vmem:[#allocation8 + $0x18] sm:$0xff] }
 0x290   : > { %v804_v13 = vld [vmem:[#allocation8 + $0x38] sm:$0xff]  ;;  %v7034_v20 = vcombine.high %v799_v7, %v803_v9  ;;  %v7033_v25 = vcombine.low %v799_v7, %v803_v9  ;;  %v847_v9 = vld [vmem:[#allocation8 + $0x190] sm:$0xff] }
 0x291   : > { %v7035_v27 = vcombine.low %v800_v11, %v804_v13 }
 0x292   : > { %4055 = vmatpush1.bf16.msra.mxu0 %v7493_v21  ;;  %4219 = vmatpush1.bf16.msra.mxu1 %v7495_v22  ;;  %v7036_v21 = vcombine.high %v800_v11, %v804_v13  ;;  %v807_v22 = vld [vmem:[#allocation8 + $0x50] sm:$0xff]  ;;  %v848_v13 = vld [vmem:[#allocation8 + $0x198] sm:$0xff] }
 0x293   : > { %4056 = vmatprep.subr.bf16.mxu0 %v7502_v23  ;;  %4220 = vmatprep.subr.bf16.mxu1 %v7504_v24  ;;  %v811_v23 = vld [vmem:[#allocation8 + $0x70] sm:$0xff]  ;;  %v812_v24 = vld [vmem:[#allocation8 + $0x78] sm:$0xff] }
 0x294   : > { %v7042_v49 = vcombine.high %v807_v22, %v811_v23  ;;  %v7041_v32 = vcombine.low %v807_v22, %v811_v23  ;;  %v7043_v33 = vcombine.low %v808_v2, %v812_v24  ;;  %v851_v11 = vld [vmem:[#allocation8 + $0x1b0] sm:$0xff] }
 0x295   : > { %v855_v22 = vld [vmem:[#allocation8 + $0x1d0] sm:$0xff] }
 0x296   : > { %4057 = vmatpush1.bf16.msra.mxu0 %v7501_v28  ;;  %4221 = vmatpush1.bf16.msra.mxu1 %v7503_v18  ;;  %v7044_v28 = vcombine.high %v808_v2, %v812_v24  ;;  %v815_v18 = vld [vmem:[#allocation8 + $0x90] sm:$0xff]  ;;  %v856_v2 = vld [vmem:[#allocation8 + $0x1d8] sm:$0xff] }
 0x297   : > { %4058 = vmatprep.subr.bf16.mxu0 %v7510_v29  ;;  %4222 = vmatprep.subr.bf16.mxu1 %v7512_v30  ;;  %v819_v29 = vld [vmem:[#allocation8 + $0xb0] sm:$0xff]  ;;  %v816_v30 = vld [vmem:[#allocation8 + $0x98] sm:$0xff] }
 0x298   : > { %v7050_v34 = vcombine.high %v815_v18, %v819_v29  ;;  %v7049_v60 = vcombine.low %v815_v18, %v819_v29  ;;  %v7051_v41 = vcombine.low %v816_v30, %v820_v31  ;;  %v859_v23 = vld [vmem:[#allocation8 + $0x1f0] sm:$0xff]  ;;  %v860_v24 = vld [vmem:[#allocation8 + $0x1f8] sm:$0xff] }
 0x299   : > { %v863_v18 = vld [vmem:[#allocation8 + $0x210] sm:$0xff] }
 0x29a   : > { %4059 = vmatpush1.bf16.msra.mxu0 %v7509_v36  ;;  %4223 = vmatpush1.bf16.msra.mxu1 %v7511_v6  ;;  %v7052_v36 = vcombine.high %v816_v30, %v820_v31  ;;  %v823_v6 = vld [vmem:[#allocation8 + $0xd0] sm:$0xff]  ;;  %v864_v30 = vld [vmem:[#allocation8 + $0x218] sm:$0xff] }
 0x29b   : > { %4060 = vmatprep.subr.bf16.mxu0 %v7518_v38  ;;  %4224 = vmatprep.subr.bf16.mxu1 %v7520_v39  ;;  %v827_v38 = vld [vmem:[#allocation8 + $0xf0] sm:$0xff]  ;;  %v824_v39 = vld [vmem:[#allocation8 + $0xd8] sm:$0xff] }
 0x29c   : > { %v7058_v43 = vcombine.high %v823_v6, %v827_v38  ;;  %v867_v29 = vld [vmem:[#allocation8 + $0x230] sm:$0xff]  ;;  %v868_v31 = vld [vmem:[#allocation8 + $0x238] sm:$0xff] }
 0x29e   : > { %4061 = vmatpush1.bf16.msra.mxu0 %v7517_v44  ;;  %4225 = vmatpush1.bf16.msra.mxu1 %v7519_v46  ;;  %v7060_v44 = vcombine.high %v824_v39, %v828_v40  ;;  %v831_v46 = vld [vmem:[#allocation8 + $0x110] sm:$0xff] }
 0x29f   : > { %4062 = vmatprep.subr.bf16.mxu0 %v7526_v54  ;;  %4226 = vmatprep.subr.bf16.mxu1 %v7528_v55  ;;  %v7057_v54 = vcombine.low %v823_v6, %v827_v38  ;;  %v7059_v55 = vcombine.low %v824_v39, %v828_v40  ;;  %v7066_v56 = vcombine.high %v831_v46, %v835_v53  ;;  %v871_v6 = vld [vmem:[#allocation8 + $0x250] sm:$0xff]  ;;  %v872_v39 = vld [vmem:[#allocation8 + $0x258] sm:$0xff] }
 0x2a0   : > { %v7065_v3 = vcombine.low %v831_v46, %v835_v53  ;;  %v875_v38 = vld [vmem:[#allocation8 + $0x270] sm:$0xff]  ;;  %v876_v40 = vld [vmem:[#allocation8 + $0x278] sm:$0xff] }
 0x2a1   : > { %v879_v46 = vld [vmem:[#allocation8 + $0x290] sm:$0xff] }
 0x2a2   : > { %4063 = vmatpush1.bf16.msra.mxu0 %v7525_v0  ;;  %4227 = vmatpush1.bf16.msra.mxu1 %v7527_v1  ;;  %v840_v0 = vld [vmem:[#allocation8 + $0x158] sm:$0xff]  ;;  %v883_v53 = vld [vmem:[#allocation8 + $0x2b0] sm:$0xff] }
 0x2a3   : > { %4064 = vmatprep.subr.bf16.mxu0 %v7534_v4  ;;  %4228 = vmatprep.subr.bf16.mxu1 %v7536_v5  ;;  %v844_v1 = vld [vmem:[#allocation8 + $0x178] sm:$0xff]  ;;  %v7074_v5 = vcombine.high %v839_v58, %v843_v62 }
 0x2a4   : > { %v7076_v7 = vcombine.high %v840_v0, %v844_v1  ;;  %v7075_v16 = vcombine.low %v840_v0, %v844_v1  ;;  %v888_v0 = vld [vmem:[#allocation8 + $0x2d8] sm:$0xff] }
 0x2a5   : > { %v892_v1 = vld [vmem:[#allocation8 + $0x2f8] sm:$0xff] }
 0x2a6   : > { %4065 = vmatpush1.bf16.msra.mxu0 %v7533_v14  ;;  %4229 = vmatpush1.bf16.msra.mxu1 %v7535_v15  ;;  %v852_v14 = vld [vmem:[#allocation8 + $0x1b8] sm:$0xff]  ;;  %v7073_v15 = vcombine.low %v839_v58, %v843_v62  ;;  %v887_v58 = vld [vmem:[#allocation8 + $0x2d0] sm:$0xff] }
 0x2a7   : > { %4239 = vmatprep.subr.bf16.mxu0 %v7034_v20  ;;  %4403 = vmatprep.subr.bf16.mxu1 %v7036_v21  ;;  %v7082_v20 = vcombine.high %v847_v9, %v851_v11  ;;  %v7084_v21 = vcombine.high %v848_v13, %v852_v14  ;;  %v891_v62 = vld [vmem:[#allocation8 + $0x2f0] sm:$0xff] }
 0x2a9   : > { %4067 = vmatmul.mubr.bf16.vlgmr.msra.gmra.mrb[8].mxu0 %v9343_v26  ;;  %4231 = vmatmul.mubr.bf16.vlgmr.msra.gmra.mrb[8].mxu1 %v9343_v26 }
 0x2aa   : > { %4240 = vmatpush1.bf16.msra.mxu0 %v7033_v25  ;;  %4271 = vmatprep.mubr.bf16.mxu0 %v9282_v8  ;;  %v7081_v25 = vcombine.low %v847_v9, %v851_v11  ;;  %v895_v9 = vld [vmem:[#allocation8 + $0x310] sm:$0xff] }
 0x2ab   : > { %4404 = vmatpush1.bf16.msra.mxu1 %v7035_v27  ;;  %4435 = vmatprep.mubr.bf16.mxu1 %v9282_v8  ;;  %v832_v8 = vld [vmem:[#allocation8 + $0x118] sm:$0xff]  ;;  %v7083_v27 = vcombine.low %v848_v13, %v852_v14  ;;  %v899_v11 = vld [vmem:[#allocation8 + $0x330] sm:$0xff] }
 0x2ac   : > { %4241 = vmatprep.subr.bf16.mxu0 %v7042_v49  ;;  %4405 = vmatprep.subr.bf16.mxu1 %v7044_v28  ;;  %v7068_v57 = vcombine.high %v832_v8, %v836_v19  ;;  %v7067_v4 = vcombine.low %v832_v8, %v836_v19  ;;  %v7090_v49 = vcombine.high %v855_v22, %v859_v23  ;;  %v880_v8 = vld [vmem:[#allocation8 + $0x298] sm:$0xff] }
 0x2ad   : > { %v7092_v28 = vcombine.high %v856_v2, %v860_v24  ;;  %v884_v19 = vld [vmem:[#allocation8 + $0x2b8] sm:$0xff] }
 0x2ae   : > { %4242 = vmatpush1.bf16.msra.mxu0 %v7041_v32  ;;  %v7089_v32 = vcombine.low %v855_v22, %v859_v23  ;;  %v896_v13 = vld [vmem:[#allocation8 + $0x318] sm:$0xff]  ;;  %v903_v22 = vld [vmem:[#allocation8 + $0x350] sm:$0xff] }
 0x2af   : > { %4406 = vmatpush1.bf16.msra.mxu1 %v7043_v33  ;;  %4243 = vmatprep.subr.bf16.mxu0 %v7050_v34  ;;  %v7091_v33 = vcombine.low %v856_v2, %v860_v24  ;;  %v7098_v34 = vcombine.high %v863_v18, %v867_v29  ;;  %v900_v14 = vld [vmem:[#allocation8 + $0x338] sm:$0xff]  ;;  %v907_v23 = vld [vmem:[#allocation8 + $0x370] sm:$0xff] }
 0x2b0   : > { %4407 = vmatprep.subr.bf16.mxu1 %v7052_v36  ;;  %v7100_v36 = vcombine.high %v864_v30, %v868_v31  ;;  %v904_v2 = vld [vmem:[#allocation8 + $0x358] sm:$0xff] }
 0x2b1   : > { %v908_v24 = vld [vmem:[#allocation8 + $0x378] sm:$0xff] }
 0x2b2   : > { %4244 = vmatpush1.bf16.msra.mxu0 %v7049_v60  ;;  %v7097_v60 = vcombine.low %v863_v18, %v867_v29  ;;  %v911_v18 = vld [vmem:[#allocation8 + $0x390] sm:$0xff] }
 0x2b3   : > { %4408 = vmatpush1.bf16.msra.mxu1 %v7051_v41  ;;  %4245 = vmatprep.subr.bf16.mxu0 %v7058_v43  ;;  %v7099_v41 = vcombine.low %v864_v30, %v868_v31  ;;  %v7106_v43 = vcombine.high %v871_v6, %v875_v38  ;;  %v915_v29 = vld [vmem:[#allocation8 + $0x3b0] sm:$0xff]  ;;  %v912_v30 = vld [vmem:[#allocation8 + $0x398] sm:$0xff] }
 0x2b4   : > { %4409 = vmatprep.subr.bf16.mxu1 %v7060_v44  ;;  %v7108_v44 = vcombine.high %v872_v39, %v876_v40  ;;  %v916_v31 = vld [vmem:[#allocation8 + $0x3b8] sm:$0xff] }
 0x2b6   : > { %4246 = vmatpush1.bf16.msra.mxu0 %v7057_v54  ;;  %v7105_v54 = vcombine.low %v871_v6, %v875_v38  ;;  %v919_v6 = vld [vmem:[#allocation8 + $0x3d0] sm:$0xff] }
 0x2b7   : > { %4410 = vmatpush1.bf16.msra.mxu1 %v7059_v55  ;;  %4247 = vmatprep.subr.bf16.mxu0 %v7066_v56  ;;  %v7107_v55 = vcombine.low %v872_v39, %v876_v40  ;;  %v7114_v56 = vcombine.high %v879_v46, %v883_v53  ;;  %v923_v38 = vld [vmem:[#allocation8 + $0x3f0] sm:$0xff]  ;;  %v920_v39 = vld [vmem:[#allocation8 + $0x3d8] sm:$0xff] }
 0x2b8   : > { %4411 = vmatprep.subr.bf16.mxu1 %v7068_v57  ;;  %v7116_v57 = vcombine.high %v880_v8, %v884_v19  ;;  %v924_v40 = vld [vmem:[#allocation8 + $0x3f8] sm:$0xff] }
 0x2ba   : > { %4248 = vmatpush1.bf16.msra.mxu0 %v7065_v3  ;;  %v7113_v3 = vcombine.low %v879_v46, %v883_v53  ;;  %v927_v46 = vld [vmem:[#allocation8 + $0x410] sm:$0xff] }
 0x2bb   : > { %4412 = vmatpush1.bf16.msra.mxu1 %v7067_v4  ;;  %4249 = vmatprep.subr.bf16.mxu0 %v7074_v5  ;;  %v7115_v4 = vcombine.low %v880_v8, %v884_v19  ;;  %v7122_v5 = vcombine.high %v887_v58, %v891_v62  ;;  %v931_v53 = vld [vmem:[#allocation8 + $0x430] sm:$0xff]  ;;  %v928_v8 = vld [vmem:[#allocation8 + $0x418] sm:$0xff] }
 0x2bc   : > { %4413 = vmatprep.subr.bf16.mxu1 %v7076_v7  ;;  %v7124_v7 = vcombine.high %v888_v0, %v892_v1  ;;  %v932_v19 = vld [vmem:[#allocation8 + $0x438] sm:$0xff] }
 0x2be   : > { %4250 = vmatpush1.bf16.msra.mxu0 %v7073_v15  ;;  %v7121_v15 = vcombine.low %v887_v58, %v891_v62  ;;  %v935_v58 = vld [vmem:[#allocation8 + $0x450] sm:$0xff] }
 0x2bf   : > { %4414 = vmatpush1.bf16.msra.mxu1 %v7075_v16  ;;  %4251 = vmatprep.subr.bf16.mxu0 %v7082_v20  ;;  %v7123_v16 = vcombine.low %v888_v0, %v892_v1  ;;  %v7130_v20 = vcombine.high %v895_v9, %v899_v11  ;;  %v939_v62 = vld [vmem:[#allocation8 + $0x470] sm:$0xff]  ;;  %v7161_v0 = vcombine.low %v927_v46, %v931_v53  ;;  %v936_v1 = vld [vmem:[#allocation8 + $0x458] sm:$0xff] }
 0x2c0   : > { %4415 = vmatprep.subr.bf16.mxu1 %v7084_v21  ;;  %v7132_v21 = vcombine.high %v896_v13, %v900_v14 }
 0x2c2   : > { %4252 = vmatpush1.bf16.msra.mxu0 %v7081_v25  ;;  %v7129_v25 = vcombine.low %v895_v9, %v899_v11  ;;  %v947_v9 = vld [vmem:[#allocation8 + $0x4b0] sm:$0xff] }
 0x2c3   : > { %4416 = vmatpush1.bf16.msra.mxu1 %v7083_v27  ;;  %4253 = vmatprep.subr.bf16.mxu0 %v7090_v49  ;;  %v7131_v27 = vcombine.low %v896_v13, %v900_v14  ;;  %v7138_v49 = vcombine.high %v903_v22, %v907_v23  ;;  %v944_v13 = vld [vmem:[#allocation8 + $0x498] sm:$0xff] }
 0x2c4   : > { %4417 = vmatprep.subr.bf16.mxu1 %v7092_v28  ;;  %v7140_v28 = vcombine.high %v904_v2, %v908_v24  ;;  %v948_v14 = vld [vmem:[#allocation8 + $0x4b8] sm:$0xff] }
 0x2c6   : > { %4254 = vmatpush1.bf16.msra.mxu0 %v7089_v32  ;;  %v7137_v32 = vcombine.low %v903_v22, %v907_v23  ;;  %v951_v22 = vld [vmem:[#allocation8 + $0x4d0] sm:$0xff] }
 0x2c7   : > { %4418 = vmatpush1.bf16.msra.mxu1 %v7091_v33  ;;  %4255 = vmatprep.subr.bf16.mxu0 %v7098_v34  ;;  %v7139_v33 = vcombine.low %v904_v2, %v908_v24  ;;  %v7146_v34 = vcombine.high %v911_v18, %v915_v29  ;;  %v955_v23 = vld [vmem:[#allocation8 + $0x4f0] sm:$0xff]  ;;  %v952_v2 = vld [vmem:[#allocation8 + $0x4d8] sm:$0xff] }
 0x2c8   : > { %4419 = vmatprep.subr.bf16.mxu1 %v7100_v36  ;;  %v7148_v36 = vcombine.high %v912_v30, %v916_v31  ;;  %v956_v24 = vld [vmem:[#allocation8 + $0x4f8] sm:$0xff] }
 0x2ca   : > { %4256 = vmatpush1.bf16.msra.mxu0 %v7097_v60  ;;  %v7145_v60 = vcombine.low %v911_v18, %v915_v29  ;;  %v963_v18 = vld [vmem:[#allocation8 + $0x530] sm:$0xff]  ;;  %v960_v29 = vld [vmem:[#allocation8 + $0x518] sm:$0xff] }
 0x2cb   : > { %4420 = vmatpush1.bf16.msra.mxu1 %v7099_v41  ;;  %4257 = vmatprep.subr.bf16.mxu0 %v7106_v43  ;;  %v7147_v41 = vcombine.low %v912_v30, %v916_v31  ;;  %v7154_v43 = vcombine.high %v919_v6, %v923_v38  ;;  %v964_v30 = vld [vmem:[#allocation8 + $0x538] sm:$0xff]  ;;  %v7187_v31 = vcombine.low %v952_v2, %v956_v24 }
 0x2cc   : > { %4421 = vmatprep.subr.bf16.mxu1 %v7108_v44  ;;  %v7156_v44 = vcombine.high %v920_v39, %v924_v40 }
 0x2ce   : > { %4258 = vmatpush1.bf16.msra.mxu0 %v7105_v54  ;;  %v7153_v54 = vcombine.low %v919_v6, %v923_v38  ;;  %v968_v6 = vld [vmem:[#allocation8 + $0x558] sm:$0xff] }
 0x2cf   : > { %4422 = vmatpush1.bf16.msra.mxu1 %v7107_v55  ;;  %4259 = vmatprep.subr.bf16.mxu0 %v7114_v56  ;;  %v7155_v55 = vcombine.low %v920_v39, %v924_v40  ;;  %v7162_v56 = vcombine.high %v927_v46, %v931_v53  ;;  %v972_v38 = vld [vmem:[#allocation8 + $0x578] sm:$0xff]  ;;  %v7195_v40 = vcombine.low %v960_v29, %v964_v30 }
 0x2d0   : > { %4423 = vmatprep.subr.bf16.mxu1 %v7116_v57  ;;  %v7164_v57 = vcombine.high %v928_v8, %v932_v19  ;;  %v976_v46 = vld [vmem:[#allocation8 + $0x598] sm:$0xff] }
 0x2d1   : > { %v980_v53 = vld [vmem:[#allocation8 + $0x5b8] sm:$0xff] }
 0x2d2   : > { %4260 = vmatpush1.bf16.msra.mxu0 %v7113_v3  ;;  %v940_v3 = vld [vmem:[#allocation8 + $0x478] sm:$0xff] }
 0x2d3   : > { %4424 = vmatpush1.bf16.msra.mxu1 %v7115_v4  ;;  %4261 = vmatprep.subr.bf16.mxu0 %v7122_v5  ;;  %v7163_v4 = vcombine.low %v928_v8, %v932_v19  ;;  %v7170_v5 = vcombine.high %v935_v58, %v939_v62  ;;  %v7172_v11 = vcombine.high %v936_v1, %v940_v3 }
 0x2d4   : > { %4425 = vmatprep.subr.bf16.mxu1 %v7124_v7  ;;  %v943_v7 = vld [vmem:[#allocation8 + $0x490] sm:$0xff]  ;;  %v7203_v19 = vcombine.low %v968_v6, %v972_v38 }
 0x2d6   : > { %4262 = vmatpush1.bf16.msra.mxu0 %v7121_v15  ;;  %v7169_v15 = vcombine.low %v935_v58, %v939_v62  ;;  %v984_v58 = vld [vmem:[#allocation8 + $0x5d8] sm:$0xff] }
 0x2d7   : > { %4426 = vmatpush1.bf16.msra.mxu1 %v7123_v16  ;;  %4263 = vmatprep.subr.bf16.mxu0 %v7130_v20  ;;  %v7171_v16 = vcombine.low %v936_v1, %v940_v3  ;;  %v7178_v20 = vcombine.high %v943_v7, %v947_v9  ;;  %v988_v62 = vld [vmem:[#allocation8 + $0x5f8] sm:$0xff]  ;;  %v7211_v1 = vcombine.low %v976_v46, %v980_v53 }
 0x2d8   : > { %4427 = vmatprep.subr.bf16.mxu1 %v7132_v21  ;;  %v7180_v21 = vcombine.high %v944_v13, %v948_v14 }
 0x2da   : > { %4264 = vmatpush1.bf16.msra.mxu0 %v7129_v25  ;;  %v7177_v25 = vcombine.low %v943_v7, %v947_v9  ;;  %v995_v7 = vld [vmem:[#allocation8 + $0x630] sm:$0xff]  ;;  %v992_v9 = vld [vmem:[#allocation8 + $0x618] sm:$0xff] }
 0x2db   : > { %4428 = vmatpush1.bf16.msra.mxu1 %v7131_v27  ;;  %4265 = vmatprep.subr.bf16.mxu0 %v7138_v49  ;;  %v7186_v27 = vcombine.high %v951_v22, %v955_v23  ;;  %v7188_v49 = vcombine.high %v952_v2, %v956_v24 }
 0x2dc   : > { %4429 = vmatprep.subr.bf16.mxu1 %v7140_v28  ;;  %v959_v28 = vld [vmem:[#allocation8 + $0x510] sm:$0xff] }
 0x2dd   : > { %v7193_v39 = vcombine.low %v959_v28, %v963_v18 }
 0x2de   : > { %4266 = vmatpush1.bf16.msra.mxu0 %v7137_v32  ;;  %v7194_v32 = vcombine.high %v959_v28, %v963_v18  ;;  %v1008_v28 = vld [vmem:[#allocation8 + $0x698] sm:$0xff] }
 0x2df   : > { %4430 = vmatpush1.bf16.msra.mxu1 %v7139_v33  ;;  %4267 = vmatprep.subr.bf16.mxu0 %v7146_v34  ;;  %v7196_v33 = vcombine.high %v960_v29, %v964_v30  ;;  %v967_v34 = vld [vmem:[#allocation8 + $0x550] sm:$0xff]  ;;  %v1012_v18 = vld [vmem:[#allocation8 + $0x6b8] sm:$0xff] }
 0x2e0   : > { %4431 = vmatprep.subr.bf16.mxu1 %v7148_v36  ;;  %v971_v36 = vld [vmem:[#allocation8 + $0x570] sm:$0xff] }
 0x2e1   : > { %v7201_v8 = vcombine.low %v967_v34, %v971_v36 }
 0x2e2   : > { %4268 = vmatpush1.bf16.msra.mxu0 %v7145_v60  ;;  %v7202_v60 = vcombine.high %v967_v34, %v971_v36  ;;  %v1016_v34 = vld [vmem:[#allocation8 + $0x6d8] sm:$0xff] }
 0x2e3   : > { %4432 = vmatpush1.bf16.msra.mxu1 %v7147_v41  ;;  %4269 = vmatprep.subr.bf16.mxu0 %v7154_v43  ;;  %v7204_v41 = vcombine.high %v968_v6, %v972_v38  ;;  %v975_v43 = vld [vmem:[#allocation8 + $0x590] sm:$0xff]  ;;  %v1020_v36 = vld [vmem:[#allocation8 + $0x6f8] sm:$0xff]  ;;  %v7243_v38 = vcombine.low %v1008_v28, %v1012_v18 }
 0x2e4   : > { %4433 = vmatprep.subr.bf16.mxu1 %v7156_v44  ;;  %v979_v44 = vld [vmem:[#allocation8 + $0x5b0] sm:$0xff] }
 0x2e6   : > { %4270 = vmatpush1.bf16.msra.mxu0 %v7153_v54  ;;  %v7210_v54 = vcombine.high %v975_v43, %v979_v44 }
 0x2e7   : > { %4434 = vmatpush1.bf16.msra.mxu1 %v7155_v55  ;;  %4280 = vmatprep.subr.bf16.mxu0 %v7162_v56  ;;  %v7212_v55 = vcombine.high %v976_v46, %v980_v53  ;;  %v983_v56 = vld [vmem:[#allocation8 + $0x5d0] sm:$0xff]  ;;  %v7251_v53 = vcombine.low %v1016_v34, %v1020_v36 }
 0x2e8   : > { %4444 = vmatprep.subr.bf16.mxu1 %v7164_v57  ;;  %v987_v57 = vld [vmem:[#allocation8 + $0x5f0] sm:$0xff] }
 0x2e9   : > { %4272 = vmatmul.mubr.bf16.vlgmr.msra.gmra.mrb[12].mxu0 %v9284_v10  ;;  %v7218_v3 = vcombine.high %v983_v56, %v987_v57 }
 0x2ea   : > { %4436 = vmatmul.mubr.bf16.vlgmr.msra.gmra.mrb[12].mxu1 %v9284_v10  ;;  %4281 = vmatpush1.bf16.msra.mxu0 %v7161_v0  ;;  %v7179_v10 = vcombine.low %v944_v13, %v948_v14  ;;  %v7209_v0 = vcombine.low %v975_v43, %v979_v44  ;;  %v7217_v13 = vcombine.low %v983_v56, %v987_v57  ;;  %v1024_v43 = vld [vmem:[#allocation8 + $0x718] sm:$0xff] }
 0x2eb   : > { %4312 = vmatprep.mubr.bf16.mxu0 %v9288_v17  ;;  %4445 = vmatpush1.bf16.msra.mxu1 %v7163_v4  ;;  %v7220_v4 = vcombine.high %v984_v58, %v988_v62  ;;  %v7219_v14 = vcombine.low %v984_v58, %v988_v62  ;;  %v1028_v44 = vld [vmem:[#allocation8 + $0x738] sm:$0xff] }
 0x2ec   : > { %4476 = vmatprep.mubr.bf16.mxu1 %v9288_v17  ;;  %4282 = vmatprep.subr.bf16.mxu0 %v7170_v5  ;;  %v7185_v17 = vcombine.low %v951_v22, %v955_v23  ;;  %v991_v5 = vld [vmem:[#allocation8 + $0x610] sm:$0xff]  ;;  %v1000_v22 = vld [vmem:[#allocation8 + $0x658] sm:$0xff]  ;;  %v7259_v62 = vcombine.low %v1024_v43, %v1028_v44 }
 0x2ed   : > { %4446 = vmatprep.subr.bf16.mxu1 %v7172_v11  ;;  %v996_v11 = vld [vmem:[#allocation8 + $0x638] sm:$0xff]  ;;  %v7225_v2 = vcombine.low %v991_v5, %v995_v7 }
 0x2ee   : > { %4283 = vmatpush1.bf16.msra.mxu0 %v7169_v15  ;;  %v7226_v15 = vcombine.high %v991_v5, %v995_v7  ;;  %v1004_v23 = vld [vmem:[#allocation8 + $0x678] sm:$0xff]  ;;  %v7227_v24 = vcombine.low %v992_v9, %v996_v11 }
 0x2ef   : > { %4447 = vmatpush1.bf16.msra.mxu1 %v7171_v16  ;;  %4284 = vmatprep.subr.bf16.mxu0 %v7178_v20  ;;  %v7228_v16 = vcombine.high %v992_v9, %v996_v11  ;;  %v999_v20 = vld [vmem:[#allocation8 + $0x650] sm:$0xff]  ;;  %v7235_v30 = vcombine.low %v1000_v22, %v1004_v23  ;;  %v1032_v56 = vld [vmem:[#allocation8 + $0x758] sm:$0xff] }
 0x2f0   : > { %4448 = vmatprep.subr.bf16.mxu1 %v7180_v21  ;;  %v1003_v21 = vld [vmem:[#allocation8 + $0x670] sm:$0xff]  ;;  %v1036_v57 = vld [vmem:[#allocation8 + $0x778] sm:$0xff] }
 0x2f1   : > { %v7233_v29 = vcombine.low %v999_v20, %v1003_v21  ;;  %v1040_v5 = vld [vmem:[#allocation8 + $0x798] sm:$0xff]  ;;  %v7267_v11 = vcombine.low %v1032_v56, %v1036_v57 }
 0x2f2   : > { %4285 = vmatpush1.bf16.msra.mxu0 %v7177_v25  ;;  %v7234_v25 = vcombine.high %v999_v20, %v1003_v21  ;;  %v1044_v7 = vld [vmem:[#allocation8 + $0x7b8] sm:$0xff] }
 0x2f3   : > { %4449 = vmatpush1.bf16.msra.mxu1 %v7179_v10  ;;  %4286 = vmatprep.subr.bf16.mxu0 %v7186_v27  ;;  %v7236_v10 = vcombine.high %v1000_v22, %v1004_v23  ;;  %v1007_v27 = vld [vmem:[#allocation8 + $0x690] sm:$0xff]  ;;  %v1048_v20 = vld [vmem:[#allocation8 + $0x7d8] sm:$0xff]  ;;  %v7275_v23 = vcombine.low %v1040_v5, %v1044_v7 }
 0x2f4   : > { %4450 = vmatprep.subr.bf16.mxu1 %v7188_v49  ;;  %v1011_v49 = vld [vmem:[#allocation8 + $0x6b0] sm:$0xff]  ;;  %v1052_v21 = vld [vmem:[#allocation8 + $0x7f8] sm:$0xff] }
 0x2f5   : > { %v7241_v6 = vcombine.low %v1007_v27, %v1011_v49 }
 0x2f6   : > { %4287 = vmatpush1.bf16.msra.mxu0 %v7185_v17  ;;  %v7242_v17 = vcombine.high %v1007_v27, %v1011_v49  ;;  %v1056_v27 = vld [vmem:[#allocation8 + $0x818] sm:$0xff] }
 0x2f7   : > { %4451 = vmatpush1.bf16.msra.mxu1 %v7187_v31  ;;  %4288 = vmatprep.subr.bf16.mxu0 %v7194_v32  ;;  %v7244_v31 = vcombine.high %v1008_v28, %v1012_v18  ;;  %v1015_v32 = vld [vmem:[#allocation8 + $0x6d0] sm:$0xff]  ;;  %v1060_v49 = vld [vmem:[#allocation8 + $0x838] sm:$0xff]  ;;  %v7283_v18 = vcombine.low %v1048_v20, %v1052_v21 }
 0x2f8   : > { %4452 = vmatprep.subr.bf16.mxu1 %v7196_v33  ;;  %v1019_v33 = vld [vmem:[#allocation8 + $0x6f0] sm:$0xff] }
 0x2f9   : > { %v7249_v46 = vcombine.low %v1015_v32, %v1019_v33 }
 0x2fa   : > { %4289 = vmatpush1.bf16.msra.mxu0 %v7193_v39  ;;  %v7250_v39 = vcombine.high %v1015_v32, %v1019_v33  ;;  %v1064_v33 = vld [vmem:[#allocation8 + $0x858] sm:$0xff] }
 0x2fb   : > { %4453 = vmatpush1.bf16.msra.mxu1 %v7195_v40  ;;  %4290 = vmatprep.subr.bf16.mxu0 %v7202_v60  ;;  %v7252_v40 = vcombine.high %v1016_v34, %v1020_v36  ;;  %v1023_v60 = vld [vmem:[#allocation8 + $0x710] sm:$0xff]  ;;  %v1068_v34 = vld [vmem:[#allocation8 + $0x878] sm:$0xff]  ;;  %v7291_v36 = vcombine.low %v1056_v27, %v1060_v49 }
 0x2fc   : > { %4454 = vmatprep.subr.bf16.mxu1 %v7204_v41  ;;  %v1027_v41 = vld [vmem:[#allocation8 + $0x730] sm:$0xff] }
 0x2fd   : > { %v7257_v58 = vcombine.low %v1023_v60, %v1027_v41 }
 0x2fe   : > { %4291 = vmatpush1.bf16.msra.mxu0 %v7201_v8  ;;  %v7258_v8 = vcombine.high %v1023_v60, %v1027_v41  ;;  %v1072_v60 = vld [vmem:[#allocation8 + $0x898] sm:$0xff] }
 0x2ff   : > { %4455 = vmatpush1.bf16.msra.mxu1 %v7203_v19  ;;  %4292 = vmatprep.subr.bf16.mxu0 %v7210_v54  ;;  %v7260_v19 = vcombine.high %v1024_v43, %v1028_v44  ;;  %v1031_v54 = vld [vmem:[#allocation8 + $0x750] sm:$0xff]  ;;  %v1076_v41 = vld [vmem:[#allocation8 + $0x8b8] sm:$0xff]  ;;  %v7299_v44 = vcombine.low %v1064_v33, %v1068_v34 }
 0x300   : > { %4456 = vmatprep.subr.bf16.mxu1 %v7212_v55  ;;  %v1035_v55 = vld [vmem:[#allocation8 + $0x770] sm:$0xff] }
 0x301   : > { %v7265_v9 = vcombine.low %v1031_v54, %v1035_v55 }
 0x302   : > { %4293 = vmatpush1.bf16.msra.mxu0 %v7209_v0  ;;  %v7266_v0 = vcombine.high %v1031_v54, %v1035_v55  ;;  %v1080_v54 = vld [vmem:[#allocation8 + $0x8d8] sm:$0xff] }
 0x303   : > { %4457 = vmatpush1.bf16.msra.mxu1 %v7211_v1  ;;  %4294 = vmatprep.subr.bf16.mxu0 %v7218_v3  ;;  %v7268_v1 = vcombine.high %v1032_v56, %v1036_v57  ;;  %v1039_v3 = vld [vmem:[#allocation8 + $0x790] sm:$0xff]  ;;  %v1084_v55 = vld [vmem:[#allocation8 + $0x8f8] sm:$0xff] }
 0x304   : > { %4458 = vmatprep.subr.bf16.mxu1 %v7220_v4  ;;  %v1043_v4 = vld [vmem:[#allocation8 + $0x7b0] sm:$0xff] }
 0x305   : > { %v7273_v22 = vcombine.low %v1039_v3, %v1043_v4 }
 0x306   : > { %4295 = vmatpush1.bf16.msra.mxu0 %v7217_v13  ;;  %v7274_v13 = vcombine.high %v1039_v3, %v1043_v4  ;;  %v1092_v3 = vld [vmem:[#allocation8 + $0x938] sm:$0xff]  ;;  %v7315_v4 = vcombine.low %v1080_v54, %v1084_v55 }
 0x307   : > { %4459 = vmatpush1.bf16.msra.mxu1 %v7219_v14  ;;  %4296 = vmatprep.subr.bf16.mxu0 %v7226_v15  ;;  %v7276_v14 = vcombine.high %v1040_v5, %v1044_v7  ;;  %v1047_v15 = vld [vmem:[#allocation8 + $0x7d0] sm:$0xff] }
 0x308   : > { %4460 = vmatprep.subr.bf16.mxu1 %v7228_v16  ;;  %v1051_v16 = vld [vmem:[#allocation8 + $0x7f0] sm:$0xff] }
 0x309   : > { %v7281_v28 = vcombine.low %v1047_v15, %v1051_v16 }
 0x30a   : > { %4297 = vmatpush1.bf16.msra.mxu0 %v7225_v2  ;;  %v7282_v2 = vcombine.high %v1047_v15, %v1051_v16 }
 0x30b   : > { %4461 = vmatpush1.bf16.msra.mxu1 %v7227_v24  ;;  %4298 = vmatprep.subr.bf16.mxu0 %v7234_v25  ;;  %v7284_v24 = vcombine.high %v1048_v20, %v1052_v21  ;;  %v1055_v25 = vld [vmem:[#allocation8 + $0x810] sm:$0xff] }
 0x30c   : > { %4462 = vmatprep.subr.bf16.mxu1 %v7236_v10  ;;  %v1059_v10 = vld [vmem:[#allocation8 + $0x830] sm:$0xff] }
 0x30d   : > { %v7289_v32 = vcombine.low %v1055_v25, %v1059_v10 }
 0x30e   : > { %4299 = vmatpush1.bf16.msra.mxu0 %v7233_v29  ;;  %v7290_v29 = vcombine.high %v1055_v25, %v1059_v10 }
 0x30f   : > { %4463 = vmatpush1.bf16.msra.mxu1 %v7235_v30  ;;  %4300 = vmatprep.subr.bf16.mxu0 %v7242_v17  ;;  %v7292_v30 = vcombine.high %v1056_v27, %v1060_v49  ;;  %v1063_v17 = vld [vmem:[#allocation8 + $0x850] sm:$0xff] }
 0x310   : > { %4464 = vmatprep.subr.bf16.mxu1 %v7244_v31  ;;  %v1067_v31 = vld [vmem:[#allocation8 + $0x870] sm:$0xff] }
 0x311   : > { %v7297_v43 = vcombine.low %v1063_v17, %v1067_v31 }
 0x312   : > { %4301 = vmatpush1.bf16.msra.mxu0 %v7241_v6  ;;  %v7298_v6 = vcombine.high %v1063_v17, %v1067_v31 }
 0x313   : > { %4465 = vmatpush1.bf16.msra.mxu1 %v7243_v38  ;;  %4302 = vmatprep.subr.bf16.mxu0 %v7250_v39  ;;  %v1071_v38 = vld [vmem:[#allocation8 + $0x890] sm:$0xff] }
 0x314   : > { %4466 = vmatprep.subr.bf16.mxu1 %v7252_v40  ;;  %v1075_v39 = vld [vmem:[#allocation8 + $0x8b0] sm:$0xff]  ;;  %v7300_v40 = vcombine.high %v1064_v33, %v1068_v34 }
 0x315   : > { %v7305_v56 = vcombine.low %v1071_v38, %v1075_v39  ;;  %v1119_v34 = vld [vmem:[#allocation8 + $0xa10] sm:$0xff] }
 0x316   : > { %4303 = vmatpush1.bf16.msra.mxu0 %v7249_v46  ;;  %v7306_v46 = vcombine.high %v1071_v38, %v1075_v39  ;;  %v1124_v38 = vld [vmem:[#allocation8 + $0xa38] sm:$0xff] }
 0x317   : > { %4467 = vmatpush1.bf16.msra.mxu1 %v7251_v53  ;;  %4304 = vmatprep.subr.bf16.mxu0 %v7258_v8  ;;  %v7308_v53 = vcombine.high %v1072_v60, %v1076_v41  ;;  %v1079_v8 = vld [vmem:[#allocation8 + $0x8d0] sm:$0xff] }
 0x318   : > { %4468 = vmatprep.subr.bf16.mxu1 %v7260_v19  ;;  %v1083_v19 = vld [vmem:[#allocation8 + $0x8f0] sm:$0xff] }
 0x319   : > { %v7314_v57 = vcombine.high %v1079_v8, %v1083_v19 }
 0x31a   : > { %4305 = vmatpush1.bf16.msra.mxu0 %v7257_v58  ;;  %v7316_v58 = vcombine.high %v1080_v54, %v1084_v55 }
 0x31b   : > { %4469 = vmatpush1.bf16.msra.mxu1 %v7259_v62  ;;  %4306 = vmatprep.subr.bf16.mxu0 %v7266_v0  ;;  %v1087_v62 = vld [vmem:[#allocation8 + $0x910] sm:$0xff] }
 0x31c   : > { %4470 = vmatprep.subr.bf16.mxu1 %v7268_v1  ;;  %v1091_v0 = vld [vmem:[#allocation8 + $0x930] sm:$0xff]  ;;  %v1088_v1 = vld [vmem:[#allocation8 + $0x918] sm:$0xff] }
 0x31d   : > { %v7322_v5 = vcombine.high %v1087_v62, %v1091_v0  ;;  %v7324_v7 = vcombine.high %v1088_v1, %v1092_v3  ;;  %v7321_v15 = vcombine.low %v1087_v62, %v1091_v0  ;;  %v7323_v16 = vcombine.low %v1088_v1, %v1092_v3 }
 0x31e   : > { %4307 = vmatpush1.bf16.msra.mxu0 %v7265_v9  ;;  %v1095_v9 = vld [vmem:[#allocation8 + $0x950] sm:$0xff] }
 0x31f   : > { %4471 = vmatpush1.bf16.msra.mxu1 %v7267_v11  ;;  %4308 = vmatprep.subr.bf16.mxu0 %v7274_v13  ;;  %v1099_v11 = vld [vmem:[#allocation8 + $0x970] sm:$0xff]  ;;  %v1096_v13 = vld [vmem:[#allocation8 + $0x958] sm:$0xff] }
 0x320   : > { %4472 = vmatprep.subr.bf16.mxu1 %v7276_v14  ;;  %v1100_v14 = vld [vmem:[#allocation8 + $0x978] sm:$0xff]  ;;  %v7330_v20 = vcombine.high %v1095_v9, %v1099_v11  ;;  %v7329_v25 = vcombine.low %v1095_v9, %v1099_v11 }
 0x321   : > { %v7332_v21 = vcombine.high %v1096_v13, %v1100_v14  ;;  %v7331_v10 = vcombine.low %v1096_v13, %v1100_v14 }
 0x322   : > { %4309 = vmatpush1.bf16.msra.mxu0 %v7273_v22  ;;  %v1103_v22 = vld [vmem:[#allocation8 + $0x990] sm:$0xff] }
 0x323   : > { %4473 = vmatpush1.bf16.msra.mxu1 %v7275_v23  ;;  %4310 = vmatprep.subr.bf16.mxu0 %v7282_v2  ;;  %v1107_v23 = vld [vmem:[#allocation8 + $0x9b0] sm:$0xff]  ;;  %v1104_v2 = vld [vmem:[#allocation8 + $0x998] sm:$0xff] }
 0x324   : > { %4474 = vmatprep.subr.bf16.mxu1 %v7284_v24  ;;  %v1108_v24 = vld [vmem:[#allocation8 + $0x9b8] sm:$0xff]  ;;  %v7338_v27 = vcombine.high %v1103_v22, %v1107_v23  ;;  %v7337_v17 = vcombine.low %v1103_v22, %v1107_v23 }
 0x325   : > { %v7340_v49 = vcombine.high %v1104_v2, %v1108_v24  ;;  %v7339_v31 = vcombine.low %v1104_v2, %v1108_v24 }
 0x326   : > { %4311 = vmatpush1.bf16.msra.mxu0 %v7281_v28  ;;  %v1111_v28 = vld [vmem:[#allocation8 + $0x9d0] sm:$0xff] }
 0x327   : > { %4475 = vmatpush1.bf16.msra.mxu1 %v7283_v18  ;;  %4321 = vmatprep.subr.bf16.mxu0 %v7290_v29  ;;  %v1115_v18 = vld [vmem:[#allocation8 + $0x9f0] sm:$0xff]  ;;  %v1112_v29 = vld [vmem:[#allocation8 + $0x9d8] sm:$0xff] }
 0x328   : > { %4485 = vmatprep.subr.bf16.mxu1 %v7292_v30  ;;  %v1116_v30 = vld [vmem:[#allocation8 + $0x9f8] sm:$0xff]  ;;  %v7345_v39 = vcombine.low %v1111_v28, %v1115_v18 }
 0x329   : > { %4313 = vmatmul.mubr.bf16.vlgmr.msra.gmra.mrb[12].mxu0 %v9313_v52  ;;  %v7348_v33 = vcombine.high %v1112_v29, %v1116_v30 }
 0x32a   : > { %4477 = vmatmul.mubr.bf16.vlgmr.msra.gmra.mrb[12].mxu1 %v9313_v52  ;;  %4322 = vmatpush1.bf16.msra.mxu0 %v7289_v32  ;;  %v7307_v52 = vcombine.low %v1072_v60, %v1076_v41  ;;  %v7346_v32 = vcombine.high %v1111_v28, %v1115_v18 }
 0x32b   : > { %4353 = vmatprep.mubr.bf16.mxu0 %v9315_v61  ;;  %4486 = vmatpush1.bf16.msra.mxu1 %v7291_v36  ;;  %v1123_v36 = vld [vmem:[#allocation8 + $0xa30] sm:$0xff] }
 0x32c   : > { %4517 = vmatprep.mubr.bf16.mxu1 %v9315_v61  ;;  %4323 = vmatprep.subr.bf16.mxu0 %v7298_v6  ;;  %v7313_v61 = vcombine.low %v1079_v8, %v1083_v19  ;;  %v1120_v6 = vld [vmem:[#allocation8 + $0xa18] sm:$0xff]  ;;  %v7354_v60 = vcombine.high %v1119_v34, %v1123_v36  ;;  %v7353_v8 = vcombine.low %v1119_v34, %v1123_v36 }
 0x32d   : > { %4487 = vmatprep.subr.bf16.mxu1 %v7300_v40  ;;  %v7347_v40 = vcombine.low %v1112_v29, %v1116_v30  ;;  %v7356_v41 = vcombine.high %v1120_v6, %v1124_v38  ;;  %v7355_v19 = vcombine.low %v1120_v6, %v1124_v38 }
 0x32e   : > { %4324 = vmatpush1.bf16.msra.mxu0 %v7297_v43  ;;  %v1127_v43 = vld [vmem:[#allocation8 + $0xa50] sm:$0xff] }
 0x32f   : > { %4488 = vmatpush1.bf16.msra.mxu1 %v7299_v44  ;;  %4325 = vmatprep.subr.bf16.mxu0 %v7306_v46  ;;  %v1131_v44 = vld [vmem:[#allocation8 + $0xa70] sm:$0xff]  ;;  %v1128_v46 = vld [vmem:[#allocation8 + $0xa58] sm:$0xff] }
 0x330   : > { %4489 = vmatprep.subr.bf16.mxu1 %v7308_v53  ;;  %v1132_v53 = vld [vmem:[#allocation8 + $0xa78] sm:$0xff]  ;;  %v7362_v54 = vcombine.high %v1127_v43, %v1131_v44  ;;  %v7361_v62 = vcombine.low %v1127_v43, %v1131_v44 }
 0x331   : > { %v7364_v55 = vcombine.high %v1128_v46, %v1132_v53  ;;  %v7363_v0 = vcombine.low %v1128_v46, %v1132_v53 }
 0x332   : > { %4326 = vmatpush1.bf16.msra.mxu0 %v7305_v56  ;;  %v1135_v56 = vld [vmem:[#allocation8 + $0xa90] sm:$0xff] }
 0x333   : > { %4490 = vmatpush1.bf16.msra.mxu1 %v7307_v52  ;;  %4327 = vmatprep.subr.bf16.mxu0 %v7314_v57  ;;  %v1139_v52 = vld [vmem:[#allocation8 + $0xab0] sm:$0xff]  ;;  %v1136_v57 = vld [vmem:[#allocation8 + $0xa98] sm:$0xff] }
 0x334   : > { %4491 = vmatprep.subr.bf16.mxu1 %v7316_v58  ;;  %v1140_v58 = vld [vmem:[#allocation8 + $0xab8] sm:$0xff]  ;;  %v7370_v1 = vcombine.high %v1135_v56, %v1139_v52  ;;  %v7369_v9 = vcombine.low %v1135_v56, %v1139_v52 }
 0x335   : > { %v7372_v3 = vcombine.high %v1136_v57, %v1140_v58  ;;  %v7371_v11 = vcombine.low %v1136_v57, %v1140_v58 }
 0x336   : > { %4328 = vmatpush1.bf16.msra.mxu0 %v7313_v61  ;;  %v1143_v61 = vld [vmem:[#allocation8 + $0xad0] sm:$0xff] }
 0x337   : > { %4492 = vmatpush1.bf16.msra.mxu1 %v7315_v4  ;;  %4329 = vmatprep.subr.bf16.mxu0 %v7322_v5  ;;  %v1147_v4 = vld [vmem:[#allocation8 + $0xaf0] sm:$0xff]  ;;  %v1144_v5 = vld [vmem:[#allocation8 + $0xad8] sm:$0xff] }
 0x338   : > { %4493 = vmatprep.subr.bf16.mxu1 %v7324_v7  ;;  %v1148_v7 = vld [vmem:[#allocation8 + $0xaf8] sm:$0xff]  ;;  %v7378_v13 = vcombine.high %v1143_v61, %v1147_v4  ;;  %v7377_v22 = vcombine.low %v1143_v61, %v1147_v4 }
 0x339   : > { %v7380_v14 = vcombine.high %v1144_v5, %v1148_v7  ;;  %v7379_v23 = vcombine.low %v1144_v5, %v1148_v7  ;;  %v1196_v61 = vld [vmem:[#allocation8 + $0xc78] sm:$0xff]  ;;  %v1199_v7 = vld [vmem:[#allocation8 + $0xc90] sm:$0xff] }
 0x33a   : > { %4330 = vmatpush1.bf16.msra.mxu0 %v7321_v15  ;;  %v1151_v15 = vld [vmem:[#allocation8 + $0xb10] sm:$0xff] }
 0x33b   : > { %4494 = vmatpush1.bf16.msra.mxu1 %v7323_v16  ;;  %4331 = vmatprep.subr.bf16.mxu0 %v7330_v20  ;;  %v1155_v16 = vld [vmem:[#allocation8 + $0xb30] sm:$0xff]  ;;  %v1152_v20 = vld [vmem:[#allocation8 + $0xb18] sm:$0xff] }
 0x33c   : > { %4495 = vmatprep.subr.bf16.mxu1 %v7332_v21  ;;  %v1156_v21 = vld [vmem:[#allocation8 + $0xb38] sm:$0xff]  ;;  %v7386_v2 = vcombine.high %v1151_v15, %v1155_v16  ;;  %v7385_v28 = vcombine.low %v1151_v15, %v1155_v16 }
 0x33d   : > { %v7388_v24 = vcombine.high %v1152_v20, %v1156_v21  ;;  %v7387_v18 = vcombine.low %v1152_v20, %v1156_v21 }
 0x33e   : > { %4332 = vmatpush1.bf16.msra.mxu0 %v7329_v25  ;;  %v1159_v25 = vld [vmem:[#allocation8 + $0xb50] sm:$0xff] }
 0x33f   : > { %4496 = vmatpush1.bf16.msra.mxu1 %v7331_v10  ;;  %4333 = vmatprep.subr.bf16.mxu0 %v7338_v27  ;;  %v1163_v10 = vld [vmem:[#allocation8 + $0xb70] sm:$0xff]  ;;  %v1160_v27 = vld [vmem:[#allocation8 + $0xb58] sm:$0xff] }
 0x340   : > { %4497 = vmatprep.subr.bf16.mxu1 %v7340_v49  ;;  %v1164_v49 = vld [vmem:[#allocation8 + $0xb78] sm:$0xff]  ;;  %v7394_v29 = vcombine.high %v1159_v25, %v1163_v10  ;;  %v7393_v34 = vcombine.low %v1159_v25, %v1163_v10 }
 0x341   : > { %v7396_v30 = vcombine.high %v1160_v27, %v1164_v49  ;;  %v7395_v36 = vcombine.low %v1160_v27, %v1164_v49  ;;  %v1215_v49 = vld [vmem:[#allocation8 + $0xd10] sm:$0xff] }
 0x342   : > { %4334 = vmatpush1.bf16.msra.mxu0 %v7337_v17  ;;  %v1167_v17 = vld [vmem:[#allocation8 + $0xb90] sm:$0xff] }
 0x343   : > { %4498 = vmatpush1.bf16.msra.mxu1 %v7339_v31  ;;  %4335 = vmatprep.subr.bf16.mxu0 %v7346_v32  ;;  %v1171_v31 = vld [vmem:[#allocation8 + $0xbb0] sm:$0xff]  ;;  %v1168_v32 = vld [vmem:[#allocation8 + $0xb98] sm:$0xff] }
 0x344   : > { %4499 = vmatprep.subr.bf16.mxu1 %v7348_v33  ;;  %v1172_v33 = vld [vmem:[#allocation8 + $0xbb8] sm:$0xff]  ;;  %v7402_v6 = vcombine.high %v1167_v17, %v1171_v31  ;;  %v7401_v43 = vcombine.low %v1167_v17, %v1171_v31 }
 0x345   : > { %v7404_v38 = vcombine.high %v1168_v32, %v1172_v33  ;;  %v7403_v44 = vcombine.low %v1168_v32, %v1172_v33  ;;  %v1223_v32 = vld [vmem:[#allocation8 + $0xd50] sm:$0xff] }
 0x346   : > { %4336 = vmatpush1.bf16.msra.mxu0 %v7345_v39  ;;  %v1175_v39 = vld [vmem:[#allocation8 + $0xbd0] sm:$0xff] }
 0x347   : > { %4500 = vmatpush1.bf16.msra.mxu1 %v7347_v40  ;;  %4337 = vmatprep.subr.bf16.mxu0 %v7354_v60  ;;  %v1179_v40 = vld [vmem:[#allocation8 + $0xbf0] sm:$0xff]  ;;  %v1176_v60 = vld [vmem:[#allocation8 + $0xbd8] sm:$0xff] }
 0x348   : > { %4501 = vmatprep.subr.bf16.mxu1 %v7356_v41  ;;  %v1180_v41 = vld [vmem:[#allocation8 + $0xbf8] sm:$0xff]  ;;  %v7410_v46 = vcombine.high %v1175_v39, %v1179_v40  ;;  %v7409_v56 = vcombine.low %v1175_v39, %v1179_v40  ;;  %v1227_v33 = vld [vmem:[#allocation8 + $0xd70] sm:$0xff] }
 0x349   : > { %v7412_v53 = vcombine.high %v1176_v60, %v1180_v41  ;;  %v7411_v52 = vcombine.low %v1176_v60, %v1180_v41  ;;  %v7458_v39 = vcombine.high %v1223_v32, %v1227_v33  ;;  %v1231_v60 = vld [vmem:[#allocation8 + $0xd90] sm:$0xff] }
 0x34a   : > { %4338 = vmatpush1.bf16.msra.mxu0 %v7353_v8  ;;  %v1183_v8 = vld [vmem:[#allocation8 + $0xc10] sm:$0xff] }
 0x34b   : > { %4502 = vmatpush1.bf16.msra.mxu1 %v7355_v19  ;;  %4339 = vmatprep.subr.bf16.mxu0 %v7362_v54  ;;  %v1187_v19 = vld [vmem:[#allocation8 + $0xc30] sm:$0xff]  ;;  %v1184_v54 = vld [vmem:[#allocation8 + $0xc18] sm:$0xff] }
 0x34c   : > { %4503 = vmatprep.subr.bf16.mxu1 %v7364_v55  ;;  %v1188_v55 = vld [vmem:[#allocation8 + $0xc38] sm:$0xff]  ;;  %v7418_v57 = vcombine.high %v1183_v8, %v1187_v19  ;;  %v1235_v41 = vld [vmem:[#allocation8 + $0xdb0] sm:$0xff] }
 0x34d   : > { %v7420_v58 = vcombine.high %v1184_v54, %v1188_v55  ;;  %v7419_v4 = vcombine.low %v1184_v54, %v1188_v55 }
 0x34e   : > { %4340 = vmatpush1.bf16.msra.mxu0 %v7361_v62  ;;  %v1191_v62 = vld [vmem:[#allocation8 + $0xc50] sm:$0xff] }
 0x34f   : > { %4504 = vmatpush1.bf16.msra.mxu1 %v7363_v0  ;;  %4341 = vmatprep.subr.bf16.mxu0 %v7370_v1  ;;  %v1195_v0 = vld [vmem:[#allocation8 + $0xc70] sm:$0xff]  ;;  %v7417_v1 = vcombine.low %v1183_v8, %v1187_v19  ;;  %v7466_v8 = vcombine.high %v1231_v60, %v1235_v41 }
 0x350   : > { %4505 = vmatprep.subr.bf16.mxu1 %v7372_v3  ;;  %v1192_v3 = vld [vmem:[#allocation8 + $0xc58] sm:$0xff]  ;;  %v7426_v5 = vcombine.high %v1191_v62, %v1195_v0  ;;  %v7425_v15 = vcombine.low %v1191_v62, %v1195_v0 }
 0x351   : > { %v7427_v16 = vcombine.low %v1192_v3, %v1196_v61  ;;  %v1240_v62 = vld [vmem:[#allocation8 + $0xdd8] sm:$0xff] }
 0x352   : > { %4342 = vmatpush1.bf16.msra.mxu0 %v7369_v9  ;;  %v1203_v9 = vld [vmem:[#allocation8 + $0xcb0] sm:$0xff]  ;;  %v1244_v0 = vld [vmem:[#allocation8 + $0xdf8] sm:$0xff] }
 0x353   : > { %4506 = vmatpush1.bf16.msra.mxu1 %v7371_v11  ;;  %4343 = vmatprep.subr.bf16.mxu0 %v7378_v13  ;;  %v7428_v11 = vcombine.high %v1192_v3, %v1196_v61  ;;  %v1200_v13 = vld [vmem:[#allocation8 + $0xc98] sm:$0xff]  ;;  %v7434_v20 = vcombine.high %v1199_v7, %v1203_v9  ;;  %v7433_v25 = vcombine.low %v1199_v7, %v1203_v9 }
 0x354   : > { %4507 = vmatprep.subr.bf16.mxu1 %v7380_v14  ;;  %v1204_v14 = vld [vmem:[#allocation8 + $0xcb8] sm:$0xff]  ;;  %v7465_v61 = vcombine.low %v1231_v60, %v1235_v41 }
 0x355   : > { %v7436_v21 = vcombine.high %v1200_v13, %v1204_v14 }
 0x356   : > { %4344 = vmatpush1.bf16.msra.mxu0 %v7377_v22  ;;  %v1207_v22 = vld [vmem:[#allocation8 + $0xcd0] sm:$0xff] }
 0x357   : > { %4508 = vmatpush1.bf16.msra.mxu1 %v7379_v23  ;;  %4345 = vmatprep.subr.bf16.mxu0 %v7386_v2  ;;  %v1211_v23 = vld [vmem:[#allocation8 + $0xcf0] sm:$0xff]  ;;  %v1208_v2 = vld [vmem:[#allocation8 + $0xcd8] sm:$0xff] }
 0x358   : > { %4509 = vmatprep.subr.bf16.mxu1 %v7388_v24  ;;  %v1212_v24 = vld [vmem:[#allocation8 + $0xcf8] sm:$0xff]  ;;  %v7442_v10 = vcombine.high %v1207_v22, %v1211_v23 }
 0x359   : > { %v7444_v27 = vcombine.high %v1208_v2, %v1212_v24 }
 0x35a   : > { %4346 = vmatpush1.bf16.msra.mxu0 %v7385_v28  ;;  %v1219_v28 = vld [vmem:[#allocation8 + $0xd30] sm:$0xff] }
 0x35b   : > { %4510 = vmatpush1.bf16.msra.mxu1 %v7387_v18  ;;  %4347 = vmatprep.subr.bf16.mxu0 %v7394_v29  ;;  %v1216_v18 = vld [vmem:[#allocation8 + $0xd18] sm:$0xff]  ;;  %v7450_v17 = vcombine.high %v1215_v49, %v1219_v28 }
 0x35c   : > { %4511 = vmatprep.subr.bf16.mxu1 %v7396_v30  ;;  %v1220_v29 = vld [vmem:[#allocation8 + $0xd38] sm:$0xff]  ;;  %v7443_v30 = vcombine.low %v1208_v2, %v1212_v24  ;;  %v1255_v2 = vld [vmem:[#allocation8 + $0xe50] sm:$0xff] }
 0x35d   : > { %v7452_v31 = vcombine.high %v1216_v18, %v1220_v29  ;;  %v1259_v24 = vld [vmem:[#allocation8 + $0xe70] sm:$0xff] }
 0x35e   : > { %4348 = vmatpush1.bf16.msra.mxu0 %v7393_v34  ;;  %v1224_v34 = vld [vmem:[#allocation8 + $0xd58] sm:$0xff] }
 0x35f   : > { %4512 = vmatpush1.bf16.msra.mxu1 %v7395_v36  ;;  %4349 = vmatprep.subr.bf16.mxu0 %v7402_v6  ;;  %v1228_v36 = vld [vmem:[#allocation8 + $0xd78] sm:$0xff]  ;;  %v7449_v6 = vcombine.low %v1215_v49, %v1219_v28  ;;  %v7490_v49 = vcombine.high %v1255_v2, %v1259_v24 }
 0x360   : > { %4513 = vmatprep.subr.bf16.mxu1 %v7404_v38  ;;  %v7451_v38 = vcombine.low %v1216_v18, %v1220_v29  ;;  %v7460_v40 = vcombine.high %v1224_v34, %v1228_v36  ;;  %v1263_v18 = vld [vmem:[#allocation8 + $0xe90] sm:$0xff] }
 0x361   : > { %v1267_v29 = vld [vmem:[#allocation8 + $0xeb0] sm:$0xff] }
 0x362   : > { %4350 = vmatpush1.bf16.msra.mxu0 %v7401_v43  ;;  %v1232_v43 = vld [vmem:[#allocation8 + $0xd98] sm:$0xff] }
 0x363   : > { %4514 = vmatpush1.bf16.msra.mxu1 %v7403_v44  ;;  %4351 = vmatprep.subr.bf16.mxu0 %v7410_v46  ;;  %v1236_v44 = vld [vmem:[#allocation8 + $0xdb8] sm:$0xff]  ;;  %v7457_v46 = vcombine.low %v1223_v32, %v1227_v33  ;;  %v7498_v32 = vcombine.high %v1263_v18, %v1267_v29 }
 0x364   : > { %4515 = vmatprep.subr.bf16.mxu1 %v7412_v53  ;;  %v7459_v53 = vcombine.low %v1224_v34, %v1228_v36  ;;  %v7468_v55 = vcombine.high %v1232_v43, %v1236_v44  ;;  %v7467_v7 = vcombine.low %v1232_v43, %v1236_v44  ;;  %v1271_v34 = vld [vmem:[#allocation8 + $0xed0] sm:$0xff] }
 0x365   : > { %v1275_v36 = vld [vmem:[#allocation8 + $0xef0] sm:$0xff] }
 0x366   : > { %4352 = vmatpush1.bf16.msra.mxu0 %v7409_v56  ;;  %v1239_v56 = vld [vmem:[#allocation8 + $0xdd0] sm:$0xff]  ;;  %v7506_v60 = vcombine.high %v1271_v34, %v1275_v36 }
 0x367   : > { %4516 = vmatpush1.bf16.msra.mxu1 %v7411_v52  ;;  %4362 = vmatprep.subr.bf16.mxu0 %v7418_v57  ;;  %v1243_v52 = vld [vmem:[#allocation8 + $0xdf0] sm:$0xff] }
 0x368   : > { %4526 = vmatprep.subr.bf16.mxu1 %v7420_v58  ;;  %v7474_v9 = vcombine.high %v1239_v56, %v1243_v52  ;;  %v1279_v43 = vld [vmem:[#allocation8 + $0xf10] sm:$0xff] }
 0x369   : > { %4354 = vmatmul.mubr.bf16.vlgmr.msra.gmra.mrb[12].mxu0 %v9331_v35  ;;  %v1283_v44 = vld [vmem:[#allocation8 + $0xf30] sm:$0xff] }
 0x36a   : > { %4518 = vmatmul.mubr.bf16.vlgmr.msra.gmra.mrb[12].mxu1 %v9331_v35  ;;  %4363 = vmatpush1.bf16.msra.mxu0 %v7417_v1  ;;  %v7435_v35 = vcombine.low %v1200_v13, %v1204_v14  ;;  %v1247_v13 = vld [vmem:[#allocation8 + $0xe10] sm:$0xff] }
 0x36b   : > { %4394 = vmatprep.mubr.bf16.mxu0 %v9333_v42  ;;  %4527 = vmatpush1.bf16.msra.mxu1 %v7419_v4  ;;  %v1251_v14 = vld [vmem:[#allocation8 + $0xe30] sm:$0xff] }
 0x36c   : > { %4558 = vmatprep.mubr.bf16.mxu1 %v9333_v42  ;;  %4364 = vmatprep.subr.bf16.mxu0 %v7426_v5  ;;  %v7441_v42 = vcombine.low %v1207_v22, %v1211_v23  ;;  %v7482_v22 = vcombine.high %v1247_v13, %v1251_v14 }
 0x36d   : > { %4528 = vmatprep.subr.bf16.mxu1 %v7428_v11  ;;  %v7476_v11 = vcombine.high %v1240_v62, %v1244_v0 }
 0x36e   : > { %4365 = vmatpush1.bf16.msra.mxu0 %v7425_v15  ;;  %v1248_v15 = vld [vmem:[#allocation8 + $0xe18] sm:$0xff] }
 0x36f   : > { %4529 = vmatpush1.bf16.msra.mxu1 %v7427_v16  ;;  %4366 = vmatprep.subr.bf16.mxu0 %v7434_v20  ;;  %v1252_v16 = vld [vmem:[#allocation8 + $0xe38] sm:$0xff]  ;;  %v7473_v20 = vcombine.low %v1239_v56, %v1243_v52  ;;  %v7514_v56 = vcombine.high %v1279_v43, %v1283_v44 }
 0x370   : > { %4530 = vmatprep.subr.bf16.mxu1 %v7436_v21  ;;  %v7475_v21 = vcombine.low %v1240_v62, %v1244_v0  ;;  %v7484_v23 = vcombine.high %v1248_v15, %v1252_v16  ;;  %v1287_v62 = vld [vmem:[#allocation8 + $0xf50] sm:$0xff] }
 0x371   : > { %v1291_v0 = vld [vmem:[#allocation8 + $0xf70] sm:$0xff] }
 0x372   : > { %4367 = vmatpush1.bf16.msra.mxu0 %v7433_v25  ;;  %v1256_v25 = vld [vmem:[#allocation8 + $0xe58] sm:$0xff] }
 0x373   : > { %4531 = vmatpush1.bf16.msra.mxu1 %v7435_v35  ;;  %4368 = vmatprep.subr.bf16.mxu0 %v7442_v10  ;;  %v1260_v35 = vld [vmem:[#allocation8 + $0xe78] sm:$0xff]  ;;  %v7481_v10 = vcombine.low %v1247_v13, %v1251_v14 }
 0x374   : > { %4532 = vmatprep.subr.bf16.mxu1 %v7444_v27  ;;  %v7483_v27 = vcombine.low %v1248_v15, %v1252_v16  ;;  %v7492_v28 = vcombine.high %v1256_v25, %v1260_v35  ;;  %v1296_v13 = vld [vmem:[#allocation8 + $0xf98] sm:$0xff]  ;;  %v9369_v15 = vld [vmem:[#allocation10] sm:$0xff]  ;;  %v7521_v16 = vcombine.low %v1287_v62, %v1291_v0 }
 0x375   : > { %v1300_v14 = vld [vmem:[#allocation8 + $0xfb8] sm:$0xff] }
 0x376   : > { %4369 = vmatpush1.bf16.msra.mxu0 %v7441_v42  ;;  %v1264_v42 = vld [vmem:[#allocation8 + $0xe98] sm:$0xff] }
 0x377   : > { %4533 = vmatpush1.bf16.msra.mxu1 %v7443_v30  ;;  %4370 = vmatprep.subr.bf16.mxu0 %v7450_v17  ;;  %v1268_v30 = vld [vmem:[#allocation8 + $0xeb8] sm:$0xff]  ;;  %v7489_v17 = vcombine.low %v1255_v2, %v1259_v24  ;;  %v1307_v2 = vld [vmem:[#allocation8 + $0xff0] sm:$0xff]  ;;  %v1318_v24 = vrot.slane %v9369_v15, %v9269_v50 }
 0x378   : > { %4534 = vmatprep.subr.bf16.mxu1 %v7452_v31  ;;  %v7491_v31 = vcombine.low %v1256_v25, %v1260_v35  ;;  %v7500_v33 = vcombine.high %v1264_v42, %v1268_v30  ;;  %v1304_v25 = vld [vmem:[#allocation8 + $0xfd8] sm:$0xff] }
 0x379   : > { %v1308_v35 = vld [vmem:[#allocation8 + $0xff8] sm:$0xff] }
 0x37a   : > { %4371 = vmatpush1.bf16.msra.mxu0 %v7449_v6  ;;  %v1272_v6 = vld [vmem:[#allocation8 + $0xed8] sm:$0xff] }
 0x37b   : > { %4535 = vmatpush1.bf16.msra.mxu1 %v7451_v38  ;;  %4372 = vmatprep.subr.bf16.mxu0 %v7458_v39  ;;  %v1276_v38 = vld [vmem:[#allocation8 + $0xef8] sm:$0xff]  ;;  %v7497_v39 = vcombine.low %v1263_v18, %v1267_v29 }
 0x37c   : > { %v9361_v19 = vpop.f32.mrb[8].mxu0  ;;  %v9363_v54 = vpop.f32.mrb[8].mxu1  ;;  %4536 = vmatprep.subr.bf16.mxu1 %v7460_v40  ;;  %v7499_v40 = vcombine.low %v1264_v42, %v1268_v30  ;;  %v7508_v41 = vcombine.high %v1272_v6, %v1276_v38  ;;  %v7539_v42 = vcombine.low %v1304_v25, %v1308_v35  ;;  %v8098_v30 = vld [vmem:[#allocation11 + $0x4] ss:$16 sps:$4 sm:$0xff]  }
 0x37d   : > { %v9365_v57 = vpop.f32.mrb[9].mxu0  ;;  %v9367_v58 = vpop.f32.mrb[9].mxu1 }
 0x37e   : > { %v4072_v1 = vpop.f32.mrb[10].mxu0  ;;  %v4236_v3 = vpop.f32.mrb[10].mxu1  ;;  %4373 = vmatpush1.bf16.msra.mxu0 %v7457_v46  ;;  %v1280_v46 = vld [vmem:[#allocation8 + $0xf18] sm:$0xff]  ;;  %v7879_v18 = vadd.f32 %v9365_v57, %v1318_v24  ;;  %v8107_v57 = vld [vmem:[#allocation11 + $0x2c] ss:$16 sps:$4 sm:$0xff]  }
 0x37f   : > { %4537 = vmatpush1.bf16.msra.mxu1 %v7459_v53  ;;  %v4073_v4 = vpop.f32.mrb[11].mxu0  ;;  %v4237_v5 = vpop.f32.mrb[11].mxu1  ;;  %4374 = vmatprep.subr.bf16.mxu0 %v7466_v8  ;;  %v1284_v53 = vld [vmem:[#allocation8 + $0xf38] sm:$0xff]  ;;  %v7505_v8 = vcombine.low %v1271_v34, %v1275_v36  ;;  %v8153_v24 = vld [vmem:[#allocation11 + $0x128] ss:$16 sps:$4 sm:$0xff]  }
 0x380   : > { %4538 = vmatprep.subr.bf16.mxu1 %v7468_v55  ;;  %v7507_v55 = vcombine.low %v1272_v6, %v1276_v38  ;;  %v7516_v52 = vcombine.high %v1280_v46, %v1284_v53  ;;  %v1288_v1 = vld [vmem:[#allocation8 + $0xf58] sm:$0xff]  ;;  %v7515_v4 = vcombine.low %v1280_v46, %v1284_v53  ;;  %v7522_v5 = vcombine.high %v1287_v62, %v1291_v0  ;;  %v8105_v38 = vld [vmem:[#allocation11 + $0x28] ss:$16 sps:$4 sm:$0xff]   ;;  %v8131_v62 = vld [vmem:[#allocation11 + $0xac] ss:$16 sps:$4 sm:$0xff]  }
 0x381   : > { %v1292_v3 = vld [vmem:[#allocation8 + $0xf78] sm:$0xff]  ;;  %v8117_v46 = vld [vmem:[#allocation11 + $0x68] ss:$16 sps:$4 sm:$0xff]  }
 0x382   : > { %4375 = vmatpush1.bf16.msra.mxu0 %v7465_v61  ;;  %v7513_v61 = vcombine.low %v1279_v43, %v1283_v44  ;;  %v8104_v34 = vld [vmem:[#allocation11 + $0x24] ss:$16 sps:$4 sm:$0xff]   ;;  %v8102_v6 = vld [vmem:[#allocation11 + $0x20] ss:$16 sps:$4 sm:$0xff]   ;;  %v8119_v44 = vld [vmem:[#allocation11 + $0x6c] ss:$16 sps:$4 sm:$0xff]  }
 0x383   : > { %4539 = vmatpush1.bf16.msra.mxu1 %v7467_v7  ;;  %4376 = vmatprep.subr.bf16.mxu0 %v7474_v9  ;;  %v7524_v7 = vcombine.high %v1288_v1, %v1292_v3  ;;  %v1295_v9 = vld [vmem:[#allocation8 + $0xf90] sm:$0xff]  ;;  %v8116_v43 = vld [vmem:[#allocation11 + $0x64] ss:$16 sps:$4 sm:$0xff]   ;;  %v8126_v0 = vld [vmem:[#allocation11 + $0xa0] ss:$16 sps:$4 sm:$0xff]  }
 0x384   : > { %4540 = vmatprep.subr.bf16.mxu1 %v7476_v11  ;;  %v1299_v11 = vld [vmem:[#allocation8 + $0xfb0] sm:$0xff]  ;;  %v8122_v53 = vld [vmem:[#allocation11 + $0x84] ss:$16 sps:$4 sm:$0xff]  }
 0x386   : > { %4377 = vmatpush1.bf16.msra.mxu0 %v7473_v20  ;;  %v7523_v20 = vcombine.low %v1288_v1, %v1292_v3  ;;  %v8129_v1 = vld [vmem:[#allocation11 + $0xa8] ss:$16 sps:$4 sm:$0xff]   ;;  %v8134_v3 = vld [vmem:[#allocation11 + $0xc4] ss:$16 sps:$4 sm:$0xff]  }
 0x387   : > { %4541 = vmatpush1.bf16.msra.mxu1 %v7475_v21  ;;  %4378 = vmatprep.subr.bf16.mxu0 %v7482_v22  ;;  %v7530_v21 = vcombine.high %v1295_v9, %v1299_v11  ;;  %v7532_v22 = vcombine.high %v1296_v13, %v1300_v14 }
 0x388   : > { %4542 = vmatprep.subr.bf16.mxu1 %v7484_v23  ;;  %v1303_v23 = vld [vmem:[#allocation8 + $0xfd0] sm:$0xff] }
 0x389   : > { %v7537_v29 = vcombine.low %v1303_v23, %v1307_v2 }
 0x38a   : > { %4379 = vmatpush1.bf16.msra.mxu0 %v7481_v10  ;;  %v7529_v10 = vcombine.low %v1295_v9, %v1299_v11  ;;  %v8143_v9 = vld [vmem:[#allocation11 + $0xec] ss:$16 sps:$4 sm:$0xff]   ;;  %v8138_v11 = vld [vmem:[#allocation11 + $0xe0] ss:$16 sps:$4 sm:$0xff]  }
 0x38b   : > { %4543 = vmatpush1.bf16.msra.mxu1 %v7483_v27  ;;  %4380 = vmatprep.subr.bf16.mxu0 %v7490_v49  ;;  %v7531_v27 = vcombine.low %v1296_v13, %v1300_v14  ;;  %v7538_v49 = vcombine.high %v1303_v23, %v1307_v2  ;;  %v8141_v13 = vld [vmem:[#allocation11 + $0xe8] ss:$16 sps:$4 sm:$0xff]   ;;  %v8146_v14 = vld [vmem:[#allocation11 + $0x104] ss:$16 sps:$4 sm:$0xff]   ;;  %v8155_v23 = vld [vmem:[#allocation11 + $0x12c] ss:$16 sps:$4 sm:$0xff]  }
 0x38c   : > { %4544 = vmatprep.subr.bf16.mxu1 %v7492_v28  ;;  %v7540_v28 = vcombine.high %v1304_v25, %v1308_v35  ;;  %v8150_v2 = vld [vmem:[#allocation11 + $0x120] ss:$16 sps:$4 sm:$0xff]   ;;  %v8158_v25 = vld [vmem:[#allocation11 + $0x144] ss:$16 sps:$4 sm:$0xff]   ;;  %v8161_v35 = vld [vmem:[#allocation11 + $0x14c] ss:$16 sps:$4 sm:$0xff]  }
 0x38e   : > { %4381 = vmatpush1.bf16.msra.mxu0 %v7489_v17  ;;  %v8101_v17 = vld [vmem:[#allocation11 + $0xc] ss:$16 sps:$4 sm:$0xff]  }
 0x38f   : > { %4545 = vmatpush1.bf16.msra.mxu1 %v7491_v31  ;;  %4382 = vmatprep.subr.bf16.mxu0 %v7498_v32  ;;  %v4568_v31 = vmax.f32 %v7879_v18, 0.0  ;;  %v8096_v32 = vld [vmem:[#allocation11] ss:$16 sps:$4 sm:$0xff]  }
 0x390   : > { %4546 = vmatprep.subr.bf16.mxu1 %v7500_v33  ;;  %v8099_v33 = vld [vmem:[#allocation11 + $0x8] ss:$16 sps:$4 sm:$0xff]   ;;  %v8162_v18 = vld [vmem:[#allocation11 + $0x160] ss:$16 sps:$4 sm:$0xff]  }
 0x391   : > { %v4576_v36 = vpack.c.bf16 %v4568_v31, %v4568_v31  ;;  %v8171_v31 = vld [vmem:[#allocation11 + $0x188] ss:$16 sps:$4 sm:$0xff]  }
 0x392   : > { %4383 = vmatpush1.bf16.msra.mxu0 %v7497_v39  ;;  %v8110_v39 = vld [vmem:[#allocation11 + $0x44] ss:$16 sps:$4 sm:$0xff]  }
 0x393   : > { %4547 = vmatpush1.bf16.msra.mxu1 %v7499_v40  ;;  %4384 = vmatprep.subr.bf16.mxu0 %v7506_v60  ;;  %v8113_v40 = vld [vmem:[#allocation11 + $0x4c] ss:$16 sps:$4 sm:$0xff]   ;;  %v8108_v60 = vld [vmem:[#allocation11 + $0x40] ss:$16 sps:$4 sm:$0xff]  }
 0x394   : > { %4548 = vmatprep.subr.bf16.mxu1 %v7508_v41  ;;  %v8111_v41 = vld [vmem:[#allocation11 + $0x48] ss:$16 sps:$4 sm:$0xff]  }
 0x396   : > { %4385 = vmatpush1.bf16.msra.mxu0 %v7505_v8  ;;  %v8125_v8 = vld [vmem:[#allocation11 + $0x8c] ss:$16 sps:$4 sm:$0xff]  }
 0x397   : > { %4549 = vmatpush1.bf16.msra.mxu1 %v7507_v55  ;;  %4386 = vmatprep.subr.bf16.mxu0 %v7514_v56  ;;  %v8120_v55 = vld [vmem:[#allocation11 + $0x80] ss:$16 sps:$4 sm:$0xff]   ;;  %v8123_v56 = vld [vmem:[#allocation11 + $0x88] ss:$16 sps:$4 sm:$0xff]  }
 0x398   : > { %4550 = vmatprep.subr.bf16.mxu1 %v7516_v52  ;;  %v8128_v52 = vld [vmem:[#allocation11 + $0xa4] ss:$16 sps:$4 sm:$0xff]  }
 0x39a   : > { %4387 = vmatpush1.bf16.msra.mxu0 %v7513_v61  ;;  %v8137_v61 = vld [vmem:[#allocation11 + $0xcc] ss:$16 sps:$4 sm:$0xff]  }
 0x39b   : > { %4551 = vmatpush1.bf16.msra.mxu1 %v7515_v4  ;;  %4388 = vmatprep.subr.bf16.mxu0 %v7522_v5  ;;  %v8132_v4 = vld [vmem:[#allocation11 + $0xc0] ss:$16 sps:$4 sm:$0xff]   ;;  %v8135_v5 = vld [vmem:[#allocation11 + $0xc8] ss:$16 sps:$4 sm:$0xff]  }
 0x39c   : > { %4552 = vmatprep.subr.bf16.mxu1 %v7524_v7  ;;  %v8140_v7 = vld [vmem:[#allocation11 + $0xe4] ss:$16 sps:$4 sm:$0xff]  }
 0x39e   : > { %4389 = vmatpush1.bf16.msra.mxu0 %v7521_v16  ;;  %v8149_v16 = vld [vmem:[#allocation11 + $0x10c] ss:$16 sps:$4 sm:$0xff]  }
 0x39f   : > { %4553 = vmatpush1.bf16.msra.mxu1 %v7523_v20  ;;  %4390 = vmatprep.subr.bf16.mxu0 %v7530_v21  ;;  %v8144_v20 = vld [vmem:[#allocation11 + $0x100] ss:$16 sps:$4 sm:$0xff]   ;;  %v8147_v21 = vld [vmem:[#allocation11 + $0x108] ss:$16 sps:$4 sm:$0xff]  }
 0x3a0   : > { %4554 = vmatprep.subr.bf16.mxu1 %v7532_v22  ;;  %v8152_v22 = vld [vmem:[#allocation11 + $0x124] ss:$16 sps:$4 sm:$0xff]  }
 0x3a2   : > { %4391 = vmatpush1.bf16.msra.mxu0 %v7529_v10  ;;  %v8156_v10 = vld [vmem:[#allocation11 + $0x140] ss:$16 sps:$4 sm:$0xff]  }
 0x3a3   : > { %4555 = vmatpush1.bf16.msra.mxu1 %v7531_v27  ;;  %4392 = vmatprep.subr.bf16.mxu0 %v7538_v49  ;;  %v8159_v27 = vld [vmem:[#allocation11 + $0x148] ss:$16 sps:$4 sm:$0xff]   ;;  %v8164_v49 = vld [vmem:[#allocation11 + $0x164] ss:$16 sps:$4 sm:$0xff]  }
 0x3a4   : > { %4556 = vmatprep.subr.bf16.mxu1 %v7540_v28  ;;  %v8167_v28 = vld [vmem:[#allocation11 + $0x16c] ss:$16 sps:$4 sm:$0xff]  }
 0x3a6   : > { %4393 = vmatpush1.bf16.msra.mxu0 %v7537_v29  ;;  %v8165_v29 = vld [vmem:[#allocation11 + $0x168] ss:$16 sps:$4 sm:$0xff]  }
 0x3a7   : > { %4557 = vmatpush1.bf16.msra.mxu1 %v7539_v42  ;;  %6141 = vmatprep.subr.bf16.mxu0 %v8098_v30  ;;  %v8170_v42 = vld [vmem:[#allocation11 + $0x184] ss:$16 sps:$4 sm:$0xff]   ;;  %v8173_v30 = vld [vmem:[#allocation11 + $0x18c] ss:$16 sps:$4 sm:$0xff]  }
 0x3a8   : > { %6305 = vmatprep.subr.bf16.mxu1 %v8101_v17  ;;  %v8168_v17 = vld [vmem:[#allocation11 + $0x180] ss:$16 sps:$4 sm:$0xff]  }
 0x3a9   : > { %4395 = vmatmul.mubr.bf16.vlgmr.msra.gmra.mrb[12].mxu0 %v9343_v26 }
 0x3aa   : > { %4559 = vmatmul.mubr.bf16.vlgmr.msra.gmra.mrb[12].mxu1 %v9343_v26  ;;  %6142 = vmatpush1.bf16.msra.mxu0 %v8096_v32  ;;  %v8114_v26 = vld [vmem:[#allocation11 + $0x60] ss:$16 sps:$4 sm:$0xff]   ;;  %v8176_v32 = vld [vmem:[#allocation11 + $0x1a4] ss:$16 sps:$4 sm:$0xff]  }
 0x3ab   : > { %6173 = vmatprep.mubr.bf16.mxu0 %v4576_v36  ;;  %6306 = vmatpush1.bf16.msra.mxu1 %v8099_v33  ;;  %v8179_v33 = vld [vmem:[#allocation11 + $0x1ac] ss:$16 sps:$4 sm:$0xff]  }
 0x3ac   : > { %6337 = vmatprep.mubr.bf16.mxu1 %v4576_v36  ;;  %6143 = vmatprep.subr.bf16.mxu0 %v8104_v34  ;;  %v8174_v34 = vld [vmem:[#allocation11 + $0x1a0] ss:$16 sps:$4 sm:$0xff]   ;;  %v1314_v36 = vrot.slane %v9369_v15, %v9264_v48 }
 0x3ad   : > { %6307 = vmatprep.subr.bf16.mxu1 %v8107_v57  ;;  %v8177_v57 = vld [vmem:[#allocation11 + $0x1a8] ss:$16 sps:$4 sm:$0xff]  }
 0x3ae   : > { %6144 = vmatpush1.bf16.msra.mxu0 %v8102_v6  ;;  %v8182_v6 = vld [vmem:[#allocation11 + $0x1c4] ss:$16 sps:$4 sm:$0xff]  }
 0x3af   : > { %6308 = vmatpush1.bf16.msra.mxu1 %v8105_v38  ;;  %6145 = vmatprep.subr.bf16.mxu0 %v8110_v39  ;;  %v8185_v38 = vld [vmem:[#allocation11 + $0x1cc] ss:$16 sps:$4 sm:$0xff]   ;;  %v1326_v39 = vrot.slane %v9369_v15, %v9272_v51 }
 0x3b0   : > { %6309 = vmatprep.subr.bf16.mxu1 %v8113_v40  ;;  %v8180_v40 = vld [vmem:[#allocation11 + $0x1c0] ss:$16 sps:$4 sm:$0xff]  }
 0x3b2   : > { %6146 = vmatpush1.bf16.msra.mxu0 %v8108_v60  ;;  %v7878_v60 = vadd.f32 %v9361_v19, %v1314_v36  ;;  %v8192_v19 = vld [vmem:[#allocation11 + $0x200] ss:$16 sps:$4 sm:$0xff]   ;;  %v8248_v36 = vld [vmem:[#allocation11 + $0x324] ss:$16 sps:$4 sm:$0xff]  }
 0x3b3   : > { %6310 = vmatpush1.bf16.msra.mxu1 %v8111_v41  ;;  %6147 = vmatprep.subr.bf16.mxu0 %v8116_v43  ;;  %v8183_v41 = vld [vmem:[#allocation11 + $0x1c8] ss:$16 sps:$4 sm:$0xff]   ;;  %v8188_v43 = vld [vmem:[#allocation11 + $0x1e4] ss:$16 sps:$4 sm:$0xff]  }
 0x3b4   : > { %6311 = vmatprep.subr.bf16.mxu1 %v8119_v44  ;;  %v8191_v44 = vld [vmem:[#allocation11 + $0x1ec] ss:$16 sps:$4 sm:$0xff]  }
 0x3b6   : > { %6148 = vmatpush1.bf16.msra.mxu0 %v8114_v26  ;;  %v7881_v26 = vadd.f32 %v9367_v58, %v1326_v39  ;;  %v8203_v58 = vld [vmem:[#allocation11 + $0x22c] ss:$16 sps:$4 sm:$0xff]   ;;  %v8254_v39 = vld [vmem:[#allocation11 + $0x344] ss:$16 sps:$4 sm:$0xff]  }
 0x3b7   : > { %6312 = vmatpush1.bf16.msra.mxu1 %v8117_v46  ;;  %6149 = vmatprep.subr.bf16.mxu0 %v8122_v53  ;;  %v8186_v46 = vld [vmem:[#allocation11 + $0x1e0] ss:$16 sps:$4 sm:$0xff]   ;;  %v4567_v53 = vmax.f32 %v7878_v60, 0.0 }
 0x3b8   : > { %6313 = vmatprep.subr.bf16.mxu1 %v8125_v8  ;;  %v8189_v8 = vld [vmem:[#allocation11 + $0x1e8] ss:$16 sps:$4 sm:$0xff]   ;;  %v8252_v60 = vld [vmem:[#allocation11 + $0x340] ss:$16 sps:$4 sm:$0xff]  }
 0x3ba   : > { %6150 = vmatpush1.bf16.msra.mxu0 %v8120_v55  ;;  %v8194_v55 = vld [vmem:[#allocation11 + $0x204] ss:$16 sps:$4 sm:$0xff]  }
 0x3bb   : > { %6314 = vmatpush1.bf16.msra.mxu1 %v8123_v56  ;;  %6151 = vmatprep.subr.bf16.mxu0 %v8128_v52  ;;  %v8197_v56 = vld [vmem:[#allocation11 + $0x20c] ss:$16 sps:$4 sm:$0xff]   ;;  %v4570_v52 = vmax.f32 %v7881_v26, 0.0  ;;  %v8258_v26 = vld [vmem:[#allocation11 + $0x360] ss:$16 sps:$4 sm:$0xff]  }
 0x3bc   : > { %6315 = vmatprep.subr.bf16.mxu1 %v8131_v62  ;;  %v4575_v62 = vpack.c.bf16 %v4567_v53, %v4567_v53  ;;  %v8266_v53 = vld [vmem:[#allocation11 + $0x384] ss:$16 sps:$4 sm:$0xff]  }
 0x3be   : > { %6152 = vmatpush1.bf16.msra.mxu0 %v8126_v0  ;;  %v8195_v0 = vld [vmem:[#allocation11 + $0x208] ss:$16 sps:$4 sm:$0xff]  }
 0x3bf   : > { %6316 = vmatpush1.bf16.msra.mxu1 %v8129_v1  ;;  %6153 = vmatprep.subr.bf16.mxu0 %v8134_v3  ;;  %v8200_v1 = vld [vmem:[#allocation11 + $0x224] ss:$16 sps:$4 sm:$0xff]   ;;  %v4578_v3 = vpack.c.bf16 %v4570_v52, %v4570_v52 }
 0x3c0   : > { %6317 = vmatprep.subr.bf16.mxu1 %v8137_v61  ;;  %v8198_v61 = vld [vmem:[#allocation11 + $0x220] ss:$16 sps:$4 sm:$0xff]   ;;  %v8272_v52 = vld [vmem:[#allocation11 + $0x3a4] ss:$16 sps:$4 sm:$0xff]  }
 0x3c2   : > { %6154 = vmatpush1.bf16.msra.mxu0 %v8132_v4  ;;  %v8201_v4 = vld [vmem:[#allocation11 + $0x228] ss:$16 sps:$4 sm:$0xff]  }
 0x3c3   : > { %6318 = vmatpush1.bf16.msra.mxu1 %v8135_v5  ;;  %6155 = vmatprep.subr.bf16.mxu0 %v8140_v7  ;;  %v8206_v5 = vld [vmem:[#allocation11 + $0x244] ss:$16 sps:$4 sm:$0xff]   ;;  %v8209_v7 = vld [vmem:[#allocation11 + $0x24c] ss:$16 sps:$4 sm:$0xff]  }
 0x3c4   : > { %6319 = vmatprep.subr.bf16.mxu1 %v8143_v9  ;;  %v8204_v9 = vld [vmem:[#allocation11 + $0x240] ss:$16 sps:$4 sm:$0xff]  }
 0x3c6   : > { %6156 = vmatpush1.bf16.msra.mxu0 %v8138_v11  ;;  %v8207_v11 = vld [vmem:[#allocation11 + $0x248] ss:$16 sps:$4 sm:$0xff]  }
 0x3c7   : > { %6320 = vmatpush1.bf16.msra.mxu1 %v8141_v13  ;;  %6157 = vmatprep.subr.bf16.mxu0 %v8146_v14  ;;  %v8212_v13 = vld [vmem:[#allocation11 + $0x264] ss:$16 sps:$4 sm:$0xff]   ;;  %v8215_v14 = vld [vmem:[#allocation11 + $0x26c] ss:$16 sps:$4 sm:$0xff]  }
 0x3c8   : > { %6321 = vmatprep.subr.bf16.mxu1 %v8149_v16  ;;  %v8210_v16 = vld [vmem:[#allocation11 + $0x260] ss:$16 sps:$4 sm:$0xff]  }
 0x3ca   : > { %6158 = vmatpush1.bf16.msra.mxu0 %v8144_v20  ;;  %v8213_v20 = vld [vmem:[#allocation11 + $0x268] ss:$16 sps:$4 sm:$0xff]  }
 0x3cb   : > { %6322 = vmatpush1.bf16.msra.mxu1 %v8147_v21  ;;  %6159 = vmatprep.subr.bf16.mxu0 %v8152_v22  ;;  %v8218_v21 = vld [vmem:[#allocation11 + $0x284] ss:$16 sps:$4 sm:$0xff]   ;;  %v8221_v22 = vld [vmem:[#allocation11 + $0x28c] ss:$16 sps:$4 sm:$0xff]  }
 0x3cc   : > { %6323 = vmatprep.subr.bf16.mxu1 %v8155_v23  ;;  %v8216_v23 = vld [vmem:[#allocation11 + $0x280] ss:$16 sps:$4 sm:$0xff]  }
 0x3ce   : > { %6160 = vmatpush1.bf16.msra.mxu0 %v8150_v2  ;;  %v8219_v2 = vld [vmem:[#allocation11 + $0x288] ss:$16 sps:$4 sm:$0xff]  }
 0x3cf   : > { %6324 = vmatpush1.bf16.msra.mxu1 %v8153_v24  ;;  %6161 = vmatprep.subr.bf16.mxu0 %v8158_v25  ;;  %v8224_v24 = vld [vmem:[#allocation11 + $0x2a4] ss:$16 sps:$4 sm:$0xff]   ;;  %v8227_v25 = vld [vmem:[#allocation11 + $0x2ac] ss:$16 sps:$4 sm:$0xff]  }
 0x3d0   : > { %6325 = vmatprep.subr.bf16.mxu1 %v8161_v35  ;;  %v8222_v35 = vld [vmem:[#allocation11 + $0x2a0] ss:$16 sps:$4 sm:$0xff]  }
 0x3d2   : > { %6162 = vmatpush1.bf16.msra.mxu0 %v8156_v10  ;;  %v8225_v10 = vld [vmem:[#allocation11 + $0x2a8] ss:$16 sps:$4 sm:$0xff]  }
 0x3d3   : > { %6326 = vmatpush1.bf16.msra.mxu1 %v8159_v27  ;;  %6163 = vmatprep.subr.bf16.mxu0 %v8164_v49  ;;  %v8230_v27 = vld [vmem:[#allocation11 + $0x2c4] ss:$16 sps:$4 sm:$0xff]   ;;  %v8233_v49 = vld [vmem:[#allocation11 + $0x2cc] ss:$16 sps:$4 sm:$0xff]  }
 0x3d4   : > { %6327 = vmatprep.subr.bf16.mxu1 %v8167_v28  ;;  %v8228_v28 = vld [vmem:[#allocation11 + $0x2c0] ss:$16 sps:$4 sm:$0xff]  }
 0x3d6   : > { %6164 = vmatpush1.bf16.msra.mxu0 %v8162_v18  ;;  %v8231_v18 = vld [vmem:[#allocation11 + $0x2c8] ss:$16 sps:$4 sm:$0xff]  }
 0x3d7   : > { %6328 = vmatpush1.bf16.msra.mxu1 %v8165_v29  ;;  %6165 = vmatprep.subr.bf16.mxu0 %v8170_v42  ;;  %v8236_v29 = vld [vmem:[#allocation11 + $0x2e4] ss:$16 sps:$4 sm:$0xff]   ;;  %v8239_v42 = vld [vmem:[#allocation11 + $0x2ec] ss:$16 sps:$4 sm:$0xff]  }
 0x3d8   : > { %6329 = vmatprep.subr.bf16.mxu1 %v8173_v30  ;;  %v8234_v30 = vld [vmem:[#allocation11 + $0x2e0] ss:$16 sps:$4 sm:$0xff]  }
 0x3da   : > { %6166 = vmatpush1.bf16.msra.mxu0 %v8168_v17  ;;  %v8237_v17 = vld [vmem:[#allocation11 + $0x2e8] ss:$16 sps:$4 sm:$0xff]  }
 0x3db   : > { %6330 = vmatpush1.bf16.msra.mxu1 %v8171_v31  ;;  %6167 = vmatprep.subr.bf16.mxu0 %v8176_v32  ;;  %v8242_v31 = vld [vmem:[#allocation11 + $0x304] ss:$16 sps:$4 sm:$0xff]   ;;  %v8245_v32 = vld [vmem:[#allocation11 + $0x30c] ss:$16 sps:$4 sm:$0xff]  }
 0x3dc   : > { %6331 = vmatprep.subr.bf16.mxu1 %v8179_v33  ;;  %v8240_v33 = vld [vmem:[#allocation11 + $0x300] ss:$16 sps:$4 sm:$0xff]  }
 0x3de   : > { %6168 = vmatpush1.bf16.msra.mxu0 %v8174_v34  ;;  %v8243_v34 = vld [vmem:[#allocation11 + $0x308] ss:$16 sps:$4 sm:$0xff]  }
 0x3df   : > { %6332 = vmatpush1.bf16.msra.mxu1 %v8177_v57  ;;  %6169 = vmatprep.subr.bf16.mxu0 %v8182_v6  ;;  %v8251_v57 = vld [vmem:[#allocation11 + $0x32c] ss:$16 sps:$4 sm:$0xff]   ;;  %v8246_v6 = vld [vmem:[#allocation11 + $0x320] ss:$16 sps:$4 sm:$0xff]  }
 0x3e0   : > { %6333 = vmatprep.subr.bf16.mxu1 %v8185_v38  ;;  %v8249_v38 = vld [vmem:[#allocation11 + $0x328] ss:$16 sps:$4 sm:$0xff]  }
 0x3e2   : > { %6170 = vmatpush1.bf16.msra.mxu0 %v8180_v40  ;;  %v8257_v40 = vld [vmem:[#allocation11 + $0x34c] ss:$16 sps:$4 sm:$0xff]  }
 0x3e3   : > { %6334 = vmatpush1.bf16.msra.mxu1 %v8183_v41  ;;  %6171 = vmatprep.subr.bf16.mxu0 %v8188_v43  ;;  %v8255_v41 = vld [vmem:[#allocation11 + $0x348] ss:$16 sps:$4 sm:$0xff]   ;;  %v8260_v43 = vld [vmem:[#allocation11 + $0x364] ss:$16 sps:$4 sm:$0xff]  }
 0x3e4   : > { %6335 = vmatprep.subr.bf16.mxu1 %v8191_v44  ;;  %v8263_v44 = vld [vmem:[#allocation11 + $0x36c] ss:$16 sps:$4 sm:$0xff]  }
 0x3e6   : > { %6172 = vmatpush1.bf16.msra.mxu0 %v8186_v46  ;;  %v8261_v46 = vld [vmem:[#allocation11 + $0x368] ss:$16 sps:$4 sm:$0xff]  }
 0x3e7   : > { %6336 = vmatpush1.bf16.msra.mxu1 %v8189_v8  ;;  %6182 = vmatprep.subr.bf16.mxu0 %v8194_v55  ;;  %v8269_v8 = vld [vmem:[#allocation11 + $0x38c] ss:$16 sps:$4 sm:$0xff]   ;;  %v8264_v55 = vld [vmem:[#allocation11 + $0x380] ss:$16 sps:$4 sm:$0xff]  }
 0x3e8   : > { %6346 = vmatprep.subr.bf16.mxu1 %v8197_v56  ;;  %v8267_v56 = vld [vmem:[#allocation11 + $0x388] ss:$16 sps:$4 sm:$0xff]  }
 0x3e9   : > { %6174 = vmatmul.mubr.bf16.vlgmr.msra.gmra.mrb[16].mxu0 %v4575_v62 }
 0x3ea   : > { %6338 = vmatmul.mubr.bf16.vlgmr.msra.gmra.mrb[16].mxu1 %v4575_v62  ;;  %6183 = vmatpush1.bf16.msra.mxu0 %v8192_v19  ;;  %v8275_v19 = vld [vmem:[#allocation11 + $0x3ac] ss:$16 sps:$4 sm:$0xff]   ;;  %v8270_v62 = vld [vmem:[#allocation11 + $0x3a0] ss:$16 sps:$4 sm:$0xff]  }
 0x3eb   : > { %6214 = vmatprep.mubr.bf16.mxu0 %v4578_v3  ;;  %6347 = vmatpush1.bf16.msra.mxu1 %v8195_v0  ;;  %v1322_v0 = vrot.slane %v9369_v15, %v9299_v63 }
 0x3ec   : > { %6378 = vmatprep.mubr.bf16.mxu1 %v4578_v3  ;;  %6184 = vmatprep.subr.bf16.mxu0 %v8200_v1  ;;  %v8273_v1 = vld [vmem:[#allocation11 + $0x3a8] ss:$16 sps:$4 sm:$0xff]   ;;  %v8278_v3 = vld [vmem:[#allocation11 + $0x3c4] ss:$16 sps:$4 sm:$0xff]  }
 0x3ed   : > { %6348 = vmatprep.subr.bf16.mxu1 %v8203_v58  ;;  %v8281_v58 = vld [vmem:[#allocation11 + $0x3cc] ss:$16 sps:$4 sm:$0xff]  }
 0x3ee   : > { %6185 = vmatpush1.bf16.msra.mxu0 %v8198_v61  ;;  %v8276_v61 = vld [vmem:[#allocation11 + $0x3c0] ss:$16 sps:$4 sm:$0xff]  }
 0x3ef   : > { %6349 = vmatpush1.bf16.msra.mxu1 %v8201_v4  ;;  %6186 = vmatprep.subr.bf16.mxu0 %v8206_v5  ;;  %v7880_v4 = vadd.f32 %v9363_v54, %v1322_v0  ;;  %v8279_v5 = vld [vmem:[#allocation11 + $0x3c8] ss:$16 sps:$4 sm:$0xff]   ;;  %v8353_v0 = vld [vmem:[#allocation11 + $0x54c] ss:$16 sps:$4 sm:$0xff]  }
 0x3f0   : > { %6350 = vmatprep.subr.bf16.mxu1 %v8209_v7  ;;  %v8284_v7 = vld [vmem:[#allocation11 + $0x3e4] ss:$16 sps:$4 sm:$0xff]   ;;  %v8291_v54 = vld [vmem:[#allocation11 + $0x408] ss:$16 sps:$4 sm:$0xff]  }
 0x3f2   : > { %6187 = vmatpush1.bf16.msra.mxu0 %v8204_v9  ;;  %v8287_v9 = vld [vmem:[#allocation11 + $0x3ec] ss:$16 sps:$4 sm:$0xff]  }
 0x3f3   : > { %6351 = vmatpush1.bf16.msra.mxu1 %v8207_v11  ;;  %6188 = vmatprep.subr.bf16.mxu0 %v8212_v13  ;;  %v8282_v11 = vld [vmem:[#allocation11 + $0x3e0] ss:$16 sps:$4 sm:$0xff]   ;;  %v4569_v13 = vmax.f32 %v7880_v4, 0.0 }
 0x3f4   : > { %6352 = vmatprep.subr.bf16.mxu1 %v8215_v14  ;;  %v8285_v14 = vld [vmem:[#allocation11 + $0x3e8] ss:$16 sps:$4 sm:$0xff]   ;;  %v8354_v4 = vld [vmem:[#allocation11 + $0x560] ss:$16 sps:$4 sm:$0xff]  }
 0x3f6   : > { %6189 = vmatpush1.bf16.msra.mxu0 %v8210_v16  ;;  %v8290_v16 = vld [vmem:[#allocation11 + $0x404] ss:$16 sps:$4 sm:$0xff]  }
 0x3f7   : > { %6353 = vmatpush1.bf16.msra.mxu1 %v8213_v20  ;;  %6190 = vmatprep.subr.bf16.mxu0 %v8218_v21  ;;  %v8293_v20 = vld [vmem:[#allocation11 + $0x40c] ss:$16 sps:$4 sm:$0xff]   ;;  %v8288_v21 = vld [vmem:[#allocation11 + $0x400] ss:$16 sps:$4 sm:$0xff]  }
 0x3f8   : > { %6354 = vmatprep.subr.bf16.mxu1 %v8221_v22  ;;  %v4577_v22 = vpack.c.bf16 %v4569_v13, %v4569_v13  ;;  %v8363_v13 = vld [vmem:[#allocation11 + $0x588] ss:$16 sps:$4 sm:$0xff]  }
 0x3fa   : > { %6191 = vmatpush1.bf16.msra.mxu0 %v8216_v23  ;;  %v8296_v23 = vld [vmem:[#allocation11 + $0x424] ss:$16 sps:$4 sm:$0xff]  }
 0x3fb   : > { %6355 = vmatpush1.bf16.msra.mxu1 %v8219_v2  ;;  %6192 = vmatprep.subr.bf16.mxu0 %v8224_v24  ;;  %v8299_v2 = vld [vmem:[#allocation11 + $0x42c] ss:$16 sps:$4 sm:$0xff]   ;;  %v8294_v24 = vld [vmem:[#allocation11 + $0x420] ss:$16 sps:$4 sm:$0xff]  }
 0x3fc   : > { %6356 = vmatprep.subr.bf16.mxu1 %v8227_v25  ;;  %v8297_v25 = vld [vmem:[#allocation11 + $0x428] ss:$16 sps:$4 sm:$0xff]  }
 0x3fe   : > { %6193 = vmatpush1.bf16.msra.mxu0 %v8222_v35  ;;  %v8302_v35 = vld [vmem:[#allocation11 + $0x444] ss:$16 sps:$4 sm:$0xff]  }
 0x3ff   : > { %6357 = vmatpush1.bf16.msra.mxu1 %v8225_v10  ;;  %6194 = vmatprep.subr.bf16.mxu0 %v8230_v27  ;;  %v8305_v10 = vld [vmem:[#allocation11 + $0x44c] ss:$16 sps:$4 sm:$0xff]   ;;  %v8300_v27 = vld [vmem:[#allocation11 + $0x440] ss:$16 sps:$4 sm:$0xff]  }
 0x400   : > { %6358 = vmatprep.subr.bf16.mxu1 %v8233_v49  ;;  %v8303_v49 = vld [vmem:[#allocation11 + $0x448] ss:$16 sps:$4 sm:$0xff]  }
 0x402   : > { %6195 = vmatpush1.bf16.msra.mxu0 %v8228_v28  ;;  %v8308_v28 = vld [vmem:[#allocation11 + $0x464] ss:$16 sps:$4 sm:$0xff]  }
 0x403   : > { %6359 = vmatpush1.bf16.msra.mxu1 %v8231_v18  ;;  %6196 = vmatprep.subr.bf16.mxu0 %v8236_v29  ;;  %v8311_v18 = vld [vmem:[#allocation11 + $0x46c] ss:$16 sps:$4 sm:$0xff]   ;;  %v8306_v29 = vld [vmem:[#allocation11 + $0x460] ss:$16 sps:$4 sm:$0xff]  }
 0x404   : > { %6360 = vmatprep.subr.bf16.mxu1 %v8239_v42  ;;  %v8309_v42 = vld [vmem:[#allocation11 + $0x468] ss:$16 sps:$4 sm:$0xff]  }
 0x406   : > { %6197 = vmatpush1.bf16.msra.mxu0 %v8234_v30  ;;  %v8314_v30 = vld [vmem:[#allocation11 + $0x484] ss:$16 sps:$4 sm:$0xff]  }
 0x407   : > { %6361 = vmatpush1.bf16.msra.mxu1 %v8237_v17  ;;  %6198 = vmatprep.subr.bf16.mxu0 %v8242_v31  ;;  %v8317_v17 = vld [vmem:[#allocation11 + $0x48c] ss:$16 sps:$4 sm:$0xff]   ;;  %v8312_v31 = vld [vmem:[#allocation11 + $0x480] ss:$16 sps:$4 sm:$0xff]  }
 0x408   : > { %6362 = vmatprep.subr.bf16.mxu1 %v8245_v32  ;;  %v8315_v32 = vld [vmem:[#allocation11 + $0x488] ss:$16 sps:$4 sm:$0xff]  }
 0x40a   : > { %6199 = vmatpush1.bf16.msra.mxu0 %v8240_v33  ;;  %v8320_v33 = vld [vmem:[#allocation11 + $0x4a4] ss:$16 sps:$4 sm:$0xff]  }
 0x40b   : > { %6363 = vmatpush1.bf16.msra.mxu1 %v8243_v34  ;;  %6200 = vmatprep.subr.bf16.mxu0 %v8248_v36  ;;  %v8323_v34 = vld [vmem:[#allocation11 + $0x4ac] ss:$16 sps:$4 sm:$0xff]   ;;  %v8318_v36 = vld [vmem:[#allocation11 + $0x4a0] ss:$16 sps:$4 sm:$0xff]  }
 0x40c   : > { %6364 = vmatprep.subr.bf16.mxu1 %v8251_v57  ;;  %v8321_v57 = vld [vmem:[#allocation11 + $0x4a8] ss:$16 sps:$4 sm:$0xff]  }
 0x40e   : > { %6201 = vmatpush1.bf16.msra.mxu0 %v8246_v6  ;;  %v8326_v6 = vld [vmem:[#allocation11 + $0x4c4] ss:$16 sps:$4 sm:$0xff]  }
 0x40f   : > { %6365 = vmatpush1.bf16.msra.mxu1 %v8249_v38  ;;  %6202 = vmatprep.subr.bf16.mxu0 %v8254_v39  ;;  %v8329_v38 = vld [vmem:[#allocation11 + $0x4cc] ss:$16 sps:$4 sm:$0xff]   ;;  %v8324_v39 = vld [vmem:[#allocation11 + $0x4c0] ss:$16 sps:$4 sm:$0xff]  }
 0x410   : > { %6366 = vmatprep.subr.bf16.mxu1 %v8257_v40  ;;  %v8327_v40 = vld [vmem:[#allocation11 + $0x4c8] ss:$16 sps:$4 sm:$0xff]  }
 0x412   : > { %6203 = vmatpush1.bf16.msra.mxu0 %v8252_v60  ;;  %v8332_v60 = vld [vmem:[#allocation11 + $0x4e4] ss:$16 sps:$4 sm:$0xff]  }
 0x413   : > { %6367 = vmatpush1.bf16.msra.mxu1 %v8255_v41  ;;  %6204 = vmatprep.subr.bf16.mxu0 %v8260_v43  ;;  %v8335_v41 = vld [vmem:[#allocation11 + $0x4ec] ss:$16 sps:$4 sm:$0xff]   ;;  %v8330_v43 = vld [vmem:[#allocation11 + $0x4e0] ss:$16 sps:$4 sm:$0xff]  }
 0x414   : > { %6368 = vmatprep.subr.bf16.mxu1 %v8263_v44  ;;  %v8333_v44 = vld [vmem:[#allocation11 + $0x4e8] ss:$16 sps:$4 sm:$0xff]  }
 0x416   : > { %6205 = vmatpush1.bf16.msra.mxu0 %v8258_v26  ;;  %v8338_v26 = vld [vmem:[#allocation11 + $0x504] ss:$16 sps:$4 sm:$0xff]  }
 0x417   : > { %6369 = vmatpush1.bf16.msra.mxu1 %v8261_v46  ;;  %6206 = vmatprep.subr.bf16.mxu0 %v8266_v53  ;;  %v8341_v46 = vld [vmem:[#allocation11 + $0x50c] ss:$16 sps:$4 sm:$0xff]   ;;  %v8336_v53 = vld [vmem:[#allocation11 + $0x500] ss:$16 sps:$4 sm:$0xff]  }
 0x418   : > { %6370 = vmatprep.subr.bf16.mxu1 %v8269_v8  ;;  %v8339_v8 = vld [vmem:[#allocation11 + $0x508] ss:$16 sps:$4 sm:$0xff]  }
 0x41a   : > { %6207 = vmatpush1.bf16.msra.mxu0 %v8264_v55  ;;  %v8344_v55 = vld [vmem:[#allocation11 + $0x524] ss:$16 sps:$4 sm:$0xff]  }
 0x41b   : > { %6371 = vmatpush1.bf16.msra.mxu1 %v8267_v56  ;;  %6208 = vmatprep.subr.bf16.mxu0 %v8272_v52  ;;  %v8347_v56 = vld [vmem:[#allocation11 + $0x52c] ss:$16 sps:$4 sm:$0xff]   ;;  %v8342_v52 = vld [vmem:[#allocation11 + $0x520] ss:$16 sps:$4 sm:$0xff]  }
 0x41c   : > { %6372 = vmatprep.subr.bf16.mxu1 %v8275_v19  ;;  %v8345_v19 = vld [vmem:[#allocation11 + $0x528] ss:$16 sps:$4 sm:$0xff]  }
 0x41e   : > { %6209 = vmatpush1.bf16.msra.mxu0 %v8270_v62  ;;  %v8350_v62 = vld [vmem:[#allocation11 + $0x544] ss:$16 sps:$4 sm:$0xff]  }
 0x41f   : > { %6373 = vmatpush1.bf16.msra.mxu1 %v8273_v1  ;;  %6210 = vmatprep.subr.bf16.mxu0 %v8278_v3  ;;  %v8348_v1 = vld [vmem:[#allocation11 + $0x540] ss:$16 sps:$4 sm:$0xff]   ;;  %v8351_v3 = vld [vmem:[#allocation11 + $0x548] ss:$16 sps:$4 sm:$0xff]  }
 0x420   : > { %6374 = vmatprep.subr.bf16.mxu1 %v8281_v58  ;;  %v8356_v58 = vld [vmem:[#allocation11 + $0x564] ss:$16 sps:$4 sm:$0xff]  }
 0x422   : > { %6211 = vmatpush1.bf16.msra.mxu0 %v8276_v61  ;;  %v8359_v61 = vld [vmem:[#allocation11 + $0x56c] ss:$16 sps:$4 sm:$0xff]  }
 0x423   : > { %6375 = vmatpush1.bf16.msra.mxu1 %v8279_v5  ;;  %6212 = vmatprep.subr.bf16.mxu0 %v8284_v7  ;;  %v8357_v5 = vld [vmem:[#allocation11 + $0x568] ss:$16 sps:$4 sm:$0xff]   ;;  %v8362_v7 = vld [vmem:[#allocation11 + $0x584] ss:$16 sps:$4 sm:$0xff]  }
 0x424   : > { %6376 = vmatprep.subr.bf16.mxu1 %v8287_v9  ;;  %v8365_v9 = vld [vmem:[#allocation11 + $0x58c] ss:$16 sps:$4 sm:$0xff]  }
 0x426   : > { %6213 = vmatpush1.bf16.msra.mxu0 %v8282_v11  ;;  %v8360_v11 = vld [vmem:[#allocation11 + $0x580] ss:$16 sps:$4 sm:$0xff]  }
 0x427   : > { %6377 = vmatpush1.bf16.msra.mxu1 %v8285_v14  ;;  %6223 = vmatprep.subr.bf16.mxu0 %v8290_v16  ;;  %v8368_v14 = vld [vmem:[#allocation11 + $0x5a4] ss:$16 sps:$4 sm:$0xff]   ;;  %v8371_v16 = vld [vmem:[#allocation11 + $0x5ac] ss:$16 sps:$4 sm:$0xff]  }
 0x428   : > { %6387 = vmatprep.subr.bf16.mxu1 %v8293_v20  ;;  %v8366_v20 = vld [vmem:[#allocation11 + $0x5a0] ss:$16 sps:$4 sm:$0xff]  }
 0x429   : > { %6215 = vmatmul.mubr.bf16.vlgmr.msra.gmra.mrb[16].mxu0 %v4577_v22 }
 0x42a   : > { %6379 = vmatmul.mubr.bf16.vlgmr.msra.gmra.mrb[16].mxu1 %v4577_v22  ;;  %6224 = vmatpush1.bf16.msra.mxu0 %v8288_v21  ;;  %v8369_v21 = vld [vmem:[#allocation11 + $0x5a8] ss:$16 sps:$4 sm:$0xff]   ;;  %v8374_v22 = vld [vmem:[#allocation11 + $0x5c4] ss:$16 sps:$4 sm:$0xff]  }
 0x42b   : > { %6388 = vmatpush1.bf16.msra.mxu1 %v8291_v54  ;;  %6225 = vmatprep.subr.bf16.mxu0 %v8296_v23  ;;  %v8377_v54 = vld [vmem:[#allocation11 + $0x5cc] ss:$16 sps:$4 sm:$0xff]   ;;  %v8372_v23 = vld [vmem:[#allocation11 + $0x5c0] ss:$16 sps:$4 sm:$0xff]  }
 0x42c   : > { %6389 = vmatprep.subr.bf16.mxu1 %v8299_v2  ;;  %v8375_v2 = vld [vmem:[#allocation11 + $0x5c8] ss:$16 sps:$4 sm:$0xff]  }
 0x42e   : > { %6226 = vmatpush1.bf16.msra.mxu0 %v8294_v24  ;;  %v8380_v24 = vld [vmem:[#allocation11 + $0x5e4] ss:$16 sps:$4 sm:$0xff]  }
 0x42f   : > { %6390 = vmatpush1.bf16.msra.mxu1 %v8297_v25  ;;  %6227 = vmatprep.subr.bf16.mxu0 %v8302_v35  ;;  %v8383_v25 = vld [vmem:[#allocation11 + $0x5ec] ss:$16 sps:$4 sm:$0xff]   ;;  %v8378_v35 = vld [vmem:[#allocation11 + $0x5e0] ss:$16 sps:$4 sm:$0xff]  }
 0x430   : > { %6391 = vmatprep.subr.bf16.mxu1 %v8305_v10  ;;  %v8381_v10 = vld [vmem:[#allocation11 + $0x5e8] ss:$16 sps:$4 sm:$0xff]  }
 0x432   : > { %6228 = vmatpush1.bf16.msra.mxu0 %v8300_v27  ;;  %v8386_v27 = vld [vmem:[#allocation11 + $0x604] ss:$16 sps:$4 sm:$0xff]  }
 0x433   : > { %6392 = vmatpush1.bf16.msra.mxu1 %v8303_v49  ;;  %6229 = vmatprep.subr.bf16.mxu0 %v8308_v28  ;;  %v8389_v49 = vld [vmem:[#allocation11 + $0x60c] ss:$16 sps:$4 sm:$0xff]   ;;  %v1330_v28 = vrot.slane %v9369_v15, %v494_v45 }
 0x434   : > { %6393 = vmatprep.subr.bf16.mxu1 %v8311_v18  ;;  %v1334_v18 = vrot.slane %v9369_v15, %v498_v12 }
 0x436   : > { %6230 = vmatpush1.bf16.msra.mxu0 %v8306_v29  ;;  %v1342_v29 = vrot.slane %v9369_v15, %v506_v59  ;;  %v8392_v59 = vld [vmem:[#allocation11 + $0x624] ss:$16 sps:$4 sm:$0xff]   ;;  %v8395_v15 = vld [vmem:[#allocation11 + $0x62c] ss:$16 sps:$4 sm:$0xff]  }
 0x437   : > { %6394 = vmatpush1.bf16.msra.mxu1 %v8309_v42  ;;  %6231 = vmatprep.subr.bf16.mxu0 %v8314_v30 }
 0x438   : > { %6395 = vmatprep.subr.bf16.mxu1 %v8317_v17 }
 0x43a   : > { %6232 = vmatpush1.bf16.msra.mxu0 %v8312_v31 }
 0x43b   : > { %6396 = vmatpush1.bf16.msra.mxu1 %v8315_v32  ;;  %6233 = vmatprep.subr.bf16.mxu0 %v8320_v33 }
 0x43c   : > { %6397 = vmatprep.subr.bf16.mxu1 %v8323_v34 }
 0x43e   : > { %6234 = vmatpush1.bf16.msra.mxu0 %v8318_v36 }
 0x43f   : > { %6398 = vmatpush1.bf16.msra.mxu1 %v8321_v57  ;;  %6235 = vmatprep.subr.bf16.mxu0 %v8326_v6 }
 0x440   : > { %6399 = vmatprep.subr.bf16.mxu1 %v8329_v38 }
 0x442   : > { %6236 = vmatpush1.bf16.msra.mxu0 %v8324_v39 }
 0x443   : > { %6400 = vmatpush1.bf16.msra.mxu1 %v8327_v40  ;;  %6237 = vmatprep.subr.bf16.mxu0 %v8332_v60  ;;  %v8384_v60 = vld [vmem:[#allocation11 + $0x600] ss:$16 sps:$4 sm:$0xff]  }
 0x444   : > { %6401 = vmatprep.subr.bf16.mxu1 %v8335_v41  ;;  %v8387_v41 = vld [vmem:[#allocation11 + $0x608] ss:$16 sps:$4 sm:$0xff]  }
 0x446   : > { %6238 = vmatpush1.bf16.msra.mxu0 %v8330_v43 }
 0x447   : > { %6402 = vmatpush1.bf16.msra.mxu1 %v8333_v44  ;;  %6239 = vmatprep.subr.bf16.mxu0 %v8338_v26  ;;  %v8390_v26 = vld [vmem:[#allocation11 + $0x620] ss:$16 sps:$4 sm:$0xff]  }
 0x448   : > { %6403 = vmatprep.subr.bf16.mxu1 %v8341_v46  ;;  %v8393_v46 = vld [vmem:[#allocation11 + $0x628] ss:$16 sps:$4 sm:$0xff]  }
 0x44a   : > { %6240 = vmatpush1.bf16.msra.mxu0 %v8336_v53  ;;  %v8398_v53 = vld [vmem:[#allocation11 + $0x644] ss:$16 sps:$4 sm:$0xff]  }
 0x44b   : > { %6404 = vmatpush1.bf16.msra.mxu1 %v8339_v8  ;;  %6241 = vmatprep.subr.bf16.mxu0 %v8344_v55  ;;  %v8401_v8 = vld [vmem:[#allocation11 + $0x64c] ss:$16 sps:$4 sm:$0xff]   ;;  %v8396_v55 = vld [vmem:[#allocation11 + $0x640] ss:$16 sps:$4 sm:$0xff]  }
 0x44c   : > { %6405 = vmatprep.subr.bf16.mxu1 %v8347_v56  ;;  %v8399_v56 = vld [vmem:[#allocation11 + $0x648] ss:$16 sps:$4 sm:$0xff]  }
 0x44e   : > { %6242 = vmatpush1.bf16.msra.mxu0 %v8342_v52  ;;  %v8404_v52 = vld [vmem:[#allocation11 + $0x664] ss:$16 sps:$4 sm:$0xff]  }
 0x44f   : > { %6406 = vmatpush1.bf16.msra.mxu1 %v8345_v19  ;;  %6243 = vmatprep.subr.bf16.mxu0 %v8350_v62  ;;  %v8407_v19 = vld [vmem:[#allocation11 + $0x66c] ss:$16 sps:$4 sm:$0xff]   ;;  %v8402_v62 = vld [vmem:[#allocation11 + $0x660] ss:$16 sps:$4 sm:$0xff]  }
 0x450   : > { %6407 = vmatprep.subr.bf16.mxu1 %v8353_v0  ;;  %v8405_v0 = vld [vmem:[#allocation11 + $0x668] ss:$16 sps:$4 sm:$0xff]  }
 0x452   : > { %6244 = vmatpush1.bf16.msra.mxu0 %v8348_v1  ;;  %v8410_v1 = vld [vmem:[#allocation11 + $0x684] ss:$16 sps:$4 sm:$0xff]  }
 0x453   : > { %6408 = vmatpush1.bf16.msra.mxu1 %v8351_v3  ;;  %6245 = vmatprep.subr.bf16.mxu0 %v8356_v58  ;;  %v8413_v3 = vld [vmem:[#allocation11 + $0x68c] ss:$16 sps:$4 sm:$0xff]   ;;  %v8408_v58 = vld [vmem:[#allocation11 + $0x680] ss:$16 sps:$4 sm:$0xff]  }
 0x454   : > { %6409 = vmatprep.subr.bf16.mxu1 %v8359_v61  ;;  %v8411_v61 = vld [vmem:[#allocation11 + $0x688] ss:$16 sps:$4 sm:$0xff]  }
 0x456   : > { %6246 = vmatpush1.bf16.msra.mxu0 %v8354_v4  ;;  %v8416_v4 = vld [vmem:[#allocation11 + $0x6a4] ss:$16 sps:$4 sm:$0xff]  }
 0x457   : > { %6410 = vmatpush1.bf16.msra.mxu1 %v8357_v5  ;;  %6247 = vmatprep.subr.bf16.mxu0 %v8362_v7  ;;  %v8419_v5 = vld [vmem:[#allocation11 + $0x6ac] ss:$16 sps:$4 sm:$0xff]   ;;  %v8414_v7 = vld [vmem:[#allocation11 + $0x6a0] ss:$16 sps:$4 sm:$0xff]  }
 0x458   : > { %6411 = vmatprep.subr.bf16.mxu1 %v8365_v9  ;;  %v8417_v9 = vld [vmem:[#allocation11 + $0x6a8] ss:$16 sps:$4 sm:$0xff]  }
 0x45a   : > { %6248 = vmatpush1.bf16.msra.mxu0 %v8360_v11  ;;  %v8422_v11 = vld [vmem:[#allocation11 + $0x6c4] ss:$16 sps:$4 sm:$0xff]  }
 0x45b   : > { %6412 = vmatpush1.bf16.msra.mxu1 %v8363_v13  ;;  %6249 = vmatprep.subr.bf16.mxu0 %v8368_v14  ;;  %v8425_v13 = vld [vmem:[#allocation11 + $0x6cc] ss:$16 sps:$4 sm:$0xff]   ;;  %v8420_v14 = vld [vmem:[#allocation11 + $0x6c0] ss:$16 sps:$4 sm:$0xff]  }
 0x45c   : > { %6413 = vmatprep.subr.bf16.mxu1 %v8371_v16  ;;  %v8423_v16 = vld [vmem:[#allocation11 + $0x6c8] ss:$16 sps:$4 sm:$0xff]  }
 0x45e   : > { %6250 = vmatpush1.bf16.msra.mxu0 %v8366_v20  ;;  %v8428_v20 = vld [vmem:[#allocation11 + $0x6e4] ss:$16 sps:$4 sm:$0xff]  }
 0x45f   : > { %6414 = vmatpush1.bf16.msra.mxu1 %v8369_v21  ;;  %6251 = vmatprep.subr.bf16.mxu0 %v8374_v22  ;;  %v8431_v21 = vld [vmem:[#allocation11 + $0x6ec] ss:$16 sps:$4 sm:$0xff]   ;;  %v8426_v22 = vld [vmem:[#allocation11 + $0x6e0] ss:$16 sps:$4 sm:$0xff]  }
 0x460   : > { %6415 = vmatprep.subr.bf16.mxu1 %v8377_v54  ;;  %v8429_v54 = vld [vmem:[#allocation11 + $0x6e8] ss:$16 sps:$4 sm:$0xff]  }
 0x462   : > { %6252 = vmatpush1.bf16.msra.mxu0 %v8372_v23  ;;  %v8434_v23 = vld [vmem:[#allocation11 + $0x704] ss:$16 sps:$4 sm:$0xff]  }
 0x463   : > { %6416 = vmatpush1.bf16.msra.mxu1 %v8375_v2  ;;  %6253 = vmatprep.subr.bf16.mxu0 %v8380_v24  ;;  %v8437_v2 = vld [vmem:[#allocation11 + $0x70c] ss:$16 sps:$4 sm:$0xff]   ;;  %v8432_v24 = vld [vmem:[#allocation11 + $0x700] ss:$16 sps:$4 sm:$0xff]  }
 0x464   : > { %6417 = vmatprep.subr.bf16.mxu1 %v8383_v25  ;;  %v8435_v25 = vld [vmem:[#allocation11 + $0x708] ss:$16 sps:$4 sm:$0xff]  }
 0x466   : > { %6254 = vmatpush1.bf16.msra.mxu0 %v8378_v35  ;;  %v8440_v35 = vld [vmem:[#allocation11 + $0x724] ss:$16 sps:$4 sm:$0xff]  }
 0x467   : > { %6418 = vmatpush1.bf16.msra.mxu1 %v8381_v10  ;;  %6264 = vmatprep.subr.bf16.mxu0 %v8386_v27  ;;  %v8443_v10 = vld [vmem:[#allocation11 + $0x72c] ss:$16 sps:$4 sm:$0xff]   ;;  %v8438_v27 = vld [vmem:[#allocation11 + $0x720] ss:$16 sps:$4 sm:$0xff]  }
 0x468   : > { %6428 = vmatprep.subr.bf16.mxu1 %v8389_v49  ;;  %v8441_v49 = vld [vmem:[#allocation11 + $0x728] ss:$16 sps:$4 sm:$0xff]  }
 0x47c   : > { %v4396_v42 = vpop.f32.mrb[12].mxu0 }
 0x47d   : > { %v7882_v30 = vadd.f32 %v4396_v42, %v1330_v28  ;;  %v9394_v17 = vpop.f32.mrb[12].mxu1  ;;  %v4398_v31 = vpop.f32.mrb[13].mxu0  ;;  %v8446_v28 = vld [vmem:[#allocation11 + $0x744] ss:$16 sps:$4 sm:$0xff]   ;;  %v8447_v42 = vld [vmem:[#allocation11 + $0x748] ss:$16 sps:$4 sm:$0xff]  }
 0x47e   : > { %v7883_v32 = vadd.f32 %v4398_v31, %v1334_v18  ;;  %v4562_v33 = vpop.f32.mrb[13].mxu1  ;;  %v4400_v34 = vpop.f32.mrb[14].mxu0  ;;  %v8449_v18 = vld [vmem:[#allocation11 + $0x74c] ss:$16 sps:$4 sm:$0xff]  }
 0x47f   : > { %v4571_v36 = vmax.f32 %v7882_v30, 0.0  ;;  %v7885_v57 = vadd.f32 %v4562_v33, %v1342_v29  ;;  %v4564_v6 = vpop.f32.mrb[14].mxu1  ;;  %v4401_v45 = vpop.f32.mrb[15].mxu0  ;;  %v8444_v29 = vld [vmem:[#allocation11 + $0x740] ss:$16 sps:$4 sm:$0xff]  }
 0x480   : > { %v4572_v38 = vmax.f32 %v7883_v32, 0.0  ;;  %v4565_v39 = vpop.f32.mrb[15].mxu1  ;;  %v8452_v30 = vld [vmem:[#allocation11 + $0x764] ss:$16 sps:$4 sm:$0xff]   ;;  %v8455_v31 = vld [vmem:[#allocation11 + $0x76c] ss:$16 sps:$4 sm:$0xff]  }
 0x481   : > { %v4574_v40 = vmax.f32 %v7885_v57, 0.0  ;;  %v4579_v43 = vpack.c.bf16 %v4571_v36, %v4571_v36  ;;  %v8450_v32 = vld [vmem:[#allocation11 + $0x760] ss:$16 sps:$4 sm:$0xff]   ;;  %v8453_v33 = vld [vmem:[#allocation11 + $0x768] ss:$16 sps:$4 sm:$0xff]  }
 0x482   : > { %v4580_v12 = vpack.c.bf16 %v4572_v38, %v4572_v38  ;;  %v8458_v34 = vld [vmem:[#allocation11 + $0x784] ss:$16 sps:$4 sm:$0xff]   ;;  %v8461_v36 = vld [vmem:[#allocation11 + $0x78c] ss:$16 sps:$4 sm:$0xff]   ;;  %v8456_v57 = vld [vmem:[#allocation11 + $0x780] ss:$16 sps:$4 sm:$0xff]  }
 0x483   : > { %v4582_v44 = vpack.c.bf16 %v4574_v40, %v4574_v40  ;;  %v8459_v6 = vld [vmem:[#allocation11 + $0x788] ss:$16 sps:$4 sm:$0xff]   ;;  %v8464_v45 = vld [vmem:[#allocation11 + $0x7a4] ss:$16 sps:$4 sm:$0xff]   ;;  %v8467_v38 = vld [vmem:[#allocation11 + $0x7ac] ss:$16 sps:$4 sm:$0xff]  }
 0x484   : > { %6255 = vmatprep.mubr.bf16.mxu0 %v4580_v12  ;;  %6419 = vmatprep.mubr.bf16.mxu1 %v4580_v12  ;;  %v8462_v39 = vld [vmem:[#allocation11 + $0x7a0] ss:$16 sps:$4 sm:$0xff]   ;;  %v8465_v40 = vld [vmem:[#allocation11 + $0x7a8] ss:$16 sps:$4 sm:$0xff]  }
 0x485   : > { %6256 = vmatmul.mubr.bf16.vlgmr.msra.gmra.mrb[16].mxu0 %v4579_v43  ;;  %6420 = vmatmul.mubr.bf16.vlgmr.msra.gmra.mrb[16].mxu1 %v4579_v43  ;;  %v8513_v12 = vld [vmem:[#allocation10] sm:$0xff] }
 0x486   : > { %6265 = vmatpush1.bf16.msra.mxu0 %v8384_v60  ;;  %6429 = vmatpush1.bf16.msra.mxu1 %v8387_v41  ;;  %v1338_v60 = vrot.slane %v8513_v12, %v502_v37  ;;  %v8470_v41 = vld [vmem:[#allocation11 + $0x7c4] ss:$16 sps:$4 sm:$0xff]   ;;  %v8473_v43 = vld [vmem:[#allocation11 + $0x7cc] ss:$16 sps:$4 sm:$0xff]  }
 0x487   : > { %6296 = vmatprep.mubr.bf16.mxu0 %v4582_v44  ;;  %6460 = vmatprep.mubr.bf16.mxu1 %v4582_v44  ;;  %v8480_v37 = vld [vmem:[#allocation14 + $0x40] sm:$0xff]  }
 0x488   : > { %6266 = vmatprep.subr.bf16.mxu0 %v8392_v59  ;;  %6430 = vmatprep.subr.bf16.mxu1 %v8395_v15  ;;  %v8468_v59 = vld [vmem:[#allocation11 + $0x7c0] ss:$16 sps:$4 sm:$0xff]   ;;  %v8471_v15 = vld [vmem:[#allocation11 + $0x7c8] ss:$16 sps:$4 sm:$0xff]   ;;  %v7884_v44 = vadd.f32 %v9394_v17, %v1338_v60 }
 0x489   : > { %v8484_v17 = vld [vmem:[#allocation14 + $0x48] sm:$0xff]  }
 0x48a   : > { %6267 = vmatpush1.bf16.msra.mxu0 %v8390_v26  ;;  %6431 = vmatpush1.bf16.msra.mxu1 %v8393_v46  ;;  %v8476_v26 = vld [vmem:[#allocation11 + $0x7e4] ss:$16 sps:$4 sm:$0xff]   ;;  %v8479_v46 = vld [vmem:[#allocation11 + $0x7ec] ss:$16 sps:$4 sm:$0xff]   ;;  %v4573_v47 = vmax.f32 %v7884_v44, 0.0 }
 0x48b   : > { %6268 = vmatprep.subr.bf16.mxu0 %v8398_v53  ;;  %6432 = vmatprep.subr.bf16.mxu1 %v8401_v8  ;;  %v8474_v53 = vld [vmem:[#allocation11 + $0x7e0] ss:$16 sps:$4 sm:$0xff]   ;;  %v8477_v8 = vld [vmem:[#allocation11 + $0x7e8] ss:$16 sps:$4 sm:$0xff]  }
 0x48e   : > { %6269 = vmatpush1.bf16.msra.mxu0 %v8396_v55  ;;  %6433 = vmatpush1.bf16.msra.mxu1 %v8399_v56  ;;  %v8481_v55 = vld [vmem:[#allocation14 + $0xc0] sm:$0xff]  }
 0x48f   : > { %6270 = vmatprep.subr.bf16.mxu0 %v8404_v52  ;;  %6434 = vmatprep.subr.bf16.mxu1 %v8407_v19  ;;  %v8482_v56 = vld [vmem:[#allocation14] sm:$0xff]   ;;  %v4581_v19 = vpack.c.bf16 %v4573_v47, %v4573_v47 }
 0x490   : > { %v8483_v52 = vld [vmem:[#allocation14 + $0x80] sm:$0xff]  }
 0x492   : > { %6271 = vmatpush1.bf16.msra.mxu0 %v8402_v62  ;;  %6435 = vmatpush1.bf16.msra.mxu1 %v8405_v0  ;;  %v8485_v62 = vld [vmem:[#allocation14 + $0xc8] sm:$0xff]  }
 0x493   : > { %6272 = vmatprep.subr.bf16.mxu0 %v8410_v1  ;;  %6436 = vmatprep.subr.bf16.mxu1 %v8413_v3  ;;  %v8486_v0 = vld [vmem:[#allocation14 + $0x8] sm:$0xff]   ;;  %v8488_v3 = vld [vmem:[#allocation14 + $0x50] sm:$0xff]  }
 0x494   : > { %v8487_v1 = vld [vmem:[#allocation14 + $0x88] sm:$0xff]  }
 0x496   : > { %6273 = vmatpush1.bf16.msra.mxu0 %v8408_v58  ;;  %6437 = vmatpush1.bf16.msra.mxu1 %v8411_v61  ;;  %v8489_v58 = vld [vmem:[#allocation14 + $0xd0] sm:$0xff]  }
 0x497   : > { %6274 = vmatprep.subr.bf16.mxu0 %v8416_v4  ;;  %6438 = vmatprep.subr.bf16.mxu1 %v8419_v5  ;;  %v8490_v61 = vld [vmem:[#allocation14 + $0x10] sm:$0xff]   ;;  %v8492_v5 = vld [vmem:[#allocation14 + $0x58] sm:$0xff]  }
 0x498   : > { %v8491_v4 = vld [vmem:[#allocation14 + $0x90] sm:$0xff]  }
 0x49a   : > { %6275 = vmatpush1.bf16.msra.mxu0 %v8414_v7  ;;  %6439 = vmatpush1.bf16.msra.mxu1 %v8417_v9  ;;  %v8493_v7 = vld [vmem:[#allocation14 + $0xd8] sm:$0xff]  }
 0x49b   : > { %6276 = vmatprep.subr.bf16.mxu0 %v8422_v11  ;;  %6440 = vmatprep.subr.bf16.mxu1 %v8425_v13  ;;  %v8494_v9 = vld [vmem:[#allocation14 + $0x18] sm:$0xff]   ;;  %v8496_v13 = vld [vmem:[#allocation14 + $0x60] sm:$0xff]  }
 0x49c   : > { %v8495_v11 = vld [vmem:[#allocation14 + $0x98] sm:$0xff]  }
 0x49e   : > { %6277 = vmatpush1.bf16.msra.mxu0 %v8420_v14  ;;  %6441 = vmatpush1.bf16.msra.mxu1 %v8423_v16  ;;  %v8497_v14 = vld [vmem:[#allocation14 + $0xe0] sm:$0xff]  }
 0x49f   : > { %6278 = vmatprep.subr.bf16.mxu0 %v8428_v20  ;;  %6442 = vmatprep.subr.bf16.mxu1 %v8431_v21  ;;  %v8498_v16 = vld [vmem:[#allocation14 + $0x20] sm:$0xff]   ;;  %v8500_v21 = vld [vmem:[#allocation14 + $0x68] sm:$0xff]  }
 0x4a0   : > { %v8499_v20 = vld [vmem:[#allocation14 + $0xa0] sm:$0xff]  }
 0x4a2   : > { %6279 = vmatpush1.bf16.msra.mxu0 %v8426_v22  ;;  %6443 = vmatpush1.bf16.msra.mxu1 %v8429_v54  ;;  %v8501_v22 = vld [vmem:[#allocation14 + $0xe8] sm:$0xff]  }
 0x4a3   : > { %6280 = vmatprep.subr.bf16.mxu0 %v8434_v23  ;;  %6444 = vmatprep.subr.bf16.mxu1 %v8437_v2  ;;  %v8502_v54 = vld [vmem:[#allocation14 + $0x28] sm:$0xff]   ;;  %v8504_v2 = vld [vmem:[#allocation14 + $0x70] sm:$0xff]  }
 0x4a4   : > { %v8503_v23 = vld [vmem:[#allocation14 + $0xa8] sm:$0xff]  }
 0x4a6   : > { %6281 = vmatpush1.bf16.msra.mxu0 %v8432_v24  ;;  %6445 = vmatpush1.bf16.msra.mxu1 %v8435_v25  ;;  %v8505_v24 = vld [vmem:[#allocation14 + $0xf0] sm:$0xff]  }
 0x4a7   : > { %6282 = vmatprep.subr.bf16.mxu0 %v8440_v35  ;;  %6446 = vmatprep.subr.bf16.mxu1 %v8443_v10  ;;  %v8506_v25 = vld [vmem:[#allocation14 + $0x30] sm:$0xff]   ;;  %v8508_v10 = vld [vmem:[#allocation14 + $0x78] sm:$0xff]  }
 0x4a8   : > { %v8507_v35 = vld [vmem:[#allocation14 + $0xb0] sm:$0xff]  }
 0x4aa   : > { %6283 = vmatpush1.bf16.msra.mxu0 %v8438_v27  ;;  %6447 = vmatpush1.bf16.msra.mxu1 %v8441_v49  ;;  %v8509_v27 = vld [vmem:[#allocation14 + $0xf8] sm:$0xff]  }
 0x4ab   : > { %6284 = vmatprep.subr.bf16.mxu0 %v8446_v28  ;;  %6448 = vmatprep.subr.bf16.mxu1 %v8449_v18  ;;  %v8510_v49 = vld [vmem:[#allocation14 + $0x38] sm:$0xff]  }
 0x4ac   : > { %v8511_v28 = vld [vmem:[#allocation14 + $0xb8] sm:$0xff]  }
 0x4ad   : > { %v4839_v18 = vld [vmem:[#allocation13] sm:$0xf] }
 0x4ae   : > { %6285 = vmatpush1.bf16.msra.mxu0 %v8444_v29  ;;  %6449 = vmatpush1.bf16.msra.mxu1 %v8447_v42  ;;  %v4844_v29 = vrot.slane %v4839_v18, %v9264_v48  ;;  %v4852_v42 = vrot.slane %v4839_v18, %v9299_v63 }
 0x4af   : > { %6286 = vmatprep.subr.bf16.mxu0 %v8452_v30  ;;  %6450 = vmatprep.subr.bf16.mxu1 %v8455_v31  ;;  %v4848_v30 = vrot.slane %v4839_v18, %v9269_v50  ;;  %v4856_v31 = vrot.slane %v4839_v18, %v9272_v51 }
 0x4b2   : > { %6287 = vmatpush1.bf16.msra.mxu0 %v8450_v32  ;;  %6451 = vmatpush1.bf16.msra.mxu1 %v8453_v33 }
 0x4b3   : > { %6288 = vmatprep.subr.bf16.mxu0 %v8458_v34  ;;  %6452 = vmatprep.subr.bf16.mxu1 %v8461_v36 }
 0x4b6   : > { %6289 = vmatpush1.bf16.msra.mxu0 %v8456_v57  ;;  %6453 = vmatpush1.bf16.msra.mxu1 %v8459_v6 }
 0x4b7   : > { %6290 = vmatprep.subr.bf16.mxu0 %v8464_v45  ;;  %6454 = vmatprep.subr.bf16.mxu1 %v8467_v38 }
 0x4ba   : > { %6291 = vmatpush1.bf16.msra.mxu0 %v8462_v39  ;;  %6455 = vmatpush1.bf16.msra.mxu1 %v8465_v40 }
 0x4bb   : > { %6292 = vmatprep.subr.bf16.mxu0 %v8470_v41  ;;  %6456 = vmatprep.subr.bf16.mxu1 %v8473_v43 }
 0x4be   : > { %6293 = vmatpush1.bf16.msra.mxu0 %v8468_v59  ;;  %6457 = vmatpush1.bf16.msra.mxu1 %v8471_v15 }
 0x4bf   : > { %6294 = vmatprep.subr.bf16.mxu0 %v8476_v26  ;;  %6458 = vmatprep.subr.bf16.mxu1 %v8479_v46  ;;  %v7797_v46 = vld [vmem:[#allocation16] ss:$0 sm:$0xff] }
 0x4c2   : > { %6295 = vmatpush1.bf16.msra.mxu0 %v8474_v53  ;;  %6459 = vmatpush1.bf16.msra.mxu1 %v8477_v8 }
 0x4c3   : > { %7834 = vmatprep.subr.bf16.mxu0 %v8480_v37  ;;  %7856 = vmatprep.subr.bf16.mxu1 %v8481_v55 }
 0x4c5   : > { %6297 = vmatmul.mubr.bf16.vlgmr.msra.gmra.mrb[16].mxu0 %v4581_v19  ;;  %6461 = vmatmul.mubr.bf16.vlgmr.msra.gmra.mrb[16].mxu1 %v4581_v19 }
 0x4c6   : > { %7835 = vmatpush3.bf16.msra.mxu0 %v8482_v56  ;;  %7857 = vmatpush3.bf16.msra.mxu1 %v8483_v52 }
 0x4c7   : > { %7836 = vmatprep.subr.bf16.mxu0 %v8484_v17  ;;  %7858 = vmatprep.subr.bf16.mxu1 %v8485_v62 }
 0x4ca   : > { %7837 = vmatpush3.bf16.msra.mxu0 %v8486_v0  ;;  %7859 = vmatpush3.bf16.msra.mxu1 %v8487_v1 }
 0x4cb   : > { %7838 = vmatprep.subr.bf16.mxu0 %v8488_v3  ;;  %7860 = vmatprep.subr.bf16.mxu1 %v8489_v58 }
 0x4ce   : > { %7839 = vmatpush3.bf16.msra.mxu0 %v8490_v61  ;;  %7861 = vmatpush3.bf16.msra.mxu1 %v8491_v4 }
 0x4cf   : > { %7840 = vmatprep.subr.bf16.mxu0 %v8492_v5  ;;  %7862 = vmatprep.subr.bf16.mxu1 %v8493_v7 }
 0x4d2   : > { %7841 = vmatpush3.bf16.msra.mxu0 %v8494_v9  ;;  %7863 = vmatpush3.bf16.msra.mxu1 %v8495_v11 }
 0x4d3   : > { %7842 = vmatprep.subr.bf16.mxu0 %v8496_v13  ;;  %7864 = vmatprep.subr.bf16.mxu1 %v8497_v14 }
 0x4d6   : > { %7843 = vmatpush3.bf16.msra.mxu0 %v8498_v16  ;;  %7865 = vmatpush3.bf16.msra.mxu1 %v8499_v20 }
 0x4d7   : > { %7844 = vmatprep.subr.bf16.mxu0 %v8500_v21  ;;  %7866 = vmatprep.subr.bf16.mxu1 %v8501_v22 }
 0x4da   : > { %7845 = vmatpush3.bf16.msra.mxu0 %v8502_v54  ;;  %7867 = vmatpush3.bf16.msra.mxu1 %v8503_v23 }
 0x4db   : > { %7846 = vmatprep.subr.bf16.mxu0 %v8504_v2  ;;  %7868 = vmatprep.subr.bf16.mxu1 %v8505_v24 }
 0x4de   : > { %7847 = vmatpush3.bf16.msra.mxu0 %v8506_v25  ;;  %7869 = vmatpush3.bf16.msra.mxu1 %v8507_v35 }
 0x4df   : > { %7848 = vmatprep.subr.bf16.mxu0 %v8508_v10  ;;  %7870 = vmatprep.subr.bf16.mxu1 %v8509_v27 }
 0x4e2   : > { %7849 = vmatpush3.bf16.msra.mxu0 %v8510_v49  ;;  %7871 = vmatpush3.bf16.msra.mxu1 %v8511_v28 }
 0x598   : > { %v6298_v32 = vpop.f32.mrb[16].mxu0  ;;  %v6462_v33 = vpop.f32.mrb[16].mxu1 }
 0x599   : > { %v7886_v34 = vadd.f32 %v6298_v32, %v4844_v29  ;;  %v7888_v36 = vadd.f32 %v6462_v33, %v4852_v42  ;;  %v6300_v57 = vpop.f32.mrb[17].mxu0  ;;  %v6464_v6 = vpop.f32.mrb[17].mxu1 }
 0x59a   : > { %v7887_v45 = vadd.f32 %v6300_v57, %v4848_v30  ;;  %v7889_v38 = vadd.f32 %v6464_v6, %v4856_v31  ;;  %v6302_v39 = vpop.f32.mrb[18].mxu0  ;;  %v6466_v40 = vpop.f32.mrb[18].mxu1 }
 0x59b   : > { %v6469_v12 = vmax.f32 %v7886_v34, 0.0  ;;  %v6471_v60 = vmax.f32 %v7888_v36, 0.0  ;;  %v6303_v48 = vpop.f32.mrb[19].mxu0  ;;  %v6467_v41 = vpop.f32.mrb[19].mxu1 }
 0x59c   : > { %v6470_v63 = vmax.f32 %v7887_v45, 0.0  ;;  %v6472_v43 = vmax.f32 %v7889_v38, 0.0 }
 0x59d   : > { %v6473_v51 = vpack.c.bf16 %v6469_v12, %v6469_v12  ;;  %v6475_v15 = vpack.c.bf16 %v6471_v60, %v6471_v60 }
 0x59e   : > { %v6474_v50 = vpack.c.bf16 %v6470_v63, %v6470_v63  ;;  %v6476_v59 = vpack.c.bf16 %v6472_v43, %v6472_v43 }
 0x5a0   : > { %6772 = vmatprep.mubr.bf16.mxu0 %v6474_v50  ;;  %6812 = vmatprep.mubr.bf16.mxu1 %v6476_v59 }
 0x5a1   : > { %6773 = vmatmul.mubr.bf16.vlgmr.msra.gmra.mrb[20].mxu0 %v6473_v51  ;;  %6813 = vmatmul.mubr.bf16.vlgmr.msra.gmra.mrb[20].mxu1 %v6475_v15 }
 0x674   : > { %v7850_v44 = vpop.f32.mrb[20].mxu0  ;;  %v7872_v26 = vpop.f32.mrb[20].mxu1 }
 0x675   : > { %v7851_v53 = vpop.f32.mrb[21].mxu0  ;;  %v7873_v8 = vpop.f32.mrb[21].mxu1 }
 0x676   : > { %v7852_v47 = vadd.f32 %v7851_v53, %v7850_v44  ;;  %v7874_v37 = vadd.f32 %v7873_v8, %v7872_v26  ;;  %v7853_v55 = vpop.f32.mrb[22].mxu0  ;;  %v7875_v56 = vpop.f32.mrb[22].mxu1 }
 0x677   : > { %v7854_v52 = vpop.f32.mrb[23].mxu0  ;;  %v7876_v19 = vpop.f32.mrb[23].mxu1 }
 0x678   : > { %v6775_v17 = vadd.f32 %v7852_v47, %v7797_v46 }
 0x67a   : > { %v6815_v62 = vadd.f32 %v7874_v37, %v6775_v17 }
 0x67c   : > { %6820 = vst [vmem:[%s455_s26] sm:$0xff] %v6815_v62 }
 0x67d   : > { %8781 = shalt.err (!%p8778_p10)
}
 0x67e   : > { %s8782_s1 = scalar_lea.hbm %s9408_s24, 128  ;;  %s8786_s22 = scalar_lea.hbm %s9487_s25, 256 }
 0x67f   : > { %p8783_p11 = scmp.ne.s32.totalorder %s9408_s24, %s8782_s1  ;;  %p8787_p7 = scmp.lt.u32.totalorder %s9408_s24, %s9487_s25 }
 0x680   : > { %p8788_p6 = scmp.lt.u32.totalorder %s8786_s22, %s8782_s1  ;;  %p8790_p12 = scmp.lt.u32.totalorder %s8782_s1, %s9408_s24 }
 0x681   : > { %p8784_p8 = pnand %p8783_p11, %p9488_p1 }
 0x682   : > { %p8789_p9 = por %p8788_p6, %p8787_p7 }
 0x683   : > { %p8785_p5 = pneg %p8784_p8 }
 0x684   : > { %p8791_p13 = por %p8790_p12, %p8789_p9 }
 0x686   : > { %p8792_p0 = pnand %p8791_p13, %p8785_p5 }
 0x688   : > { %8795 = shalt.err (!%p8792_p0)
}
 0x689   : > { %7996 = dma.vmem_to_hbm [thread:$0]  (%p9488_p1), %s9410_s19, 128, %s9408_s24, %s6822_s13  }
 0x68a PF: > { %s6847_s23 = sand.u32 1, %s8838_s30   ;;  %p9489_p2 = scmp.ne.s32.totalorder %s9476_s29, 0 }
 0x68b   : > { %p9490_p3 = scmp.ge.s32.totalorder %s8850_s12, 2  ;;  %s6848_s18 = scalar_lea.sflag [#allocation4], %s6847_s23 }
 0x68d   : > { %p8028_p4 = pnand %p9490_p3, %p9489_p2 }
 0x68f   : > { %8833 = dma.done.wait (!%p8028_p4), %s6848_s18, 128  }
 0x690   : > { %8835 = vsyncadd (!%p8028_p4), %s6848_s18, 4294967168  ;;  %p26_p10 = scmp.ge.s32.totalorder %s9146_s27, 4   ;;  %s9491_s30 = smov %s8842_s10 }
 0x691   : > { %s9492_s10 = smov %s8846_s11  ;;  %s9493_s11 = smov %s9157_s17 }
 0x692   : > { %s9494_s12 = smov %s9146_s27  ;;  %28 = sbr.rel (!%p26_p10) target bundleno = 12 (0xc), region = 133 }
 0x699   :  { %6853 = vsyncpa [#allocation3], 1 }
 0x69a   :  { %6855 = vsyncpa [#allocation3 + $0x1], 1 }
 0x69b   :  { %6856 = vsyncpa [#allocation6], 1 }
 0x69c   :  { %6857 = vsyncpa [#allocation9], 1 }
 0x69d   :  { %6858 = vsyncpa [#allocation12], 1 }
 0x69e   :  { %6859 = vsyncpa [#allocation15], 1 }
 0x69f   :  { %6860 = vsyncpa [#allocation4], 1 }
 0x6a0   :  { %6862 = vsyncpa [#allocation4 + $0x1], 1 }

</bundles_post_ra>
